<compile_context>
chip_gen: v6e
topology: v6e:2x2x1
jax: 0.10.0
libtpu: 0.0.40
codegen_flags: <defaults>
</compile_context>

<pallas_src>
import jax
import jax.numpy as jnp
from jax import lax
from jax.experimental import pallas as pl
from jax.experimental.pallas import tpu as pltpu


_VMEM_LIMIT_BYTES = 48 * 1024 * 1024       # explicit scoped-VMEM cap (fits v7x's 64 MiB)
_VMEM_BUDGET_FOR_BLOCKING = 36 * 1024 * 1024


def _gru_row_bytes(t, din, h2):
    """Per-batch-row f32 VMEM footprint of one GRU layer invocation:
    x block (double buffered) + gi scratch (6H = 3*h2) + seq/out block (x2)."""
    return t * (2 * din + 3 * h2 + 2 * h2) * 4


def _pad_and_block(n, row_bytes, vmem_budget=_VMEM_BUDGET_FOR_BLOCKING):
    """Pick a batch block (multiple of 8, <=128, VMEM-aware) and the padded
    batch size it divides.  When the padded batch allows it, use >=2 blocks so
    the 'parallel' grid axis can shard across both v7x TensorCores."""
    n8 = max(8, ((n + 7) // 8) * 8)
    blk = min(128, n8)
    max_rows = max(8, (int(vmem_budget // max(row_bytes, 1)) // 8) * 8)
    blk = min(blk, max_rows)
    if n8 >= 16 and blk >= n8:
        # force at least 2 blocks (v7x has 2 TensorCores per chip)
        blk = min(blk, ((n8 + 15) // 16) * 8)
    n_pad = ((n8 + blk - 1) // blk) * blk
    return n_pad, blk


# --------------------------------------------------------------------------
# Fused bidirectional GRU layer (PyTorch gate order r, z, n).
#   wih: [Din, 6H]  columns = [fwd r,z,n | bwd r,z,n]; r/z hidden biases are
#                   already folded into bih (they are added outside the reset
#                   gate), so the in-loop hidden projection is bias-free.
#   whh: [2H, 3H]   rows 0:H = fwd W_hh^T, rows H:2H = bwd W_hh^T.
#   bih: [1, 6H]    fused input (+ r/z hidden) bias, same column order as wih.
#   bhn: [1, 2H]    [b_hn fwd | b_hn bwd]  (must stay inside r * (...)).
# --------------------------------------------------------------------------
def _gru_bidir_layer(x_ref, wih_ref, whh_ref, bih_ref, bhn_ref, gi_ref, seq_ref):
    T, NB, Din = x_ref.shape
    G6 = wih_ref.shape[1]
    G3 = G6 // 2
    H = G6 // 6

    # (1) Hoisted input projection: one matmul for all timesteps, both
    #     directions, with the r/z hidden biases pre-folded into bih.
    x_flat = x_ref[...].reshape(T * NB, Din)
    gi = jnp.dot(x_flat, wih_ref[...], preferred_element_type=jnp.float32) + bih_ref[...]
    gi_ref[...] = gi.reshape(T, NB, G6)

    # (2) Loop-invariant hoists (weights, biases, broadcasts).
    whh_f = whh_ref[0:H, :]
    whh_b = whh_ref[H:2 * H, :]
    bhn_f = jnp.broadcast_to(bhn_ref[:, 0:H], (NB, H))
    bhn_b = jnp.broadcast_to(bhn_ref[:, H:2 * H], (NB, H))

    def step(t, carry):
        h_f, h_b = carry
        tb = T - 1 - t
        # One full-width worth of gi load per step, no direction select:
        # fwd gates at time t, bwd gates at time T-1-t (contiguous slices).
        gi_f = gi_ref[t, :, 0:G3]
        gi_b = gi_ref[tb, :, G3:G6]
        # Two half-K matmuls (no zero-padded block-diagonal whh).
        gh_f = jnp.dot(h_f, whh_f, preferred_element_type=jnp.float32)
        gh_b = jnp.dot(h_b, whh_b, preferred_element_type=jnp.float32)
        rz_f = jax.nn.sigmoid(gi_f[:, 0:2 * H] + gh_f[:, 0:2 * H])
        rz_b = jax.nn.sigmoid(gi_b[:, 0:2 * H] + gh_b[:, 0:2 * H])
        n_f = jnp.tanh(gi_f[:, 2 * H:G3] + rz_f[:, 0:H] * (gh_f[:, 2 * H:G3] + bhn_f))
        n_b = jnp.tanh(gi_b[:, 2 * H:G3] + rz_b[:, 0:H] * (gh_b[:, 2 * H:G3] + bhn_b))
        z_f = rz_f[:, H:2 * H]
        z_b = rz_b[:, H:2 * H]
        h_f = (1.0 - z_f) * n_f + z_f * h_f
        h_b = (1.0 - z_b) * n_b + z_b * h_b
        # Direct per-step writes (no scratch buffering + concat epilogue).
        seq_ref[t, :, 0:H] = h_f
        seq_ref[tb, :, H:2 * H] = h_b
        return (h_f, h_b)

    h0 = jnp.zeros((NB, H), jnp.float32)
    lax.fori_loop(0, T, step, (h0, h0), unroll=min(T, 8))


# --------------------------------------------------------------------------
# Attention pooling over time (HAN-style: softmax over ALL timesteps, then
# zero padded positions, then renormalise with +1e-4), fused algebraically:
#   w = mask*e/sum(e) / (sum(mask*e)/sum(e) + 1e-4)
#     = mask*e * 1/(sum(mask*e) + 1e-4*sum(e))
# --------------------------------------------------------------------------
def _attn_pool(o, dw_ref, db_ref, ctx_ref, mask_ref):
    T, NB, D = o.shape
    a = jnp.tanh(jnp.dot(o.reshape(T * NB, D), dw_ref[...],
                         preferred_element_type=jnp.float32) + db_ref[...])
    a = a.reshape(T, NB, D)
    ctx = ctx_ref[...].reshape(1, 1, D)
    # Context projection as a VPU multiply + lane reduce (no 1-column matmul).
    logits = jnp.sum(a * ctx, axis=-1, keepdims=True)                     # [T, NB, 1]
    m = jnp.max(logits, axis=0, keepdims=True)
    e = jnp.exp(logits - m)
    me = jnp.where(mask_ref[...] != 0.0, e, 0.0)
    denom = (jnp.sum(me, axis=0, keepdims=True)
             + 0.0001 * jnp.sum(e, axis=0, keepdims=True))
    w = me * pl.reciprocal(denom, approx=True)                            # [T, NB, 1]
    # NOTE: a fully lane-dense [T, NB] softmax layout was considered but needs
    # a [T,NB] -> [T,NB,1] relayout for the weighted sum, whose Mosaic
    # lowering is not guaranteed; the elementwise pass count here is already
    # minimised (1 sub, 1 exp, 1 select, 1 mul).
    return jnp.sum(o * w, axis=0)                                         # [NB, D]


# --------------------------------------------------------------------------
# Kernels
# --------------------------------------------------------------------------
def _bigru_layer_kernel(x_ref, wih_ref, whh_ref, bih_ref, bhn_ref,
                        out_ref, gi_ref):
    _gru_bidir_layer(x_ref, wih_ref, whh_ref, bih_ref, bhn_ref, gi_ref, out_ref)


def _bigru_attn_layer_kernel(x_ref, wih_ref, whh_ref, bih_ref, bhn_ref,
                             dw_ref, db_ref, ctx_ref, mask_ref,
                             pooled_ref, gi_ref, seq_ref):
    # Last word-level GRU layer + attention pooling fused: the [T, NB, 2H]
    # sequence stays in VMEM and never round-trips through HBM.
    _gru_bidir_layer(x_ref, wih_ref, whh_ref, bih_ref, bhn_ref, gi_ref, seq_ref)
    pooled_ref[...] = _attn_pool(seq_ref[...], dw_ref, db_ref, ctx_ref, mask_ref)


def _bigru_attn_fc_layer_kernel(x_ref, wih_ref, whh_ref, bih_ref, bhn_ref,
                                dw_ref, db_ref, ctx_ref, mask_ref,
                                fcw_ref, fcb_ref,
                                out_ref, gi_ref, seq_ref):
    # Last sentence-level GRU layer + attention pooling + final classifier.
    _gru_bidir_layer(x_ref, wih_ref, whh_ref, bih_ref, bhn_ref, gi_ref, seq_ref)
    pooled = _attn_pool(seq_ref[...], dw_ref, db_ref, ctx_ref, mask_ref)
    out_ref[...] = jnp.dot(pooled, fcw_ref[...],
                           preferred_element_type=jnp.float32) + fcb_ref[...]


# --------------------------------------------------------------------------
# pallas_call wrappers
# --------------------------------------------------------------------------
def _compiler_params():
    return pltpu.CompilerParams(dimension_semantics=("parallel",),
                                vmem_limit_bytes=_VMEM_LIMIT_BYTES)


def bigru_layer(x_tm, gru_w, block_n):
    wih, whh, bih, bhn = gru_w
    T, Np, Din = x_tm.shape
    G6 = wih.shape[1]
    H2 = G6 // 3
    return pl.pallas_call(
        _bigru_layer_kernel,
        out_shape=jax.ShapeDtypeStruct((T, Np, H2), jnp.float32),
        grid=(Np // block_n,),
        in_specs=[
            pl.BlockSpec((T, block_n, Din), lambda n: (0, n, 0)),
            pl.BlockSpec((Din, G6), lambda n: (0, 0)),
            pl.BlockSpec((H2, G6 // 2), lambda n: (0, 0)),
            pl.BlockSpec((1, G6), lambda n: (0, 0)),
            pl.BlockSpec((1, H2), lambda n: (0, 0)),
        ],
        out_specs=pl.BlockSpec((T, block_n, H2), lambda n: (0, n, 0)),
        scratch_shapes=[pltpu.VMEM((T, block_n, G6), jnp.float32)],
        compiler_params=_compiler_params(),
    )(x_tm, wih, whh, bih, bhn)


def bigru_attn_layer(x_tm, gru_w, dense_w, dense_b, ctx, mask3, block_n):
    wih, whh, bih, bhn = gru_w
    T, Np, Din = x_tm.shape
    G6 = wih.shape[1]
    D = G6 // 3
    return pl.pallas_call(
        _bigru_attn_layer_kernel,
        out_shape=jax.ShapeDtypeStruct((Np, D), jnp.float32),
        grid=(Np // block_n,),
        in_specs=[
            pl.BlockSpec((T, block_n, Din), lambda n: (0, n, 0)),
            pl.BlockSpec((Din, G6), lambda n: (0, 0)),
            pl.BlockSpec((D, G6 // 2), lambda n: (0, 0)),
            pl.BlockSpec((1, G6), lambda n: (0, 0)),
            pl.BlockSpec((1, D), lambda n: (0, 0)),
            pl.BlockSpec((D, D), lambda n: (0, 0)),
            pl.BlockSpec((1, D), lambda n: (0, 0)),
            pl.BlockSpec((1, D), lambda n: (0, 0)),
            pl.BlockSpec((T, block_n, 1), lambda n: (0, n, 0)),
        ],
        out_specs=pl.BlockSpec((block_n, D), lambda n: (n, 0)),
        scratch_shapes=[pltpu.VMEM((T, block_n, G6), jnp.float32),
                        pltpu.VMEM((T, block_n, D), jnp.float32)],
        compiler_params=_compiler_params(),
    )(x_tm, wih, whh, bih, bhn, dense_w, dense_b, ctx, mask3)


def bigru_attn_fc_layer(x_tm, gru_w, dense_w, dense_b, ctx, mask3, fc_w, fc_b, block_n):
    wih, whh, bih, bhn = gru_w
    T, Np, Din = x_tm.shape
    G6 = wih.shape[1]
    D = G6 // 3
    C = fc_w.shape[1]
    return pl.pallas_call(
        _bigru_attn_fc_layer_kernel,
        out_shape=jax.ShapeDtypeStruct((Np, C), jnp.float32),
        grid=(Np // block_n,),
        in_specs=[
            pl.BlockSpec((T, block_n, Din), lambda n: (0, n, 0)),
            pl.BlockSpec((Din, G6), lambda n: (0, 0)),
            pl.BlockSpec((D, G6 // 2), lambda n: (0, 0)),
            pl.BlockSpec((1, G6), lambda n: (0, 0)),
            pl.BlockSpec((1, D), lambda n: (0, 0)),
            pl.BlockSpec((D, D), lambda n: (0, 0)),
            pl.BlockSpec((1, D), lambda n: (0, 0)),
            pl.BlockSpec((1, D), lambda n: (0, 0)),
            pl.BlockSpec((T, block_n, 1), lambda n: (0, n, 0)),
            pl.BlockSpec((D, C), lambda n: (0, 0)),
            pl.BlockSpec((1, C), lambda n: (0, 0)),
        ],
        out_specs=pl.BlockSpec((block_n, C), lambda n: (n, 0)),
        scratch_shapes=[pltpu.VMEM((T, block_n, G6), jnp.float32),
                        pltpu.VMEM((T, block_n, D), jnp.float32)],
        compiler_params=_compiler_params(),
    )(x_tm, wih, whh, bih, bhn, dense_w, dense_b, ctx, mask3, fc_w, fc_b)


# --------------------------------------------------------------------------
# Parameters (deterministic synthetic init, packed for the fused kernels)
# --------------------------------------------------------------------------
def _pack_bigru_weights(wih_f, whh_f, bih_f, bhh_f, wih_b, whh_b, bih_b, bhh_b):
    """Pack per-direction GRU weights (wih_*: [Din,3H], whh_*: [H,3H],
    b*: [1,3H], gate order r,z,n) into the fused direction-blocked layout.
    The r/z hidden biases are folded into the input bias (they are added
    outside the reset gate); the n hidden bias stays separate."""
    H = whh_f.shape[0]

    def fuse_bias(bih, bhh):
        return jnp.concatenate([bih[:, :2 * H] + bhh[:, :2 * H], bih[:, 2 * H:]], axis=1)

    wih = jnp.concatenate([wih_f, wih_b], axis=1)                        # [Din, 6H]
    bih = jnp.concatenate([fuse_bias(bih_f, bhh_f), fuse_bias(bih_b, bhh_b)], axis=1)
    whh = jnp.concatenate([whh_f, whh_b], axis=0)                        # [2H, 3H]
    bhn = jnp.concatenate([bhh_f[:, 2 * H:], bhh_b[:, 2 * H:]], axis=1)  # [1, 2H]
    return wih, whh, bih, bhn


def init_han_params(key, vocab, emb_dim, hidden, class_num):
    ks = iter(jax.random.split(key, 64))

    def nrm(shape, scale=0.1):
        return scale * jax.random.normal(next(ks), shape, dtype=jnp.float32)

    def bigru_stack(in_dim):
        layers = []
        d = in_dim
        for _ in range(2):          # num_layers = 2, bidirectional
            layers.append(_pack_bigru_weights(
                nrm((d, 3 * hidden)), nrm((hidden, 3 * hidden)),
                nrm((1, 3 * hidden)), nrm((1, 3 * hidden)),
                nrm((d, 3 * hidden)), nrm((hidden, 3 * hidden)),
                nrm((1, 3 * hidden)), nrm((1, 3 * hidden))))
            d = 2 * hidden
        return layers

    D2 = 2 * hidden
    return dict(
        embedding=nrm((vocab, emb_dim), 0.5),
        word_gru=bigru_stack(emb_dim),
        word_dense_w=nrm((D2, D2)), word_dense_b=nrm((1, D2)),
        word_context=nrm((1, D2)),
        sentence_gru=bigru_stack(D2),
        sentence_dense_w=nrm((D2, D2)), sentence_dense_b=nrm((1, D2)),
        sentence_context=nrm((1, D2)),
        fc_w=nrm((D2, class_num)), fc_b=nrm((1, class_num)),
    )


# --------------------------------------------------------------------------
# Full forward (heavy compute in Pallas; gather / pad / reshape glue in XLA)
# --------------------------------------------------------------------------
def han_forward(x_tokens, params):
    B, S, L = x_tokens.shape
    x_flat = x_tokens.reshape(B * S, L).astype(jnp.int32)
    N_w = B * S
    E = params["embedding"].shape[1]
    H2 = params["word_dense_w"].shape[0]

    # --- word level -------------------------------------------------------
    Np_w, blk_w = _pad_and_block(N_w, _gru_row_bytes(L, max(E, H2), H2))
    # Embedding gather directly into time-major layout [L, B*S, E].
    emb_tm = jnp.take(params["embedding"], x_flat.T, axis=0)             # [L, N_w, E]
    if Np_w != N_w:
        emb_tm = jnp.pad(emb_tm, ((0, 0), (0, Np_w - N_w), (0, 0)))

    word_mask = (x_flat.T != 0).astype(jnp.float32)                      # [L, N_w]
    if Np_w != N_w:
        word_mask = jnp.pad(word_mask, ((0, 0), (0, Np_w - N_w)))
    word_mask = word_mask[:, :, None]                                    # [L, Np_w, 1]

    wl1, wl2 = params["word_gru"]
    word_h = bigru_layer(emb_tm, wl1, blk_w)                             # [L, Np_w, 2H]
    sent_vec = bigru_attn_layer(word_h, wl2,
                                params["word_dense_w"], params["word_dense_b"],
                                params["word_context"], word_mask, blk_w)  # [Np_w, 2H]
    sent_vec = sent_vec[:N_w].reshape(B, S, H2)

    # --- sentence level ----------------------------------------------------
    Np_s, blk_s = _pad_and_block(B, _gru_row_bytes(S, H2, H2))
    sent_tm = jnp.transpose(sent_vec, (1, 0, 2))                         # [S, B, 2H]
    if Np_s != B:
        sent_tm = jnp.pad(sent_tm, ((0, 0), (0, Np_s - B), (0, 0)))

    sent_mask = (jnp.sum(x_flat.reshape(B, S, L), axis=2) != 0).astype(jnp.float32).T  # [S, B]
    if Np_s != B:
        sent_mask = jnp.pad(sent_mask, ((0, 0), (0, Np_s - B)))
    sent_mask = sent_mask[:, :, None]                                    # [S, Np_s, 1]

    sl1, sl2 = params["sentence_gru"]
    sent_h = bigru_layer(sent_tm, sl1, blk_s)                            # [S, Np_s, 2H]
    # nn.Dropout(p=0.2) is identity at inference time.
    # TODO(synk): training-mode dropout (random mask + 1/(1-p) scaling) not implemented.
    logits = bigru_attn_fc_layer(sent_h, sl2,
                                 params["sentence_dense_w"], params["sentence_dense_b"],
                                 params["sentence_context"], sent_mask,
                                 params["fc_w"], params["fc_b"], blk_s)  # [Np_s, C]
    return logits[:B]


if __name__ == "__main__":
    key = jax.random.PRNGKey(0)
    k_tok, k_par = jax.random.split(key)

    VOCAB, EMB, HID, NCLS = 32, 16, 16, 4       # embedding_in/hidden, gru_hidden, class_num
    B, S, L = 2, 3, 8                           # batch, sentence_num, sentence_length

    x = jax.random.randint(k_tok, (B, S, L), 0, VOCAB, dtype=jnp.int32)
    x = x.at[:, :, -2:].set(0)                  # padding tokens (masked in word attention)
    x = x.at[1, 2, :].set(0)                    # fully-padded sentence (masked in sentence attention)

    params = init_han_params(k_par, VOCAB, EMB, HID, NCLS)

    out = jax.jit(han_forward)(x, params)
    out = jax.block_until_ready(out)

    assert out.shape == (B, NCLS), out.shape
    assert bool(jnp.all(jnp.isfinite(out)))
    print("KERNEL_OK")
</pallas_src>

<mosaic_0001>
module attributes {stable_mosaic.version = 11 : i64} {
  func.func @_bigru_attn_layer_kernel(%arg0: i32, %arg1: memref<8x8x32xf32, #tpu.memory_space<vmem>>, %arg2: memref<32x96xf32, #tpu.memory_space<vmem>>, %arg3: memref<32x48xf32, #tpu.memory_space<vmem>>, %arg4: memref<1x96xf32, #tpu.memory_space<vmem>>, %arg5: memref<1x32xf32, #tpu.memory_space<vmem>>, %arg6: memref<32x32xf32, #tpu.memory_space<vmem>>, %arg7: memref<1x32xf32, #tpu.memory_space<vmem>>, %arg8: memref<1x32xf32, #tpu.memory_space<vmem>>, %arg9: memref<8x8x1xf32, #tpu.memory_space<vmem>>, %arg10: memref<8x32xf32, #tpu.memory_space<vmem>>, %arg11: memref<8x8x96xf32, #tpu.memory_space<vmem>>, %arg12: memref<8x8x32xf32, #tpu.memory_space<vmem>>) attributes {dimension_semantics = [#tpu.dimension_semantics<parallel>], iteration_bounds = array<i64: 1>, scalar_prefetch = 0 : i64, scratch_operands = 2 : i64, tpu.core_type = #tpu.core_type<tc>, window_params = [{transform_indices = @transform_0, window_bounds = array<i64: 8, 8, 32>}, {pipeline_mode = #tpu.pipeline_mode<synchronous>, transform_indices = @transform_1, window_bounds = array<i64: 32, 96>}, {pipeline_mode = #tpu.pipeline_mode<synchronous>, transform_indices = @transform_2, window_bounds = array<i64: 32, 48>}, {pipeline_mode = #tpu.pipeline_mode<synchronous>, transform_indices = @transform_3, window_bounds = array<i64: 1, 96>}, {pipeline_mode = #tpu.pipeline_mode<synchronous>, transform_indices = @transform_4, window_bounds = array<i64: 1, 32>}, {pipeline_mode = #tpu.pipeline_mode<synchronous>, transform_indices = @transform_5, window_bounds = array<i64: 32, 32>}, {pipeline_mode = #tpu.pipeline_mode<synchronous>, transform_indices = @transform_6, window_bounds = array<i64: 1, 32>}, {pipeline_mode = #tpu.pipeline_mode<synchronous>, transform_indices = @transform_7, window_bounds = array<i64: 1, 32>}, {transform_indices = @transform_8, window_bounds = array<i64: 8, 8, 1>}, {transform_indices = @transform_9, window_bounds = array<i64: 8, 32>}]} {
    %c0 = arith.constant 0 : index
    %c0_0 = arith.constant 0 : index
    %c0_1 = arith.constant 0 : index
    %0 = vector.load %arg1[%c0, %c0_0, %c0_1] : memref<8x8x32xf32, #tpu.memory_space<vmem>>, vector<8x8x32xf32>
    %1 = vector.shape_cast %0 : vector<8x8x32xf32> to vector<64x32xf32>
    %c0_2 = arith.constant 0 : index
    %c0_3 = arith.constant 0 : index
    %2 = vector.load %arg2[%c0_2, %c0_3] : memref<32x96xf32, #tpu.memory_space<vmem>>, vector<32x96xf32>
    %cst = arith.constant dense<0.000000e+00> : vector<64x96xf32>
    %3 = tpu.matmul %1, %2, %cst {dimension_numbers = #tpu.dot_dimension_numbers<[1], [0], [0], [1], [0, 0, 1, 1], [], []>} : vector<64x32xf32>, vector<32x96xf32>, vector<64x96xf32> -> vector<64x96xf32>
    %c0_4 = arith.constant 0 : index
    %c0_5 = arith.constant 0 : index
    %4 = vector.load %arg4[%c0_4, %c0_5] : memref<1x96xf32, #tpu.memory_space<vmem>>, vector<1x96xf32>
    %5 = vector.broadcast %4 : vector<1x96xf32> to vector<64x96xf32>
    %6 = arith.addf %3, %5 : vector<64x96xf32>
    %7 = vector.shape_cast %6 : vector<64x96xf32> to vector<8x8x96xf32>
    %c0_6 = arith.constant 0 : index
    %c0_7 = arith.constant 0 : index
    %c0_8 = arith.constant 0 : index
    %8 = vector.load %arg11[%c0_6, %c0_7, %c0_8] : memref<8x8x96xf32, #tpu.memory_space<vmem>>, vector<8x8x96xf32>
    tpu.vector_store %arg11[%c0_6, %c0_7, %c0_8], %7 {strides = array<i32>} : memref<8x8x96xf32, #tpu.memory_space<vmem>>, vector<8x8x96xf32>,
    %c0_9 = arith.constant 0 : index
    %c0_10 = arith.constant 0 : index
    %9 = vector.load %arg3[%c0_9, %c0_10] : memref<32x48xf32, #tpu.memory_space<vmem>>, vector<16x48xf32>
    %c16 = arith.constant 16 : index
    %c0_11 = arith.constant 0 : index
    %10 = vector.load %arg3[%c16, %c0_11] : memref<32x48xf32, #tpu.memory_space<vmem>>, vector<16x48xf32>
    %c0_12 = arith.constant 0 : index
    %c0_13 = arith.constant 0 : index
    %11 = vector.load %arg5[%c0_12, %c0_13] : memref<1x32xf32, #tpu.memory_space<vmem>>, vector<1x16xf32>
    %12 = vector.shape_cast %11 : vector<1x16xf32> to vector<1x16xf32>
    %13 = vector.broadcast %12 : vector<1x16xf32> to vector<8x16xf32>
    %c0_14 = arith.constant 0 : index
    %c16_15 = arith.constant 16 : index
    %14 = vector.load %arg5[%c0_14, %c16_15] : memref<1x32xf32, #tpu.memory_space<vmem>>, vector<1x16xf32>
    %15 = vector.shape_cast %14 : vector<1x16xf32> to vector<1x16xf32>
    %16 = vector.broadcast %15 : vector<1x16xf32> to vector<8x16xf32>
    %cst_16 = arith.constant 0.000000e+00 : f32
    %17 = vector.broadcast %cst_16 : f32 to vector<8x16xf32>
    %c0_i32 = arith.constant 0 : i32
    %c7_i32 = arith.constant 7 : i32
    %18 = arith.subi %c7_i32, %c0_i32 : i32
    %19 = arith.index_cast %c0_i32 : i32 to index
    %c0_17 = arith.constant 0 : index
    %c0_18 = arith.constant 0 : index
    %20 = vector.load %arg11[%19, %c0_17, %c0_18] : memref<8x8x96xf32, #tpu.memory_space<vmem>>, vector<1x8x48xf32>
    %21 = vector.shape_cast %20 : vector<1x8x48xf32> to vector<8x48xf32>
    %22 = arith.index_cast %18 : i32 to index
    %c0_19 = arith.constant 0 : index
    %c48 = arith.constant 48 : index
    %23 = vector.load %arg11[%22, %c0_19, %c48] : memref<8x8x96xf32, #tpu.memory_space<vmem>>, vector<1x8x48xf32>
    %24 = vector.shape_cast %23 : vector<1x8x48xf32> to vector<8x48xf32>
    %cst_20 = arith.constant dense<0.000000e+00> : vector<8x48xf32>
    %25 = tpu.matmul %17, %9, %cst_20 {dimension_numbers = #tpu.dot_dimension_numbers<[1], [0], [0], [1], [0, 0, 1, 1], [], []>} : vector<8x16xf32>, vector<16x48xf32>, vector<8x48xf32> -> vector<8x48xf32>
    %cst_21 = arith.constant dense<0.000000e+00> : vector<8x48xf32>
    %26 = tpu.matmul %17, %10, %cst_21 {dimension_numbers = #tpu.dot_dimension_numbers<[1], [0], [0], [1], [0, 0, 1, 1], [], []>} : vector<8x16xf32>, vector<16x48xf32>, vector<8x48xf32> -> vector<8x48xf32>
    %27 = vector.extract_strided_slice %21 {offsets = [0, 0], sizes = [8, 32], strides = [1, 1]} : vector<8x48xf32> to vector<8x32xf32>
    %28 = vector.extract_strided_slice %25 {offsets = [0, 0], sizes = [8, 32], strides = [1, 1]} : vector<8x48xf32> to vector<8x32xf32>
    %29 = arith.addf %27, %28 : vector<8x32xf32>
    %30 = arith.negf %29 : vector<8x32xf32>
    %31 = math.exp %30 : vector<8x32xf32>
    %cst_22 = arith.constant 1.000000e+00 : f32
    %32 = vector.broadcast %cst_22 : f32 to vector<8x32xf32>
    %33 = arith.addf %32, %31 : vector<8x32xf32>
    %34 = arith.divf %32, %33 : vector<8x32xf32>
    %35 = vector.extract_strided_slice %24 {offsets = [0, 0], sizes = [8, 32], strides = [1, 1]} : vector<8x48xf32> to vector<8x32xf32>
    %36 = vector.extract_strided_slice %26 {offsets = [0, 0], sizes = [8, 32], strides = [1, 1]} : vector<8x48xf32> to vector<8x32xf32>
    %37 = arith.addf %35, %36 : vector<8x32xf32>
    %38 = arith.negf %37 : vector<8x32xf32>
    %39 = math.exp %38 : vector<8x32xf32>
    %cst_23 = arith.constant 1.000000e+00 : f32
    %40 = vector.broadcast %cst_23 : f32 to vector<8x32xf32>
    %41 = arith.addf %40, %39 : vector<8x32xf32>
    %42 = arith.divf %40, %41 : vector<8x32xf32>
    %43 = vector.extract_strided_slice %21 {offsets = [0, 32], sizes = [8, 16], strides = [1, 1]} : vector<8x48xf32> to vector<8x16xf32>
    %44 = vector.extract_strided_slice %34 {offsets = [0, 0], sizes = [8, 16], strides = [1, 1]} : vector<8x32xf32> to vector<8x16xf32>
    %45 = vector.extract_strided_slice %25 {offsets = [0, 32], sizes = [8, 16], strides = [1, 1]} : vector<8x48xf32> to vector<8x16xf32>
    %46 = arith.addf %45, %13 : vector<8x16xf32>
    %47 = arith.mulf %44, %46 : vector<8x16xf32>
    %48 = arith.addf %43, %47 : vector<8x16xf32>
    %49 = math.tanh %48 : vector<8x16xf32>
    %50 = vector.extract_strided_slice %24 {offsets = [0, 32], sizes = [8, 16], strides = [1, 1]} : vector<8x48xf32> to vector<8x16xf32>
    %51 = vector.extract_strided_slice %42 {offsets = [0, 0], sizes = [8, 16], strides = [1, 1]} : vector<8x32xf32> to vector<8x16xf32>
    %52 = vector.extract_strided_slice %26 {offsets = [0, 32], sizes = [8, 16], strides = [1, 1]} : vector<8x48xf32> to vector<8x16xf32>
    %53 = arith.addf %52, %16 : vector<8x16xf32>
    %54 = arith.mulf %51, %53 : vector<8x16xf32>
    %55 = arith.addf %50, %54 : vector<8x16xf32>
    %56 = math.tanh %55 : vector<8x16xf32>
    %57 = vector.extract_strided_slice %34 {offsets = [0, 16], sizes = [8, 16], strides = [1, 1]} : vector<8x32xf32> to vector<8x16xf32>
    %58 = vector.extract_strided_slice %42 {offsets = [0, 16], sizes = [8, 16], strides = [1, 1]} : vector<8x32xf32> to vector<8x16xf32>
    %cst_24 = arith.constant 1.000000e+00 : f32
    %59 = vector.broadcast %cst_24 : f32 to vector<8x16xf32>
    %60 = arith.subf %59, %57 : vector<8x16xf32>
    %61 = arith.mulf %60, %49 : vector<8x16xf32>
    %62 = arith.mulf %57, %17 : vector<8x16xf32>
    %63 = arith.addf %61, %62 : vector<8x16xf32>
    %cst_25 = arith.constant 1.000000e+00 : f32
    %64 = vector.broadcast %cst_25 : f32 to vector<8x16xf32>
    %65 = arith.subf %64, %58 : vector<8x16xf32>
    %66 = arith.mulf %65, %56 : vector<8x16xf32>
    %67 = arith.mulf %58, %17 : vector<8x16xf32>
    %68 = arith.addf %66, %67 : vector<8x16xf32>
    %69 = arith.index_cast %c0_i32 : i32 to index
    %c0_26 = arith.constant 0 : index
    %c0_27 = arith.constant 0 : index
    %70 = vector.load %arg12[%69, %c0_26, %c0_27] : memref<8x8x32xf32, #tpu.memory_space<vmem>>, vector<1x8x16xf32>
    %71 = vector.shape_cast %70 : vector<1x8x16xf32> to vector<8x16xf32>
    %72 = vector.shape_cast %63 : vector<8x16xf32> to vector<1x8x16xf32>
    tpu.vector_store %arg12[%69, %c0_26, %c0_27], %72 {strides = array<i32>} : memref<8x8x32xf32, #tpu.memory_space<vmem>>, vector<1x8x16xf32>,
    %73 = arith.index_cast %18 : i32 to index
    %c0_28 = arith.constant 0 : index
    %c16_29 = arith.constant 16 : index
    %74 = vector.load %arg12[%73, %c0_28, %c16_29] : memref<8x8x32xf32, #tpu.memory_space<vmem>>, vector<1x8x16xf32>
    %75 = vector.shape_cast %74 : vector<1x8x16xf32> to vector<8x16xf32>
    %76 = vector.shape_cast %68 : vector<8x16xf32> to vector<1x8x16xf32>
    tpu.vector_store %arg12[%73, %c0_28, %c16_29], %76 {strides = array<i32>} : memref<8x8x32xf32, #tpu.memory_space<vmem>>, vector<1x8x16xf32>,
    %c1_i32 = arith.constant 1 : i32
    %c7_i32_30 = arith.constant 7 : i32
    %77 = arith.subi %c7_i32_30, %c1_i32 : i32
    %78 = arith.index_cast %c1_i32 : i32 to index
    %c0_31 = arith.constant 0 : index
    %c0_32 = arith.constant 0 : index
    %79 = vector.load %arg11[%78, %c0_31, %c0_32] : memref<8x8x96xf32, #tpu.memory_space<vmem>>, vector<1x8x48xf32>
    %80 = vector.shape_cast %79 : vector<1x8x48xf32> to vector<8x48xf32>
    %81 = arith.index_cast %77 : i32 to index
    %c0_33 = arith.constant 0 : index
    %c48_34 = arith.constant 48 : index
    %82 = vector.load %arg11[%81, %c0_33, %c48_34] : memref<8x8x96xf32, #tpu.memory_space<vmem>>, vector<1x8x48xf32>
    %83 = vector.shape_cast %82 : vector<1x8x48xf32> to vector<8x48xf32>
    %cst_35 = arith.constant dense<0.000000e+00> : vector<8x48xf32>
    %84 = tpu.matmul %63, %9, %cst_35 {dimension_numbers = #tpu.dot_dimension_numbers<[1], [0], [0], [1], [0, 0, 1, 1], [], []>} : vector<8x16xf32>, vector<16x48xf32>, vector<8x48xf32> -> vector<8x48xf32>
    %cst_36 = arith.constant dense<0.000000e+00> : vector<8x48xf32>
    %85 = tpu.matmul %68, %10, %cst_36 {dimension_numbers = #tpu.dot_dimension_numbers<[1], [0], [0], [1], [0, 0, 1, 1], [], []>} : vector<8x16xf32>, vector<16x48xf32>, vector<8x48xf32> -> vector<8x48xf32>
    %86 = vector.extract_strided_slice %80 {offsets = [0, 0], sizes = [8, 32], strides = [1, 1]} : vector<8x48xf32> to vector<8x32xf32>
    %87 = vector.extract_strided_slice %84 {offsets = [0, 0], sizes = [8, 32], strides = [1, 1]} : vector<8x48xf32> to vector<8x32xf32>
    %88 = arith.addf %86, %87 : vector<8x32xf32>
    %89 = arith.negf %88 : vector<8x32xf32>
    %90 = math.exp %89 : vector<8x32xf32>
    %cst_37 = arith.constant 1.000000e+00 : f32
    %91 = vector.broadcast %cst_37 : f32 to vector<8x32xf32>
    %92 = arith.addf %91, %90 : vector<8x32xf32>
    %93 = arith.divf %91, %92 : vector<8x32xf32>
    %94 = vector.extract_strided_slice %83 {offsets = [0, 0], sizes = [8, 32], strides = [1, 1]} : vector<8x48xf32> to vector<8x32xf32>
    %95 = vector.extract_strided_slice %85 {offsets = [0, 0], sizes = [8, 32], strides = [1, 1]} : vector<8x48xf32> to vector<8x32xf32>
    %96 = arith.addf %94, %95 : vector<8x32xf32>
    %97 = arith.negf %96 : vector<8x32xf32>
    %98 = math.exp %97 : vector<8x32xf32>
    %cst_38 = arith.constant 1.000000e+00 : f32
    %99 = vector.broadcast %cst_38 : f32 to vector<8x32xf32>
    %100 = arith.addf %99, %98 : vector<8x32xf32>
    %101 = arith.divf %99, %100 : vector<8x32xf32>
    %102 = vector.extract_strided_slice %80 {offsets = [0, 32], sizes = [8, 16], strides = [1, 1]} : vector<8x48xf32> to vector<8x16xf32>
    %103 = vector.extract_strided_slice %93 {offsets = [0, 0], sizes = [8, 16], strides = [1, 1]} : vector<8x32xf32> to vector<8x16xf32>
    %104 = vector.extract_strided_slice %84 {offsets = [0, 32], sizes = [8, 16], strides = [1, 1]} : vector<8x48xf32> to vector<8x16xf32>
    %105 = arith.addf %104, %13 : vector<8x16xf32>
    %106 = arith.mulf %103, %105 : vector<8x16xf32>
    %107 = arith.addf %102, %106 : vector<8x16xf32>
    %108 = math.tanh %107 : vector<8x16xf32>
    %109 = vector.extract_strided_slice %83 {offsets = [0, 32], sizes = [8, 16], strides = [1, 1]} : vector<8x48xf32> to vector<8x16xf32>
    %110 = vector.extract_strided_slice %101 {offsets = [0, 0], sizes = [8, 16], strides = [1, 1]} : vector<8x32xf32> to vector<8x16xf32>
    %111 = vector.extract_strided_slice %85 {offsets = [0, 32], sizes = [8, 16], strides = [1, 1]} : vector<8x48xf32> to vector<8x16xf32>
    %112 = arith.addf %111, %16 : vector<8x16xf32>
    %113 = arith.mulf %110, %112 : vector<8x16xf32>
    %114 = arith.addf %109, %113 : vector<8x16xf32>
    %115 = math.tanh %114 : vector<8x16xf32>
    %116 = vector.extract_strided_slice %93 {offsets = [0, 16], sizes = [8, 16], strides = [1, 1]} : vector<8x32xf32> to vector<8x16xf32>
    %117 = vector.extract_strided_slice %101 {offsets = [0, 16], sizes = [8, 16], strides = [1, 1]} : vector<8x32xf32> to vector<8x16xf32>
    %cst_39 = arith.constant 1.000000e+00 : f32
    %118 = vector.broadcast %cst_39 : f32 to vector<8x16xf32>
    %119 = arith.subf %118, %116 : vector<8x16xf32>
    %120 = arith.mulf %119, %108 : vector<8x16xf32>
    %121 = arith.mulf %116, %63 : vector<8x16xf32>
    %122 = arith.addf %120, %121 : vector<8x16xf32>
    %cst_40 = arith.constant 1.000000e+00 : f32
    %123 = vector.broadcast %cst_40 : f32 to vector<8x16xf32>
    %124 = arith.subf %123, %117 : vector<8x16xf32>
    %125 = arith.mulf %124, %115 : vector<8x16xf32>
    %126 = arith.mulf %117, %68 : vector<8x16xf32>
    %127 = arith.addf %125, %126 : vector<8x16xf32>
    %128 = arith.index_cast %c1_i32 : i32 to index
    %c0_41 = arith.constant 0 : index
    %c0_42 = arith.constant 0 : index
    %129 = vector.load %arg12[%128, %c0_41, %c0_42] : memref<8x8x32xf32, #tpu.memory_space<vmem>>, vector<1x8x16xf32>
    %130 = vector.shape_cast %129 : vector<1x8x16xf32> to vector<8x16xf32>
    %131 = vector.shape_cast %122 : vector<8x16xf32> to vector<1x8x16xf32>
    tpu.vector_store %arg12[%128, %c0_41, %c0_42], %131 {strides = array<i32>} : memref<8x8x32xf32, #tpu.memory_space<vmem>>, vector<1x8x16xf32>,
    %132 = arith.index_cast %77 : i32 to index
    %c0_43 = arith.constant 0 : index
    %c16_44 = arith.constant 16 : index
    %133 = vector.load %arg12[%132, %c0_43, %c16_44] : memref<8x8x32xf32, #tpu.memory_space<vmem>>, vector<1x8x16xf32>
    %134 = vector.shape_cast %133 : vector<1x8x16xf32> to vector<8x16xf32>
    %135 = vector.shape_cast %127 : vector<8x16xf32> to vector<1x8x16xf32>
    tpu.vector_store %arg12[%132, %c0_43, %c16_44], %135 {strides = array<i32>} : memref<8x8x32xf32, #tpu.memory_space<vmem>>, vector<1x8x16xf32>,
    %c2_i32 = arith.constant 2 : i32
    %c7_i32_45 = arith.constant 7 : i32
    %136 = arith.subi %c7_i32_45, %c2_i32 : i32
    %137 = arith.index_cast %c2_i32 : i32 to index
    %c0_46 = arith.constant 0 : index
    %c0_47 = arith.constant 0 : index
    %138 = vector.load %arg11[%137, %c0_46, %c0_47] : memref<8x8x96xf32, #tpu.memory_space<vmem>>, vector<1x8x48xf32>
    %139 = vector.shape_cast %138 : vector<1x8x48xf32> to vector<8x48xf32>
    %140 = arith.index_cast %136 : i32 to index
    %c0_48 = arith.constant 0 : index
    %c48_49 = arith.constant 48 : index
    %141 = vector.load %arg11[%140, %c0_48, %c48_49] : memref<8x8x96xf32, #tpu.memory_space<vmem>>, vector<1x8x48xf32>
    %142 = vector.shape_cast %141 : vector<1x8x48xf32> to vector<8x48xf32>
    %cst_50 = arith.constant dense<0.000000e+00> : vector<8x48xf32>
    %143 = tpu.matmul %122, %9, %cst_50 {dimension_numbers = #tpu.dot_dimension_numbers<[1], [0], [0], [1], [0, 0, 1, 1], [], []>} : vector<8x16xf32>, vector<16x48xf32>, vector<8x48xf32> -> vector<8x48xf32>
    %cst_51 = arith.constant dense<0.000000e+00> : vector<8x48xf32>
    %144 = tpu.matmul %127, %10, %cst_51 {dimension_numbers = #tpu.dot_dimension_numbers<[1], [0], [0], [1], [0, 0, 1, 1], [], []>} : vector<8x16xf32>, vector<16x48xf32>, vector<8x48xf32> -> vector<8x48xf32>
    %145 = vector.extract_strided_slice %139 {offsets = [0, 0], sizes = [8, 32], strides = [1, 1]} : vector<8x48xf32> to vector<8x32xf32>
    %146 = vector.extract_strided_slice %143 {offsets = [0, 0], sizes = [8, 32], strides = [1, 1]} : vector<8x48xf32> to vector<8x32xf32>
    %147 = arith.addf %145, %146 : vector<8x32xf32>
    %148 = arith.negf %147 : vector<8x32xf32>
    %149 = math.exp %148 : vector<8x32xf32>
    %cst_52 = arith.constant 1.000000e+00 : f32
    %150 = vector.broadcast %cst_52 : f32 to vector<8x32xf32>
    %151 = arith.addf %150, %149 : vector<8x32xf32>
    %152 = arith.divf %150, %151 : vector<8x32xf32>
    %153 = vector.extract_strided_slice %142 {offsets = [0, 0], sizes = [8, 32], strides = [1, 1]} : vector<8x48xf32> to vector<8x32xf32>
    %154 = vector.extract_strided_slice %144 {offsets = [0, 0], sizes = [8, 32], strides = [1, 1]} : vector<8x48xf32> to vector<8x32xf32>
    %155 = arith.addf %153, %154 : vector<8x32xf32>
    %156 = arith.negf %155 : vector<8x32xf32>
    %157 = math.exp %156 : vector<8x32xf32>
    %cst_53 = arith.constant 1.000000e+00 : f32
    %158 = vector.broadcast %cst_53 : f32 to vector<8x32xf32>
    %159 = arith.addf %158, %157 : vector<8x32xf32>
    %160 = arith.divf %158, %159 : vector<8x32xf32>
    %161 = vector.extract_strided_slice %139 {offsets = [0, 32], sizes = [8, 16], strides = [1, 1]} : vector<8x48xf32> to vector<8x16xf32>
    %162 = vector.extract_strided_slice %152 {offsets = [0, 0], sizes = [8, 16], strides = [1, 1]} : vector<8x32xf32> to vector<8x16xf32>
    %163 = vector.extract_strided_slice %143 {offsets = [0, 32], sizes = [8, 16], strides = [1, 1]} : vector<8x48xf32> to vector<8x16xf32>
    %164 = arith.addf %163, %13 : vector<8x16xf32>
    %165 = arith.mulf %162, %164 : vector<8x16xf32>
    %166 = arith.addf %161, %165 : vector<8x16xf32>
    %167 = math.tanh %166 : vector<8x16xf32>
    %168 = vector.extract_strided_slice %142 {offsets = [0, 32], sizes = [8, 16], strides = [1, 1]} : vector<8x48xf32> to vector<8x16xf32>
    %169 = vector.extract_strided_slice %160 {offsets = [0, 0], sizes = [8, 16], strides = [1, 1]} : vector<8x32xf32> to vector<8x16xf32>
    %170 = vector.extract_strided_slice %144 {offsets = [0, 32], sizes = [8, 16], strides = [1, 1]} : vector<8x48xf32> to vector<8x16xf32>
    %171 = arith.addf %170, %16 : vector<8x16xf32>
    %172 = arith.mulf %169, %171 : vector<8x16xf32>
    %173 = arith.addf %168, %172 : vector<8x16xf32>
    %174 = math.tanh %173 : vector<8x16xf32>
    %175 = vector.extract_strided_slice %152 {offsets = [0, 16], sizes = [8, 16], strides = [1, 1]} : vector<8x32xf32> to vector<8x16xf32>
    %176 = vector.extract_strided_slice %160 {offsets = [0, 16], sizes = [8, 16], strides = [1, 1]} : vector<8x32xf32> to vector<8x16xf32>
    %cst_54 = arith.constant 1.000000e+00 : f32
    %177 = vector.broadcast %cst_54 : f32 to vector<8x16xf32>
    %178 = arith.subf %177, %175 : vector<8x16xf32>
    %179 = arith.mulf %178, %167 : vector<8x16xf32>
    %180 = arith.mulf %175, %122 : vector<8x16xf32>
    %181 = arith.addf %179, %180 : vector<8x16xf32>
    %cst_55 = arith.constant 1.000000e+00 : f32
    %182 = vector.broadcast %cst_55 : f32 to vector<8x16xf32>
    %183 = arith.subf %182, %176 : vector<8x16xf32>
    %184 = arith.mulf %183, %174 : vector<8x16xf32>
    %185 = arith.mulf %176, %127 : vector<8x16xf32>
    %186 = arith.addf %184, %185 : vector<8x16xf32>
    %187 = arith.index_cast %c2_i32 : i32 to index
    %c0_56 = arith.constant 0 : index
    %c0_57 = arith.constant 0 : index
    %188 = vector.load %arg12[%187, %c0_56, %c0_57] : memref<8x8x32xf32, #tpu.memory_space<vmem>>, vector<1x8x16xf32>
    %189 = vector.shape_cast %188 : vector<1x8x16xf32> to vector<8x16xf32>
    %190 = vector.shape_cast %181 : vector<8x16xf32> to vector<1x8x16xf32>
    tpu.vector_store %arg12[%187, %c0_56, %c0_57], %190 {strides = array<i32>} : memref<8x8x32xf32, #tpu.memory_space<vmem>>, vector<1x8x16xf32>,
    %191 = arith.index_cast %136 : i32 to index
    %c0_58 = arith.constant 0 : index
    %c16_59 = arith.constant 16 : index
    %192 = vector.load %arg12[%191, %c0_58, %c16_59] : memref<8x8x32xf32, #tpu.memory_space<vmem>>, vector<1x8x16xf32>
    %193 = vector.shape_cast %192 : vector<1x8x16xf32> to vector<8x16xf32>
    %194 = vector.shape_cast %186 : vector<8x16xf32> to vector<1x8x16xf32>
    tpu.vector_store %arg12[%191, %c0_58, %c16_59], %194 {strides = array<i32>} : memref<8x8x32xf32, #tpu.memory_space<vmem>>, vector<1x8x16xf32>,
    %c3_i32 = arith.constant 3 : i32
    %c7_i32_60 = arith.constant 7 : i32
    %195 = arith.subi %c7_i32_60, %c3_i32 : i32
    %196 = arith.index_cast %c3_i32 : i32 to index
    %c0_61 = arith.constant 0 : index
    %c0_62 = arith.constant 0 : index
    %197 = vector.load %arg11[%196, %c0_61, %c0_62] : memref<8x8x96xf32, #tpu.memory_space<vmem>>, vector<1x8x48xf32>
    %198 = vector.shape_cast %197 : vector<1x8x48xf32> to vector<8x48xf32>
    %199 = arith.index_cast %195 : i32 to index
    %c0_63 = arith.constant 0 : index
    %c48_64 = arith.constant 48 : index
    %200 = vector.load %arg11[%199, %c0_63, %c48_64] : memref<8x8x96xf32, #tpu.memory_space<vmem>>, vector<1x8x48xf32>
    %201 = vector.shape_cast %200 : vector<1x8x48xf32> to vector<8x48xf32>
    %cst_65 = arith.constant dense<0.000000e+00> : vector<8x48xf32>
    %202 = tpu.matmul %181, %9, %cst_65 {dimension_numbers = #tpu.dot_dimension_numbers<[1], [0], [0], [1], [0, 0, 1, 1], [], []>} : vector<8x16xf32>, vector<16x48xf32>, vector<8x48xf32> -> vector<8x48xf32>
    %cst_66 = arith.constant dense<0.000000e+00> : vector<8x48xf32>
    %203 = tpu.matmul %186, %10, %cst_66 {dimension_numbers = #tpu.dot_dimension_numbers<[1], [0], [0], [1], [0, 0, 1, 1], [], []>} : vector<8x16xf32>, vector<16x48xf32>, vector<8x48xf32> -> vector<8x48xf32>
    %204 = vector.extract_strided_slice %198 {offsets = [0, 0], sizes = [8, 32], strides = [1, 1]} : vector<8x48xf32> to vector<8x32xf32>
    %205 = vector.extract_strided_slice %202 {offsets = [0, 0], sizes = [8, 32], strides = [1, 1]} : vector<8x48xf32> to vector<8x32xf32>
    %206 = arith.addf %204, %205 : vector<8x32xf32>
    %207 = arith.negf %206 : vector<8x32xf32>
    %208 = math.exp %207 : vector<8x32xf32>
    %cst_67 = arith.constant 1.000000e+00 : f32
    %209 = vector.broadcast %cst_67 : f32 to vector<8x32xf32>
    %210 = arith.addf %209, %208 : vector<8x32xf32>
    %211 = arith.divf %209, %210 : vector<8x32xf32>
    %212 = vector.extract_strided_slice %201 {offsets = [0, 0], sizes = [8, 32], strides = [1, 1]} : vector<8x48xf32> to vector<8x32xf32>
    %213 = vector.extract_strided_slice %203 {offsets = [0, 0], sizes = [8, 32], strides = [1, 1]} : vector<8x48xf32> to vector<8x32xf32>
    %214 = arith.addf %212, %213 : vector<8x32xf32>
    %215 = arith.negf %214 : vector<8x32xf32>
    %216 = math.exp %215 : vector<8x32xf32>
    %cst_68 = arith.constant 1.000000e+00 : f32
    %217 = vector.broadcast %cst_68 : f32 to vector<8x32xf32>
    %218 = arith.addf %217, %216 : vector<8x32xf32>
    %219 = arith.divf %217, %218 : vector<8x32xf32>
    %220 = vector.extract_strided_slice %198 {offsets = [0, 32], sizes = [8, 16], strides = [1, 1]} : vector<8x48xf32> to vector<8x16xf32>
    %221 = vector.extract_strided_slice %211 {offsets = [0, 0], sizes = [8, 16], strides = [1, 1]} : vector<8x32xf32> to vector<8x16xf32>
    %222 = vector.extract_strided_slice %202 {offsets = [0, 32], sizes = [8, 16], strides = [1, 1]} : vector<8x48xf32> to vector<8x16xf32>
    %223 = arith.addf %222, %13 : vector<8x16xf32>
    %224 = arith.mulf %221, %223 : vector<8x16xf32>
    %225 = arith.addf %220, %224 : vector<8x16xf32>
    %226 = math.tanh %225 : vector<8x16xf32>
    %227 = vector.extract_strided_slice %201 {offsets = [0, 32], sizes = [8, 16], strides = [1, 1]} : vector<8x48xf32> to vector<8x16xf32>
    %228 = vector.extract_strided_slice %219 {offsets = [0, 0], sizes = [8, 16], strides = [1, 1]} : vector<8x32xf32> to vector<8x16xf32>
    %229 = vector.extract_strided_slice %203 {offsets = [0, 32], sizes = [8, 16], strides = [1, 1]} : vector<8x48xf32> to vector<8x16xf32>
    %230 = arith.addf %229, %16 : vector<8x16xf32>
    %231 = arith.mulf %228, %230 : vector<8x16xf32>
    %232 = arith.addf %227, %231 : vector<8x16xf32>
    %233 = math.tanh %232 : vector<8x16xf32>
    %234 = vector.extract_strided_slice %211 {offsets = [0, 16], sizes = [8, 16], strides = [1, 1]} : vector<8x32xf32> to vector<8x16xf32>
    %235 = vector.extract_strided_slice %219 {offsets = [0, 16], sizes = [8, 16], strides = [1, 1]} : vector<8x32xf32> to vector<8x16xf32>
    %cst_69 = arith.constant 1.000000e+00 : f32
    %236 = vector.broadcast %cst_69 : f32 to vector<8x16xf32>
    %237 = arith.subf %236, %234 : vector<8x16xf32>
    %238 = arith.mulf %237, %226 : vector<8x16xf32>
    %239 = arith.mulf %234, %181 : vector<8x16xf32>
    %240 = arith.addf %238, %239 : vector<8x16xf32>
    %cst_70 = arith.constant 1.000000e+00 : f32
    %241 = vector.broadcast %cst_70 : f32 to vector<8x16xf32>
    %242 = arith.subf %241, %235 : vector<8x16xf32>
    %243 = arith.mulf %242, %233 : vector<8x16xf32>
    %244 = arith.mulf %235, %186 : vector<8x16xf32>
    %245 = arith.addf %243, %244 : vector<8x16xf32>
    %246 = arith.index_cast %c3_i32 : i32 to index
    %c0_71 = arith.constant 0 : index
    %c0_72 = arith.constant 0 : index
    %247 = vector.load %arg12[%246, %c0_71, %c0_72] : memref<8x8x32xf32, #tpu.memory_space<vmem>>, vector<1x8x16xf32>
    %248 = vector.shape_cast %247 : vector<1x8x16xf32> to vector<8x16xf32>
    %249 = vector.shape_cast %240 : vector<8x16xf32> to vector<1x8x16xf32>
    tpu.vector_store %arg12[%246, %c0_71, %c0_72], %249 {strides = array<i32>} : memref<8x8x32xf32, #tpu.memory_space<vmem>>, vector<1x8x16xf32>,
    %250 = arith.index_cast %195 : i32 to index
    %c0_73 = arith.constant 0 : index
    %c16_74 = arith.constant 16 : index
    %251 = vector.load %arg12[%250, %c0_73, %c16_74] : memref<8x8x32xf32, #tpu.memory_space<vmem>>, vector<1x8x16xf32>
    %252 = vector.shape_cast %251 : vector<1x8x16xf32> to vector<8x16xf32>
    %253 = vector.shape_cast %245 : vector<8x16xf32> to vector<1x8x16xf32>
    tpu.vector_store %arg12[%250, %c0_73, %c16_74], %253 {strides = array<i32>} : memref<8x8x32xf32, #tpu.memory_space<vmem>>, vector<1x8x16xf32>,
    %c4_i32 = arith.constant 4 : i32
    %c7_i32_75 = arith.constant 7 : i32
    %254 = arith.subi %c7_i32_75, %c4_i32 : i32
    %255 = arith.index_cast %c4_i32 : i32 to index
    %c0_76 = arith.constant 0 : index
    %c0_77 = arith.constant 0 : index
    %256 = vector.load %arg11[%255, %c0_76, %c0_77] : memref<8x8x96xf32, #tpu.memory_space<vmem>>, vector<1x8x48xf32>
    %257 = vector.shape_cast %256 : vector<1x8x48xf32> to vector<8x48xf32>
    %258 = arith.index_cast %254 : i32 to index
    %c0_78 = arith.constant 0 : index
    %c48_79 = arith.constant 48 : index
    %259 = vector.load %arg11[%258, %c0_78, %c48_79] : memref<8x8x96xf32, #tpu.memory_space<vmem>>, vector<1x8x48xf32>
    %260 = vector.shape_cast %259 : vector<1x8x48xf32> to vector<8x48xf32>
    %cst_80 = arith.constant dense<0.000000e+00> : vector<8x48xf32>
    %261 = tpu.matmul %240, %9, %cst_80 {dimension_numbers = #tpu.dot_dimension_numbers<[1], [0], [0], [1], [0, 0, 1, 1], [], []>} : vector<8x16xf32>, vector<16x48xf32>, vector<8x48xf32> -> vector<8x48xf32>
    %cst_81 = arith.constant dense<0.000000e+00> : vector<8x48xf32>
    %262 = tpu.matmul %245, %10, %cst_81 {dimension_numbers = #tpu.dot_dimension_numbers<[1], [0], [0], [1], [0, 0, 1, 1], [], []>} : vector<8x16xf32>, vector<16x48xf32>, vector<8x48xf32> -> vector<8x48xf32>
    %263 = vector.extract_strided_slice %257 {offsets = [0, 0], sizes = [8, 32], strides = [1, 1]} : vector<8x48xf32> to vector<8x32xf32>
    %264 = vector.extract_strided_slice %261 {offsets = [0, 0], sizes = [8, 32], strides = [1, 1]} : vector<8x48xf32> to vector<8x32xf32>
    %265 = arith.addf %263, %264 : vector<8x32xf32>
    %266 = arith.negf %265 : vector<8x32xf32>
    %267 = math.exp %266 : vector<8x32xf32>
    %cst_82 = arith.constant 1.000000e+00 : f32
    %268 = vector.broadcast %cst_82 : f32 to vector<8x32xf32>
    %269 = arith.addf %268, %267 : vector<8x32xf32>
    %270 = arith.divf %268, %269 : vector<8x32xf32>
    %271 = vector.extract_strided_slice %260 {offsets = [0, 0], sizes = [8, 32], strides = [1, 1]} : vector<8x48xf32> to vector<8x32xf32>
    %272 = vector.extract_strided_slice %262 {offsets = [0, 0], sizes = [8, 32], strides = [1, 1]} : vector<8x48xf32> to vector<8x32xf32>
    %273 = arith.addf %271, %272 : vector<8x32xf32>
    %274 = arith.negf %273 : vector<8x32xf32>
    %275 = math.exp %274 : vector<8x32xf32>
    %cst_83 = arith.constant 1.000000e+00 : f32
    %276 = vector.broadcast %cst_83 : f32 to vector<8x32xf32>
    %277 = arith.addf %276, %275 : vector<8x32xf32>
    %278 = arith.divf %276, %277 : vector<8x32xf32>
    %279 = vector.extract_strided_slice %257 {offsets = [0, 32], sizes = [8, 16], strides = [1, 1]} : vector<8x48xf32> to vector<8x16xf32>
    %280 = vector.extract_strided_slice %270 {offsets = [0, 0], sizes = [8, 16], strides = [1, 1]} : vector<8x32xf32> to vector<8x16xf32>
    %281 = vector.extract_strided_slice %261 {offsets = [0, 32], sizes = [8, 16], strides = [1, 1]} : vector<8x48xf32> to vector<8x16xf32>
    %282 = arith.addf %281, %13 : vector<8x16xf32>
    %283 = arith.mulf %280, %282 : vector<8x16xf32>
    %284 = arith.addf %279, %283 : vector<8x16xf32>
    %285 = math.tanh %284 : vector<8x16xf32>
    %286 = vector.extract_strided_slice %260 {offsets = [0, 32], sizes = [8, 16], strides = [1, 1]} : vector<8x48xf32> to vector<8x16xf32>
    %287 = vector.extract_strided_slice %278 {offsets = [0, 0], sizes = [8, 16], strides = [1, 1]} : vector<8x32xf32> to vector<8x16xf32>
    %288 = vector.extract_strided_slice %262 {offsets = [0, 32], sizes = [8, 16], strides = [1, 1]} : vector<8x48xf32> to vector<8x16xf32>
    %289 = arith.addf %288, %16 : vector<8x16xf32>
    %290 = arith.mulf %287, %289 : vector<8x16xf32>
    %291 = arith.addf %286, %290 : vector<8x16xf32>
    %292 = math.tanh %291 : vector<8x16xf32>
    %293 = vector.extract_strided_slice %270 {offsets = [0, 16], sizes = [8, 16], strides = [1, 1]} : vector<8x32xf32> to vector<8x16xf32>
    %294 = vector.extract_strided_slice %278 {offsets = [0, 16], sizes = [8, 16], strides = [1, 1]} : vector<8x32xf32> to vector<8x16xf32>
    %cst_84 = arith.constant 1.000000e+00 : f32
    %295 = vector.broadcast %cst_84 : f32 to vector<8x16xf32>
    %296 = arith.subf %295, %293 : vector<8x16xf32>
    %297 = arith.mulf %296, %285 : vector<8x16xf32>
    %298 = arith.mulf %293, %240 : vector<8x16xf32>
    %299 = arith.addf %297, %298 : vector<8x16xf32>
    %cst_85 = arith.constant 1.000000e+00 : f32
    %300 = vector.broadcast %cst_85 : f32 to vector<8x16xf32>
    %301 = arith.subf %300, %294 : vector<8x16xf32>
    %302 = arith.mulf %301, %292 : vector<8x16xf32>
    %303 = arith.mulf %294, %245 : vector<8x16xf32>
    %304 = arith.addf %302, %303 : vector<8x16xf32>
    %305 = arith.index_cast %c4_i32 : i32 to index
    %c0_86 = arith.constant 0 : index
    %c0_87 = arith.constant 0 : index
    %306 = vector.load %arg12[%305, %c0_86, %c0_87] : memref<8x8x32xf32, #tpu.memory_space<vmem>>, vector<1x8x16xf32>
    %307 = vector.shape_cast %306 : vector<1x8x16xf32> to vector<8x16xf32>
    %308 = vector.shape_cast %299 : vector<8x16xf32> to vector<1x8x16xf32>
    tpu.vector_store %arg12[%305, %c0_86, %c0_87], %308 {strides = array<i32>} : memref<8x8x32xf32, #tpu.memory_space<vmem>>, vector<1x8x16xf32>,
    %309 = arith.index_cast %254 : i32 to index
    %c0_88 = arith.constant 0 : index
    %c16_89 = arith.constant 16 : index
    %310 = vector.load %arg12[%309, %c0_88, %c16_89] : memref<8x8x32xf32, #tpu.memory_space<vmem>>, vector<1x8x16xf32>
    %311 = vector.shape_cast %310 : vector<1x8x16xf32> to vector<8x16xf32>
    %312 = vector.shape_cast %304 : vector<8x16xf32> to vector<1x8x16xf32>
    tpu.vector_store %arg12[%309, %c0_88, %c16_89], %312 {strides = array<i32>} : memref<8x8x32xf32, #tpu.memory_space<vmem>>, vector<1x8x16xf32>,
    %c5_i32 = arith.constant 5 : i32
    %c7_i32_90 = arith.constant 7 : i32
    %313 = arith.subi %c7_i32_90, %c5_i32 : i32
    %314 = arith.index_cast %c5_i32 : i32 to index
    %c0_91 = arith.constant 0 : index
    %c0_92 = arith.constant 0 : index
    %315 = vector.load %arg11[%314, %c0_91, %c0_92] : memref<8x8x96xf32, #tpu.memory_space<vmem>>, vector<1x8x48xf32>
    %316 = vector.shape_cast %315 : vector<1x8x48xf32> to vector<8x48xf32>
    %317 = arith.index_cast %313 : i32 to index
    %c0_93 = arith.constant 0 : index
    %c48_94 = arith.constant 48 : index
    %318 = vector.load %arg11[%317, %c0_93, %c48_94] : memref<8x8x96xf32, #tpu.memory_space<vmem>>, vector<1x8x48xf32>
    %319 = vector.shape_cast %318 : vector<1x8x48xf32> to vector<8x48xf32>
    %cst_95 = arith.constant dense<0.000000e+00> : vector<8x48xf32>
    %320 = tpu.matmul %299, %9, %cst_95 {dimension_numbers = #tpu.dot_dimension_numbers<[1], [0], [0], [1], [0, 0, 1, 1], [], []>} : vector<8x16xf32>, vector<16x48xf32>, vector<8x48xf32> -> vector<8x48xf32>
    %cst_96 = arith.constant dense<0.000000e+00> : vector<8x48xf32>
    %321 = tpu.matmul %304, %10, %cst_96 {dimension_numbers = #tpu.dot_dimension_numbers<[1], [0], [0], [1], [0, 0, 1, 1], [], []>} : vector<8x16xf32>, vector<16x48xf32>, vector<8x48xf32> -> vector<8x48xf32>
    %322 = vector.extract_strided_slice %316 {offsets = [0, 0], sizes = [8, 32], strides = [1, 1]} : vector<8x48xf32> to vector<8x32xf32>
    %323 = vector.extract_strided_slice %320 {offsets = [0, 0], sizes = [8, 32], strides = [1, 1]} : vector<8x48xf32> to vector<8x32xf32>
    %324 = arith.addf %322, %323 : vector<8x32xf32>
    %325 = arith.negf %324 : vector<8x32xf32>
    %326 = math.exp %325 : vector<8x32xf32>
    %cst_97 = arith.constant 1.000000e+00 : f32
    %327 = vector.broadcast %cst_97 : f32 to vector<8x32xf32>
    %328 = arith.addf %327, %326 : vector<8x32xf32>
    %329 = arith.divf %327, %328 : vector<8x32xf32>
    %330 = vector.extract_strided_slice %319 {offsets = [0, 0], sizes = [8, 32], strides = [1, 1]} : vector<8x48xf32> to vector<8x32xf32>
    %331 = vector.extract_strided_slice %321 {offsets = [0, 0], sizes = [8, 32], strides = [1, 1]} : vector<8x48xf32> to vector<8x32xf32>
    %332 = arith.addf %330, %331 : vector<8x32xf32>
    %333 = arith.negf %332 : vector<8x32xf32>
    %334 = math.exp %333 : vector<8x32xf32>
    %cst_98 = arith.constant 1.000000e+00 : f32
    %335 = vector.broadcast %cst_98 : f32 to vector<8x32xf32>
    %336 = arith.addf %335, %334 : vector<8x32xf32>
    %337 = arith.divf %335, %336 : vector<8x32xf32>
    %338 = vector.extract_strided_slice %316 {offsets = [0, 32], sizes = [8, 16], strides = [1, 1]} : vector<8x48xf32> to vector<8x16xf32>
    %339 = vector.extract_strided_slice %329 {offsets = [0, 0], sizes = [8, 16], strides = [1, 1]} : vector<8x32xf32> to vector<8x16xf32>
    %340 = vector.extract_strided_slice %320 {offsets = [0, 32], sizes = [8, 16], strides = [1, 1]} : vector<8x48xf32> to vector<8x16xf32>
    %341 = arith.addf %340, %13 : vector<8x16xf32>
    %342 = arith.mulf %339, %341 : vector<8x16xf32>
    %343 = arith.addf %338, %342 : vector<8x16xf32>
    %344 = math.tanh %343 : vector<8x16xf32>
    %345 = vector.extract_strided_slice %319 {offsets = [0, 32], sizes = [8, 16], strides = [1, 1]} : vector<8x48xf32> to vector<8x16xf32>
    %346 = vector.extract_strided_slice %337 {offsets = [0, 0], sizes = [8, 16], strides = [1, 1]} : vector<8x32xf32> to vector<8x16xf32>
    %347 = vector.extract_strided_slice %321 {offsets = [0, 32], sizes = [8, 16], strides = [1, 1]} : vector<8x48xf32> to vector<8x16xf32>
    %348 = arith.addf %347, %16 : vector<8x16xf32>
    %349 = arith.mulf %346, %348 : vector<8x16xf32>
    %350 = arith.addf %345, %349 : vector<8x16xf32>
    %351 = math.tanh %350 : vector<8x16xf32>
    %352 = vector.extract_strided_slice %329 {offsets = [0, 16], sizes = [8, 16], strides = [1, 1]} : vector<8x32xf32> to vector<8x16xf32>
    %353 = vector.extract_strided_slice %337 {offsets = [0, 16], sizes = [8, 16], strides = [1, 1]} : vector<8x32xf32> to vector<8x16xf32>
    %cst_99 = arith.constant 1.000000e+00 : f32
    %354 = vector.broadcast %cst_99 : f32 to vector<8x16xf32>
    %355 = arith.subf %354, %352 : vector<8x16xf32>
    %356 = arith.mulf %355, %344 : vector<8x16xf32>
    %357 = arith.mulf %352, %299 : vector<8x16xf32>
    %358 = arith.addf %356, %357 : vector<8x16xf32>
    %cst_100 = arith.constant 1.000000e+00 : f32
    %359 = vector.broadcast %cst_100 : f32 to vector<8x16xf32>
    %360 = arith.subf %359, %353 : vector<8x16xf32>
    %361 = arith.mulf %360, %351 : vector<8x16xf32>
    %362 = arith.mulf %353, %304 : vector<8x16xf32>
    %363 = arith.addf %361, %362 : vector<8x16xf32>
    %364 = arith.index_cast %c5_i32 : i32 to index
    %c0_101 = arith.constant 0 : index
    %c0_102 = arith.constant 0 : index
    %365 = vector.load %arg12[%364, %c0_101, %c0_102] : memref<8x8x32xf32, #tpu.memory_space<vmem>>, vector<1x8x16xf32>
    %366 = vector.shape_cast %365 : vector<1x8x16xf32> to vector<8x16xf32>
    %367 = vector.shape_cast %358 : vector<8x16xf32> to vector<1x8x16xf32>
    tpu.vector_store %arg12[%364, %c0_101, %c0_102], %367 {strides = array<i32>} : memref<8x8x32xf32, #tpu.memory_space<vmem>>, vector<1x8x16xf32>,
    %368 = arith.index_cast %313 : i32 to index
    %c0_103 = arith.constant 0 : index
    %c16_104 = arith.constant 16 : index
    %369 = vector.load %arg12[%368, %c0_103, %c16_104] : memref<8x8x32xf32, #tpu.memory_space<vmem>>, vector<1x8x16xf32>
    %370 = vector.shape_cast %369 : vector<1x8x16xf32> to vector<8x16xf32>
    %371 = vector.shape_cast %363 : vector<8x16xf32> to vector<1x8x16xf32>
    tpu.vector_store %arg12[%368, %c0_103, %c16_104], %371 {strides = array<i32>} : memref<8x8x32xf32, #tpu.memory_space<vmem>>, vector<1x8x16xf32>,
    %c6_i32 = arith.constant 6 : i32
    %c7_i32_105 = arith.constant 7 : i32
    %372 = arith.subi %c7_i32_105, %c6_i32 : i32
    %373 = arith.index_cast %c6_i32 : i32 to index
    %c0_106 = arith.constant 0 : index
    %c0_107 = arith.constant 0 : index
    %374 = vector.load %arg11[%373, %c0_106, %c0_107] : memref<8x8x96xf32, #tpu.memory_space<vmem>>, vector<1x8x48xf32>
    %375 = vector.shape_cast %374 : vector<1x8x48xf32> to vector<8x48xf32>
    %376 = arith.index_cast %372 : i32 to index
    %c0_108 = arith.constant 0 : index
    %c48_109 = arith.constant 48 : index
    %377 = vector.load %arg11[%376, %c0_108, %c48_109] : memref<8x8x96xf32, #tpu.memory_space<vmem>>, vector<1x8x48xf32>
    %378 = vector.shape_cast %377 : vector<1x8x48xf32> to vector<8x48xf32>
    %cst_110 = arith.constant dense<0.000000e+00> : vector<8x48xf32>
    %379 = tpu.matmul %358, %9, %cst_110 {dimension_numbers = #tpu.dot_dimension_numbers<[1], [0], [0], [1], [0, 0, 1, 1], [], []>} : vector<8x16xf32>, vector<16x48xf32>, vector<8x48xf32> -> vector<8x48xf32>
    %cst_111 = arith.constant dense<0.000000e+00> : vector<8x48xf32>
    %380 = tpu.matmul %363, %10, %cst_111 {dimension_numbers = #tpu.dot_dimension_numbers<[1], [0], [0], [1], [0, 0, 1, 1], [], []>} : vector<8x16xf32>, vector<16x48xf32>, vector<8x48xf32> -> vector<8x48xf32>
    %381 = vector.extract_strided_slice %375 {offsets = [0, 0], sizes = [8, 32], strides = [1, 1]} : vector<8x48xf32> to vector<8x32xf32>
    %382 = vector.extract_strided_slice %379 {offsets = [0, 0], sizes = [8, 32], strides = [1, 1]} : vector<8x48xf32> to vector<8x32xf32>
    %383 = arith.addf %381, %382 : vector<8x32xf32>
    %384 = arith.negf %383 : vector<8x32xf32>
    %385 = math.exp %384 : vector<8x32xf32>
    %cst_112 = arith.constant 1.000000e+00 : f32
    %386 = vector.broadcast %cst_112 : f32 to vector<8x32xf32>
    %387 = arith.addf %386, %385 : vector<8x32xf32>
    %388 = arith.divf %386, %387 : vector<8x32xf32>
    %389 = vector.extract_strided_slice %378 {offsets = [0, 0], sizes = [8, 32], strides = [1, 1]} : vector<8x48xf32> to vector<8x32xf32>
    %390 = vector.extract_strided_slice %380 {offsets = [0, 0], sizes = [8, 32], strides = [1, 1]} : vector<8x48xf32> to vector<8x32xf32>
    %391 = arith.addf %389, %390 : vector<8x32xf32>
    %392 = arith.negf %391 : vector<8x32xf32>
    %393 = math.exp %392 : vector<8x32xf32>
    %cst_113 = arith.constant 1.000000e+00 : f32
    %394 = vector.broadcast %cst_113 : f32 to vector<8x32xf32>
    %395 = arith.addf %394, %393 : vector<8x32xf32>
    %396 = arith.divf %394, %395 : vector<8x32xf32>
    %397 = vector.extract_strided_slice %375 {offsets = [0, 32], sizes = [8, 16], strides = [1, 1]} : vector<8x48xf32> to vector<8x16xf32>
    %398 = vector.extract_strided_slice %388 {offsets = [0, 0], sizes = [8, 16], strides = [1, 1]} : vector<8x32xf32> to vector<8x16xf32>
    %399 = vector.extract_strided_slice %379 {offsets = [0, 32], sizes = [8, 16], strides = [1, 1]} : vector<8x48xf32> to vector<8x16xf32>
    %400 = arith.addf %399, %13 : vector<8x16xf32>
    %401 = arith.mulf %398, %400 : vector<8x16xf32>
    %402 = arith.addf %397, %401 : vector<8x16xf32>
    %403 = math.tanh %402 : vector<8x16xf32>
    %404 = vector.extract_strided_slice %378 {offsets = [0, 32], sizes = [8, 16], strides = [1, 1]} : vector<8x48xf32> to vector<8x16xf32>
    %405 = vector.extract_strided_slice %396 {offsets = [0, 0], sizes = [8, 16], strides = [1, 1]} : vector<8x32xf32> to vector<8x16xf32>
    %406 = vector.extract_strided_slice %380 {offsets = [0, 32], sizes = [8, 16], strides = [1, 1]} : vector<8x48xf32> to vector<8x16xf32>
    %407 = arith.addf %406, %16 : vector<8x16xf32>
    %408 = arith.mulf %405, %407 : vector<8x16xf32>
    %409 = arith.addf %404, %408 : vector<8x16xf32>
    %410 = math.tanh %409 : vector<8x16xf32>
    %411 = vector.extract_strided_slice %388 {offsets = [0, 16], sizes = [8, 16], strides = [1, 1]} : vector<8x32xf32> to vector<8x16xf32>
    %412 = vector.extract_strided_slice %396 {offsets = [0, 16], sizes = [8, 16], strides = [1, 1]} : vector<8x32xf32> to vector<8x16xf32>
    %cst_114 = arith.constant 1.000000e+00 : f32
    %413 = vector.broadcast %cst_114 : f32 to vector<8x16xf32>
    %414 = arith.subf %413, %411 : vector<8x16xf32>
    %415 = arith.mulf %414, %403 : vector<8x16xf32>
    %416 = arith.mulf %411, %358 : vector<8x16xf32>
    %417 = arith.addf %415, %416 : vector<8x16xf32>
    %cst_115 = arith.constant 1.000000e+00 : f32
    %418 = vector.broadcast %cst_115 : f32 to vector<8x16xf32>
    %419 = arith.subf %418, %412 : vector<8x16xf32>
    %420 = arith.mulf %419, %410 : vector<8x16xf32>
    %421 = arith.mulf %412, %363 : vector<8x16xf32>
    %422 = arith.addf %420, %421 : vector<8x16xf32>
    %423 = arith.index_cast %c6_i32 : i32 to index
    %c0_116 = arith.constant 0 : index
    %c0_117 = arith.constant 0 : index
    %424 = vector.load %arg12[%423, %c0_116, %c0_117] : memref<8x8x32xf32, #tpu.memory_space<vmem>>, vector<1x8x16xf32>
    %425 = vector.shape_cast %424 : vector<1x8x16xf32> to vector<8x16xf32>
    %426 = vector.shape_cast %417 : vector<8x16xf32> to vector<1x8x16xf32>
    tpu.vector_store %arg12[%423, %c0_116, %c0_117], %426 {strides = array<i32>} : memref<8x8x32xf32, #tpu.memory_space<vmem>>, vector<1x8x16xf32>,
    %427 = arith.index_cast %372 : i32 to index
    %c0_118 = arith.constant 0 : index
    %c16_119 = arith.constant 16 : index
    %428 = vector.load %arg12[%427, %c0_118, %c16_119] : memref<8x8x32xf32, #tpu.memory_space<vmem>>, vector<1x8x16xf32>
    %429 = vector.shape_cast %428 : vector<1x8x16xf32> to vector<8x16xf32>
    %430 = vector.shape_cast %422 : vector<8x16xf32> to vector<1x8x16xf32>
    tpu.vector_store %arg12[%427, %c0_118, %c16_119], %430 {strides = array<i32>} : memref<8x8x32xf32, #tpu.memory_space<vmem>>, vector<1x8x16xf32>,
    %c7_i32_120 = arith.constant 7 : i32
    %c7_i32_121 = arith.constant 7 : i32
    %431 = arith.subi %c7_i32_121, %c7_i32_120 : i32
    %432 = arith.index_cast %c7_i32_120 : i32 to index
    %c0_122 = arith.constant 0 : index
    %c0_123 = arith.constant 0 : index
    %433 = vector.load %arg11[%432, %c0_122, %c0_123] : memref<8x8x96xf32, #tpu.memory_space<vmem>>, vector<1x8x48xf32>
    %434 = vector.shape_cast %433 : vector<1x8x48xf32> to vector<8x48xf32>
    %435 = arith.index_cast %431 : i32 to index
    %c0_124 = arith.constant 0 : index
    %c48_125 = arith.constant 48 : index
    %436 = vector.load %arg11[%435, %c0_124, %c48_125] : memref<8x8x96xf32, #tpu.memory_space<vmem>>, vector<1x8x48xf32>
    %437 = vector.shape_cast %436 : vector<1x8x48xf32> to vector<8x48xf32>
    %cst_126 = arith.constant dense<0.000000e+00> : vector<8x48xf32>
    %438 = tpu.matmul %417, %9, %cst_126 {dimension_numbers = #tpu.dot_dimension_numbers<[1], [0], [0], [1], [0, 0, 1, 1], [], []>} : vector<8x16xf32>, vector<16x48xf32>, vector<8x48xf32> -> vector<8x48xf32>
    %cst_127 = arith.constant dense<0.000000e+00> : vector<8x48xf32>
    %439 = tpu.matmul %422, %10, %cst_127 {dimension_numbers = #tpu.dot_dimension_numbers<[1], [0], [0], [1], [0, 0, 1, 1], [], []>} : vector<8x16xf32>, vector<16x48xf32>, vector<8x48xf32> -> vector<8x48xf32>
    %440 = vector.extract_strided_slice %434 {offsets = [0, 0], sizes = [8, 32], strides = [1, 1]} : vector<8x48xf32> to vector<8x32xf32>
    %441 = vector.extract_strided_slice %438 {offsets = [0, 0], sizes = [8, 32], strides = [1, 1]} : vector<8x48xf32> to vector<8x32xf32>
    %442 = arith.addf %440, %441 : vector<8x32xf32>
    %443 = arith.negf %442 : vector<8x32xf32>
    %444 = math.exp %443 : vector<8x32xf32>
    %cst_128 = arith.constant 1.000000e+00 : f32
    %445 = vector.broadcast %cst_128 : f32 to vector<8x32xf32>
    %446 = arith.addf %445, %444 : vector<8x32xf32>
    %447 = arith.divf %445, %446 : vector<8x32xf32>
    %448 = vector.extract_strided_slice %437 {offsets = [0, 0], sizes = [8, 32], strides = [1, 1]} : vector<8x48xf32> to vector<8x32xf32>
    %449 = vector.extract_strided_slice %439 {offsets = [0, 0], sizes = [8, 32], strides = [1, 1]} : vector<8x48xf32> to vector<8x32xf32>
    %450 = arith.addf %448, %449 : vector<8x32xf32>
    %451 = arith.negf %450 : vector<8x32xf32>
    %452 = math.exp %451 : vector<8x32xf32>
    %cst_129 = arith.constant 1.000000e+00 : f32
    %453 = vector.broadcast %cst_129 : f32 to vector<8x32xf32>
    %454 = arith.addf %453, %452 : vector<8x32xf32>
    %455 = arith.divf %453, %454 : vector<8x32xf32>
    %456 = vector.extract_strided_slice %434 {offsets = [0, 32], sizes = [8, 16], strides = [1, 1]} : vector<8x48xf32> to vector<8x16xf32>
    %457 = vector.extract_strided_slice %447 {offsets = [0, 0], sizes = [8, 16], strides = [1, 1]} : vector<8x32xf32> to vector<8x16xf32>
    %458 = vector.extract_strided_slice %438 {offsets = [0, 32], sizes = [8, 16], strides = [1, 1]} : vector<8x48xf32> to vector<8x16xf32>
    %459 = arith.addf %458, %13 : vector<8x16xf32>
    %460 = arith.mulf %457, %459 : vector<8x16xf32>
    %461 = arith.addf %456, %460 : vector<8x16xf32>
    %462 = math.tanh %461 : vector<8x16xf32>
    %463 = vector.extract_strided_slice %437 {offsets = [0, 32], sizes = [8, 16], strides = [1, 1]} : vector<8x48xf32> to vector<8x16xf32>
    %464 = vector.extract_strided_slice %455 {offsets = [0, 0], sizes = [8, 16], strides = [1, 1]} : vector<8x32xf32> to vector<8x16xf32>
    %465 = vector.extract_strided_slice %439 {offsets = [0, 32], sizes = [8, 16], strides = [1, 1]} : vector<8x48xf32> to vector<8x16xf32>
    %466 = arith.addf %465, %16 : vector<8x16xf32>
    %467 = arith.mulf %464, %466 : vector<8x16xf32>
    %468 = arith.addf %463, %467 : vector<8x16xf32>
    %469 = math.tanh %468 : vector<8x16xf32>
    %470 = vector.extract_strided_slice %447 {offsets = [0, 16], sizes = [8, 16], strides = [1, 1]} : vector<8x32xf32> to vector<8x16xf32>
    %471 = vector.extract_strided_slice %455 {offsets = [0, 16], sizes = [8, 16], strides = [1, 1]} : vector<8x32xf32> to vector<8x16xf32>
    %cst_130 = arith.constant 1.000000e+00 : f32
    %472 = vector.broadcast %cst_130 : f32 to vector<8x16xf32>
    %473 = arith.subf %472, %470 : vector<8x16xf32>
    %474 = arith.mulf %473, %462 : vector<8x16xf32>
    %475 = arith.mulf %470, %417 : vector<8x16xf32>
    %476 = arith.addf %474, %475 : vector<8x16xf32>
    %cst_131 = arith.constant 1.000000e+00 : f32
    %477 = vector.broadcast %cst_131 : f32 to vector<8x16xf32>
    %478 = arith.subf %477, %471 : vector<8x16xf32>
    %479 = arith.mulf %478, %469 : vector<8x16xf32>
    %480 = arith.mulf %471, %422 : vector<8x16xf32>
    %481 = arith.addf %479, %480 : vector<8x16xf32>
    %482 = arith.index_cast %c7_i32_120 : i32 to index
    %c0_132 = arith.constant 0 : index
    %c0_133 = arith.constant 0 : index
    %483 = vector.load %arg12[%482, %c0_132, %c0_133] : memref<8x8x32xf32, #tpu.memory_space<vmem>>, vector<1x8x16xf32>
    %484 = vector.shape_cast %483 : vector<1x8x16xf32> to vector<8x16xf32>
    %485 = vector.shape_cast %476 : vector<8x16xf32> to vector<1x8x16xf32>
    tpu.vector_store %arg12[%482, %c0_132, %c0_133], %485 {strides = array<i32>} : memref<8x8x32xf32, #tpu.memory_space<vmem>>, vector<1x8x16xf32>,
    %486 = arith.index_cast %431 : i32 to index
    %c0_134 = arith.constant 0 : index
    %c16_135 = arith.constant 16 : index
    %487 = vector.load %arg12[%486, %c0_134, %c16_135] : memref<8x8x32xf32, #tpu.memory_space<vmem>>, vector<1x8x16xf32>
    %488 = vector.shape_cast %487 : vector<1x8x16xf32> to vector<8x16xf32>
    %489 = vector.shape_cast %481 : vector<8x16xf32> to vector<1x8x16xf32>
    tpu.vector_store %arg12[%486, %c0_134, %c16_135], %489 {strides = array<i32>} : memref<8x8x32xf32, #tpu.memory_space<vmem>>, vector<1x8x16xf32>,
    %c8_i32 = arith.constant 8 : i32
    %c0_136 = arith.constant 0 : index
    %c0_137 = arith.constant 0 : index
    %c0_138 = arith.constant 0 : index
    %490 = vector.load %arg12[%c0_136, %c0_137, %c0_138] : memref<8x8x32xf32, #tpu.memory_space<vmem>>, vector<8x8x32xf32>
    %491 = vector.shape_cast %490 : vector<8x8x32xf32> to vector<64x32xf32>
    %c0_139 = arith.constant 0 : index
    %c0_140 = arith.constant 0 : index
    %492 = vector.load %arg6[%c0_139, %c0_140] : memref<32x32xf32, #tpu.memory_space<vmem>>, vector<32x32xf32>
    %cst_141 = arith.constant dense<0.000000e+00> : vector<64x32xf32>
    %493 = tpu.matmul %491, %492, %cst_141 {dimension_numbers = #tpu.dot_dimension_numbers<[1], [0], [0], [1], [0, 0, 1, 1], [], []>} : vector<64x32xf32>, vector<32x32xf32>, vector<64x32xf32> -> vector<64x32xf32>
    %c0_142 = arith.constant 0 : index
    %c0_143 = arith.constant 0 : index
    %494 = vector.load %arg7[%c0_142, %c0_143] : memref<1x32xf32, #tpu.memory_space<vmem>>, vector<1x32xf32>
    %495 = vector.broadcast %494 : vector<1x32xf32> to vector<64x32xf32>
    %496 = arith.addf %493, %495 : vector<64x32xf32>
    %497 = math.tanh %496 : vector<64x32xf32>
    %498 = vector.shape_cast %497 : vector<64x32xf32> to vector<8x8x32xf32>
    %c0_144 = arith.constant 0 : index
    %c0_145 = arith.constant 0 : index
    %499 = vector.load %arg8[%c0_144, %c0_145] : memref<1x32xf32, #tpu.memory_space<vmem>>, vector<1x32xf32>
    %500 = vector.shape_cast %499 : vector<1x32xf32> to vector<1x1x32xf32>
    %501 = vector.broadcast %500 : vector<1x1x32xf32> to vector<8x8x32xf32>
    %502 = arith.mulf %498, %501 : vector<8x8x32xf32>
    %cst_146 = arith.constant dense<0.000000e+00> : vector<8x8xf32>
    %503 = vector.multi_reduction <add>, %502, %cst_146 [2] : vector<8x8x32xf32> to vector<8x8xf32>
    %504 = vector.shape_cast %503 : vector<8x8xf32> to vector<8x8x1xf32>
    %cst_147 = arith.constant dense<0xFF800000> : vector<8x1xf32>
    %505 = vector.multi_reduction <maximumf>, %504, %cst_147 [0] : vector<8x8x1xf32> to vector<8x1xf32>
    %506 = vector.shape_cast %505 : vector<8x1xf32> to vector<1x8x1xf32>
    %507 = vector.broadcast %506 : vector<1x8x1xf32> to vector<8x8x1xf32>
    %508 = arith.subf %504, %507 : vector<8x8x1xf32>
    %509 = math.exp %508 : vector<8x8x1xf32>
    %c0_148 = arith.constant 0 : index
    %c0_149 = arith.constant 0 : index
    %c0_150 = arith.constant 0 : index
    %510 = vector.load %arg9[%c0_148, %c0_149, %c0_150] : memref<8x8x1xf32, #tpu.memory_space<vmem>>, vector<8x8x1xf32>
    %cst_151 = arith.constant 0.000000e+00 : f32
    %511 = vector.broadcast %cst_151 : f32 to vector<8x8x1xf32>
    %512 = arith.cmpf one, %510, %511 : vector<8x8x1xf32>
    %cst_152 = arith.constant 0.000000e+00 : f32
    %513 = vector.broadcast %cst_152 : f32 to vector<8x8x1xf32>
    %514 = arith.select %512, %509, %513 : vector<8x8x1xi1>, vector<8x8x1xf32>
    %cst_153 = arith.constant dense<0.000000e+00> : vector<8x1xf32>
    %515 = vector.multi_reduction <add>, %514, %cst_153 [0] : vector<8x8x1xf32> to vector<8x1xf32>
    %516 = vector.shape_cast %515 : vector<8x1xf32> to vector<1x8x1xf32>
    %cst_154 = arith.constant dense<0.000000e+00> : vector<8x1xf32>
    %517 = vector.multi_reduction <add>, %509, %cst_154 [0] : vector<8x8x1xf32> to vector<8x1xf32>
    %518 = vector.shape_cast %517 : vector<8x1xf32> to vector<1x8x1xf32>
    %cst_155 = arith.constant 9.99999974E-5 : f32
    %519 = vector.broadcast %cst_155 : f32 to vector<1x8x1xf32>
    %520 = arith.mulf %519, %518 : vector<1x8x1xf32>
    %521 = arith.addf %516, %520 : vector<1x8x1xf32>
    %522 = tpu.reciprocal %521 {approx = true} : vector<1x8x1xf32> -> vector<1x8x1xf32>
    %523 = vector.broadcast %522 : vector<1x8x1xf32> to vector<8x8x1xf32>
    %524 = arith.mulf %514, %523 : vector<8x8x1xf32>
    %525 = vector.broadcast %524 : vector<8x8x1xf32> to vector<8x8x32xf32>
    %526 = arith.mulf %490, %525 : vector<8x8x32xf32>
    %cst_156 = arith.constant dense<0.000000e+00> : vector<8x32xf32>
    %527 = vector.multi_reduction <add>, %526, %cst_156 [0] : vector<8x8x32xf32> to vector<8x32xf32>
    %c0_157 = arith.constant 0 : index
    %c0_158 = arith.constant 0 : index
    %528 = vector.load %arg10[%c0_157, %c0_158] : memref<8x32xf32, #tpu.memory_space<vmem>>, vector<8x32xf32>
    tpu.vector_store %arg10[%c0_157, %c0_158], %527 {strides = array<i32>} : memref<8x32xf32, #tpu.memory_space<vmem>>, vector<8x32xf32>,
    return
  }
  func.func @transform_0(%arg0: i32) -> (i32, i32, i32) {
    %c0_i32 = arith.constant 0 : i32
    %c0_i32_0 = arith.constant 0 : i32
    %c0_i32_1 = arith.constant 0 : i32
    return %c0_i32, %arg0, %c0_i32_0 : i32, i32, i32
  }
  func.func @transform_1(%arg0: i32) -> (i32, i32) {
    %c0_i32 = arith.constant 0 : i32
    %c0_i32_0 = arith.constant 0 : i32
    %c0_i32_1 = arith.constant 0 : i32
    return %c0_i32, %c0_i32_0 : i32, i32
  }
  func.func @transform_2(%arg0: i32) -> (i32, i32) {
    %c0_i32 = arith.constant 0 : i32
    %c0_i32_0 = arith.constant 0 : i32
    %c0_i32_1 = arith.constant 0 : i32
    return %c0_i32, %c0_i32_0 : i32, i32
  }
  func.func @transform_3(%arg0: i32) -> (i32, i32) {
    %c0_i32 = arith.constant 0 : i32
    %c0_i32_0 = arith.constant 0 : i32
    %c0_i32_1 = arith.constant 0 : i32
    return %c0_i32, %c0_i32_0 : i32, i32
  }
  func.func @transform_4(%arg0: i32) -> (i32, i32) {
    %c0_i32 = arith.constant 0 : i32
    %c0_i32_0 = arith.constant 0 : i32
    %c0_i32_1 = arith.constant 0 : i32
    return %c0_i32, %c0_i32_0 : i32, i32
  }
  func.func @transform_5(%arg0: i32) -> (i32, i32) {
    %c0_i32 = arith.constant 0 : i32
    %c0_i32_0 = arith.constant 0 : i32
    %c0_i32_1 = arith.constant 0 : i32
    return %c0_i32, %c0_i32_0 : i32, i32
  }
  func.func @transform_6(%arg0: i32) -> (i32, i32) {
    %c0_i32 = arith.constant 0 : i32
    %c0_i32_0 = arith.constant 0 : i32
    %c0_i32_1 = arith.constant 0 : i32
    return %c0_i32, %c0_i32_0 : i32, i32
  }
  func.func @transform_7(%arg0: i32) -> (i32, i32) {
    %c0_i32 = arith.constant 0 : i32
    %c0_i32_0 = arith.constant 0 : i32
    %c0_i32_1 = arith.constant 0 : i32
    return %c0_i32, %c0_i32_0 : i32, i32
  }
  func.func @transform_8(%arg0: i32) -> (i32, i32, i32) {
    %c0_i32 = arith.constant 0 : i32
    %c0_i32_0 = arith.constant 0 : i32
    %c0_i32_1 = arith.constant 0 : i32
    return %c0_i32, %arg0, %c0_i32_0 : i32, i32, i32
  }
  func.func @transform_9(%arg0: i32) -> (i32, i32) {
    %c0_i32 = arith.constant 0 : i32
    %c0_i32_0 = arith.constant 0 : i32
    return %arg0, %c0_i32 : i32, i32
  }
}

module attributes {stable_mosaic.version = 11 : i64} {
  func.func @_bigru_layer_kernel(%arg0: i32, %arg1: memref<8x8x16xf32, #tpu.memory_space<vmem>>, %arg2: memref<16x96xf32, #tpu.memory_space<vmem>>, %arg3: memref<32x48xf32, #tpu.memory_space<vmem>>, %arg4: memref<1x96xf32, #tpu.memory_space<vmem>>, %arg5: memref<1x32xf32, #tpu.memory_space<vmem>>, %arg6: memref<8x8x32xf32, #tpu.memory_space<vmem>>, %arg7: memref<8x8x96xf32, #tpu.memory_space<vmem>>) attributes {dimension_semantics = [#tpu.dimension_semantics<parallel>], iteration_bounds = array<i64: 1>, scalar_prefetch = 0 : i64, scratch_operands = 1 : i64, tpu.core_type = #tpu.core_type<tc>, window_params = [{transform_indices = @transform_0, window_bounds = array<i64: 8, 8, 16>}, {pipeline_mode = #tpu.pipeline_mode<synchronous>, transform_indices = @transform_1, window_bounds = array<i64: 16, 96>}, {pipeline_mode = #tpu.pipeline_mode<synchronous>, transform_indices = @transform_2, window_bounds = array<i64: 32, 48>}, {pipeline_mode = #tpu.pipeline_mode<synchronous>, transform_indices = @transform_3, window_bounds = array<i64: 1, 96>}, {pipeline_mode = #tpu.pipeline_mode<synchronous>, transform_indices = @transform_4, window_bounds = array<i64: 1, 32>}, {transform_indices = @transform_5, window_bounds = array<i64: 8, 8, 32>}]} {
    %c0 = arith.constant 0 : index
    %c0_0 = arith.constant 0 : index
    %c0_1 = arith.constant 0 : index
    %0 = vector.load %arg1[%c0, %c0_0, %c0_1] : memref<8x8x16xf32, #tpu.memory_space<vmem>>, vector<8x8x16xf32>
    %1 = vector.shape_cast %0 : vector<8x8x16xf32> to vector<64x16xf32>
    %c0_2 = arith.constant 0 : index
    %c0_3 = arith.constant 0 : index
    %2 = vector.load %arg2[%c0_2, %c0_3] : memref<16x96xf32, #tpu.memory_space<vmem>>, vector<16x96xf32>
    %cst = arith.constant dense<0.000000e+00> : vector<64x96xf32>
    %3 = tpu.matmul %1, %2, %cst {dimension_numbers = #tpu.dot_dimension_numbers<[1], [0], [0], [1], [0, 0, 1, 1], [], []>} : vector<64x16xf32>, vector<16x96xf32>, vector<64x96xf32> -> vector<64x96xf32>
    %c0_4 = arith.constant 0 : index
    %c0_5 = arith.constant 0 : index
    %4 = vector.load %arg4[%c0_4, %c0_5] : memref<1x96xf32, #tpu.memory_space<vmem>>, vector<1x96xf32>
    %5 = vector.broadcast %4 : vector<1x96xf32> to vector<64x96xf32>
    %6 = arith.addf %3, %5 : vector<64x96xf32>
    %7 = vector.shape_cast %6 : vector<64x96xf32> to vector<8x8x96xf32>
    %c0_6 = arith.constant 0 : index
    %c0_7 = arith.constant 0 : index
    %c0_8 = arith.constant 0 : index
    %8 = vector.load %arg7[%c0_6, %c0_7, %c0_8] : memref<8x8x96xf32, #tpu.memory_space<vmem>>, vector<8x8x96xf32>
    tpu.vector_store %arg7[%c0_6, %c0_7, %c0_8], %7 {strides = array<i32>} : memref<8x8x96xf32, #tpu.memory_space<vmem>>, vector<8x8x96xf32>,
    %c0_9 = arith.constant 0 : index
    %c0_10 = arith.constant 0 : index
    %9 = vector.load %arg3[%c0_9, %c0_10] : memref<32x48xf32, #tpu.memory_space<vmem>>, vector<16x48xf32>
    %c16 = arith.constant 16 : index
    %c0_11 = arith.constant 0 : index
    %10 = vector.load %arg3[%c16, %c0_11] : memref<32x48xf32, #tpu.memory_space<vmem>>, vector<16x48xf32>
    %c0_12 = arith.constant 0 : index
    %c0_13 = arith.constant 0 : index
    %11 = vector.load %arg5[%c0_12, %c0_13] : memref<1x32xf32, #tpu.memory_space<vmem>>, vector<1x16xf32>
    %12 = vector.shape_cast %11 : vector<1x16xf32> to vector<1x16xf32>
    %13 = vector.broadcast %12 : vector<1x16xf32> to vector<8x16xf32>
    %c0_14 = arith.constant 0 : index
    %c16_15 = arith.constant 16 : index
    %14 = vector.load %arg5[%c0_14, %c16_15] : memref<1x32xf32, #tpu.memory_space<vmem>>, vector<1x16xf32>
    %15 = vector.shape_cast %14 : vector<1x16xf32> to vector<1x16xf32>
    %16 = vector.broadcast %15 : vector<1x16xf32> to vector<8x16xf32>
    %cst_16 = arith.constant 0.000000e+00 : f32
    %17 = vector.broadcast %cst_16 : f32 to vector<8x16xf32>
    %c0_i32 = arith.constant 0 : i32
    %c7_i32 = arith.constant 7 : i32
    %18 = arith.subi %c7_i32, %c0_i32 : i32
    %19 = arith.index_cast %c0_i32 : i32 to index
    %c0_17 = arith.constant 0 : index
    %c0_18 = arith.constant 0 : index
    %20 = vector.load %arg7[%19, %c0_17, %c0_18] : memref<8x8x96xf32, #tpu.memory_space<vmem>>, vector<1x8x48xf32>
    %21 = vector.shape_cast %20 : vector<1x8x48xf32> to vector<8x48xf32>
    %22 = arith.index_cast %18 : i32 to index
    %c0_19 = arith.constant 0 : index
    %c48 = arith.constant 48 : index
    %23 = vector.load %arg7[%22, %c0_19, %c48] : memref<8x8x96xf32, #tpu.memory_space<vmem>>, vector<1x8x48xf32>
    %24 = vector.shape_cast %23 : vector<1x8x48xf32> to vector<8x48xf32>
    %cst_20 = arith.constant dense<0.000000e+00> : vector<8x48xf32>
    %25 = tpu.matmul %17, %9, %cst_20 {dimension_numbers = #tpu.dot_dimension_numbers<[1], [0], [0], [1], [0, 0, 1, 1], [], []>} : vector<8x16xf32>, vector<16x48xf32>, vector<8x48xf32> -> vector<8x48xf32>
    %cst_21 = arith.constant dense<0.000000e+00> : vector<8x48xf32>
    %26 = tpu.matmul %17, %10, %cst_21 {dimension_numbers = #tpu.dot_dimension_numbers<[1], [0], [0], [1], [0, 0, 1, 1], [], []>} : vector<8x16xf32>, vector<16x48xf32>, vector<8x48xf32> -> vector<8x48xf32>
    %27 = vector.extract_strided_slice %21 {offsets = [0, 0], sizes = [8, 32], strides = [1, 1]} : vector<8x48xf32> to vector<8x32xf32>
    %28 = vector.extract_strided_slice %25 {offsets = [0, 0], sizes = [8, 32], strides = [1, 1]} : vector<8x48xf32> to vector<8x32xf32>
    %29 = arith.addf %27, %28 : vector<8x32xf32>
    %30 = arith.negf %29 : vector<8x32xf32>
    %31 = math.exp %30 : vector<8x32xf32>
    %cst_22 = arith.constant 1.000000e+00 : f32
    %32 = vector.broadcast %cst_22 : f32 to vector<8x32xf32>
    %33 = arith.addf %32, %31 : vector<8x32xf32>
    %34 = arith.divf %32, %33 : vector<8x32xf32>
    %35 = vector.extract_strided_slice %24 {offsets = [0, 0], sizes = [8, 32], strides = [1, 1]} : vector<8x48xf32> to vector<8x32xf32>
    %36 = vector.extract_strided_slice %26 {offsets = [0, 0], sizes = [8, 32], strides = [1, 1]} : vector<8x48xf32> to vector<8x32xf32>
    %37 = arith.addf %35, %36 : vector<8x32xf32>
    %38 = arith.negf %37 : vector<8x32xf32>
    %39 = math.exp %38 : vector<8x32xf32>
    %cst_23 = arith.constant 1.000000e+00 : f32
    %40 = vector.broadcast %cst_23 : f32 to vector<8x32xf32>
    %41 = arith.addf %40, %39 : vector<8x32xf32>
    %42 = arith.divf %40, %41 : vector<8x32xf32>
    %43 = vector.extract_strided_slice %21 {offsets = [0, 32], sizes = [8, 16], strides = [1, 1]} : vector<8x48xf32> to vector<8x16xf32>
    %44 = vector.extract_strided_slice %34 {offsets = [0, 0], sizes = [8, 16], strides = [1, 1]} : vector<8x32xf32> to vector<8x16xf32>
    %45 = vector.extract_strided_slice %25 {offsets = [0, 32], sizes = [8, 16], strides = [1, 1]} : vector<8x48xf32> to vector<8x16xf32>
    %46 = arith.addf %45, %13 : vector<8x16xf32>
    %47 = arith.mulf %44, %46 : vector<8x16xf32>
    %48 = arith.addf %43, %47 : vector<8x16xf32>
    %49 = math.tanh %48 : vector<8x16xf32>
    %50 = vector.extract_strided_slice %24 {offsets = [0, 32], sizes = [8, 16], strides = [1, 1]} : vector<8x48xf32> to vector<8x16xf32>
    %51 = vector.extract_strided_slice %42 {offsets = [0, 0], sizes = [8, 16], strides = [1, 1]} : vector<8x32xf32> to vector<8x16xf32>
    %52 = vector.extract_strided_slice %26 {offsets = [0, 32], sizes = [8, 16], strides = [1, 1]} : vector<8x48xf32> to vector<8x16xf32>
    %53 = arith.addf %52, %16 : vector<8x16xf32>
    %54 = arith.mulf %51, %53 : vector<8x16xf32>
    %55 = arith.addf %50, %54 : vector<8x16xf32>
    %56 = math.tanh %55 : vector<8x16xf32>
    %57 = vector.extract_strided_slice %34 {offsets = [0, 16], sizes = [8, 16], strides = [1, 1]} : vector<8x32xf32> to vector<8x16xf32>
    %58 = vector.extract_strided_slice %42 {offsets = [0, 16], sizes = [8, 16], strides = [1, 1]} : vector<8x32xf32> to vector<8x16xf32>
    %cst_24 = arith.constant 1.000000e+00 : f32
    %59 = vector.broadcast %cst_24 : f32 to vector<8x16xf32>
    %60 = arith.subf %59, %57 : vector<8x16xf32>
    %61 = arith.mulf %60, %49 : vector<8x16xf32>
    %62 = arith.mulf %57, %17 : vector<8x16xf32>
    %63 = arith.addf %61, %62 : vector<8x16xf32>
    %cst_25 = arith.constant 1.000000e+00 : f32
    %64 = vector.broadcast %cst_25 : f32 to vector<8x16xf32>
    %65 = arith.subf %64, %58 : vector<8x16xf32>
    %66 = arith.mulf %65, %56 : vector<8x16xf32>
    %67 = arith.mulf %58, %17 : vector<8x16xf32>
    %68 = arith.addf %66, %67 : vector<8x16xf32>
    %69 = arith.index_cast %c0_i32 : i32 to index
    %c0_26 = arith.constant 0 : index
    %c0_27 = arith.constant 0 : index
    %70 = vector.load %arg6[%69, %c0_26, %c0_27] : memref<8x8x32xf32, #tpu.memory_space<vmem>>, vector<1x8x16xf32>
    %71 = vector.shape_cast %70 : vector<1x8x16xf32> to vector<8x16xf32>
    %72 = vector.shape_cast %63 : vector<8x16xf32> to vector<1x8x16xf32>
    tpu.vector_store %arg6[%69, %c0_26, %c0_27], %72 {strides = array<i32>} : memref<8x8x32xf32, #tpu.memory_space<vmem>>, vector<1x8x16xf32>,
    %73 = arith.index_cast %18 : i32 to index
    %c0_28 = arith.constant 0 : index
    %c16_29 = arith.constant 16 : index
    %74 = vector.load %arg6[%73, %c0_28, %c16_29] : memref<8x8x32xf32, #tpu.memory_space<vmem>>, vector<1x8x16xf32>
    %75 = vector.shape_cast %74 : vector<1x8x16xf32> to vector<8x16xf32>
    %76 = vector.shape_cast %68 : vector<8x16xf32> to vector<1x8x16xf32>
    tpu.vector_store %arg6[%73, %c0_28, %c16_29], %76 {strides = array<i32>} : memref<8x8x32xf32, #tpu.memory_space<vmem>>, vector<1x8x16xf32>,
    %c1_i32 = arith.constant 1 : i32
    %c7_i32_30 = arith.constant 7 : i32
    %77 = arith.subi %c7_i32_30, %c1_i32 : i32
    %78 = arith.index_cast %c1_i32 : i32 to index
    %c0_31 = arith.constant 0 : index
    %c0_32 = arith.constant 0 : index
    %79 = vector.load %arg7[%78, %c0_31, %c0_32] : memref<8x8x96xf32, #tpu.memory_space<vmem>>, vector<1x8x48xf32>
    %80 = vector.shape_cast %79 : vector<1x8x48xf32> to vector<8x48xf32>
    %81 = arith.index_cast %77 : i32 to index
    %c0_33 = arith.constant 0 : index
    %c48_34 = arith.constant 48 : index
    %82 = vector.load %arg7[%81, %c0_33, %c48_34] : memref<8x8x96xf32, #tpu.memory_space<vmem>>, vector<1x8x48xf32>
    %83 = vector.shape_cast %82 : vector<1x8x48xf32> to vector<8x48xf32>
    %cst_35 = arith.constant dense<0.000000e+00> : vector<8x48xf32>
    %84 = tpu.matmul %63, %9, %cst_35 {dimension_numbers = #tpu.dot_dimension_numbers<[1], [0], [0], [1], [0, 0, 1, 1], [], []>} : vector<8x16xf32>, vector<16x48xf32>, vector<8x48xf32> -> vector<8x48xf32>
    %cst_36 = arith.constant dense<0.000000e+00> : vector<8x48xf32>
    %85 = tpu.matmul %68, %10, %cst_36 {dimension_numbers = #tpu.dot_dimension_numbers<[1], [0], [0], [1], [0, 0, 1, 1], [], []>} : vector<8x16xf32>, vector<16x48xf32>, vector<8x48xf32> -> vector<8x48xf32>
    %86 = vector.extract_strided_slice %80 {offsets = [0, 0], sizes = [8, 32], strides = [1, 1]} : vector<8x48xf32> to vector<8x32xf32>
    %87 = vector.extract_strided_slice %84 {offsets = [0, 0], sizes = [8, 32], strides = [1, 1]} : vector<8x48xf32> to vector<8x32xf32>
    %88 = arith.addf %86, %87 : vector<8x32xf32>
    %89 = arith.negf %88 : vector<8x32xf32>
    %90 = math.exp %89 : vector<8x32xf32>
    %cst_37 = arith.constant 1.000000e+00 : f32
    %91 = vector.broadcast %cst_37 : f32 to vector<8x32xf32>
    %92 = arith.addf %91, %90 : vector<8x32xf32>
    %93 = arith.divf %91, %92 : vector<8x32xf32>
    %94 = vector.extract_strided_slice %83 {offsets = [0, 0], sizes = [8, 32], strides = [1, 1]} : vector<8x48xf32> to vector<8x32xf32>
    %95 = vector.extract_strided_slice %85 {offsets = [0, 0], sizes = [8, 32], strides = [1, 1]} : vector<8x48xf32> to vector<8x32xf32>
    %96 = arith.addf %94, %95 : vector<8x32xf32>
    %97 = arith.negf %96 : vector<8x32xf32>
    %98 = math.exp %97 : vector<8x32xf32>
    %cst_38 = arith.constant 1.000000e+00 : f32
    %99 = vector.broadcast %cst_38 : f32 to vector<8x32xf32>
    %100 = arith.addf %99, %98 : vector<8x32xf32>
    %101 = arith.divf %99, %100 : vector<8x32xf32>
    %102 = vector.extract_strided_slice %80 {offsets = [0, 32], sizes = [8, 16], strides = [1, 1]} : vector<8x48xf32> to vector<8x16xf32>
    %103 = vector.extract_strided_slice %93 {offsets = [0, 0], sizes = [8, 16], strides = [1, 1]} : vector<8x32xf32> to vector<8x16xf32>
    %104 = vector.extract_strided_slice %84 {offsets = [0, 32], sizes = [8, 16], strides = [1, 1]} : vector<8x48xf32> to vector<8x16xf32>
    %105 = arith.addf %104, %13 : vector<8x16xf32>
    %106 = arith.mulf %103, %105 : vector<8x16xf32>
    %107 = arith.addf %102, %106 : vector<8x16xf32>
    %108 = math.tanh %107 : vector<8x16xf32>
    %109 = vector.extract_strided_slice %83 {offsets = [0, 32], sizes = [8, 16], strides = [1, 1]} : vector<8x48xf32> to vector<8x16xf32>
    %110 = vector.extract_strided_slice %101 {offsets = [0, 0], sizes = [8, 16], strides = [1, 1]} : vector<8x32xf32> to vector<8x16xf32>
    %111 = vector.extract_strided_slice %85 {offsets = [0, 32], sizes = [8, 16], strides = [1, 1]} : vector<8x48xf32> to vector<8x16xf32>
    %112 = arith.addf %111, %16 : vector<8x16xf32>
    %113 = arith.mulf %110, %112 : vector<8x16xf32>
    %114 = arith.addf %109, %113 : vector<8x16xf32>
    %115 = math.tanh %114 : vector<8x16xf32>
    %116 = vector.extract_strided_slice %93 {offsets = [0, 16], sizes = [8, 16], strides = [1, 1]} : vector<8x32xf32> to vector<8x16xf32>
    %117 = vector.extract_strided_slice %101 {offsets = [0, 16], sizes = [8, 16], strides = [1, 1]} : vector<8x32xf32> to vector<8x16xf32>
    %cst_39 = arith.constant 1.000000e+00 : f32
    %118 = vector.broadcast %cst_39 : f32 to vector<8x16xf32>
    %119 = arith.subf %118, %116 : vector<8x16xf32>
    %120 = arith.mulf %119, %108 : vector<8x16xf32>
    %121 = arith.mulf %116, %63 : vector<8x16xf32>
    %122 = arith.addf %120, %121 : vector<8x16xf32>
    %cst_40 = arith.constant 1.000000e+00 : f32
    %123 = vector.broadcast %cst_40 : f32 to vector<8x16xf32>
    %124 = arith.subf %123, %117 : vector<8x16xf32>
    %125 = arith.mulf %124, %115 : vector<8x16xf32>
    %126 = arith.mulf %117, %68 : vector<8x16xf32>
    %127 = arith.addf %125, %126 : vector<8x16xf32>
    %128 = arith.index_cast %c1_i32 : i32 to index
    %c0_41 = arith.constant 0 : index
    %c0_42 = arith.constant 0 : index
    %129 = vector.load %arg6[%128, %c0_41, %c0_42] : memref<8x8x32xf32, #tpu.memory_space<vmem>>, vector<1x8x16xf32>
    %130 = vector.shape_cast %129 : vector<1x8x16xf32> to vector<8x16xf32>
    %131 = vector.shape_cast %122 : vector<8x16xf32> to vector<1x8x16xf32>
    tpu.vector_store %arg6[%128, %c0_41, %c0_42], %131 {strides = array<i32>} : memref<8x8x32xf32, #tpu.memory_space<vmem>>, vector<1x8x16xf32>,
    %132 = arith.index_cast %77 : i32 to index
    %c0_43 = arith.constant 0 : index
    %c16_44 = arith.constant 16 : index
    %133 = vector.load %arg6[%132, %c0_43, %c16_44] : memref<8x8x32xf32, #tpu.memory_space<vmem>>, vector<1x8x16xf32>
    %134 = vector.shape_cast %133 : vector<1x8x16xf32> to vector<8x16xf32>
    %135 = vector.shape_cast %127 : vector<8x16xf32> to vector<1x8x16xf32>
    tpu.vector_store %arg6[%132, %c0_43, %c16_44], %135 {strides = array<i32>} : memref<8x8x32xf32, #tpu.memory_space<vmem>>, vector<1x8x16xf32>,
    %c2_i32 = arith.constant 2 : i32
    %c7_i32_45 = arith.constant 7 : i32
    %136 = arith.subi %c7_i32_45, %c2_i32 : i32
    %137 = arith.index_cast %c2_i32 : i32 to index
    %c0_46 = arith.constant 0 : index
    %c0_47 = arith.constant 0 : index
    %138 = vector.load %arg7[%137, %c0_46, %c0_47] : memref<8x8x96xf32, #tpu.memory_space<vmem>>, vector<1x8x48xf32>
    %139 = vector.shape_cast %138 : vector<1x8x48xf32> to vector<8x48xf32>
    %140 = arith.index_cast %136 : i32 to index
    %c0_48 = arith.constant 0 : index
    %c48_49 = arith.constant 48 : index
    %141 = vector.load %arg7[%140, %c0_48, %c48_49] : memref<8x8x96xf32, #tpu.memory_space<vmem>>, vector<1x8x48xf32>
    %142 = vector.shape_cast %141 : vector<1x8x48xf32> to vector<8x48xf32>
    %cst_50 = arith.constant dense<0.000000e+00> : vector<8x48xf32>
    %143 = tpu.matmul %122, %9, %cst_50 {dimension_numbers = #tpu.dot_dimension_numbers<[1], [0], [0], [1], [0, 0, 1, 1], [], []>} : vector<8x16xf32>, vector<16x48xf32>, vector<8x48xf32> -> vector<8x48xf32>
    %cst_51 = arith.constant dense<0.000000e+00> : vector<8x48xf32>
    %144 = tpu.matmul %127, %10, %cst_51 {dimension_numbers = #tpu.dot_dimension_numbers<[1], [0], [0], [1], [0, 0, 1, 1], [], []>} : vector<8x16xf32>, vector<16x48xf32>, vector<8x48xf32> -> vector<8x48xf32>
    %145 = vector.extract_strided_slice %139 {offsets = [0, 0], sizes = [8, 32], strides = [1, 1]} : vector<8x48xf32> to vector<8x32xf32>
    %146 = vector.extract_strided_slice %143 {offsets = [0, 0], sizes = [8, 32], strides = [1, 1]} : vector<8x48xf32> to vector<8x32xf32>
    %147 = arith.addf %145, %146 : vector<8x32xf32>
    %148 = arith.negf %147 : vector<8x32xf32>
    %149 = math.exp %148 : vector<8x32xf32>
    %cst_52 = arith.constant 1.000000e+00 : f32
    %150 = vector.broadcast %cst_52 : f32 to vector<8x32xf32>
    %151 = arith.addf %150, %149 : vector<8x32xf32>
    %152 = arith.divf %150, %151 : vector<8x32xf32>
    %153 = vector.extract_strided_slice %142 {offsets = [0, 0], sizes = [8, 32], strides = [1, 1]} : vector<8x48xf32> to vector<8x32xf32>
    %154 = vector.extract_strided_slice %144 {offsets = [0, 0], sizes = [8, 32], strides = [1, 1]} : vector<8x48xf32> to vector<8x32xf32>
    %155 = arith.addf %153, %154 : vector<8x32xf32>
    %156 = arith.negf %155 : vector<8x32xf32>
    %157 = math.exp %156 : vector<8x32xf32>
    %cst_53 = arith.constant 1.000000e+00 : f32
    %158 = vector.broadcast %cst_53 : f32 to vector<8x32xf32>
    %159 = arith.addf %158, %157 : vector<8x32xf32>
    %160 = arith.divf %158, %159 : vector<8x32xf32>
    %161 = vector.extract_strided_slice %139 {offsets = [0, 32], sizes = [8, 16], strides = [1, 1]} : vector<8x48xf32> to vector<8x16xf32>
    %162 = vector.extract_strided_slice %152 {offsets = [0, 0], sizes = [8, 16], strides = [1, 1]} : vector<8x32xf32> to vector<8x16xf32>
    %163 = vector.extract_strided_slice %143 {offsets = [0, 32], sizes = [8, 16], strides = [1, 1]} : vector<8x48xf32> to vector<8x16xf32>
    %164 = arith.addf %163, %13 : vector<8x16xf32>
    %165 = arith.mulf %162, %164 : vector<8x16xf32>
    %166 = arith.addf %161, %165 : vector<8x16xf32>
    %167 = math.tanh %166 : vector<8x16xf32>
    %168 = vector.extract_strided_slice %142 {offsets = [0, 32], sizes = [8, 16], strides = [1, 1]} : vector<8x48xf32> to vector<8x16xf32>
    %169 = vector.extract_strided_slice %160 {offsets = [0, 0], sizes = [8, 16], strides = [1, 1]} : vector<8x32xf32> to vector<8x16xf32>
    %170 = vector.extract_strided_slice %144 {offsets = [0, 32], sizes = [8, 16], strides = [1, 1]} : vector<8x48xf32> to vector<8x16xf32>
    %171 = arith.addf %170, %16 : vector<8x16xf32>
    %172 = arith.mulf %169, %171 : vector<8x16xf32>
    %173 = arith.addf %168, %172 : vector<8x16xf32>
    %174 = math.tanh %173 : vector<8x16xf32>
    %175 = vector.extract_strided_slice %152 {offsets = [0, 16], sizes = [8, 16], strides = [1, 1]} : vector<8x32xf32> to vector<8x16xf32>
    %176 = vector.extract_strided_slice %160 {offsets = [0, 16], sizes = [8, 16], strides = [1, 1]} : vector<8x32xf32> to vector<8x16xf32>
    %cst_54 = arith.constant 1.000000e+00 : f32
    %177 = vector.broadcast %cst_54 : f32 to vector<8x16xf32>
    %178 = arith.subf %177, %175 : vector<8x16xf32>
    %179 = arith.mulf %178, %167 : vector<8x16xf32>
    %180 = arith.mulf %175, %122 : vector<8x16xf32>
    %181 = arith.addf %179, %180 : vector<8x16xf32>
    %cst_55 = arith.constant 1.000000e+00 : f32
    %182 = vector.broadcast %cst_55 : f32 to vector<8x16xf32>
    %183 = arith.subf %182, %176 : vector<8x16xf32>
    %184 = arith.mulf %183, %174 : vector<8x16xf32>
    %185 = arith.mulf %176, %127 : vector<8x16xf32>
    %186 = arith.addf %184, %185 : vector<8x16xf32>
    %187 = arith.index_cast %c2_i32 : i32 to index
    %c0_56 = arith.constant 0 : index
    %c0_57 = arith.constant 0 : index
    %188 = vector.load %arg6[%187, %c0_56, %c0_57] : memref<8x8x32xf32, #tpu.memory_space<vmem>>, vector<1x8x16xf32>
    %189 = vector.shape_cast %188 : vector<1x8x16xf32> to vector<8x16xf32>
    %190 = vector.shape_cast %181 : vector<8x16xf32> to vector<1x8x16xf32>
    tpu.vector_store %arg6[%187, %c0_56, %c0_57], %190 {strides = array<i32>} : memref<8x8x32xf32, #tpu.memory_space<vmem>>, vector<1x8x16xf32>,
    %191 = arith.index_cast %136 : i32 to index
    %c0_58 = arith.constant 0 : index
    %c16_59 = arith.constant 16 : index
    %192 = vector.load %arg6[%191, %c0_58, %c16_59] : memref<8x8x32xf32, #tpu.memory_space<vmem>>, vector<1x8x16xf32>
    %193 = vector.shape_cast %192 : vector<1x8x16xf32> to vector<8x16xf32>
    %194 = vector.shape_cast %186 : vector<8x16xf32> to vector<1x8x16xf32>
    tpu.vector_store %arg6[%191, %c0_58, %c16_59], %194 {strides = array<i32>} : memref<8x8x32xf32, #tpu.memory_space<vmem>>, vector<1x8x16xf32>,
    %c3_i32 = arith.constant 3 : i32
    %c7_i32_60 = arith.constant 7 : i32
    %195 = arith.subi %c7_i32_60, %c3_i32 : i32
    %196 = arith.index_cast %c3_i32 : i32 to index
    %c0_61 = arith.constant 0 : index
    %c0_62 = arith.constant 0 : index
    %197 = vector.load %arg7[%196, %c0_61, %c0_62] : memref<8x8x96xf32, #tpu.memory_space<vmem>>, vector<1x8x48xf32>
    %198 = vector.shape_cast %197 : vector<1x8x48xf32> to vector<8x48xf32>
    %199 = arith.index_cast %195 : i32 to index
    %c0_63 = arith.constant 0 : index
    %c48_64 = arith.constant 48 : index
    %200 = vector.load %arg7[%199, %c0_63, %c48_64] : memref<8x8x96xf32, #tpu.memory_space<vmem>>, vector<1x8x48xf32>
    %201 = vector.shape_cast %200 : vector<1x8x48xf32> to vector<8x48xf32>
    %cst_65 = arith.constant dense<0.000000e+00> : vector<8x48xf32>
    %202 = tpu.matmul %181, %9, %cst_65 {dimension_numbers = #tpu.dot_dimension_numbers<[1], [0], [0], [1], [0, 0, 1, 1], [], []>} : vector<8x16xf32>, vector<16x48xf32>, vector<8x48xf32> -> vector<8x48xf32>
    %cst_66 = arith.constant dense<0.000000e+00> : vector<8x48xf32>
    %203 = tpu.matmul %186, %10, %cst_66 {dimension_numbers = #tpu.dot_dimension_numbers<[1], [0], [0], [1], [0, 0, 1, 1], [], []>} : vector<8x16xf32>, vector<16x48xf32>, vector<8x48xf32> -> vector<8x48xf32>
    %204 = vector.extract_strided_slice %198 {offsets = [0, 0], sizes = [8, 32], strides = [1, 1]} : vector<8x48xf32> to vector<8x32xf32>
    %205 = vector.extract_strided_slice %202 {offsets = [0, 0], sizes = [8, 32], strides = [1, 1]} : vector<8x48xf32> to vector<8x32xf32>
    %206 = arith.addf %204, %205 : vector<8x32xf32>
    %207 = arith.negf %206 : vector<8x32xf32>
    %208 = math.exp %207 : vector<8x32xf32>
    %cst_67 = arith.constant 1.000000e+00 : f32
    %209 = vector.broadcast %cst_67 : f32 to vector<8x32xf32>
    %210 = arith.addf %209, %208 : vector<8x32xf32>
    %211 = arith.divf %209, %210 : vector<8x32xf32>
    %212 = vector.extract_strided_slice %201 {offsets = [0, 0], sizes = [8, 32], strides = [1, 1]} : vector<8x48xf32> to vector<8x32xf32>
    %213 = vector.extract_strided_slice %203 {offsets = [0, 0], sizes = [8, 32], strides = [1, 1]} : vector<8x48xf32> to vector<8x32xf32>
    %214 = arith.addf %212, %213 : vector<8x32xf32>
    %215 = arith.negf %214 : vector<8x32xf32>
    %216 = math.exp %215 : vector<8x32xf32>
    %cst_68 = arith.constant 1.000000e+00 : f32
    %217 = vector.broadcast %cst_68 : f32 to vector<8x32xf32>
    %218 = arith.addf %217, %216 : vector<8x32xf32>
    %219 = arith.divf %217, %218 : vector<8x32xf32>
    %220 = vector.extract_strided_slice %198 {offsets = [0, 32], sizes = [8, 16], strides = [1, 1]} : vector<8x48xf32> to vector<8x16xf32>
    %221 = vector.extract_strided_slice %211 {offsets = [0, 0], sizes = [8, 16], strides = [1, 1]} : vector<8x32xf32> to vector<8x16xf32>
    %222 = vector.extract_strided_slice %202 {offsets = [0, 32], sizes = [8, 16], strides = [1, 1]} : vector<8x48xf32> to vector<8x16xf32>
    %223 = arith.addf %222, %13 : vector<8x16xf32>
    %224 = arith.mulf %221, %223 : vector<8x16xf32>
    %225 = arith.addf %220, %224 : vector<8x16xf32>
    %226 = math.tanh %225 : vector<8x16xf32>
    %227 = vector.extract_strided_slice %201 {offsets = [0, 32], sizes = [8, 16], strides = [1, 1]} : vector<8x48xf32> to vector<8x16xf32>
    %228 = vector.extract_strided_slice %219 {offsets = [0, 0], sizes = [8, 16], strides = [1, 1]} : vector<8x32xf32> to vector<8x16xf32>
    %229 = vector.extract_strided_slice %203 {offsets = [0, 32], sizes = [8, 16], strides = [1, 1]} : vector<8x48xf32> to vector<8x16xf32>
    %230 = arith.addf %229, %16 : vector<8x16xf32>
    %231 = arith.mulf %228, %230 : vector<8x16xf32>
    %232 = arith.addf %227, %231 : vector<8x16xf32>
    %233 = math.tanh %232 : vector<8x16xf32>
    %234 = vector.extract_strided_slice %211 {offsets = [0, 16], sizes = [8, 16], strides = [1, 1]} : vector<8x32xf32> to vector<8x16xf32>
    %235 = vector.extract_strided_slice %219 {offsets = [0, 16], sizes = [8, 16], strides = [1, 1]} : vector<8x32xf32> to vector<8x16xf32>
    %cst_69 = arith.constant 1.000000e+00 : f32
    %236 = vector.broadcast %cst_69 : f32 to vector<8x16xf32>
    %237 = arith.subf %236, %234 : vector<8x16xf32>
    %238 = arith.mulf %237, %226 : vector<8x16xf32>
    %239 = arith.mulf %234, %181 : vector<8x16xf32>
    %240 = arith.addf %238, %239 : vector<8x16xf32>
    %cst_70 = arith.constant 1.000000e+00 : f32
    %241 = vector.broadcast %cst_70 : f32 to vector<8x16xf32>
    %242 = arith.subf %241, %235 : vector<8x16xf32>
    %243 = arith.mulf %242, %233 : vector<8x16xf32>
    %244 = arith.mulf %235, %186 : vector<8x16xf32>
    %245 = arith.addf %243, %244 : vector<8x16xf32>
    %246 = arith.index_cast %c3_i32 : i32 to index
    %c0_71 = arith.constant 0 : index
    %c0_72 = arith.constant 0 : index
    %247 = vector.load %arg6[%246, %c0_71, %c0_72] : memref<8x8x32xf32, #tpu.memory_space<vmem>>, vector<1x8x16xf32>
    %248 = vector.shape_cast %247 : vector<1x8x16xf32> to vector<8x16xf32>
    %249 = vector.shape_cast %240 : vector<8x16xf32> to vector<1x8x16xf32>
    tpu.vector_store %arg6[%246, %c0_71, %c0_72], %249 {strides = array<i32>} : memref<8x8x32xf32, #tpu.memory_space<vmem>>, vector<1x8x16xf32>,
    %250 = arith.index_cast %195 : i32 to index
    %c0_73 = arith.constant 0 : index
    %c16_74 = arith.constant 16 : index
    %251 = vector.load %arg6[%250, %c0_73, %c16_74] : memref<8x8x32xf32, #tpu.memory_space<vmem>>, vector<1x8x16xf32>
    %252 = vector.shape_cast %251 : vector<1x8x16xf32> to vector<8x16xf32>
    %253 = vector.shape_cast %245 : vector<8x16xf32> to vector<1x8x16xf32>
    tpu.vector_store %arg6[%250, %c0_73, %c16_74], %253 {strides = array<i32>} : memref<8x8x32xf32, #tpu.memory_space<vmem>>, vector<1x8x16xf32>,
    %c4_i32 = arith.constant 4 : i32
    %c7_i32_75 = arith.constant 7 : i32
    %254 = arith.subi %c7_i32_75, %c4_i32 : i32
    %255 = arith.index_cast %c4_i32 : i32 to index
    %c0_76 = arith.constant 0 : index
    %c0_77 = arith.constant 0 : index
    %256 = vector.load %arg7[%255, %c0_76, %c0_77] : memref<8x8x96xf32, #tpu.memory_space<vmem>>, vector<1x8x48xf32>
    %257 = vector.shape_cast %256 : vector<1x8x48xf32> to vector<8x48xf32>
    %258 = arith.index_cast %254 : i32 to index
    %c0_78 = arith.constant 0 : index
    %c48_79 = arith.constant 48 : index
    %259 = vector.load %arg7[%258, %c0_78, %c48_79] : memref<8x8x96xf32, #tpu.memory_space<vmem>>, vector<1x8x48xf32>
    %260 = vector.shape_cast %259 : vector<1x8x48xf32> to vector<8x48xf32>
    %cst_80 = arith.constant dense<0.000000e+00> : vector<8x48xf32>
    %261 = tpu.matmul %240, %9, %cst_80 {dimension_numbers = #tpu.dot_dimension_numbers<[1], [0], [0], [1], [0, 0, 1, 1], [], []>} : vector<8x16xf32>, vector<16x48xf32>, vector<8x48xf32> -> vector<8x48xf32>
    %cst_81 = arith.constant dense<0.000000e+00> : vector<8x48xf32>
    %262 = tpu.matmul %245, %10, %cst_81 {dimension_numbers = #tpu.dot_dimension_numbers<[1], [0], [0], [1], [0, 0, 1, 1], [], []>} : vector<8x16xf32>, vector<16x48xf32>, vector<8x48xf32> -> vector<8x48xf32>
    %263 = vector.extract_strided_slice %257 {offsets = [0, 0], sizes = [8, 32], strides = [1, 1]} : vector<8x48xf32> to vector<8x32xf32>
    %264 = vector.extract_strided_slice %261 {offsets = [0, 0], sizes = [8, 32], strides = [1, 1]} : vector<8x48xf32> to vector<8x32xf32>
    %265 = arith.addf %263, %264 : vector<8x32xf32>
    %266 = arith.negf %265 : vector<8x32xf32>
    %267 = math.exp %266 : vector<8x32xf32>
    %cst_82 = arith.constant 1.000000e+00 : f32
    %268 = vector.broadcast %cst_82 : f32 to vector<8x32xf32>
    %269 = arith.addf %268, %267 : vector<8x32xf32>
    %270 = arith.divf %268, %269 : vector<8x32xf32>
    %271 = vector.extract_strided_slice %260 {offsets = [0, 0], sizes = [8, 32], strides = [1, 1]} : vector<8x48xf32> to vector<8x32xf32>
    %272 = vector.extract_strided_slice %262 {offsets = [0, 0], sizes = [8, 32], strides = [1, 1]} : vector<8x48xf32> to vector<8x32xf32>
    %273 = arith.addf %271, %272 : vector<8x32xf32>
    %274 = arith.negf %273 : vector<8x32xf32>
    %275 = math.exp %274 : vector<8x32xf32>
    %cst_83 = arith.constant 1.000000e+00 : f32
    %276 = vector.broadcast %cst_83 : f32 to vector<8x32xf32>
    %277 = arith.addf %276, %275 : vector<8x32xf32>
    %278 = arith.divf %276, %277 : vector<8x32xf32>
    %279 = vector.extract_strided_slice %257 {offsets = [0, 32], sizes = [8, 16], strides = [1, 1]} : vector<8x48xf32> to vector<8x16xf32>
    %280 = vector.extract_strided_slice %270 {offsets = [0, 0], sizes = [8, 16], strides = [1, 1]} : vector<8x32xf32> to vector<8x16xf32>
    %281 = vector.extract_strided_slice %261 {offsets = [0, 32], sizes = [8, 16], strides = [1, 1]} : vector<8x48xf32> to vector<8x16xf32>
    %282 = arith.addf %281, %13 : vector<8x16xf32>
    %283 = arith.mulf %280, %282 : vector<8x16xf32>
    %284 = arith.addf %279, %283 : vector<8x16xf32>
    %285 = math.tanh %284 : vector<8x16xf32>
    %286 = vector.extract_strided_slice %260 {offsets = [0, 32], sizes = [8, 16], strides = [1, 1]} : vector<8x48xf32> to vector<8x16xf32>
    %287 = vector.extract_strided_slice %278 {offsets = [0, 0], sizes = [8, 16], strides = [1, 1]} : vector<8x32xf32> to vector<8x16xf32>
    %288 = vector.extract_strided_slice %262 {offsets = [0, 32], sizes = [8, 16], strides = [1, 1]} : vector<8x48xf32> to vector<8x16xf32>
    %289 = arith.addf %288, %16 : vector<8x16xf32>
    %290 = arith.mulf %287, %289 : vector<8x16xf32>
    %291 = arith.addf %286, %290 : vector<8x16xf32>
    %292 = math.tanh %291 : vector<8x16xf32>
    %293 = vector.extract_strided_slice %270 {offsets = [0, 16], sizes = [8, 16], strides = [1, 1]} : vector<8x32xf32> to vector<8x16xf32>
    %294 = vector.extract_strided_slice %278 {offsets = [0, 16], sizes = [8, 16], strides = [1, 1]} : vector<8x32xf32> to vector<8x16xf32>
    %cst_84 = arith.constant 1.000000e+00 : f32
    %295 = vector.broadcast %cst_84 : f32 to vector<8x16xf32>
    %296 = arith.subf %295, %293 : vector<8x16xf32>
    %297 = arith.mulf %296, %285 : vector<8x16xf32>
    %298 = arith.mulf %293, %240 : vector<8x16xf32>
    %299 = arith.addf %297, %298 : vector<8x16xf32>
    %cst_85 = arith.constant 1.000000e+00 : f32
    %300 = vector.broadcast %cst_85 : f32 to vector<8x16xf32>
    %301 = arith.subf %300, %294 : vector<8x16xf32>
    %302 = arith.mulf %301, %292 : vector<8x16xf32>
    %303 = arith.mulf %294, %245 : vector<8x16xf32>
    %304 = arith.addf %302, %303 : vector<8x16xf32>
    %305 = arith.index_cast %c4_i32 : i32 to index
    %c0_86 = arith.constant 0 : index
    %c0_87 = arith.constant 0 : index
    %306 = vector.load %arg6[%305, %c0_86, %c0_87] : memref<8x8x32xf32, #tpu.memory_space<vmem>>, vector<1x8x16xf32>
    %307 = vector.shape_cast %306 : vector<1x8x16xf32> to vector<8x16xf32>
    %308 = vector.shape_cast %299 : vector<8x16xf32> to vector<1x8x16xf32>
    tpu.vector_store %arg6[%305, %c0_86, %c0_87], %308 {strides = array<i32>} : memref<8x8x32xf32, #tpu.memory_space<vmem>>, vector<1x8x16xf32>,
    %309 = arith.index_cast %254 : i32 to index
    %c0_88 = arith.constant 0 : index
    %c16_89 = arith.constant 16 : index
    %310 = vector.load %arg6[%309, %c0_88, %c16_89] : memref<8x8x32xf32, #tpu.memory_space<vmem>>, vector<1x8x16xf32>
    %311 = vector.shape_cast %310 : vector<1x8x16xf32> to vector<8x16xf32>
    %312 = vector.shape_cast %304 : vector<8x16xf32> to vector<1x8x16xf32>
    tpu.vector_store %arg6[%309, %c0_88, %c16_89], %312 {strides = array<i32>} : memref<8x8x32xf32, #tpu.memory_space<vmem>>, vector<1x8x16xf32>,
    %c5_i32 = arith.constant 5 : i32
    %c7_i32_90 = arith.constant 7 : i32
    %313 = arith.subi %c7_i32_90, %c5_i32 : i32
    %314 = arith.index_cast %c5_i32 : i32 to index
    %c0_91 = arith.constant 0 : index
    %c0_92 = arith.constant 0 : index
    %315 = vector.load %arg7[%314, %c0_91, %c0_92] : memref<8x8x96xf32, #tpu.memory_space<vmem>>, vector<1x8x48xf32>
    %316 = vector.shape_cast %315 : vector<1x8x48xf32> to vector<8x48xf32>
    %317 = arith.index_cast %313 : i32 to index
    %c0_93 = arith.constant 0 : index
    %c48_94 = arith.constant 48 : index
    %318 = vector.load %arg7[%317, %c0_93, %c48_94] : memref<8x8x96xf32, #tpu.memory_space<vmem>>, vector<1x8x48xf32>
    %319 = vector.shape_cast %318 : vector<1x8x48xf32> to vector<8x48xf32>
    %cst_95 = arith.constant dense<0.000000e+00> : vector<8x48xf32>
    %320 = tpu.matmul %299, %9, %cst_95 {dimension_numbers = #tpu.dot_dimension_numbers<[1], [0], [0], [1], [0, 0, 1, 1], [], []>} : vector<8x16xf32>, vector<16x48xf32>, vector<8x48xf32> -> vector<8x48xf32>
    %cst_96 = arith.constant dense<0.000000e+00> : vector<8x48xf32>
    %321 = tpu.matmul %304, %10, %cst_96 {dimension_numbers = #tpu.dot_dimension_numbers<[1], [0], [0], [1], [0, 0, 1, 1], [], []>} : vector<8x16xf32>, vector<16x48xf32>, vector<8x48xf32> -> vector<8x48xf32>
    %322 = vector.extract_strided_slice %316 {offsets = [0, 0], sizes = [8, 32], strides = [1, 1]} : vector<8x48xf32> to vector<8x32xf32>
    %323 = vector.extract_strided_slice %320 {offsets = [0, 0], sizes = [8, 32], strides = [1, 1]} : vector<8x48xf32> to vector<8x32xf32>
    %324 = arith.addf %322, %323 : vector<8x32xf32>
    %325 = arith.negf %324 : vector<8x32xf32>
    %326 = math.exp %325 : vector<8x32xf32>
    %cst_97 = arith.constant 1.000000e+00 : f32
    %327 = vector.broadcast %cst_97 : f32 to vector<8x32xf32>
    %328 = arith.addf %327, %326 : vector<8x32xf32>
    %329 = arith.divf %327, %328 : vector<8x32xf32>
    %330 = vector.extract_strided_slice %319 {offsets = [0, 0], sizes = [8, 32], strides = [1, 1]} : vector<8x48xf32> to vector<8x32xf32>
    %331 = vector.extract_strided_slice %321 {offsets = [0, 0], sizes = [8, 32], strides = [1, 1]} : vector<8x48xf32> to vector<8x32xf32>
    %332 = arith.addf %330, %331 : vector<8x32xf32>
    %333 = arith.negf %332 : vector<8x32xf32>
    %334 = math.exp %333 : vector<8x32xf32>
    %cst_98 = arith.constant 1.000000e+00 : f32
    %335 = vector.broadcast %cst_98 : f32 to vector<8x32xf32>
    %336 = arith.addf %335, %334 : vector<8x32xf32>
    %337 = arith.divf %335, %336 : vector<8x32xf32>
    %338 = vector.extract_strided_slice %316 {offsets = [0, 32], sizes = [8, 16], strides = [1, 1]} : vector<8x48xf32> to vector<8x16xf32>
    %339 = vector.extract_strided_slice %329 {offsets = [0, 0], sizes = [8, 16], strides = [1, 1]} : vector<8x32xf32> to vector<8x16xf32>
    %340 = vector.extract_strided_slice %320 {offsets = [0, 32], sizes = [8, 16], strides = [1, 1]} : vector<8x48xf32> to vector<8x16xf32>
    %341 = arith.addf %340, %13 : vector<8x16xf32>
    %342 = arith.mulf %339, %341 : vector<8x16xf32>
    %343 = arith.addf %338, %342 : vector<8x16xf32>
    %344 = math.tanh %343 : vector<8x16xf32>
    %345 = vector.extract_strided_slice %319 {offsets = [0, 32], sizes = [8, 16], strides = [1, 1]} : vector<8x48xf32> to vector<8x16xf32>
    %346 = vector.extract_strided_slice %337 {offsets = [0, 0], sizes = [8, 16], strides = [1, 1]} : vector<8x32xf32> to vector<8x16xf32>
    %347 = vector.extract_strided_slice %321 {offsets = [0, 32], sizes = [8, 16], strides = [1, 1]} : vector<8x48xf32> to vector<8x16xf32>
    %348 = arith.addf %347, %16 : vector<8x16xf32>
    %349 = arith.mulf %346, %348 : vector<8x16xf32>
    %350 = arith.addf %345, %349 : vector<8x16xf32>
    %351 = math.tanh %350 : vector<8x16xf32>
    %352 = vector.extract_strided_slice %329 {offsets = [0, 16], sizes = [8, 16], strides = [1, 1]} : vector<8x32xf32> to vector<8x16xf32>
    %353 = vector.extract_strided_slice %337 {offsets = [0, 16], sizes = [8, 16], strides = [1, 1]} : vector<8x32xf32> to vector<8x16xf32>
    %cst_99 = arith.constant 1.000000e+00 : f32
    %354 = vector.broadcast %cst_99 : f32 to vector<8x16xf32>
    %355 = arith.subf %354, %352 : vector<8x16xf32>
    %356 = arith.mulf %355, %344 : vector<8x16xf32>
    %357 = arith.mulf %352, %299 : vector<8x16xf32>
    %358 = arith.addf %356, %357 : vector<8x16xf32>
    %cst_100 = arith.constant 1.000000e+00 : f32
    %359 = vector.broadcast %cst_100 : f32 to vector<8x16xf32>
    %360 = arith.subf %359, %353 : vector<8x16xf32>
    %361 = arith.mulf %360, %351 : vector<8x16xf32>
    %362 = arith.mulf %353, %304 : vector<8x16xf32>
    %363 = arith.addf %361, %362 : vector<8x16xf32>
    %364 = arith.index_cast %c5_i32 : i32 to index
    %c0_101 = arith.constant 0 : index
    %c0_102 = arith.constant 0 : index
    %365 = vector.load %arg6[%364, %c0_101, %c0_102] : memref<8x8x32xf32, #tpu.memory_space<vmem>>, vector<1x8x16xf32>
    %366 = vector.shape_cast %365 : vector<1x8x16xf32> to vector<8x16xf32>
    %367 = vector.shape_cast %358 : vector<8x16xf32> to vector<1x8x16xf32>
    tpu.vector_store %arg6[%364, %c0_101, %c0_102], %367 {strides = array<i32>} : memref<8x8x32xf32, #tpu.memory_space<vmem>>, vector<1x8x16xf32>,
    %368 = arith.index_cast %313 : i32 to index
    %c0_103 = arith.constant 0 : index
    %c16_104 = arith.constant 16 : index
    %369 = vector.load %arg6[%368, %c0_103, %c16_104] : memref<8x8x32xf32, #tpu.memory_space<vmem>>, vector<1x8x16xf32>
    %370 = vector.shape_cast %369 : vector<1x8x16xf32> to vector<8x16xf32>
    %371 = vector.shape_cast %363 : vector<8x16xf32> to vector<1x8x16xf32>
    tpu.vector_store %arg6[%368, %c0_103, %c16_104], %371 {strides = array<i32>} : memref<8x8x32xf32, #tpu.memory_space<vmem>>, vector<1x8x16xf32>,
    %c6_i32 = arith.constant 6 : i32
    %c7_i32_105 = arith.constant 7 : i32
    %372 = arith.subi %c7_i32_105, %c6_i32 : i32
    %373 = arith.index_cast %c6_i32 : i32 to index
    %c0_106 = arith.constant 0 : index
    %c0_107 = arith.constant 0 : index
    %374 = vector.load %arg7[%373, %c0_106, %c0_107] : memref<8x8x96xf32, #tpu.memory_space<vmem>>, vector<1x8x48xf32>
    %375 = vector.shape_cast %374 : vector<1x8x48xf32> to vector<8x48xf32>
    %376 = arith.index_cast %372 : i32 to index
    %c0_108 = arith.constant 0 : index
    %c48_109 = arith.constant 48 : index
    %377 = vector.load %arg7[%376, %c0_108, %c48_109] : memref<8x8x96xf32, #tpu.memory_space<vmem>>, vector<1x8x48xf32>
    %378 = vector.shape_cast %377 : vector<1x8x48xf32> to vector<8x48xf32>
    %cst_110 = arith.constant dense<0.000000e+00> : vector<8x48xf32>
    %379 = tpu.matmul %358, %9, %cst_110 {dimension_numbers = #tpu.dot_dimension_numbers<[1], [0], [0], [1], [0, 0, 1, 1], [], []>} : vector<8x16xf32>, vector<16x48xf32>, vector<8x48xf32> -> vector<8x48xf32>
    %cst_111 = arith.constant dense<0.000000e+00> : vector<8x48xf32>
    %380 = tpu.matmul %363, %10, %cst_111 {dimension_numbers = #tpu.dot_dimension_numbers<[1], [0], [0], [1], [0, 0, 1, 1], [], []>} : vector<8x16xf32>, vector<16x48xf32>, vector<8x48xf32> -> vector<8x48xf32>
    %381 = vector.extract_strided_slice %375 {offsets = [0, 0], sizes = [8, 32], strides = [1, 1]} : vector<8x48xf32> to vector<8x32xf32>
    %382 = vector.extract_strided_slice %379 {offsets = [0, 0], sizes = [8, 32], strides = [1, 1]} : vector<8x48xf32> to vector<8x32xf32>
    %383 = arith.addf %381, %382 : vector<8x32xf32>
    %384 = arith.negf %383 : vector<8x32xf32>
    %385 = math.exp %384 : vector<8x32xf32>
    %cst_112 = arith.constant 1.000000e+00 : f32
    %386 = vector.broadcast %cst_112 : f32 to vector<8x32xf32>
    %387 = arith.addf %386, %385 : vector<8x32xf32>
    %388 = arith.divf %386, %387 : vector<8x32xf32>
    %389 = vector.extract_strided_slice %378 {offsets = [0, 0], sizes = [8, 32], strides = [1, 1]} : vector<8x48xf32> to vector<8x32xf32>
    %390 = vector.extract_strided_slice %380 {offsets = [0, 0], sizes = [8, 32], strides = [1, 1]} : vector<8x48xf32> to vector<8x32xf32>
    %391 = arith.addf %389, %390 : vector<8x32xf32>
    %392 = arith.negf %391 : vector<8x32xf32>
    %393 = math.exp %392 : vector<8x32xf32>
    %cst_113 = arith.constant 1.000000e+00 : f32
    %394 = vector.broadcast %cst_113 : f32 to vector<8x32xf32>
    %395 = arith.addf %394, %393 : vector<8x32xf32>
    %396 = arith.divf %394, %395 : vector<8x32xf32>
    %397 = vector.extract_strided_slice %375 {offsets = [0, 32], sizes = [8, 16], strides = [1, 1]} : vector<8x48xf32> to vector<8x16xf32>
    %398 = vector.extract_strided_slice %388 {offsets = [0, 0], sizes = [8, 16], strides = [1, 1]} : vector<8x32xf32> to vector<8x16xf32>
    %399 = vector.extract_strided_slice %379 {offsets = [0, 32], sizes = [8, 16], strides = [1, 1]} : vector<8x48xf32> to vector<8x16xf32>
    %400 = arith.addf %399, %13 : vector<8x16xf32>
    %401 = arith.mulf %398, %400 : vector<8x16xf32>
    %402 = arith.addf %397, %401 : vector<8x16xf32>
    %403 = math.tanh %402 : vector<8x16xf32>
    %404 = vector.extract_strided_slice %378 {offsets = [0, 32], sizes = [8, 16], strides = [1, 1]} : vector<8x48xf32> to vector<8x16xf32>
    %405 = vector.extract_strided_slice %396 {offsets = [0, 0], sizes = [8, 16], strides = [1, 1]} : vector<8x32xf32> to vector<8x16xf32>
    %406 = vector.extract_strided_slice %380 {offsets = [0, 32], sizes = [8, 16], strides = [1, 1]} : vector<8x48xf32> to vector<8x16xf32>
    %407 = arith.addf %406, %16 : vector<8x16xf32>
    %408 = arith.mulf %405, %407 : vector<8x16xf32>
    %409 = arith.addf %404, %408 : vector<8x16xf32>
    %410 = math.tanh %409 : vector<8x16xf32>
    %411 = vector.extract_strided_slice %388 {offsets = [0, 16], sizes = [8, 16], strides = [1, 1]} : vector<8x32xf32> to vector<8x16xf32>
    %412 = vector.extract_strided_slice %396 {offsets = [0, 16], sizes = [8, 16], strides = [1, 1]} : vector<8x32xf32> to vector<8x16xf32>
    %cst_114 = arith.constant 1.000000e+00 : f32
    %413 = vector.broadcast %cst_114 : f32 to vector<8x16xf32>
    %414 = arith.subf %413, %411 : vector<8x16xf32>
    %415 = arith.mulf %414, %403 : vector<8x16xf32>
    %416 = arith.mulf %411, %358 : vector<8x16xf32>
    %417 = arith.addf %415, %416 : vector<8x16xf32>
    %cst_115 = arith.constant 1.000000e+00 : f32
    %418 = vector.broadcast %cst_115 : f32 to vector<8x16xf32>
    %419 = arith.subf %418, %412 : vector<8x16xf32>
    %420 = arith.mulf %419, %410 : vector<8x16xf32>
    %421 = arith.mulf %412, %363 : vector<8x16xf32>
    %422 = arith.addf %420, %421 : vector<8x16xf32>
    %423 = arith.index_cast %c6_i32 : i32 to index
    %c0_116 = arith.constant 0 : index
    %c0_117 = arith.constant 0 : index
    %424 = vector.load %arg6[%423, %c0_116, %c0_117] : memref<8x8x32xf32, #tpu.memory_space<vmem>>, vector<1x8x16xf32>
    %425 = vector.shape_cast %424 : vector<1x8x16xf32> to vector<8x16xf32>
    %426 = vector.shape_cast %417 : vector<8x16xf32> to vector<1x8x16xf32>
    tpu.vector_store %arg6[%423, %c0_116, %c0_117], %426 {strides = array<i32>} : memref<8x8x32xf32, #tpu.memory_space<vmem>>, vector<1x8x16xf32>,
    %427 = arith.index_cast %372 : i32 to index
    %c0_118 = arith.constant 0 : index
    %c16_119 = arith.constant 16 : index
    %428 = vector.load %arg6[%427, %c0_118, %c16_119] : memref<8x8x32xf32, #tpu.memory_space<vmem>>, vector<1x8x16xf32>
    %429 = vector.shape_cast %428 : vector<1x8x16xf32> to vector<8x16xf32>
    %430 = vector.shape_cast %422 : vector<8x16xf32> to vector<1x8x16xf32>
    tpu.vector_store %arg6[%427, %c0_118, %c16_119], %430 {strides = array<i32>} : memref<8x8x32xf32, #tpu.memory_space<vmem>>, vector<1x8x16xf32>,
    %c7_i32_120 = arith.constant 7 : i32
    %c7_i32_121 = arith.constant 7 : i32
    %431 = arith.subi %c7_i32_121, %c7_i32_120 : i32
    %432 = arith.index_cast %c7_i32_120 : i32 to index
    %c0_122 = arith.constant 0 : index
    %c0_123 = arith.constant 0 : index
    %433 = vector.load %arg7[%432, %c0_122, %c0_123] : memref<8x8x96xf32, #tpu.memory_space<vmem>>, vector<1x8x48xf32>
    %434 = vector.shape_cast %433 : vector<1x8x48xf32> to vector<8x48xf32>
    %435 = arith.index_cast %431 : i32 to index
    %c0_124 = arith.constant 0 : index
    %c48_125 = arith.constant 48 : index
    %436 = vector.load %arg7[%435, %c0_124, %c48_125] : memref<8x8x96xf32, #tpu.memory_space<vmem>>, vector<1x8x48xf32>
    %437 = vector.shape_cast %436 : vector<1x8x48xf32> to vector<8x48xf32>
    %cst_126 = arith.constant dense<0.000000e+00> : vector<8x48xf32>
    %438 = tpu.matmul %417, %9, %cst_126 {dimension_numbers = #tpu.dot_dimension_numbers<[1], [0], [0], [1], [0, 0, 1, 1], [], []>} : vector<8x16xf32>, vector<16x48xf32>, vector<8x48xf32> -> vector<8x48xf32>
    %cst_127 = arith.constant dense<0.000000e+00> : vector<8x48xf32>
    %439 = tpu.matmul %422, %10, %cst_127 {dimension_numbers = #tpu.dot_dimension_numbers<[1], [0], [0], [1], [0, 0, 1, 1], [], []>} : vector<8x16xf32>, vector<16x48xf32>, vector<8x48xf32> -> vector<8x48xf32>
    %440 = vector.extract_strided_slice %434 {offsets = [0, 0], sizes = [8, 32], strides = [1, 1]} : vector<8x48xf32> to vector<8x32xf32>
    %441 = vector.extract_strided_slice %438 {offsets = [0, 0], sizes = [8, 32], strides = [1, 1]} : vector<8x48xf32> to vector<8x32xf32>
    %442 = arith.addf %440, %441 : vector<8x32xf32>
    %443 = arith.negf %442 : vector<8x32xf32>
    %444 = math.exp %443 : vector<8x32xf32>
    %cst_128 = arith.constant 1.000000e+00 : f32
    %445 = vector.broadcast %cst_128 : f32 to vector<8x32xf32>
    %446 = arith.addf %445, %444 : vector<8x32xf32>
    %447 = arith.divf %445, %446 : vector<8x32xf32>
    %448 = vector.extract_strided_slice %437 {offsets = [0, 0], sizes = [8, 32], strides = [1, 1]} : vector<8x48xf32> to vector<8x32xf32>
    %449 = vector.extract_strided_slice %439 {offsets = [0, 0], sizes = [8, 32], strides = [1, 1]} : vector<8x48xf32> to vector<8x32xf32>
    %450 = arith.addf %448, %449 : vector<8x32xf32>
    %451 = arith.negf %450 : vector<8x32xf32>
    %452 = math.exp %451 : vector<8x32xf32>
    %cst_129 = arith.constant 1.000000e+00 : f32
    %453 = vector.broadcast %cst_129 : f32 to vector<8x32xf32>
    %454 = arith.addf %453, %452 : vector<8x32xf32>
    %455 = arith.divf %453, %454 : vector<8x32xf32>
    %456 = vector.extract_strided_slice %434 {offsets = [0, 32], sizes = [8, 16], strides = [1, 1]} : vector<8x48xf32> to vector<8x16xf32>
    %457 = vector.extract_strided_slice %447 {offsets = [0, 0], sizes = [8, 16], strides = [1, 1]} : vector<8x32xf32> to vector<8x16xf32>
    %458 = vector.extract_strided_slice %438 {offsets = [0, 32], sizes = [8, 16], strides = [1, 1]} : vector<8x48xf32> to vector<8x16xf32>
    %459 = arith.addf %458, %13 : vector<8x16xf32>
    %460 = arith.mulf %457, %459 : vector<8x16xf32>
    %461 = arith.addf %456, %460 : vector<8x16xf32>
    %462 = math.tanh %461 : vector<8x16xf32>
    %463 = vector.extract_strided_slice %437 {offsets = [0, 32], sizes = [8, 16], strides = [1, 1]} : vector<8x48xf32> to vector<8x16xf32>
    %464 = vector.extract_strided_slice %455 {offsets = [0, 0], sizes = [8, 16], strides = [1, 1]} : vector<8x32xf32> to vector<8x16xf32>
    %465 = vector.extract_strided_slice %439 {offsets = [0, 32], sizes = [8, 16], strides = [1, 1]} : vector<8x48xf32> to vector<8x16xf32>
    %466 = arith.addf %465, %16 : vector<8x16xf32>
    %467 = arith.mulf %464, %466 : vector<8x16xf32>
    %468 = arith.addf %463, %467 : vector<8x16xf32>
    %469 = math.tanh %468 : vector<8x16xf32>
    %470 = vector.extract_strided_slice %447 {offsets = [0, 16], sizes = [8, 16], strides = [1, 1]} : vector<8x32xf32> to vector<8x16xf32>
    %471 = vector.extract_strided_slice %455 {offsets = [0, 16], sizes = [8, 16], strides = [1, 1]} : vector<8x32xf32> to vector<8x16xf32>
    %cst_130 = arith.constant 1.000000e+00 : f32
    %472 = vector.broadcast %cst_130 : f32 to vector<8x16xf32>
    %473 = arith.subf %472, %470 : vector<8x16xf32>
    %474 = arith.mulf %473, %462 : vector<8x16xf32>
    %475 = arith.mulf %470, %417 : vector<8x16xf32>
    %476 = arith.addf %474, %475 : vector<8x16xf32>
    %cst_131 = arith.constant 1.000000e+00 : f32
    %477 = vector.broadcast %cst_131 : f32 to vector<8x16xf32>
    %478 = arith.subf %477, %471 : vector<8x16xf32>
    %479 = arith.mulf %478, %469 : vector<8x16xf32>
    %480 = arith.mulf %471, %422 : vector<8x16xf32>
    %481 = arith.addf %479, %480 : vector<8x16xf32>
    %482 = arith.index_cast %c7_i32_120 : i32 to index
    %c0_132 = arith.constant 0 : index
    %c0_133 = arith.constant 0 : index
    %483 = vector.load %arg6[%482, %c0_132, %c0_133] : memref<8x8x32xf32, #tpu.memory_space<vmem>>, vector<1x8x16xf32>
    %484 = vector.shape_cast %483 : vector<1x8x16xf32> to vector<8x16xf32>
    %485 = vector.shape_cast %476 : vector<8x16xf32> to vector<1x8x16xf32>
    tpu.vector_store %arg6[%482, %c0_132, %c0_133], %485 {strides = array<i32>} : memref<8x8x32xf32, #tpu.memory_space<vmem>>, vector<1x8x16xf32>,
    %486 = arith.index_cast %431 : i32 to index
    %c0_134 = arith.constant 0 : index
    %c16_135 = arith.constant 16 : index
    %487 = vector.load %arg6[%486, %c0_134, %c16_135] : memref<8x8x32xf32, #tpu.memory_space<vmem>>, vector<1x8x16xf32>
    %488 = vector.shape_cast %487 : vector<1x8x16xf32> to vector<8x16xf32>
    %489 = vector.shape_cast %481 : vector<8x16xf32> to vector<1x8x16xf32>
    tpu.vector_store %arg6[%486, %c0_134, %c16_135], %489 {strides = array<i32>} : memref<8x8x32xf32, #tpu.memory_space<vmem>>, vector<1x8x16xf32>,
    %c8_i32 = arith.constant 8 : i32
    return
  }
  func.func @transform_0(%arg0: i32) -> (i32, i32, i32) {
    %c0_i32 = arith.constant 0 : i32
    %c0_i32_0 = arith.constant 0 : i32
    %c0_i32_1 = arith.constant 0 : i32
    return %c0_i32, %arg0, %c0_i32_0 : i32, i32, i32
  }
  func.func @transform_1(%arg0: i32) -> (i32, i32) {
    %c0_i32 = arith.constant 0 : i32
    %c0_i32_0 = arith.constant 0 : i32
    %c0_i32_1 = arith.constant 0 : i32
    return %c0_i32, %c0_i32_0 : i32, i32
  }
  func.func @transform_2(%arg0: i32) -> (i32, i32) {
    %c0_i32 = arith.constant 0 : i32
    %c0_i32_0 = arith.constant 0 : i32
    %c0_i32_1 = arith.constant 0 : i32
    return %c0_i32, %c0_i32_0 : i32, i32
  }
  func.func @transform_3(%arg0: i32) -> (i32, i32) {
    %c0_i32 = arith.constant 0 : i32
    %c0_i32_0 = arith.constant 0 : i32
    %c0_i32_1 = arith.constant 0 : i32
    return %c0_i32, %c0_i32_0 : i32, i32
  }
  func.func @transform_4(%arg0: i32) -> (i32, i32) {
    %c0_i32 = arith.constant 0 : i32
    %c0_i32_0 = arith.constant 0 : i32
    %c0_i32_1 = arith.constant 0 : i32
    return %c0_i32, %c0_i32_0 : i32, i32
  }
  func.func @transform_5(%arg0: i32) -> (i32, i32, i32) {
    %c0_i32 = arith.constant 0 : i32
    %c0_i32_0 = arith.constant 0 : i32
    %c0_i32_1 = arith.constant 0 : i32
    return %c0_i32, %arg0, %c0_i32_0 : i32, i32, i32
  }
}

module attributes {stable_mosaic.version = 11 : i64} {
  func.func @_bigru_layer_kernel(%arg0: i32, %arg1: memref<3x8x32xf32, #tpu.memory_space<vmem>>, %arg2: memref<32x96xf32, #tpu.memory_space<vmem>>, %arg3: memref<32x48xf32, #tpu.memory_space<vmem>>, %arg4: memref<1x96xf32, #tpu.memory_space<vmem>>, %arg5: memref<1x32xf32, #tpu.memory_space<vmem>>, %arg6: memref<3x8x32xf32, #tpu.memory_space<vmem>>, %arg7: memref<3x8x96xf32, #tpu.memory_space<vmem>>) attributes {dimension_semantics = [#tpu.dimension_semantics<parallel>], iteration_bounds = array<i64: 1>, scalar_prefetch = 0 : i64, scratch_operands = 1 : i64, tpu.core_type = #tpu.core_type<tc>, window_params = [{transform_indices = @transform_0, window_bounds = array<i64: 3, 8, 32>}, {pipeline_mode = #tpu.pipeline_mode<synchronous>, transform_indices = @transform_1, window_bounds = array<i64: 32, 96>}, {pipeline_mode = #tpu.pipeline_mode<synchronous>, transform_indices = @transform_2, window_bounds = array<i64: 32, 48>}, {pipeline_mode = #tpu.pipeline_mode<synchronous>, transform_indices = @transform_3, window_bounds = array<i64: 1, 96>}, {pipeline_mode = #tpu.pipeline_mode<synchronous>, transform_indices = @transform_4, window_bounds = array<i64: 1, 32>}, {transform_indices = @transform_5, window_bounds = array<i64: 3, 8, 32>}]} {
    %c0 = arith.constant 0 : index
    %c0_0 = arith.constant 0 : index
    %c0_1 = arith.constant 0 : index
    %0 = vector.load %arg1[%c0, %c0_0, %c0_1] : memref<3x8x32xf32, #tpu.memory_space<vmem>>, vector<3x8x32xf32>
    %1 = vector.shape_cast %0 : vector<3x8x32xf32> to vector<24x32xf32>
    %c0_2 = arith.constant 0 : index
    %c0_3 = arith.constant 0 : index
    %2 = vector.load %arg2[%c0_2, %c0_3] : memref<32x96xf32, #tpu.memory_space<vmem>>, vector<32x96xf32>
    %cst = arith.constant dense<0.000000e+00> : vector<24x96xf32>
    %3 = tpu.matmul %1, %2, %cst {dimension_numbers = #tpu.dot_dimension_numbers<[1], [0], [0], [1], [0, 0, 1, 1], [], []>} : vector<24x32xf32>, vector<32x96xf32>, vector<24x96xf32> -> vector<24x96xf32>
    %c0_4 = arith.constant 0 : index
    %c0_5 = arith.constant 0 : index
    %4 = vector.load %arg4[%c0_4, %c0_5] : memref<1x96xf32, #tpu.memory_space<vmem>>, vector<1x96xf32>
    %5 = vector.broadcast %4 : vector<1x96xf32> to vector<24x96xf32>
    %6 = arith.addf %3, %5 : vector<24x96xf32>
    %7 = vector.shape_cast %6 : vector<24x96xf32> to vector<3x8x96xf32>
    %c0_6 = arith.constant 0 : index
    %c0_7 = arith.constant 0 : index
    %c0_8 = arith.constant 0 : index
    %8 = vector.load %arg7[%c0_6, %c0_7, %c0_8] : memref<3x8x96xf32, #tpu.memory_space<vmem>>, vector<3x8x96xf32>
    tpu.vector_store %arg7[%c0_6, %c0_7, %c0_8], %7 {strides = array<i32>} : memref<3x8x96xf32, #tpu.memory_space<vmem>>, vector<3x8x96xf32>,
    %c0_9 = arith.constant 0 : index
    %c0_10 = arith.constant 0 : index
    %9 = vector.load %arg3[%c0_9, %c0_10] : memref<32x48xf32, #tpu.memory_space<vmem>>, vector<16x48xf32>
    %c16 = arith.constant 16 : index
    %c0_11 = arith.constant 0 : index
    %10 = vector.load %arg3[%c16, %c0_11] : memref<32x48xf32, #tpu.memory_space<vmem>>, vector<16x48xf32>
    %c0_12 = arith.constant 0 : index
    %c0_13 = arith.constant 0 : index
    %11 = vector.load %arg5[%c0_12, %c0_13] : memref<1x32xf32, #tpu.memory_space<vmem>>, vector<1x16xf32>
    %12 = vector.shape_cast %11 : vector<1x16xf32> to vector<1x16xf32>
    %13 = vector.broadcast %12 : vector<1x16xf32> to vector<8x16xf32>
    %c0_14 = arith.constant 0 : index
    %c16_15 = arith.constant 16 : index
    %14 = vector.load %arg5[%c0_14, %c16_15] : memref<1x32xf32, #tpu.memory_space<vmem>>, vector<1x16xf32>
    %15 = vector.shape_cast %14 : vector<1x16xf32> to vector<1x16xf32>
    %16 = vector.broadcast %15 : vector<1x16xf32> to vector<8x16xf32>
    %cst_16 = arith.constant 0.000000e+00 : f32
    %17 = vector.broadcast %cst_16 : f32 to vector<8x16xf32>
    %c0_i32 = arith.constant 0 : i32
    %c2_i32 = arith.constant 2 : i32
    %18 = arith.subi %c2_i32, %c0_i32 : i32
    %19 = arith.index_cast %c0_i32 : i32 to index
    %c0_17 = arith.constant 0 : index
    %c0_18 = arith.constant 0 : index
    %20 = vector.load %arg7[%19, %c0_17, %c0_18] : memref<3x8x96xf32, #tpu.memory_space<vmem>>, vector<1x8x48xf32>
    %21 = vector.shape_cast %20 : vector<1x8x48xf32> to vector<8x48xf32>
    %22 = arith.index_cast %18 : i32 to index
    %c0_19 = arith.constant 0 : index
    %c48 = arith.constant 48 : index
    %23 = vector.load %arg7[%22, %c0_19, %c48] : memref<3x8x96xf32, #tpu.memory_space<vmem>>, vector<1x8x48xf32>
    %24 = vector.shape_cast %23 : vector<1x8x48xf32> to vector<8x48xf32>
    %cst_20 = arith.constant dense<0.000000e+00> : vector<8x48xf32>
    %25 = tpu.matmul %17, %9, %cst_20 {dimension_numbers = #tpu.dot_dimension_numbers<[1], [0], [0], [1], [0, 0, 1, 1], [], []>} : vector<8x16xf32>, vector<16x48xf32>, vector<8x48xf32> -> vector<8x48xf32>
    %cst_21 = arith.constant dense<0.000000e+00> : vector<8x48xf32>
    %26 = tpu.matmul %17, %10, %cst_21 {dimension_numbers = #tpu.dot_dimension_numbers<[1], [0], [0], [1], [0, 0, 1, 1], [], []>} : vector<8x16xf32>, vector<16x48xf32>, vector<8x48xf32> -> vector<8x48xf32>
    %27 = vector.extract_strided_slice %21 {offsets = [0, 0], sizes = [8, 32], strides = [1, 1]} : vector<8x48xf32> to vector<8x32xf32>
    %28 = vector.extract_strided_slice %25 {offsets = [0, 0], sizes = [8, 32], strides = [1, 1]} : vector<8x48xf32> to vector<8x32xf32>
    %29 = arith.addf %27, %28 : vector<8x32xf32>
    %30 = arith.negf %29 : vector<8x32xf32>
    %31 = math.exp %30 : vector<8x32xf32>
    %cst_22 = arith.constant 1.000000e+00 : f32
    %32 = vector.broadcast %cst_22 : f32 to vector<8x32xf32>
    %33 = arith.addf %32, %31 : vector<8x32xf32>
    %34 = arith.divf %32, %33 : vector<8x32xf32>
    %35 = vector.extract_strided_slice %24 {offsets = [0, 0], sizes = [8, 32], strides = [1, 1]} : vector<8x48xf32> to vector<8x32xf32>
    %36 = vector.extract_strided_slice %26 {offsets = [0, 0], sizes = [8, 32], strides = [1, 1]} : vector<8x48xf32> to vector<8x32xf32>
    %37 = arith.addf %35, %36 : vector<8x32xf32>
    %38 = arith.negf %37 : vector<8x32xf32>
    %39 = math.exp %38 : vector<8x32xf32>
    %cst_23 = arith.constant 1.000000e+00 : f32
    %40 = vector.broadcast %cst_23 : f32 to vector<8x32xf32>
    %41 = arith.addf %40, %39 : vector<8x32xf32>
    %42 = arith.divf %40, %41 : vector<8x32xf32>
    %43 = vector.extract_strided_slice %21 {offsets = [0, 32], sizes = [8, 16], strides = [1, 1]} : vector<8x48xf32> to vector<8x16xf32>
    %44 = vector.extract_strided_slice %34 {offsets = [0, 0], sizes = [8, 16], strides = [1, 1]} : vector<8x32xf32> to vector<8x16xf32>
    %45 = vector.extract_strided_slice %25 {offsets = [0, 32], sizes = [8, 16], strides = [1, 1]} : vector<8x48xf32> to vector<8x16xf32>
    %46 = arith.addf %45, %13 : vector<8x16xf32>
    %47 = arith.mulf %44, %46 : vector<8x16xf32>
    %48 = arith.addf %43, %47 : vector<8x16xf32>
    %49 = math.tanh %48 : vector<8x16xf32>
    %50 = vector.extract_strided_slice %24 {offsets = [0, 32], sizes = [8, 16], strides = [1, 1]} : vector<8x48xf32> to vector<8x16xf32>
    %51 = vector.extract_strided_slice %42 {offsets = [0, 0], sizes = [8, 16], strides = [1, 1]} : vector<8x32xf32> to vector<8x16xf32>
    %52 = vector.extract_strided_slice %26 {offsets = [0, 32], sizes = [8, 16], strides = [1, 1]} : vector<8x48xf32> to vector<8x16xf32>
    %53 = arith.addf %52, %16 : vector<8x16xf32>
    %54 = arith.mulf %51, %53 : vector<8x16xf32>
    %55 = arith.addf %50, %54 : vector<8x16xf32>
    %56 = math.tanh %55 : vector<8x16xf32>
    %57 = vector.extract_strided_slice %34 {offsets = [0, 16], sizes = [8, 16], strides = [1, 1]} : vector<8x32xf32> to vector<8x16xf32>
    %58 = vector.extract_strided_slice %42 {offsets = [0, 16], sizes = [8, 16], strides = [1, 1]} : vector<8x32xf32> to vector<8x16xf32>
    %cst_24 = arith.constant 1.000000e+00 : f32
    %59 = vector.broadcast %cst_24 : f32 to vector<8x16xf32>
    %60 = arith.subf %59, %57 : vector<8x16xf32>
    %61 = arith.mulf %60, %49 : vector<8x16xf32>
    %62 = arith.mulf %57, %17 : vector<8x16xf32>
    %63 = arith.addf %61, %62 : vector<8x16xf32>
    %cst_25 = arith.constant 1.000000e+00 : f32
    %64 = vector.broadcast %cst_25 : f32 to vector<8x16xf32>
    %65 = arith.subf %64, %58 : vector<8x16xf32>
    %66 = arith.mulf %65, %56 : vector<8x16xf32>
    %67 = arith.mulf %58, %17 : vector<8x16xf32>
    %68 = arith.addf %66, %67 : vector<8x16xf32>
    %69 = arith.index_cast %c0_i32 : i32 to index
    %c0_26 = arith.constant 0 : index
    %c0_27 = arith.constant 0 : index
    %70 = vector.load %arg6[%69, %c0_26, %c0_27] : memref<3x8x32xf32, #tpu.memory_space<vmem>>, vector<1x8x16xf32>
    %71 = vector.shape_cast %70 : vector<1x8x16xf32> to vector<8x16xf32>
    %72 = vector.shape_cast %63 : vector<8x16xf32> to vector<1x8x16xf32>
    tpu.vector_store %arg6[%69, %c0_26, %c0_27], %72 {strides = array<i32>} : memref<3x8x32xf32, #tpu.memory_space<vmem>>, vector<1x8x16xf32>,
    %73 = arith.index_cast %18 : i32 to index
    %c0_28 = arith.constant 0 : index
    %c16_29 = arith.constant 16 : index
    %74 = vector.load %arg6[%73, %c0_28, %c16_29] : memref<3x8x32xf32, #tpu.memory_space<vmem>>, vector<1x8x16xf32>
    %75 = vector.shape_cast %74 : vector<1x8x16xf32> to vector<8x16xf32>
    %76 = vector.shape_cast %68 : vector<8x16xf32> to vector<1x8x16xf32>
    tpu.vector_store %arg6[%73, %c0_28, %c16_29], %76 {strides = array<i32>} : memref<3x8x32xf32, #tpu.memory_space<vmem>>, vector<1x8x16xf32>,
    %c1_i32 = arith.constant 1 : i32
    %c2_i32_30 = arith.constant 2 : i32
    %77 = arith.subi %c2_i32_30, %c1_i32 : i32
    %78 = arith.index_cast %c1_i32 : i32 to index
    %c0_31 = arith.constant 0 : index
    %c0_32 = arith.constant 0 : index
    %79 = vector.load %arg7[%78, %c0_31, %c0_32] : memref<3x8x96xf32, #tpu.memory_space<vmem>>, vector<1x8x48xf32>
    %80 = vector.shape_cast %79 : vector<1x8x48xf32> to vector<8x48xf32>
    %81 = arith.index_cast %77 : i32 to index
    %c0_33 = arith.constant 0 : index
    %c48_34 = arith.constant 48 : index
    %82 = vector.load %arg7[%81, %c0_33, %c48_34] : memref<3x8x96xf32, #tpu.memory_space<vmem>>, vector<1x8x48xf32>
    %83 = vector.shape_cast %82 : vector<1x8x48xf32> to vector<8x48xf32>
    %cst_35 = arith.constant dense<0.000000e+00> : vector<8x48xf32>
    %84 = tpu.matmul %63, %9, %cst_35 {dimension_numbers = #tpu.dot_dimension_numbers<[1], [0], [0], [1], [0, 0, 1, 1], [], []>} : vector<8x16xf32>, vector<16x48xf32>, vector<8x48xf32> -> vector<8x48xf32>
    %cst_36 = arith.constant dense<0.000000e+00> : vector<8x48xf32>
    %85 = tpu.matmul %68, %10, %cst_36 {dimension_numbers = #tpu.dot_dimension_numbers<[1], [0], [0], [1], [0, 0, 1, 1], [], []>} : vector<8x16xf32>, vector<16x48xf32>, vector<8x48xf32> -> vector<8x48xf32>
    %86 = vector.extract_strided_slice %80 {offsets = [0, 0], sizes = [8, 32], strides = [1, 1]} : vector<8x48xf32> to vector<8x32xf32>
    %87 = vector.extract_strided_slice %84 {offsets = [0, 0], sizes = [8, 32], strides = [1, 1]} : vector<8x48xf32> to vector<8x32xf32>
    %88 = arith.addf %86, %87 : vector<8x32xf32>
    %89 = arith.negf %88 : vector<8x32xf32>
    %90 = math.exp %89 : vector<8x32xf32>
    %cst_37 = arith.constant 1.000000e+00 : f32
    %91 = vector.broadcast %cst_37 : f32 to vector<8x32xf32>
    %92 = arith.addf %91, %90 : vector<8x32xf32>
    %93 = arith.divf %91, %92 : vector<8x32xf32>
    %94 = vector.extract_strided_slice %83 {offsets = [0, 0], sizes = [8, 32], strides = [1, 1]} : vector<8x48xf32> to vector<8x32xf32>
    %95 = vector.extract_strided_slice %85 {offsets = [0, 0], sizes = [8, 32], strides = [1, 1]} : vector<8x48xf32> to vector<8x32xf32>
    %96 = arith.addf %94, %95 : vector<8x32xf32>
    %97 = arith.negf %96 : vector<8x32xf32>
    %98 = math.exp %97 : vector<8x32xf32>
    %cst_38 = arith.constant 1.000000e+00 : f32
    %99 = vector.broadcast %cst_38 : f32 to vector<8x32xf32>
    %100 = arith.addf %99, %98 : vector<8x32xf32>
    %101 = arith.divf %99, %100 : vector<8x32xf32>
    %102 = vector.extract_strided_slice %80 {offsets = [0, 32], sizes = [8, 16], strides = [1, 1]} : vector<8x48xf32> to vector<8x16xf32>
    %103 = vector.extract_strided_slice %93 {offsets = [0, 0], sizes = [8, 16], strides = [1, 1]} : vector<8x32xf32> to vector<8x16xf32>
    %104 = vector.extract_strided_slice %84 {offsets = [0, 32], sizes = [8, 16], strides = [1, 1]} : vector<8x48xf32> to vector<8x16xf32>
    %105 = arith.addf %104, %13 : vector<8x16xf32>
    %106 = arith.mulf %103, %105 : vector<8x16xf32>
    %107 = arith.addf %102, %106 : vector<8x16xf32>
    %108 = math.tanh %107 : vector<8x16xf32>
    %109 = vector.extract_strided_slice %83 {offsets = [0, 32], sizes = [8, 16], strides = [1, 1]} : vector<8x48xf32> to vector<8x16xf32>
    %110 = vector.extract_strided_slice %101 {offsets = [0, 0], sizes = [8, 16], strides = [1, 1]} : vector<8x32xf32> to vector<8x16xf32>
    %111 = vector.extract_strided_slice %85 {offsets = [0, 32], sizes = [8, 16], strides = [1, 1]} : vector<8x48xf32> to vector<8x16xf32>
    %112 = arith.addf %111, %16 : vector<8x16xf32>
    %113 = arith.mulf %110, %112 : vector<8x16xf32>
    %114 = arith.addf %109, %113 : vector<8x16xf32>
    %115 = math.tanh %114 : vector<8x16xf32>
    %116 = vector.extract_strided_slice %93 {offsets = [0, 16], sizes = [8, 16], strides = [1, 1]} : vector<8x32xf32> to vector<8x16xf32>
    %117 = vector.extract_strided_slice %101 {offsets = [0, 16], sizes = [8, 16], strides = [1, 1]} : vector<8x32xf32> to vector<8x16xf32>
    %cst_39 = arith.constant 1.000000e+00 : f32
    %118 = vector.broadcast %cst_39 : f32 to vector<8x16xf32>
    %119 = arith.subf %118, %116 : vector<8x16xf32>
    %120 = arith.mulf %119, %108 : vector<8x16xf32>
    %121 = arith.mulf %116, %63 : vector<8x16xf32>
    %122 = arith.addf %120, %121 : vector<8x16xf32>
    %cst_40 = arith.constant 1.000000e+00 : f32
    %123 = vector.broadcast %cst_40 : f32 to vector<8x16xf32>
    %124 = arith.subf %123, %117 : vector<8x16xf32>
    %125 = arith.mulf %124, %115 : vector<8x16xf32>
    %126 = arith.mulf %117, %68 : vector<8x16xf32>
    %127 = arith.addf %125, %126 : vector<8x16xf32>
    %128 = arith.index_cast %c1_i32 : i32 to index
    %c0_41 = arith.constant 0 : index
    %c0_42 = arith.constant 0 : index
    %129 = vector.load %arg6[%128, %c0_41, %c0_42] : memref<3x8x32xf32, #tpu.memory_space<vmem>>, vector<1x8x16xf32>
    %130 = vector.shape_cast %129 : vector<1x8x16xf32> to vector<8x16xf32>
    %131 = vector.shape_cast %122 : vector<8x16xf32> to vector<1x8x16xf32>
    tpu.vector_store %arg6[%128, %c0_41, %c0_42], %131 {strides = array<i32>} : memref<3x8x32xf32, #tpu.memory_space<vmem>>, vector<1x8x16xf32>,
    %132 = arith.index_cast %77 : i32 to index
    %c0_43 = arith.constant 0 : index
    %c16_44 = arith.constant 16 : index
    %133 = vector.load %arg6[%132, %c0_43, %c16_44] : memref<3x8x32xf32, #tpu.memory_space<vmem>>, vector<1x8x16xf32>
    %134 = vector.shape_cast %133 : vector<1x8x16xf32> to vector<8x16xf32>
    %135 = vector.shape_cast %127 : vector<8x16xf32> to vector<1x8x16xf32>
    tpu.vector_store %arg6[%132, %c0_43, %c16_44], %135 {strides = array<i32>} : memref<3x8x32xf32, #tpu.memory_space<vmem>>, vector<1x8x16xf32>,
    %c2_i32_45 = arith.constant 2 : i32
    %c2_i32_46 = arith.constant 2 : i32
    %136 = arith.subi %c2_i32_46, %c2_i32_45 : i32
    %137 = arith.index_cast %c2_i32_45 : i32 to index
    %c0_47 = arith.constant 0 : index
    %c0_48 = arith.constant 0 : index
    %138 = vector.load %arg7[%137, %c0_47, %c0_48] : memref<3x8x96xf32, #tpu.memory_space<vmem>>, vector<1x8x48xf32>
    %139 = vector.shape_cast %138 : vector<1x8x48xf32> to vector<8x48xf32>
    %140 = arith.index_cast %136 : i32 to index
    %c0_49 = arith.constant 0 : index
    %c48_50 = arith.constant 48 : index
    %141 = vector.load %arg7[%140, %c0_49, %c48_50] : memref<3x8x96xf32, #tpu.memory_space<vmem>>, vector<1x8x48xf32>
    %142 = vector.shape_cast %141 : vector<1x8x48xf32> to vector<8x48xf32>
    %cst_51 = arith.constant dense<0.000000e+00> : vector<8x48xf32>
    %143 = tpu.matmul %122, %9, %cst_51 {dimension_numbers = #tpu.dot_dimension_numbers<[1], [0], [0], [1], [0, 0, 1, 1], [], []>} : vector<8x16xf32>, vector<16x48xf32>, vector<8x48xf32> -> vector<8x48xf32>
    %cst_52 = arith.constant dense<0.000000e+00> : vector<8x48xf32>
    %144 = tpu.matmul %127, %10, %cst_52 {dimension_numbers = #tpu.dot_dimension_numbers<[1], [0], [0], [1], [0, 0, 1, 1], [], []>} : vector<8x16xf32>, vector<16x48xf32>, vector<8x48xf32> -> vector<8x48xf32>
    %145 = vector.extract_strided_slice %139 {offsets = [0, 0], sizes = [8, 32], strides = [1, 1]} : vector<8x48xf32> to vector<8x32xf32>
    %146 = vector.extract_strided_slice %143 {offsets = [0, 0], sizes = [8, 32], strides = [1, 1]} : vector<8x48xf32> to vector<8x32xf32>
    %147 = arith.addf %145, %146 : vector<8x32xf32>
    %148 = arith.negf %147 : vector<8x32xf32>
    %149 = math.exp %148 : vector<8x32xf32>
    %cst_53 = arith.constant 1.000000e+00 : f32
    %150 = vector.broadcast %cst_53 : f32 to vector<8x32xf32>
    %151 = arith.addf %150, %149 : vector<8x32xf32>
    %152 = arith.divf %150, %151 : vector<8x32xf32>
    %153 = vector.extract_strided_slice %142 {offsets = [0, 0], sizes = [8, 32], strides = [1, 1]} : vector<8x48xf32> to vector<8x32xf32>
    %154 = vector.extract_strided_slice %144 {offsets = [0, 0], sizes = [8, 32], strides = [1, 1]} : vector<8x48xf32> to vector<8x32xf32>
    %155 = arith.addf %153, %154 : vector<8x32xf32>
    %156 = arith.negf %155 : vector<8x32xf32>
    %157 = math.exp %156 : vector<8x32xf32>
    %cst_54 = arith.constant 1.000000e+00 : f32
    %158 = vector.broadcast %cst_54 : f32 to vector<8x32xf32>
    %159 = arith.addf %158, %157 : vector<8x32xf32>
    %160 = arith.divf %158, %159 : vector<8x32xf32>
    %161 = vector.extract_strided_slice %139 {offsets = [0, 32], sizes = [8, 16], strides = [1, 1]} : vector<8x48xf32> to vector<8x16xf32>
    %162 = vector.extract_strided_slice %152 {offsets = [0, 0], sizes = [8, 16], strides = [1, 1]} : vector<8x32xf32> to vector<8x16xf32>
    %163 = vector.extract_strided_slice %143 {offsets = [0, 32], sizes = [8, 16], strides = [1, 1]} : vector<8x48xf32> to vector<8x16xf32>
    %164 = arith.addf %163, %13 : vector<8x16xf32>
    %165 = arith.mulf %162, %164 : vector<8x16xf32>
    %166 = arith.addf %161, %165 : vector<8x16xf32>
    %167 = math.tanh %166 : vector<8x16xf32>
    %168 = vector.extract_strided_slice %142 {offsets = [0, 32], sizes = [8, 16], strides = [1, 1]} : vector<8x48xf32> to vector<8x16xf32>
    %169 = vector.extract_strided_slice %160 {offsets = [0, 0], sizes = [8, 16], strides = [1, 1]} : vector<8x32xf32> to vector<8x16xf32>
    %170 = vector.extract_strided_slice %144 {offsets = [0, 32], sizes = [8, 16], strides = [1, 1]} : vector<8x48xf32> to vector<8x16xf32>
    %171 = arith.addf %170, %16 : vector<8x16xf32>
    %172 = arith.mulf %169, %171 : vector<8x16xf32>
    %173 = arith.addf %168, %172 : vector<8x16xf32>
    %174 = math.tanh %173 : vector<8x16xf32>
    %175 = vector.extract_strided_slice %152 {offsets = [0, 16], sizes = [8, 16], strides = [1, 1]} : vector<8x32xf32> to vector<8x16xf32>
    %176 = vector.extract_strided_slice %160 {offsets = [0, 16], sizes = [8, 16], strides = [1, 1]} : vector<8x32xf32> to vector<8x16xf32>
    %cst_55 = arith.constant 1.000000e+00 : f32
    %177 = vector.broadcast %cst_55 : f32 to vector<8x16xf32>
    %178 = arith.subf %177, %175 : vector<8x16xf32>
    %179 = arith.mulf %178, %167 : vector<8x16xf32>
    %180 = arith.mulf %175, %122 : vector<8x16xf32>
    %181 = arith.addf %179, %180 : vector<8x16xf32>
    %cst_56 = arith.constant 1.000000e+00 : f32
    %182 = vector.broadcast %cst_56 : f32 to vector<8x16xf32>
    %183 = arith.subf %182, %176 : vector<8x16xf32>
    %184 = arith.mulf %183, %174 : vector<8x16xf32>
    %185 = arith.mulf %176, %127 : vector<8x16xf32>
    %186 = arith.addf %184, %185 : vector<8x16xf32>
    %187 = arith.index_cast %c2_i32_45 : i32 to index
    %c0_57 = arith.constant 0 : index
    %c0_58 = arith.constant 0 : index
    %188 = vector.load %arg6[%187, %c0_57, %c0_58] : memref<3x8x32xf32, #tpu.memory_space<vmem>>, vector<1x8x16xf32>
    %189 = vector.shape_cast %188 : vector<1x8x16xf32> to vector<8x16xf32>
    %190 = vector.shape_cast %181 : vector<8x16xf32> to vector<1x8x16xf32>
    tpu.vector_store %arg6[%187, %c0_57, %c0_58], %190 {strides = array<i32>} : memref<3x8x32xf32, #tpu.memory_space<vmem>>, vector<1x8x16xf32>,
    %191 = arith.index_cast %136 : i32 to index
    %c0_59 = arith.constant 0 : index
    %c16_60 = arith.constant 16 : index
    %192 = vector.load %arg6[%191, %c0_59, %c16_60] : memref<3x8x32xf32, #tpu.memory_space<vmem>>, vector<1x8x16xf32>
    %193 = vector.shape_cast %192 : vector<1x8x16xf32> to vector<8x16xf32>
    %194 = vector.shape_cast %186 : vector<8x16xf32> to vector<1x8x16xf32>
    tpu.vector_store %arg6[%191, %c0_59, %c16_60], %194 {strides = array<i32>} : memref<3x8x32xf32, #tpu.memory_space<vmem>>, vector<1x8x16xf32>,
    %c3_i32 = arith.constant 3 : i32
    return
  }
  func.func @transform_0(%arg0: i32) -> (i32, i32, i32) {
    %c0_i32 = arith.constant 0 : i32
    %c0_i32_0 = arith.constant 0 : i32
    %c0_i32_1 = arith.constant 0 : i32
    return %c0_i32, %arg0, %c0_i32_0 : i32, i32, i32
  }
  func.func @transform_1(%arg0: i32) -> (i32, i32) {
    %c0_i32 = arith.constant 0 : i32
    %c0_i32_0 = arith.constant 0 : i32
    %c0_i32_1 = arith.constant 0 : i32
    return %c0_i32, %c0_i32_0 : i32, i32
  }
  func.func @transform_2(%arg0: i32) -> (i32, i32) {
    %c0_i32 = arith.constant 0 : i32
    %c0_i32_0 = arith.constant 0 : i32
    %c0_i32_1 = arith.constant 0 : i32
    return %c0_i32, %c0_i32_0 : i32, i32
  }
  func.func @transform_3(%arg0: i32) -> (i32, i32) {
    %c0_i32 = arith.constant 0 : i32
    %c0_i32_0 = arith.constant 0 : i32
    %c0_i32_1 = arith.constant 0 : i32
    return %c0_i32, %c0_i32_0 : i32, i32
  }
  func.func @transform_4(%arg0: i32) -> (i32, i32) {
    %c0_i32 = arith.constant 0 : i32
    %c0_i32_0 = arith.constant 0 : i32
    %c0_i32_1 = arith.constant 0 : i32
    return %c0_i32, %c0_i32_0 : i32, i32
  }
  func.func @transform_5(%arg0: i32) -> (i32, i32, i32) {
    %c0_i32 = arith.constant 0 : i32
    %c0_i32_0 = arith.constant 0 : i32
    %c0_i32_1 = arith.constant 0 : i32
    return %c0_i32, %arg0, %c0_i32_0 : i32, i32, i32
  }
}

module attributes {stable_mosaic.version = 11 : i64} {
  func.func @_bigru_attn_fc_layer_kernel(%arg0: i32, %arg1: memref<3x8x32xf32, #tpu.memory_space<vmem>>, %arg2: memref<32x96xf32, #tpu.memory_space<vmem>>, %arg3: memref<32x48xf32, #tpu.memory_space<vmem>>, %arg4: memref<1x96xf32, #tpu.memory_space<vmem>>, %arg5: memref<1x32xf32, #tpu.memory_space<vmem>>, %arg6: memref<32x32xf32, #tpu.memory_space<vmem>>, %arg7: memref<1x32xf32, #tpu.memory_space<vmem>>, %arg8: memref<1x32xf32, #tpu.memory_space<vmem>>, %arg9: memref<3x8x1xf32, #tpu.memory_space<vmem>>, %arg10: memref<32x4xf32, #tpu.memory_space<vmem>>, %arg11: memref<1x4xf32, #tpu.memory_space<vmem>>, %arg12: memref<8x4xf32, #tpu.memory_space<vmem>>, %arg13: memref<3x8x96xf32, #tpu.memory_space<vmem>>, %arg14: memref<3x8x32xf32, #tpu.memory_space<vmem>>) attributes {dimension_semantics = [#tpu.dimension_semantics<parallel>], iteration_bounds = array<i64: 1>, scalar_prefetch = 0 : i64, scratch_operands = 2 : i64, tpu.core_type = #tpu.core_type<tc>, window_params = [{transform_indices = @transform_0, window_bounds = array<i64: 3, 8, 32>}, {pipeline_mode = #tpu.pipeline_mode<synchronous>, transform_indices = @transform_1, window_bounds = array<i64: 32, 96>}, {pipeline_mode = #tpu.pipeline_mode<synchronous>, transform_indices = @transform_2, window_bounds = array<i64: 32, 48>}, {pipeline_mode = #tpu.pipeline_mode<synchronous>, transform_indices = @transform_3, window_bounds = array<i64: 1, 96>}, {pipeline_mode = #tpu.pipeline_mode<synchronous>, transform_indices = @transform_4, window_bounds = array<i64: 1, 32>}, {pipeline_mode = #tpu.pipeline_mode<synchronous>, transform_indices = @transform_5, window_bounds = array<i64: 32, 32>}, {pipeline_mode = #tpu.pipeline_mode<synchronous>, transform_indices = @transform_6, window_bounds = array<i64: 1, 32>}, {pipeline_mode = #tpu.pipeline_mode<synchronous>, transform_indices = @transform_7, window_bounds = array<i64: 1, 32>}, {transform_indices = @transform_8, window_bounds = array<i64: 3, 8, 1>}, {pipeline_mode = #tpu.pipeline_mode<synchronous>, transform_indices = @transform_9, window_bounds = array<i64: 32, 4>}, {pipeline_mode = #tpu.pipeline_mode<synchronous>, transform_indices = @transform_10, window_bounds = array<i64: 1, 4>}, {transform_indices = @transform_11, window_bounds = array<i64: 8, 4>}]} {
    %c0 = arith.constant 0 : index
    %c0_0 = arith.constant 0 : index
    %c0_1 = arith.constant 0 : index
    %0 = vector.load %arg1[%c0, %c0_0, %c0_1] : memref<3x8x32xf32, #tpu.memory_space<vmem>>, vector<3x8x32xf32>
    %1 = vector.shape_cast %0 : vector<3x8x32xf32> to vector<24x32xf32>
    %c0_2 = arith.constant 0 : index
    %c0_3 = arith.constant 0 : index
    %2 = vector.load %arg2[%c0_2, %c0_3] : memref<32x96xf32, #tpu.memory_space<vmem>>, vector<32x96xf32>
    %cst = arith.constant dense<0.000000e+00> : vector<24x96xf32>
    %3 = tpu.matmul %1, %2, %cst {dimension_numbers = #tpu.dot_dimension_numbers<[1], [0], [0], [1], [0, 0, 1, 1], [], []>} : vector<24x32xf32>, vector<32x96xf32>, vector<24x96xf32> -> vector<24x96xf32>
    %c0_4 = arith.constant 0 : index
    %c0_5 = arith.constant 0 : index
    %4 = vector.load %arg4[%c0_4, %c0_5] : memref<1x96xf32, #tpu.memory_space<vmem>>, vector<1x96xf32>
    %5 = vector.broadcast %4 : vector<1x96xf32> to vector<24x96xf32>
    %6 = arith.addf %3, %5 : vector<24x96xf32>
    %7 = vector.shape_cast %6 : vector<24x96xf32> to vector<3x8x96xf32>
    %c0_6 = arith.constant 0 : index
    %c0_7 = arith.constant 0 : index
    %c0_8 = arith.constant 0 : index
    %8 = vector.load %arg13[%c0_6, %c0_7, %c0_8] : memref<3x8x96xf32, #tpu.memory_space<vmem>>, vector<3x8x96xf32>
    tpu.vector_store %arg13[%c0_6, %c0_7, %c0_8], %7 {strides = array<i32>} : memref<3x8x96xf32, #tpu.memory_space<vmem>>, vector<3x8x96xf32>,
    %c0_9 = arith.constant 0 : index
    %c0_10 = arith.constant 0 : index
    %9 = vector.load %arg3[%c0_9, %c0_10] : memref<32x48xf32, #tpu.memory_space<vmem>>, vector<16x48xf32>
    %c16 = arith.constant 16 : index
    %c0_11 = arith.constant 0 : index
    %10 = vector.load %arg3[%c16, %c0_11] : memref<32x48xf32, #tpu.memory_space<vmem>>, vector<16x48xf32>
    %c0_12 = arith.constant 0 : index
    %c0_13 = arith.constant 0 : index
    %11 = vector.load %arg5[%c0_12, %c0_13] : memref<1x32xf32, #tpu.memory_space<vmem>>, vector<1x16xf32>
    %12 = vector.shape_cast %11 : vector<1x16xf32> to vector<1x16xf32>
    %13 = vector.broadcast %12 : vector<1x16xf32> to vector<8x16xf32>
    %c0_14 = arith.constant 0 : index
    %c16_15 = arith.constant 16 : index
    %14 = vector.load %arg5[%c0_14, %c16_15] : memref<1x32xf32, #tpu.memory_space<vmem>>, vector<1x16xf32>
    %15 = vector.shape_cast %14 : vector<1x16xf32> to vector<1x16xf32>
    %16 = vector.broadcast %15 : vector<1x16xf32> to vector<8x16xf32>
    %cst_16 = arith.constant 0.000000e+00 : f32
    %17 = vector.broadcast %cst_16 : f32 to vector<8x16xf32>
    %c0_i32 = arith.constant 0 : i32
    %c2_i32 = arith.constant 2 : i32
    %18 = arith.subi %c2_i32, %c0_i32 : i32
    %19 = arith.index_cast %c0_i32 : i32 to index
    %c0_17 = arith.constant 0 : index
    %c0_18 = arith.constant 0 : index
    %20 = vector.load %arg13[%19, %c0_17, %c0_18] : memref<3x8x96xf32, #tpu.memory_space<vmem>>, vector<1x8x48xf32>
    %21 = vector.shape_cast %20 : vector<1x8x48xf32> to vector<8x48xf32>
    %22 = arith.index_cast %18 : i32 to index
    %c0_19 = arith.constant 0 : index
    %c48 = arith.constant 48 : index
    %23 = vector.load %arg13[%22, %c0_19, %c48] : memref<3x8x96xf32, #tpu.memory_space<vmem>>, vector<1x8x48xf32>
    %24 = vector.shape_cast %23 : vector<1x8x48xf32> to vector<8x48xf32>
    %cst_20 = arith.constant dense<0.000000e+00> : vector<8x48xf32>
    %25 = tpu.matmul %17, %9, %cst_20 {dimension_numbers = #tpu.dot_dimension_numbers<[1], [0], [0], [1], [0, 0, 1, 1], [], []>} : vector<8x16xf32>, vector<16x48xf32>, vector<8x48xf32> -> vector<8x48xf32>
    %cst_21 = arith.constant dense<0.000000e+00> : vector<8x48xf32>
    %26 = tpu.matmul %17, %10, %cst_21 {dimension_numbers = #tpu.dot_dimension_numbers<[1], [0], [0], [1], [0, 0, 1, 1], [], []>} : vector<8x16xf32>, vector<16x48xf32>, vector<8x48xf32> -> vector<8x48xf32>
    %27 = vector.extract_strided_slice %21 {offsets = [0, 0], sizes = [8, 32], strides = [1, 1]} : vector<8x48xf32> to vector<8x32xf32>
    %28 = vector.extract_strided_slice %25 {offsets = [0, 0], sizes = [8, 32], strides = [1, 1]} : vector<8x48xf32> to vector<8x32xf32>
    %29 = arith.addf %27, %28 : vector<8x32xf32>
    %30 = arith.negf %29 : vector<8x32xf32>
    %31 = math.exp %30 : vector<8x32xf32>
    %cst_22 = arith.constant 1.000000e+00 : f32
    %32 = vector.broadcast %cst_22 : f32 to vector<8x32xf32>
    %33 = arith.addf %32, %31 : vector<8x32xf32>
    %34 = arith.divf %32, %33 : vector<8x32xf32>
    %35 = vector.extract_strided_slice %24 {offsets = [0, 0], sizes = [8, 32], strides = [1, 1]} : vector<8x48xf32> to vector<8x32xf32>
    %36 = vector.extract_strided_slice %26 {offsets = [0, 0], sizes = [8, 32], strides = [1, 1]} : vector<8x48xf32> to vector<8x32xf32>
    %37 = arith.addf %35, %36 : vector<8x32xf32>
    %38 = arith.negf %37 : vector<8x32xf32>
    %39 = math.exp %38 : vector<8x32xf32>
    %cst_23 = arith.constant 1.000000e+00 : f32
    %40 = vector.broadcast %cst_23 : f32 to vector<8x32xf32>
    %41 = arith.addf %40, %39 : vector<8x32xf32>
    %42 = arith.divf %40, %41 : vector<8x32xf32>
    %43 = vector.extract_strided_slice %21 {offsets = [0, 32], sizes = [8, 16], strides = [1, 1]} : vector<8x48xf32> to vector<8x16xf32>
    %44 = vector.extract_strided_slice %34 {offsets = [0, 0], sizes = [8, 16], strides = [1, 1]} : vector<8x32xf32> to vector<8x16xf32>
    %45 = vector.extract_strided_slice %25 {offsets = [0, 32], sizes = [8, 16], strides = [1, 1]} : vector<8x48xf32> to vector<8x16xf32>
    %46 = arith.addf %45, %13 : vector<8x16xf32>
    %47 = arith.mulf %44, %46 : vector<8x16xf32>
    %48 = arith.addf %43, %47 : vector<8x16xf32>
    %49 = math.tanh %48 : vector<8x16xf32>
    %50 = vector.extract_strided_slice %24 {offsets = [0, 32], sizes = [8, 16], strides = [1, 1]} : vector<8x48xf32> to vector<8x16xf32>
    %51 = vector.extract_strided_slice %42 {offsets = [0, 0], sizes = [8, 16], strides = [1, 1]} : vector<8x32xf32> to vector<8x16xf32>
    %52 = vector.extract_strided_slice %26 {offsets = [0, 32], sizes = [8, 16], strides = [1, 1]} : vector<8x48xf32> to vector<8x16xf32>
    %53 = arith.addf %52, %16 : vector<8x16xf32>
    %54 = arith.mulf %51, %53 : vector<8x16xf32>
    %55 = arith.addf %50, %54 : vector<8x16xf32>
    %56 = math.tanh %55 : vector<8x16xf32>
    %57 = vector.extract_strided_slice %34 {offsets = [0, 16], sizes = [8, 16], strides = [1, 1]} : vector<8x32xf32> to vector<8x16xf32>
    %58 = vector.extract_strided_slice %42 {offsets = [0, 16], sizes = [8, 16], strides = [1, 1]} : vector<8x32xf32> to vector<8x16xf32>
    %cst_24 = arith.constant 1.000000e+00 : f32
    %59 = vector.broadcast %cst_24 : f32 to vector<8x16xf32>
    %60 = arith.subf %59, %57 : vector<8x16xf32>
    %61 = arith.mulf %60, %49 : vector<8x16xf32>
    %62 = arith.mulf %57, %17 : vector<8x16xf32>
    %63 = arith.addf %61, %62 : vector<8x16xf32>
    %cst_25 = arith.constant 1.000000e+00 : f32
    %64 = vector.broadcast %cst_25 : f32 to vector<8x16xf32>
    %65 = arith.subf %64, %58 : vector<8x16xf32>
    %66 = arith.mulf %65, %56 : vector<8x16xf32>
    %67 = arith.mulf %58, %17 : vector<8x16xf32>
    %68 = arith.addf %66, %67 : vector<8x16xf32>
    %69 = arith.index_cast %c0_i32 : i32 to index
    %c0_26 = arith.constant 0 : index
    %c0_27 = arith.constant 0 : index
    %70 = vector.load %arg14[%69, %c0_26, %c0_27] : memref<3x8x32xf32, #tpu.memory_space<vmem>>, vector<1x8x16xf32>
    %71 = vector.shape_cast %70 : vector<1x8x16xf32> to vector<8x16xf32>
    %72 = vector.shape_cast %63 : vector<8x16xf32> to vector<1x8x16xf32>
    tpu.vector_store %arg14[%69, %c0_26, %c0_27], %72 {strides = array<i32>} : memref<3x8x32xf32, #tpu.memory_space<vmem>>, vector<1x8x16xf32>,
    %73 = arith.index_cast %18 : i32 to index
    %c0_28 = arith.constant 0 : index
    %c16_29 = arith.constant 16 : index
    %74 = vector.load %arg14[%73, %c0_28, %c16_29] : memref<3x8x32xf32, #tpu.memory_space<vmem>>, vector<1x8x16xf32>
    %75 = vector.shape_cast %74 : vector<1x8x16xf32> to vector<8x16xf32>
    %76 = vector.shape_cast %68 : vector<8x16xf32> to vector<1x8x16xf32>
    tpu.vector_store %arg14[%73, %c0_28, %c16_29], %76 {strides = array<i32>} : memref<3x8x32xf32, #tpu.memory_space<vmem>>, vector<1x8x16xf32>,
    %c1_i32 = arith.constant 1 : i32
    %c2_i32_30 = arith.constant 2 : i32
    %77 = arith.subi %c2_i32_30, %c1_i32 : i32
    %78 = arith.index_cast %c1_i32 : i32 to index
    %c0_31 = arith.constant 0 : index
    %c0_32 = arith.constant 0 : index
    %79 = vector.load %arg13[%78, %c0_31, %c0_32] : memref<3x8x96xf32, #tpu.memory_space<vmem>>, vector<1x8x48xf32>
    %80 = vector.shape_cast %79 : vector<1x8x48xf32> to vector<8x48xf32>
    %81 = arith.index_cast %77 : i32 to index
    %c0_33 = arith.constant 0 : index
    %c48_34 = arith.constant 48 : index
    %82 = vector.load %arg13[%81, %c0_33, %c48_34] : memref<3x8x96xf32, #tpu.memory_space<vmem>>, vector<1x8x48xf32>
    %83 = vector.shape_cast %82 : vector<1x8x48xf32> to vector<8x48xf32>
    %cst_35 = arith.constant dense<0.000000e+00> : vector<8x48xf32>
    %84 = tpu.matmul %63, %9, %cst_35 {dimension_numbers = #tpu.dot_dimension_numbers<[1], [0], [0], [1], [0, 0, 1, 1], [], []>} : vector<8x16xf32>, vector<16x48xf32>, vector<8x48xf32> -> vector<8x48xf32>
    %cst_36 = arith.constant dense<0.000000e+00> : vector<8x48xf32>
    %85 = tpu.matmul %68, %10, %cst_36 {dimension_numbers = #tpu.dot_dimension_numbers<[1], [0], [0], [1], [0, 0, 1, 1], [], []>} : vector<8x16xf32>, vector<16x48xf32>, vector<8x48xf32> -> vector<8x48xf32>
    %86 = vector.extract_strided_slice %80 {offsets = [0, 0], sizes = [8, 32], strides = [1, 1]} : vector<8x48xf32> to vector<8x32xf32>
    %87 = vector.extract_strided_slice %84 {offsets = [0, 0], sizes = [8, 32], strides = [1, 1]} : vector<8x48xf32> to vector<8x32xf32>
    %88 = arith.addf %86, %87 : vector<8x32xf32>
    %89 = arith.negf %88 : vector<8x32xf32>
    %90 = math.exp %89 : vector<8x32xf32>
    %cst_37 = arith.constant 1.000000e+00 : f32
    %91 = vector.broadcast %cst_37 : f32 to vector<8x32xf32>
    %92 = arith.addf %91, %90 : vector<8x32xf32>
    %93 = arith.divf %91, %92 : vector<8x32xf32>
    %94 = vector.extract_strided_slice %83 {offsets = [0, 0], sizes = [8, 32], strides = [1, 1]} : vector<8x48xf32> to vector<8x32xf32>
    %95 = vector.extract_strided_slice %85 {offsets = [0, 0], sizes = [8, 32], strides = [1, 1]} : vector<8x48xf32> to vector<8x32xf32>
    %96 = arith.addf %94, %95 : vector<8x32xf32>
    %97 = arith.negf %96 : vector<8x32xf32>
    %98 = math.exp %97 : vector<8x32xf32>
    %cst_38 = arith.constant 1.000000e+00 : f32
    %99 = vector.broadcast %cst_38 : f32 to vector<8x32xf32>
    %100 = arith.addf %99, %98 : vector<8x32xf32>
    %101 = arith.divf %99, %100 : vector<8x32xf32>
    %102 = vector.extract_strided_slice %80 {offsets = [0, 32], sizes = [8, 16], strides = [1, 1]} : vector<8x48xf32> to vector<8x16xf32>
    %103 = vector.extract_strided_slice %93 {offsets = [0, 0], sizes = [8, 16], strides = [1, 1]} : vector<8x32xf32> to vector<8x16xf32>
    %104 = vector.extract_strided_slice %84 {offsets = [0, 32], sizes = [8, 16], strides = [1, 1]} : vector<8x48xf32> to vector<8x16xf32>
    %105 = arith.addf %104, %13 : vector<8x16xf32>
    %106 = arith.mulf %103, %105 : vector<8x16xf32>
    %107 = arith.addf %102, %106 : vector<8x16xf32>
    %108 = math.tanh %107 : vector<8x16xf32>
    %109 = vector.extract_strided_slice %83 {offsets = [0, 32], sizes = [8, 16], strides = [1, 1]} : vector<8x48xf32> to vector<8x16xf32>
    %110 = vector.extract_strided_slice %101 {offsets = [0, 0], sizes = [8, 16], strides = [1, 1]} : vector<8x32xf32> to vector<8x16xf32>
    %111 = vector.extract_strided_slice %85 {offsets = [0, 32], sizes = [8, 16], strides = [1, 1]} : vector<8x48xf32> to vector<8x16xf32>
    %112 = arith.addf %111, %16 : vector<8x16xf32>
    %113 = arith.mulf %110, %112 : vector<8x16xf32>
    %114 = arith.addf %109, %113 : vector<8x16xf32>
    %115 = math.tanh %114 : vector<8x16xf32>
    %116 = vector.extract_strided_slice %93 {offsets = [0, 16], sizes = [8, 16], strides = [1, 1]} : vector<8x32xf32> to vector<8x16xf32>
    %117 = vector.extract_strided_slice %101 {offsets = [0, 16], sizes = [8, 16], strides = [1, 1]} : vector<8x32xf32> to vector<8x16xf32>
    %cst_39 = arith.constant 1.000000e+00 : f32
    %118 = vector.broadcast %cst_39 : f32 to vector<8x16xf32>
    %119 = arith.subf %118, %116 : vector<8x16xf32>
    %120 = arith.mulf %119, %108 : vector<8x16xf32>
    %121 = arith.mulf %116, %63 : vector<8x16xf32>
    %122 = arith.addf %120, %121 : vector<8x16xf32>
    %cst_40 = arith.constant 1.000000e+00 : f32
    %123 = vector.broadcast %cst_40 : f32 to vector<8x16xf32>
    %124 = arith.subf %123, %117 : vector<8x16xf32>
    %125 = arith.mulf %124, %115 : vector<8x16xf32>
    %126 = arith.mulf %117, %68 : vector<8x16xf32>
    %127 = arith.addf %125, %126 : vector<8x16xf32>
    %128 = arith.index_cast %c1_i32 : i32 to index
    %c0_41 = arith.constant 0 : index
    %c0_42 = arith.constant 0 : index
    %129 = vector.load %arg14[%128, %c0_41, %c0_42] : memref<3x8x32xf32, #tpu.memory_space<vmem>>, vector<1x8x16xf32>
    %130 = vector.shape_cast %129 : vector<1x8x16xf32> to vector<8x16xf32>
    %131 = vector.shape_cast %122 : vector<8x16xf32> to vector<1x8x16xf32>
    tpu.vector_store %arg14[%128, %c0_41, %c0_42], %131 {strides = array<i32>} : memref<3x8x32xf32, #tpu.memory_space<vmem>>, vector<1x8x16xf32>,
    %132 = arith.index_cast %77 : i32 to index
    %c0_43 = arith.constant 0 : index
    %c16_44 = arith.constant 16 : index
    %133 = vector.load %arg14[%132, %c0_43, %c16_44] : memref<3x8x32xf32, #tpu.memory_space<vmem>>, vector<1x8x16xf32>
    %134 = vector.shape_cast %133 : vector<1x8x16xf32> to vector<8x16xf32>
    %135 = vector.shape_cast %127 : vector<8x16xf32> to vector<1x8x16xf32>
    tpu.vector_store %arg14[%132, %c0_43, %c16_44], %135 {strides = array<i32>} : memref<3x8x32xf32, #tpu.memory_space<vmem>>, vector<1x8x16xf32>,
    %c2_i32_45 = arith.constant 2 : i32
    %c2_i32_46 = arith.constant 2 : i32
    %136 = arith.subi %c2_i32_46, %c2_i32_45 : i32
    %137 = arith.index_cast %c2_i32_45 : i32 to index
    %c0_47 = arith.constant 0 : index
    %c0_48 = arith.constant 0 : index
    %138 = vector.load %arg13[%137, %c0_47, %c0_48] : memref<3x8x96xf32, #tpu.memory_space<vmem>>, vector<1x8x48xf32>
    %139 = vector.shape_cast %138 : vector<1x8x48xf32> to vector<8x48xf32>
    %140 = arith.index_cast %136 : i32 to index
    %c0_49 = arith.constant 0 : index
    %c48_50 = arith.constant 48 : index
    %141 = vector.load %arg13[%140, %c0_49, %c48_50] : memref<3x8x96xf32, #tpu.memory_space<vmem>>, vector<1x8x48xf32>
    %142 = vector.shape_cast %141 : vector<1x8x48xf32> to vector<8x48xf32>
    %cst_51 = arith.constant dense<0.000000e+00> : vector<8x48xf32>
    %143 = tpu.matmul %122, %9, %cst_51 {dimension_numbers = #tpu.dot_dimension_numbers<[1], [0], [0], [1], [0, 0, 1, 1], [], []>} : vector<8x16xf32>, vector<16x48xf32>, vector<8x48xf32> -> vector<8x48xf32>
    %cst_52 = arith.constant dense<0.000000e+00> : vector<8x48xf32>
    %144 = tpu.matmul %127, %10, %cst_52 {dimension_numbers = #tpu.dot_dimension_numbers<[1], [0], [0], [1], [0, 0, 1, 1], [], []>} : vector<8x16xf32>, vector<16x48xf32>, vector<8x48xf32> -> vector<8x48xf32>
    %145 = vector.extract_strided_slice %139 {offsets = [0, 0], sizes = [8, 32], strides = [1, 1]} : vector<8x48xf32> to vector<8x32xf32>
    %146 = vector.extract_strided_slice %143 {offsets = [0, 0], sizes = [8, 32], strides = [1, 1]} : vector<8x48xf32> to vector<8x32xf32>
    %147 = arith.addf %145, %146 : vector<8x32xf32>
    %148 = arith.negf %147 : vector<8x32xf32>
    %149 = math.exp %148 : vector<8x32xf32>
    %cst_53 = arith.constant 1.000000e+00 : f32
    %150 = vector.broadcast %cst_53 : f32 to vector<8x32xf32>
    %151 = arith.addf %150, %149 : vector<8x32xf32>
    %152 = arith.divf %150, %151 : vector<8x32xf32>
    %153 = vector.extract_strided_slice %142 {offsets = [0, 0], sizes = [8, 32], strides = [1, 1]} : vector<8x48xf32> to vector<8x32xf32>
    %154 = vector.extract_strided_slice %144 {offsets = [0, 0], sizes = [8, 32], strides = [1, 1]} : vector<8x48xf32> to vector<8x32xf32>
    %155 = arith.addf %153, %154 : vector<8x32xf32>
    %156 = arith.negf %155 : vector<8x32xf32>
    %157 = math.exp %156 : vector<8x32xf32>
    %cst_54 = arith.constant 1.000000e+00 : f32
    %158 = vector.broadcast %cst_54 : f32 to vector<8x32xf32>
    %159 = arith.addf %158, %157 : vector<8x32xf32>
    %160 = arith.divf %158, %159 : vector<8x32xf32>
    %161 = vector.extract_strided_slice %139 {offsets = [0, 32], sizes = [8, 16], strides = [1, 1]} : vector<8x48xf32> to vector<8x16xf32>
    %162 = vector.extract_strided_slice %152 {offsets = [0, 0], sizes = [8, 16], strides = [1, 1]} : vector<8x32xf32> to vector<8x16xf32>
    %163 = vector.extract_strided_slice %143 {offsets = [0, 32], sizes = [8, 16], strides = [1, 1]} : vector<8x48xf32> to vector<8x16xf32>
    %164 = arith.addf %163, %13 : vector<8x16xf32>
    %165 = arith.mulf %162, %164 : vector<8x16xf32>
    %166 = arith.addf %161, %165 : vector<8x16xf32>
    %167 = math.tanh %166 : vector<8x16xf32>
    %168 = vector.extract_strided_slice %142 {offsets = [0, 32], sizes = [8, 16], strides = [1, 1]} : vector<8x48xf32> to vector<8x16xf32>
    %169 = vector.extract_strided_slice %160 {offsets = [0, 0], sizes = [8, 16], strides = [1, 1]} : vector<8x32xf32> to vector<8x16xf32>
    %170 = vector.extract_strided_slice %144 {offsets = [0, 32], sizes = [8, 16], strides = [1, 1]} : vector<8x48xf32> to vector<8x16xf32>
    %171 = arith.addf %170, %16 : vector<8x16xf32>
    %172 = arith.mulf %169, %171 : vector<8x16xf32>
    %173 = arith.addf %168, %172 : vector<8x16xf32>
    %174 = math.tanh %173 : vector<8x16xf32>
    %175 = vector.extract_strided_slice %152 {offsets = [0, 16], sizes = [8, 16], strides = [1, 1]} : vector<8x32xf32> to vector<8x16xf32>
    %176 = vector.extract_strided_slice %160 {offsets = [0, 16], sizes = [8, 16], strides = [1, 1]} : vector<8x32xf32> to vector<8x16xf32>
    %cst_55 = arith.constant 1.000000e+00 : f32
    %177 = vector.broadcast %cst_55 : f32 to vector<8x16xf32>
    %178 = arith.subf %177, %175 : vector<8x16xf32>
    %179 = arith.mulf %178, %167 : vector<8x16xf32>
    %180 = arith.mulf %175, %122 : vector<8x16xf32>
    %181 = arith.addf %179, %180 : vector<8x16xf32>
    %cst_56 = arith.constant 1.000000e+00 : f32
    %182 = vector.broadcast %cst_56 : f32 to vector<8x16xf32>
    %183 = arith.subf %182, %176 : vector<8x16xf32>
    %184 = arith.mulf %183, %174 : vector<8x16xf32>
    %185 = arith.mulf %176, %127 : vector<8x16xf32>
    %186 = arith.addf %184, %185 : vector<8x16xf32>
    %187 = arith.index_cast %c2_i32_45 : i32 to index
    %c0_57 = arith.constant 0 : index
    %c0_58 = arith.constant 0 : index
    %188 = vector.load %arg14[%187, %c0_57, %c0_58] : memref<3x8x32xf32, #tpu.memory_space<vmem>>, vector<1x8x16xf32>
    %189 = vector.shape_cast %188 : vector<1x8x16xf32> to vector<8x16xf32>
    %190 = vector.shape_cast %181 : vector<8x16xf32> to vector<1x8x16xf32>
    tpu.vector_store %arg14[%187, %c0_57, %c0_58], %190 {strides = array<i32>} : memref<3x8x32xf32, #tpu.memory_space<vmem>>, vector<1x8x16xf32>,
    %191 = arith.index_cast %136 : i32 to index
    %c0_59 = arith.constant 0 : index
    %c16_60 = arith.constant 16 : index
    %192 = vector.load %arg14[%191, %c0_59, %c16_60] : memref<3x8x32xf32, #tpu.memory_space<vmem>>, vector<1x8x16xf32>
    %193 = vector.shape_cast %192 : vector<1x8x16xf32> to vector<8x16xf32>
    %194 = vector.shape_cast %186 : vector<8x16xf32> to vector<1x8x16xf32>
    tpu.vector_store %arg14[%191, %c0_59, %c16_60], %194 {strides = array<i32>} : memref<3x8x32xf32, #tpu.memory_space<vmem>>, vector<1x8x16xf32>,
    %c3_i32 = arith.constant 3 : i32
    %c0_61 = arith.constant 0 : index
    %c0_62 = arith.constant 0 : index
    %c0_63 = arith.constant 0 : index
    %195 = vector.load %arg14[%c0_61, %c0_62, %c0_63] : memref<3x8x32xf32, #tpu.memory_space<vmem>>, vector<3x8x32xf32>
    %196 = vector.shape_cast %195 : vector<3x8x32xf32> to vector<24x32xf32>
    %c0_64 = arith.constant 0 : index
    %c0_65 = arith.constant 0 : index
    %197 = vector.load %arg6[%c0_64, %c0_65] : memref<32x32xf32, #tpu.memory_space<vmem>>, vector<32x32xf32>
    %cst_66 = arith.constant dense<0.000000e+00> : vector<24x32xf32>
    %198 = tpu.matmul %196, %197, %cst_66 {dimension_numbers = #tpu.dot_dimension_numbers<[1], [0], [0], [1], [0, 0, 1, 1], [], []>} : vector<24x32xf32>, vector<32x32xf32>, vector<24x32xf32> -> vector<24x32xf32>
    %c0_67 = arith.constant 0 : index
    %c0_68 = arith.constant 0 : index
    %199 = vector.load %arg7[%c0_67, %c0_68] : memref<1x32xf32, #tpu.memory_space<vmem>>, vector<1x32xf32>
    %200 = vector.broadcast %199 : vector<1x32xf32> to vector<24x32xf32>
    %201 = arith.addf %198, %200 : vector<24x32xf32>
    %202 = math.tanh %201 : vector<24x32xf32>
    %203 = vector.shape_cast %202 : vector<24x32xf32> to vector<3x8x32xf32>
    %c0_69 = arith.constant 0 : index
    %c0_70 = arith.constant 0 : index
    %204 = vector.load %arg8[%c0_69, %c0_70] : memref<1x32xf32, #tpu.memory_space<vmem>>, vector<1x32xf32>
    %205 = vector.shape_cast %204 : vector<1x32xf32> to vector<1x1x32xf32>
    %206 = vector.broadcast %205 : vector<1x1x32xf32> to vector<3x8x32xf32>
    %207 = arith.mulf %203, %206 : vector<3x8x32xf32>
    %cst_71 = arith.constant dense<0.000000e+00> : vector<3x8xf32>
    %208 = vector.multi_reduction <add>, %207, %cst_71 [2] : vector<3x8x32xf32> to vector<3x8xf32>
    %209 = vector.shape_cast %208 : vector<3x8xf32> to vector<3x8x1xf32>
    %cst_72 = arith.constant dense<0xFF800000> : vector<8x1xf32>
    %210 = vector.multi_reduction <maximumf>, %209, %cst_72 [0] : vector<3x8x1xf32> to vector<8x1xf32>
    %211 = vector.shape_cast %210 : vector<8x1xf32> to vector<1x8x1xf32>
    %212 = vector.broadcast %211 : vector<1x8x1xf32> to vector<3x8x1xf32>
    %213 = arith.subf %209, %212 : vector<3x8x1xf32>
    %214 = math.exp %213 : vector<3x8x1xf32>
    %c0_73 = arith.constant 0 : index
    %c0_74 = arith.constant 0 : index
    %c0_75 = arith.constant 0 : index
    %215 = vector.load %arg9[%c0_73, %c0_74, %c0_75] : memref<3x8x1xf32, #tpu.memory_space<vmem>>, vector<3x8x1xf32>
    %cst_76 = arith.constant 0.000000e+00 : f32
    %216 = vector.broadcast %cst_76 : f32 to vector<3x8x1xf32>
    %217 = arith.cmpf one, %215, %216 : vector<3x8x1xf32>
    %cst_77 = arith.constant 0.000000e+00 : f32
    %218 = vector.broadcast %cst_77 : f32 to vector<3x8x1xf32>
    %219 = arith.select %217, %214, %218 : vector<3x8x1xi1>, vector<3x8x1xf32>
    %cst_78 = arith.constant dense<0.000000e+00> : vector<8x1xf32>
    %220 = vector.multi_reduction <add>, %219, %cst_78 [0] : vector<3x8x1xf32> to vector<8x1xf32>
    %221 = vector.shape_cast %220 : vector<8x1xf32> to vector<1x8x1xf32>
    %cst_79 = arith.constant dense<0.000000e+00> : vector<8x1xf32>
    %222 = vector.multi_reduction <add>, %214, %cst_79 [0] : vector<3x8x1xf32> to vector<8x1xf32>
    %223 = vector.shape_cast %222 : vector<8x1xf32> to vector<1x8x1xf32>
    %cst_80 = arith.constant 9.99999974E-5 : f32
    %224 = vector.broadcast %cst_80 : f32 to vector<1x8x1xf32>
    %225 = arith.mulf %224, %223 : vector<1x8x1xf32>
    %226 = arith.addf %221, %225 : vector<1x8x1xf32>
    %227 = tpu.reciprocal %226 {approx = true} : vector<1x8x1xf32> -> vector<1x8x1xf32>
    %228 = vector.broadcast %227 : vector<1x8x1xf32> to vector<3x8x1xf32>
    %229 = arith.mulf %219, %228 : vector<3x8x1xf32>
    %230 = vector.broadcast %229 : vector<3x8x1xf32> to vector<3x8x32xf32>
    %231 = arith.mulf %195, %230 : vector<3x8x32xf32>
    %cst_81 = arith.constant dense<0.000000e+00> : vector<8x32xf32>
    %232 = vector.multi_reduction <add>, %231, %cst_81 [0] : vector<3x8x32xf32> to vector<8x32xf32>
    %c0_82 = arith.constant 0 : index
    %c0_83 = arith.constant 0 : index
    %233 = vector.load %arg10[%c0_82, %c0_83] : memref<32x4xf32, #tpu.memory_space<vmem>>, vector<32x4xf32>
    %cst_84 = arith.constant dense<0.000000e+00> : vector<8x4xf32>
    %234 = tpu.matmul %232, %233, %cst_84 {dimension_numbers = #tpu.dot_dimension_numbers<[1], [0], [0], [1], [0, 0, 1, 1], [], []>} : vector<8x32xf32>, vector<32x4xf32>, vector<8x4xf32> -> vector<8x4xf32>
    %c0_85 = arith.constant 0 : index
    %c0_86 = arith.constant 0 : index
    %235 = vector.load %arg11[%c0_85, %c0_86] : memref<1x4xf32, #tpu.memory_space<vmem>>, vector<1x4xf32>
    %236 = vector.broadcast %235 : vector<1x4xf32> to vector<8x4xf32>
    %237 = arith.addf %234, %236 : vector<8x4xf32>
    %c0_87 = arith.constant 0 : index
    %c0_88 = arith.constant 0 : index
    %238 = vector.load %arg12[%c0_87, %c0_88] : memref<8x4xf32, #tpu.memory_space<vmem>>, vector<8x4xf32>
    tpu.vector_store %arg12[%c0_87, %c0_88], %237 {strides = array<i32>} : memref<8x4xf32, #tpu.memory_space<vmem>>, vector<8x4xf32>,
    return
  }
  func.func @transform_0(%arg0: i32) -> (i32, i32, i32) {
    %c0_i32 = arith.constant 0 : i32
    %c0_i32_0 = arith.constant 0 : i32
    %c0_i32_1 = arith.constant 0 : i32
    return %c0_i32, %arg0, %c0_i32_0 : i32, i32, i32
  }
  func.func @transform_1(%arg0: i32) -> (i32, i32) {
    %c0_i32 = arith.constant 0 : i32
    %c0_i32_0 = arith.constant 0 : i32
    %c0_i32_1 = arith.constant 0 : i32
    return %c0_i32, %c0_i32_0 : i32, i32
  }
  func.func @transform_2(%arg0: i32) -> (i32, i32) {
    %c0_i32 = arith.constant 0 : i32
    %c0_i32_0 = arith.constant 0 : i32
    %c0_i32_1 = arith.constant 0 : i32
    return %c0_i32, %c0_i32_0 : i32, i32
  }
  func.func @transform_3(%arg0: i32) -> (i32, i32) {
    %c0_i32 = arith.constant 0 : i32
    %c0_i32_0 = arith.constant 0 : i32
    %c0_i32_1 = arith.constant 0 : i32
    return %c0_i32, %c0_i32_0 : i32, i32
  }
  func.func @transform_4(%arg0: i32) -> (i32, i32) {
    %c0_i32 = arith.constant 0 : i32
    %c0_i32_0 = arith.constant 0 : i32
    %c0_i32_1 = arith.constant 0 : i32
    return %c0_i32, %c0_i32_0 : i32, i32
  }
  func.func @transform_5(%arg0: i32) -> (i32, i32) {
    %c0_i32 = arith.constant 0 : i32
    %c0_i32_0 = arith.constant 0 : i32
    %c0_i32_1 = arith.constant 0 : i32
    return %c0_i32, %c0_i32_0 : i32, i32
  }
  func.func @transform_6(%arg0: i32) -> (i32, i32) {
    %c0_i32 = arith.constant 0 : i32
    %c0_i32_0 = arith.constant 0 : i32
    %c0_i32_1 = arith.constant 0 : i32
    return %c0_i32, %c0_i32_0 : i32, i32
  }
  func.func @transform_7(%arg0: i32) -> (i32, i32) {
    %c0_i32 = arith.constant 0 : i32
    %c0_i32_0 = arith.constant 0 : i32
    %c0_i32_1 = arith.constant 0 : i32
    return %c0_i32, %c0_i32_0 : i32, i32
  }
  func.func @transform_8(%arg0: i32) -> (i32, i32, i32) {
    %c0_i32 = arith.constant 0 : i32
    %c0_i32_0 = arith.constant 0 : i32
    %c0_i32_1 = arith.constant 0 : i32
    return %c0_i32, %arg0, %c0_i32_0 : i32, i32, i32
  }
  func.func @transform_9(%arg0: i32) -> (i32, i32) {
    %c0_i32 = arith.constant 0 : i32
    %c0_i32_0 = arith.constant 0 : i32
    %c0_i32_1 = arith.constant 0 : i32
    return %c0_i32, %c0_i32_0 : i32, i32
  }
  func.func @transform_10(%arg0: i32) -> (i32, i32) {
    %c0_i32 = arith.constant 0 : i32
    %c0_i32_0 = arith.constant 0 : i32
    %c0_i32_1 = arith.constant 0 : i32
    return %c0_i32, %c0_i32_0 : i32, i32
  }
  func.func @transform_11(%arg0: i32) -> (i32, i32) {
    %c0_i32 = arith.constant 0 : i32
    %c0_i32_0 = arith.constant 0 : i32
    return %arg0, %c0_i32 : i32, i32
  }
}

</mosaic_0001>

<bundles_post_ra>
// kernel: han_forward.6
= control target key start
LH: loop header
LB: loop body
LE: loop exit
PB: predicated region body
PF: predicated region fallthrough
CT: control target
= control target key end

     0   :  { %v946_v0 = vmov 0.0   ;;  %vm947_vm0 = vmmov 0   ;;  %vm34_vm1 = vcmask 261120   ;;  %vm124_vm2 = vcmask 785408   ;;  %s952_s18 = smov 112   ;;  %s953_s19 = smov 64   ;;  %s1163_s1 = inlined_call_operand.vmem [shape: f32[32,96], index: 1, kind: input, shape index: {}]   ;;  %s1164_s2 = inlined_call_operand.vmem [shape: f32[32,48], index: 2, kind: input, shape index: {}]   ;;  %s1165_s0 = inlined_call_operand.vmem [shape: f32[3,8,32], index: 0, kind: input, shape index: {}]   ;;  %s1166_s4 = inlined_call_operand.vmem [shape: f32[1,32], index: 4, kind: input, shape index: {}]   ;;  %s1167_s3 = inlined_call_operand.vmem [shape: f32[1,96], index: 3, kind: input, shape index: {}]   ;;  %s1168_s5 = inlined_call_operand.vmem [shape: f32[3,8,32], index: 5, kind: output, shape index: {}]  }
   0x1   :  { %842 = vmatprep.subr.mxu0 %v946_v0  ;;  %859 = vmatprep.subr.mxu1 %v946_v0  ;;  %v26_v1 = vld [vmem:[%s1163_s1 + $0x18] sm:$0xff]  ;;  %v129_v2 = vld [vmem:[%s1164_s2 + $0x8] sm:$0xff]  ;;  %v25_v3 = vld [vmem:[%s1163_s1 + $0x10] sm:$0xff]  ;;  %vm141_vm3 = vcmask 130048   ;;  %s954_s24 = smov 80   ;;  %vm359_vm4 = vcmask 261248  }
   0x2   :  { %843 = vmatpush3.msra.mxu0 %v26_v1  ;;  %860 = vmatpush3.msra.mxu1 %v129_v2  ;;  %v128_v4 = vld [vmem:[%s1164_s2] sm:$0xff]  ;;  %v24_v5 = vld [vmem:[%s1163_s1 + $0x8] sm:$0xff]  ;;  %v1007_v6 = vld [vmem:[%s1164_s2 + $0x18] sm:$0xff] }
   0x3   :  { %844 = vmatprep.subr.mxu0 %v946_v0  ;;  %861 = vmatprep.subr.mxu1 %v946_v0  ;;  %v23_v7 = vld [vmem:[%s1163_s1] sm:$0xff]  ;;  %v1021_v8 = vld [vmem:[%s1164_s2 + $0x10] sm:$0xff]  ;;  %s948_s2 = smov 32   ;;  %v21_v11 = vld [vmem:[%s1165_s0 + $0x8] sm:$0xff] }
   0x4   :  { %845 = vmatpush3.msra.mxu0 %v25_v3  ;;  %862 = vmatpush3.msra.mxu1 %v128_v4  ;;  %v20_v9 = vld [vmem:[%s1165_s0] sm:$0xff]  ;;  %v22_v12 = vld [vmem:[%s1165_s0 + $0x10] sm:$0xff]  ;;  %s950_s0 = smov 48  }
   0x5   :  { %863 = vmatprep.mubr.msk.f32.mxu1 %vm947_vm0, %v946_v0  ;;  %846 = vmatprep.subr.mxu0 %v946_v0  ;;  %v802_v10 = vld [vmem:[%s1166_s4] ss:$0 sm:$0xff]  ;;  %s949_s4 = smov 16  }
   0x6   :  { %864 = vmatmul.mubr.f32.vlgmr.msra.gmra.mxu1 %v946_v0  ;;  %866 = vmatprep.subr.mxu1 %v946_v0  ;;  %v798_v16 = vld [vmem:[%s1167_s3] ss:$0 sm:$0xff]  ;;  %s951_s3 = smov 96  }
   0x7   :  { %847 = vmatpush3.msra.mxu0 %v24_v5  ;;  %867 = vmatpush3.msra.mxu1 %v1007_v6 }
   0x8   :  { %848 = vmatprep.subr.mxu0 %v946_v0  ;;  %868 = vmatprep.subr.mxu1 %v946_v0 }
   0x9   :  { %849 = vmatpush3.msra.mxu0 %v23_v7  ;;  %850 = vmatprep.mubr.msk.f32.mxu0 %vm947_vm0, %v946_v0 }
   0xa   :  { %869 = vmatpush3.msra.mxu1 %v1021_v8  ;;  %870 = vmatprep.mubr.msk.f32.mxu1 %vm947_vm0, %v946_v0 }
   0xb   :  { %851 = vmatmul.mubr.msk.f32.vlgmr.msra.gmra.mxu0 %vm34_vm1, %v20_v9  ;;  %871 = vmatmul.mubr.f32.vlgmr.msra.gmra.mxu1 %v946_v0 }
   0xc   :  { %303 = vrot.lane.b32.xlu0 %v802_v10, %s948_s2  ;;  %853 = vmatprep.mubr.msk.f32.mxu0 %vm947_vm0, %v946_v0 }
   0xd   :  { %873 = vmatprep.subr.mxu1 %v946_v0  ;;  %877 = vmatprep.mubr.msk.f32.mxu1 %vm947_vm0, %v946_v0 }
   0xe   :  { %874 = vmatpush3.msra.mxu1 %v129_v2  ;;  %887 = vmatprep.subr.mxu0 %v946_v0 }
   0xf   :  { %854 = vmatmul.mubr.msk.f32.gmra.mxu0 %vm34_vm1, %v21_v11  ;;  %875 = vmatprep.subr.mxu1 %v946_v0 }
  0x10   :  { %318 = vrot.lane.b32.xlu0 %v802_v10, %s949_s4  ;;  %856 = vmatprep.mubr.msk.f32.mxu0 %vm947_vm0, %v946_v0 }
  0x11   :  { %876 = vmatpush3.msra.mxu1 %v128_v4  ;;  %888 = vmatpush3.msra.mxu0 %v129_v2 }
  0x12   :  { %880 = vmatprep.subr.mxu1 %v946_v0  ;;  %889 = vmatprep.subr.mxu0 %v946_v0 }
  0x13   :  { %857 = vmatmul.mubr.msk.f32.gmra.mxu0 %vm34_vm1, %v22_v12 }
  0x14   :  { %890 = vmatpush3.msra.mxu0 %v128_v4  ;;  %891 = vmatprep.mubr.msk.f32.mxu0 %vm947_vm0, %v946_v0 }
  0x7e   :  { %v1061_v13 = vpop.permute.xlu0 %303 }
  0x82   :  { %v1066_v17 = vpop.permute.xlu0 %318 }
  0xc6   :  { %v211_v14 = vpop.f32.mrf.mxu1 }
  0xc7   :  { %v306_v24 = vadd.f32 %v1061_v13, %v211_v14 }
  0xc8   :  { %v865_v15 = vpop.f32.mrf.mxu1 }
  0xcb   :  { %v110_v18 = vpop.f32.mrf.mxu0  ;;  %v281_v19 = vpop.f32.mrf.mxu1 }
  0xcc   :  { %v111_v20 = vadd.f32 %v798_v16, %v110_v18  ;;  %v321_v21 = vadd.f32 %v1066_v17, %v281_v19  ;;  %293 = vrot.lane.b32.xlu1 %v281_v19, %s950_s0 }
  0xcd   :  { %v872_v22 = vpop.f32.mrf.mxu1  ;;  %v852_v23 = vpop.f32.mrf.mxu0 }
  0xce   :  { %125 = vst.msk [vmem:[#allocation2] sm:$0xff] %vm124_vm2, %v111_v20  ;;  %323 = vrot.lane.b32.xlu0 %v321_v21, %s949_s4 }
  0xcf   :  { %v115_v25 = vpop.f32.mrf.mxu0 }
  0xd0   :  { %308 = vrot.lane.b32.xlu1 %v306_v24, %s951_s3  ;;  %v116_v26 = vadd.f32 %v798_v16, %v115_v25 }
  0xd1   :  { %v855_v27 = vpop.f32.mrf.mxu0 }
  0xd2   :  { %126 = vst.msk [vmem:[#allocation2 + $0x8] sm:$0xff] %vm124_vm2, %v116_v26 }
  0xd3   :  { %v120_v28 = vpop.f32.mrf.mxu0 }
  0xd4   :  { %v121_v29 = vadd.f32 %v798_v16, %v120_v28 }
  0xd5   :  { %v858_v30 = vpop.f32.mrf.mxu0  ;;  %v1076_v31 = vld [vmem:[#allocation2] sm:$0xff] }
  0xd6   :  { %127 = vst.msk [vmem:[#allocation2 + $0x10] sm:$0xff] %vm124_vm2, %v121_v29  ;;  %v285_v32 = vadd.f32 %v211_v14, %v1076_v31 }
  0xd8   :  { %v803_v33 = vmul.f32 -1.442695, %v285_v32 }
  0xda   :  { %910 = vpow2.f32 %v803_v33 }
  0xdd   :  { %v1079_v36 = vld [vmem:[#allocation2 + $0x10] sm:$0xff] }
  0xe7   :  { %v911_v34 = vpop.eup %910 }
  0xe8   :  { %v289_v35 = vadd.f32 1.0, %v911_v34 }
  0xea   :  { %912 = vrcp.f32 %v289_v35 }
  0xf7   :  { %v913_v40 = vpop.eup %912 }
  0xf8   :  { %v333_v54 = vsub.f32 1.0, %v913_v40  ;;  %v339_v56 = vmul.f32 0.0, %v913_v40 }
 0x13e   :  { %v294_v37 = vpop.permute.xlu1 %293 }
 0x13f   :  { %v296_v38 = vadd.f32 %v294_v37, %v1079_v36 }
 0x140   :  { %v324_v46 = vpop.permute.xlu0 %323 }
 0x141   :  { %v804_v39 = vmul.f32 -1.442695, %v296_v38 }
 0x142   :  { %v309_v41 = vpop.permute.xlu1 %308 }
 0x143   :  { %914 = vpow2.f32 %v804_v39  ;;  %v311_v42 = vmul.f32 %v913_v40, %v309_v41 }
 0x145   :  { %313 = vrot.lane.b32.xlu1 %v311_v42, %s948_s2 }
 0x150   :  { %v915_v43 = vpop.eup %914 }
 0x151   :  { %v300_v44 = vadd.f32 1.0, %v915_v43 }
 0x153   :  { %916 = vrcp.f32 %v300_v44 }
 0x160   :  { %v917_v45 = vpop.eup %916 }
 0x161   :  { %v326_v47 = vmul.f32 %v917_v45, %v324_v46  ;;  %v341_v59 = vsub.f32 1.0, %v917_v45  ;;  %v347_v61 = vmul.f32 0.0, %v917_v45 }
 0x163   :  { %328 = vrot.lane.b32.xlu0 %v326_v47, %s948_s2 }
 0x1b7   :  { %v314_v48 = vpop.permute.xlu1 %313 }
 0x1b8   :  { %v316_v49 = vadd.f32 %v314_v48, %v1076_v31 }
 0x1ba   :  { %918 = vtanh.f32 %v316_v49 }
 0x1c7   :  { %v919_v50 = vpop.eup %918 }
 0x1c8   :  { %335 = vrot.lane.b32.xlu1 %v919_v50, %s952_s18 }
 0x1d5   :  { %v329_v51 = vpop.permute.xlu0 %328 }
 0x1d6   :  { %v331_v52 = vadd.f32 %v329_v51, %v1079_v36 }
 0x1d8   :  { %920 = vtanh.f32 %v331_v52 }
 0x1e5   :  { %v921_v53 = vpop.eup %920 }
 0x1e6   :  { %343 = vrot.lane.b32.xlu0 %v921_v53, %s952_s18 }
 0x23a   :  { %v336_v55 = vpop.permute.xlu1 %335 }
 0x23b   :  { %v338_v57 = vmul.f32 %v336_v55, %v333_v54 }
 0x23d   :  { %v1088_v58 = vadd.f32 %v339_v56, %v338_v57 }
 0x23f   :  { %350 = vrot.lane.b32.xlu1 %v1088_v58, %s952_s18 }
 0x258   :  { %v344_v60 = vpop.permute.xlu0 %343 }
 0x259   :  { %v346_v62 = vmul.f32 %v344_v60, %v341_v59 }
 0x25b   :  { %v1092_v63 = vadd.f32 %v347_v61, %v346_v62 }
 0x25d   :  { %435 = vrot.lane.b32.xlu0 %v1092_v63, %s953_s19 }
 0x2b1   :  { %v351_v1 = vpop.permute.xlu1 %350 }
 0x2b2   :  { %353 = vst.msk [vmem:[%s1168_s5] sm:$0xff] %vm141_vm3, %v351_v1  ;;  %878 = vmatmul.mubr.msk.f32.vlgmr.msra.gmra.mxu1 %vm141_vm3, %v351_v1 }
 0x2b3   :  { %881 = vmatpush3.msra.mxu1 %v1007_v6  ;;  %884 = vmatprep.mubr.msk.f32.mxu1 %vm947_vm0, %v946_v0 }
 0x2b4   :  { %882 = vmatprep.subr.mxu1 %v946_v0 }
 0x2b5   :  { %883 = vmatpush3.msra.mxu1 %v1021_v8 }
 0x2b6   :  { %894 = vmatprep.subr.mxu1 %v946_v0 }
 0x2cf   :  { %v436_v2 = vpop.permute.xlu0 %435 }
 0x2d0   :  { %885 = vmatmul.mubr.msk.f32.vlgmr.msra.gmra.mxu1 %vm141_vm3, %v436_v2 }
 0x2d1   :  { %895 = vmatpush3.msra.mxu1 %v1007_v6  ;;  %898 = vmatprep.mubr.msk.f32.mxu1 %vm947_vm0, %v946_v0  ;;  %v362_v6 = vld [vmem:[#allocation2 + $0x8] sm:$0xff] }
 0x2d2   :  { %896 = vmatprep.subr.mxu1 %v946_v0 }
 0x2d3   :  { %897 = vmatpush3.msra.mxu1 %v1021_v8 }
 0x372   :  { %v431_v3 = vpop.f32.mrf.mxu1 }
 0x373   :  { %v527_v10 = vadd.f32 %v431_v3, %v1061_v13  ;;  %v509_v11 = vadd.f32 %v431_v3, %v362_v6 }
 0x374   :  { %v879_v4 = vpop.f32.mrf.mxu1 }
 0x375   :  { %v808_v12 = vmul.f32 -1.442695, %v509_v11 }
 0x377   :  { %922 = vpow2.f32 %v808_v12 }
 0x384   :  { %v923_v0 = vpop.eup %922 }
 0x385   :  { %v513_v8 = vadd.f32 1.0, %v923_v0 }
 0x387   :  { %924 = vrcp.f32 %v513_v8 }
 0x390   :  { %v505_v5 = vpop.f32.mrf.mxu1 }
 0x391   :  { %v539_v7 = vadd.f32 %v505_v5, %v1066_v17  ;;  %517 = vrot.lane.b32.xlu1 %v505_v5, %s950_s0 }
 0x392   :  { %v886_v9 = vpop.f32.mrf.mxu1 }
 0x393   :  { %541 = vrot.lane.b32.xlu0 %v539_v7, %s949_s4 }
 0x394   :  { %v925_v18 = vpop.eup %924 }
 0x395   :  { %529 = vrot.lane.b32.xlu1 %v527_v10, %s951_s3  ;;  %v551_v33 = vsub.f32 1.0, %v925_v18  ;;  %v557_v35 = vmul.f32 %v925_v18, %v1088_v58 }
 0x403   :  { %v518_v14 = vpop.permute.xlu1 %517 }
 0x404   :  { %v520_v15 = vadd.f32 %v518_v14, %v362_v6 }
 0x405   :  { %v542_v24 = vpop.permute.xlu0 %541 }
 0x406   :  { %v809_v16 = vmul.f32 -1.442695, %v520_v15 }
 0x407   :  { %v530_v19 = vpop.permute.xlu1 %529 }
 0x408   :  { %926 = vpow2.f32 %v809_v16  ;;  %v532_v20 = vmul.f32 %v925_v18, %v530_v19 }
 0x40a   :  { %534 = vrot.lane.b32.xlu1 %v532_v20, %s948_s2 }
 0x415   :  { %v927_v21 = vpop.eup %926 }
 0x416   :  { %v524_v22 = vadd.f32 1.0, %v927_v21 }
 0x418   :  { %928 = vrcp.f32 %v524_v22 }
 0x425   :  { %v929_v23 = vpop.eup %928 }
 0x426   :  { %v544_v25 = vmul.f32 %v929_v23, %v542_v24  ;;  %v559_v39 = vsub.f32 1.0, %v929_v23  ;;  %v565_v41 = vmul.f32 %v929_v23, %v1092_v63 }
 0x428   :  { %546 = vrot.lane.b32.xlu0 %v544_v25, %s948_s2 }
 0x47c   :  { %v535_v26 = vpop.permute.xlu1 %534 }
 0x47d   :  { %v537_v27 = vadd.f32 %v535_v26, %v362_v6 }
 0x47f   :  { %930 = vtanh.f32 %v537_v27 }
 0x48c   :  { %v931_v28 = vpop.eup %930 }
 0x48d   :  { %553 = vrot.lane.b32.xlu1 %v931_v28, %s952_s18 }
 0x49a   :  { %v547_v29 = vpop.permute.xlu0 %546 }
 0x49b   :  { %v549_v30 = vadd.f32 %v547_v29, %v362_v6 }
 0x49d   :  { %932 = vtanh.f32 %v549_v30 }
 0x4aa   :  { %v933_v32 = vpop.eup %932 }
 0x4ab   :  { %561 = vrot.lane.b32.xlu0 %v933_v32, %s952_s18 }
 0x4ff   :  { %v554_v34 = vpop.permute.xlu1 %553 }
 0x500   :  { %v556_v37 = vmul.f32 %v554_v34, %v551_v33 }
 0x502   :  { %v558_v38 = vadd.f32 %v557_v35, %v556_v37 }
 0x504   :  { %568 = vrot.lane.b32.xlu1 %v558_v38, %s952_s18 }
 0x51d   :  { %v562_v40 = vpop.permute.xlu0 %561 }
 0x51e   :  { %v564_v42 = vmul.f32 %v562_v40, %v559_v39 }
 0x520   :  { %v566_v43 = vadd.f32 %v565_v41, %v564_v42 }
 0x522   :  { %652 = vrot.lane.b32.xlu0 %v566_v43, %s953_s19 }
 0x576   :  { %v569_v44 = vpop.permute.xlu1 %568 }
 0x577   :  { %810 = vst.msk [vmem:[%s1168_s5 + $0x8] sm:$0xff] %vm141_vm3, %v569_v44  ;;  %892 = vmatmul.mubr.msk.f32.vlgmr.msra.gmra.mxu0 %vm141_vm3, %v569_v44 }
 0x594   :  { %v653_v45 = vpop.permute.xlu0 %652 }
 0x595   :  { %899 = vmatmul.mubr.msk.f32.vlgmr.msra.gmra.mxu1 %vm141_vm3, %v653_v45 }
 0x637   :  { %v648_v46 = vpop.f32.mrf.mxu0 }
 0x638   :  { %v744_v47 = vadd.f32 %v648_v46, %v1061_v13  ;;  %v726_v52 = vadd.f32 %v648_v46, %v1079_v36 }
 0x639   :  { %v893_v48 = vpop.f32.mrf.mxu0 }
 0x63a   :  { %746 = vrot.lane.b32.xlu1 %v744_v47, %s951_s3  ;;  %v814_v53 = vmul.f32 -1.442695, %v726_v52 }
 0x63c   :  { %934 = vpow2.f32 %v814_v53 }
 0x649   :  { %v935_v54 = vpop.eup %934 }
 0x64a   :  { %v730_v55 = vadd.f32 1.0, %v935_v54 }
 0x64c   :  { %936 = vrcp.f32 %v730_v55 }
 0x655   :  { %v722_v49 = vpop.f32.mrf.mxu1 }
 0x656   :  { %734 = vrot.lane.b32.xlu0 %v722_v49, %s950_s0  ;;  %v756_v51 = vadd.f32 %v722_v49, %v1066_v17 }
 0x657   :  { %v900_v50 = vpop.f32.mrf.mxu1 }
 0x659   :  { %v937_v56 = vpop.eup %936 }
 0x65a   :  { %758 = vrot.lane.b32.xlu0 %v756_v51, %s949_s4  ;;  %v768_v6 = vsub.f32 1.0, %v937_v56  ;;  %v774_v12 = vmul.f32 %v937_v56, %v558_v38 }
 0x6ac   :  { %v747_v13 = vpop.permute.xlu1 %746 }
 0x6ad   :  { %v749_v57 = vmul.f32 %v937_v56, %v747_v13 }
 0x6af   :  { %751 = vrot.lane.b32.xlu1 %v749_v57, %s948_s2 }
 0x6c8   :  { %v735_v58 = vpop.permute.xlu0 %734 }
 0x6c9   :  { %v737_v59 = vadd.f32 %v735_v58, %v1076_v31 }
 0x6cb   :  { %v815_v60 = vmul.f32 -1.442695, %v737_v59 }
 0x6cc   :  { %v759_v1 = vpop.permute.xlu0 %758 }
 0x6cd   :  { %938 = vpow2.f32 %v815_v60 }
 0x6da   :  { %v939_v17 = vpop.eup %938 }
 0x6db   :  { %v741_v61 = vadd.f32 1.0, %v939_v17 }
 0x6dd   :  { %940 = vrcp.f32 %v741_v61 }
 0x6ea   :  { %v941_v62 = vpop.eup %940 }
 0x6eb   :  { %v761_v2 = vmul.f32 %v941_v62, %v759_v1  ;;  %v782_v14 = vmul.f32 %v941_v62, %v566_v43 }
 0x6ed   :  { %763 = vrot.lane.b32.xlu0 %v761_v2, %s948_s2 }
 0x721   :  { %v752_v3 = vpop.permute.xlu1 %751 }
 0x722   :  { %v754_v4 = vadd.f32 %v752_v3, %v1079_v36 }
 0x724   :  { %942 = vtanh.f32 %v754_v4 }
 0x731   :  { %v943_v5 = vpop.eup %942 }
 0x732   :  { %770 = vrot.lane.b32.xlu1 %v943_v5, %s952_s18 }
 0x736   :  { %355 = vrot.lane.b32.xlu1 %v1092_v63, %s954_s24 }
 0x75f   :  { %v764_v7 = vpop.permute.xlu0 %763 }
 0x760   :  { %v766_v9 = vadd.f32 %v764_v7, %v1076_v31  ;;  %v776_v31 = vsub.f32 1.0, %v941_v62 }
 0x762   :  { %944 = vtanh.f32 %v766_v9 }
 0x76f   :  { %v945_v10 = vpop.eup %944 }
 0x770   :  { %778 = vrot.lane.b32.xlu0 %v945_v10, %s952_s18 }
 0x774   :  { %574 = vrot.lane.b32.xlu0 %v566_v43, %s954_s24 }
 0x7a4   :  { %v771_v11 = vpop.permute.xlu1 %770 }
 0x7a5   :  { %v773_v0 = vmul.f32 %v771_v11, %v768_v6 }
 0x7a7   :  { %v775_v36 = vadd.f32 %v774_v12, %v773_v0 }
 0x7a8   :  { %v356_v8 = vpop.permute.xlu1 %355 }
 0x7a9   :  { %805 = vst.msk [vmem:[%s1168_s5 + $0x10] sm:$0xff] %vm359_vm4, %v356_v8  ;;  %785 = vrot.lane.b32.xlu1 %v775_v36, %s952_s18 }
 0x7e2   :  { %v779_v63 = vpop.permute.xlu0 %778 }
 0x7e3   :  { %v781_v15 = vmul.f32 %v779_v63, %v776_v31 }
 0x7e5   :  { %v783_v16 = vadd.f32 %v782_v14, %v781_v15 }
 0x7e6   :  { %v575_v18 = vpop.permute.xlu0 %574 }
 0x7e7   :  { %811 = vst.msk [vmem:[%s1168_s5 + $0x8] sm:$0xff] %vm359_vm4, %v575_v18  ;;  %790 = vrot.lane.b32.xlu0 %v783_v16, %s954_s24 }
 0x81b   :  { %v786_v19 = vpop.permute.xlu1 %785 }
 0x81c   :  { %816 = vst.msk [vmem:[%s1168_s5 + $0x10] sm:$0xff] %vm141_vm3, %v786_v19 }
 0x859   :  { %v791_v20 = vpop.permute.xlu0 %790 }
 0x85a   :  { %793 = vst.msk [vmem:[%s1168_s5] sm:$0xff] %vm359_vm4, %v791_v20 }

// kernel: han_forward.7
= control target key start
LH: loop header
LB: loop body
LE: loop exit
PB: predicated region body
PF: predicated region fallthrough
CT: control target
= control target key end

     0   :  { %v1292_v0 = vmov 0.0   ;;  %vm1293_vm0 = vmmov 0   ;;  %vm52_vm1 = vcmask 261120   ;;  %vm142_vm2 = vcmask 785408   ;;  %s1298_s23 = smov 112   ;;  %s1299_s24 = smov 64   ;;  %s1627_s1 = inlined_call_operand.vmem [shape: f32[32,96], index: 1, kind: input, shape index: {}]   ;;  %s1628_s2 = inlined_call_operand.vmem [shape: f32[32,48], index: 2, kind: input, shape index: {}]   ;;  %s1629_s0 = inlined_call_operand.vmem [shape: f32[3,8,32], index: 0, kind: input, shape index: {}]   ;;  %s1630_s4 = inlined_call_operand.vmem [shape: f32[1,32], index: 4, kind: input, shape index: {}]   ;;  %s1631_s3 = inlined_call_operand.vmem [shape: f32[1,96], index: 3, kind: input, shape index: {}]   ;;  %s1632_s5 = inlined_call_operand.vmem [shape: f32[32,32], index: 5, kind: input, shape index: {}]   ;;  %s1633_s6 = inlined_call_operand.vmem [shape: f32[1,32], index: 6, kind: input, shape index: {}]   ;;  %s1634_s7 = inlined_call_operand.vmem [shape: f32[1,32], index: 7, kind: input, shape index: {}]   ;;  %s1635_s8 = inlined_call_operand.vmem [shape: f32[3,8,1], index: 8, kind: input, shape index: {}]   ;;  %s1636_s9 = inlined_call_operand.vmem [shape: f32[32,4], index: 9, kind: input, shape index: {}]   ;;  %s1637_s10 = inlined_call_operand.vmem [shape: f32[1,4], index: 10, kind: input, shape index: {}]   ;;  %s1638_s11 = inlined_call_operand.vmem [shape: f32[8,4], index: 11, kind: output, shape index: {}]  }
   0x1   :  { %1143 = vmatprep.subr.mxu0 %v1292_v0  ;;  %1160 = vmatprep.subr.mxu1 %v1292_v0  ;;  %v44_v1 = vld [vmem:[%s1627_s1 + $0x18] sm:$0xff]  ;;  %v1370_v2 = vld [vmem:[%s1628_s2 + $0x8] sm:$0xff]  ;;  %v43_v3 = vld [vmem:[%s1627_s1 + $0x10] sm:$0xff]  ;;  %vm159_vm3 = vcmask 130048   ;;  %s1300_s25 = smov 80   ;;  %vm377_vm4 = vcmask 261248  }
   0x2   :  { %1144 = vmatpush3.msra.mxu0 %v44_v1  ;;  %1161 = vmatpush3.msra.mxu1 %v1370_v2  ;;  %v1379_v4 = vld [vmem:[%s1628_s2] sm:$0xff]  ;;  %v42_v5 = vld [vmem:[%s1627_s1 + $0x8] sm:$0xff]  ;;  %v1390_v6 = vld [vmem:[%s1628_s2 + $0x18] sm:$0xff]  ;;  %vm957_vm7 = vcmask 7168   ;;  %vm1078_vm9 = vcmask 31744  }
   0x3   :  { %1145 = vmatprep.subr.mxu0 %v1292_v0  ;;  %1162 = vmatprep.subr.mxu1 %v1292_v0  ;;  %v41_v7 = vld [vmem:[%s1627_s1] sm:$0xff]  ;;  %v1404_v8 = vld [vmem:[%s1628_s2 + $0x10] sm:$0xff]  ;;  %s1294_s2 = smov 32   ;;  %v39_v11 = vld [vmem:[%s1629_s0 + $0x8] sm:$0xff] }
   0x4   :  { %1146 = vmatpush3.msra.mxu0 %v43_v3  ;;  %1163 = vmatpush3.msra.mxu1 %v1379_v4  ;;  %v38_v9 = vld [vmem:[%s1629_s0] sm:$0xff]  ;;  %v40_v12 = vld [vmem:[%s1629_s0 + $0x10] sm:$0xff]  ;;  %s1296_s0 = smov 48  }
   0x5   :  { %1164 = vmatprep.mubr.msk.f32.mxu1 %vm1293_vm0, %v1292_v0  ;;  %1147 = vmatprep.subr.mxu0 %v1292_v0  ;;  %v1088_v10 = vld [vmem:[%s1630_s4] ss:$0 sm:$0xff]  ;;  %s1295_s4 = smov 16  }
   0x6   :  { %1165 = vmatmul.mubr.f32.vlgmr.msra.gmra.mxu1 %v1292_v0  ;;  %1167 = vmatprep.subr.mxu1 %v1292_v0  ;;  %v1084_v16 = vld [vmem:[%s1631_s3] ss:$0 sm:$0xff]  ;;  %s1297_s3 = smov 96  }
   0x7   :  { %1148 = vmatpush3.msra.mxu0 %v42_v5  ;;  %1168 = vmatpush3.msra.mxu1 %v1390_v6 }
   0x8   :  { %1149 = vmatprep.subr.mxu0 %v1292_v0  ;;  %1169 = vmatprep.subr.mxu1 %v1292_v0 }
   0x9   :  { %1150 = vmatpush3.msra.mxu0 %v41_v7  ;;  %1151 = vmatprep.mubr.msk.f32.mxu0 %vm1293_vm0, %v1292_v0 }
   0xa   :  { %1170 = vmatpush3.msra.mxu1 %v1404_v8  ;;  %1171 = vmatprep.mubr.msk.f32.mxu1 %vm1293_vm0, %v1292_v0 }
   0xb   :  { %1152 = vmatmul.mubr.msk.f32.vlgmr.msra.gmra.mxu0 %vm52_vm1, %v38_v9  ;;  %1172 = vmatmul.mubr.f32.vlgmr.msra.gmra.mxu1 %v1292_v0 }
   0xc   :  { %321 = vrot.lane.b32.xlu0 %v1088_v10, %s1294_s2  ;;  %1154 = vmatprep.mubr.msk.f32.mxu0 %vm1293_vm0, %v1292_v0 }
   0xd   :  { %1174 = vmatprep.subr.mxu1 %v1292_v0  ;;  %1178 = vmatprep.mubr.msk.f32.mxu1 %vm1293_vm0, %v1292_v0 }
   0xe   :  { %1175 = vmatpush3.msra.mxu1 %v1370_v2  ;;  %1202 = vmatprep.subr.mxu0 %v1292_v0 }
   0xf   :  { %1155 = vmatmul.mubr.msk.f32.gmra.mxu0 %vm52_vm1, %v39_v11  ;;  %1176 = vmatprep.subr.mxu1 %v1292_v0 }
  0x10   :  { %336 = vrot.lane.b32.xlu0 %v1088_v10, %s1295_s4  ;;  %1157 = vmatprep.mubr.msk.f32.mxu0 %vm1293_vm0, %v1292_v0 }
  0x11   :  { %1177 = vmatpush3.msra.mxu1 %v1379_v4 }
  0x12   :  { %1181 = vmatprep.subr.mxu1 %v1292_v0 }
  0x13   :  { %1158 = vmatmul.mubr.msk.f32.gmra.mxu0 %vm52_vm1, %v40_v12 }
  0x14   :  { %1210 = vmatprep.mubr.msk.f32.mxu0 %vm1293_vm0, %v1292_v0 }
  0x7e   :  { %v1445_v13 = vpop.permute.xlu0 %321 }
  0x82   :  { %v1450_v17 = vpop.permute.xlu0 %336 }
  0xc6   :  { %v229_v14 = vpop.f32.mrf.mxu1 }
  0xc7   :  { %v324_v24 = vadd.f32 %v1445_v13, %v229_v14 }
  0xc8   :  { %v1166_v15 = vpop.f32.mrf.mxu1 }
  0xcb   :  { %v128_v18 = vpop.f32.mrf.mxu0  ;;  %v299_v19 = vpop.f32.mrf.mxu1 }
  0xcc   :  { %v129_v20 = vadd.f32 %v1084_v16, %v128_v18  ;;  %v339_v21 = vadd.f32 %v1450_v17, %v299_v19  ;;  %311 = vrot.lane.b32.xlu1 %v299_v19, %s1296_s0 }
  0xcd   :  { %v1173_v22 = vpop.f32.mrf.mxu1  ;;  %v1153_v23 = vpop.f32.mrf.mxu0 }
  0xce   :  { %143 = vst.msk [vmem:[#allocation2] sm:$0xff] %vm142_vm2, %v129_v20  ;;  %341 = vrot.lane.b32.xlu0 %v339_v21, %s1295_s4 }
  0xcf   :  { %v133_v25 = vpop.f32.mrf.mxu0 }
  0xd0   :  { %326 = vrot.lane.b32.xlu1 %v324_v24, %s1297_s3  ;;  %v134_v26 = vadd.f32 %v1084_v16, %v133_v25 }
  0xd1   :  { %v1156_v27 = vpop.f32.mrf.mxu0 }
  0xd2   :  { %144 = vst.msk [vmem:[#allocation2 + $0x8] sm:$0xff] %vm142_vm2, %v134_v26 }
  0xd3   :  { %v138_v28 = vpop.f32.mrf.mxu0 }
  0xd4   :  { %v139_v29 = vadd.f32 %v1084_v16, %v138_v28 }
  0xd5   :  { %v1159_v30 = vpop.f32.mrf.mxu0  ;;  %v1460_v31 = vld [vmem:[#allocation2] sm:$0xff] }
  0xd6   :  { %145 = vst.msk [vmem:[#allocation2 + $0x10] sm:$0xff] %vm142_vm2, %v139_v29  ;;  %v303_v32 = vadd.f32 %v229_v14, %v1460_v31 }
  0xd8   :  { %v1089_v33 = vmul.f32 -1.442695, %v303_v32 }
  0xd9   :  { %v380_v12 = vld [vmem:[#allocation2 + $0x8] sm:$0xff] }
  0xda   :  { %1242 = vpow2.f32 %v1089_v33 }
  0xdd   :  { %v1463_v36 = vld [vmem:[#allocation2 + $0x10] sm:$0xff] }
  0xe7   :  { %v1243_v34 = vpop.eup %1242 }
  0xe8   :  { %v307_v35 = vadd.f32 1.0, %v1243_v34 }
  0xea   :  { %1244 = vrcp.f32 %v307_v35 }
  0xf7   :  { %v1245_v40 = vpop.eup %1244 }
  0xf8   :  { %v351_v54 = vsub.f32 1.0, %v1245_v40  ;;  %v357_v56 = vmul.f32 0.0, %v1245_v40 }
 0x13e   :  { %v312_v37 = vpop.permute.xlu1 %311 }
 0x13f   :  { %v314_v38 = vadd.f32 %v312_v37, %v1463_v36 }
 0x140   :  { %v342_v46 = vpop.permute.xlu0 %341 }
 0x141   :  { %v1090_v39 = vmul.f32 -1.442695, %v314_v38 }
 0x142   :  { %v327_v41 = vpop.permute.xlu1 %326 }
 0x143   :  { %1246 = vpow2.f32 %v1090_v39  ;;  %v329_v42 = vmul.f32 %v1245_v40, %v327_v41 }
 0x145   :  { %331 = vrot.lane.b32.xlu1 %v329_v42, %s1294_s2 }
 0x150   :  { %v1247_v43 = vpop.eup %1246 }
 0x151   :  { %v318_v44 = vadd.f32 1.0, %v1247_v43 }
 0x153   :  { %1248 = vrcp.f32 %v318_v44 }
 0x160   :  { %v1249_v45 = vpop.eup %1248 }
 0x161   :  { %v344_v47 = vmul.f32 %v1249_v45, %v342_v46  ;;  %v359_v59 = vsub.f32 1.0, %v1249_v45  ;;  %v365_v61 = vmul.f32 0.0, %v1249_v45 }
 0x163   :  { %346 = vrot.lane.b32.xlu0 %v344_v47, %s1294_s2 }
 0x1b7   :  { %v332_v48 = vpop.permute.xlu1 %331 }
 0x1b8   :  { %v334_v49 = vadd.f32 %v332_v48, %v1460_v31 }
 0x1ba   :  { %1250 = vtanh.f32 %v334_v49 }
 0x1c7   :  { %v1251_v50 = vpop.eup %1250 }
 0x1c8   :  { %353 = vrot.lane.b32.xlu1 %v1251_v50, %s1298_s23 }
 0x1d5   :  { %v347_v51 = vpop.permute.xlu0 %346 }
 0x1d6   :  { %v349_v52 = vadd.f32 %v347_v51, %v1463_v36 }
 0x1d8   :  { %1252 = vtanh.f32 %v349_v52 }
 0x1e5   :  { %v1253_v53 = vpop.eup %1252 }
 0x1e6   :  { %361 = vrot.lane.b32.xlu0 %v1253_v53, %s1298_s23 }
 0x23a   :  { %v354_v55 = vpop.permute.xlu1 %353 }
 0x23b   :  { %v356_v57 = vmul.f32 %v354_v55, %v351_v54 }
 0x23d   :  { %v1472_v58 = vadd.f32 %v357_v56, %v356_v57 }
 0x23f   :  { %368 = vrot.lane.b32.xlu1 %v1472_v58, %s1298_s23 }
 0x258   :  { %v362_v60 = vpop.permute.xlu0 %361 }
 0x259   :  { %v364_v62 = vmul.f32 %v362_v60, %v359_v59 }
 0x25b   :  { %v1476_v63 = vadd.f32 %v365_v61, %v364_v62 }
 0x25d   :  { %453 = vrot.lane.b32.xlu0 %v1476_v63, %s1299_s24 }
 0x2b1   :  { %v369_v1 = vpop.permute.xlu1 %368 }
 0x2b2   :  { %371 = vst.msk [vmem:[#allocation3] sm:$0xff] %vm159_vm3, %v369_v1  ;;  %1179 = vmatmul.mubr.msk.f32.vlgmr.msra.gmra.mxu1 %vm159_vm3, %v369_v1 }
 0x2b3   :  { %1182 = vmatpush3.msra.mxu1 %v1390_v6  ;;  %1185 = vmatprep.mubr.msk.f32.mxu1 %vm1293_vm0, %v1292_v0 }
 0x2b4   :  { %1183 = vmatprep.subr.mxu1 %v1292_v0 }
 0x2b5   :  { %1184 = vmatpush3.msra.mxu1 %v1404_v8 }
 0x2b6   :  { %1188 = vmatprep.subr.mxu1 %v1292_v0 }
 0x2cf   :  { %v454_v3 = vpop.permute.xlu0 %453 }
 0x2d0   :  { %1186 = vmatmul.mubr.msk.f32.vlgmr.msra.gmra.mxu1 %vm159_vm3, %v454_v3 }
 0x2d1   :  { %1189 = vmatpush3.msra.mxu1 %v1370_v2  ;;  %1192 = vmatprep.mubr.msk.f32.mxu1 %vm1293_vm0, %v1292_v0 }
 0x2d2   :  { %1190 = vmatprep.subr.mxu1 %v1292_v0 }
 0x2d3   :  { %1191 = vmatpush3.msra.mxu1 %v1379_v4 }
 0x2d4   :  { %1195 = vmatprep.subr.mxu1 %v1292_v0 }
 0x372   :  { %v449_v5 = vpop.f32.mrf.mxu1 }
 0x373   :  { %v545_v7 = vadd.f32 %v449_v5, %v1445_v13  ;;  %v527_v14 = vadd.f32 %v449_v5, %v380_v12 }
 0x374   :  { %v1180_v9 = vpop.f32.mrf.mxu1 }
 0x375   :  { %547 = vrot.lane.b32.xlu0 %v545_v7, %s1297_s3  ;;  %v1093_v15 = vmul.f32 -1.442695, %v527_v14  ;;  %v818_v14 = vld [vmem:[%s1632_s5 + $0x18] sm:$0xff] }
 0x376   :  { %1203 = vmatpush3.msra.mxu0 %v818_v14 }
 0x377   :  { %1254 = vpow2.f32 %v1093_v15  ;;  %1204 = vmatprep.subr.mxu0 %v1292_v0 }
 0x384   :  { %v1255_v4 = vpop.eup %1254 }
 0x385   :  { %v531_v16 = vadd.f32 1.0, %v1255_v4 }
 0x387   :  { %1256 = vrcp.f32 %v531_v16 }
 0x390   :  { %v523_v10 = vpop.f32.mrf.mxu1 }
 0x391   :  { %535 = vrot.lane.b32.xlu1 %v523_v10, %s1296_s0  ;;  %v557_v2 = vadd.f32 %v523_v10, %v1450_v17 }
 0x392   :  { %v1187_v11 = vpop.f32.mrf.mxu1 }
 0x394   :  { %v1257_v18 = vpop.eup %1256 }
 0x395   :  { %559 = vrot.lane.b32.xlu1 %v557_v2, %s1295_s4  ;;  %v569_v37 = vsub.f32 1.0, %v1257_v18  ;;  %v575_v39 = vmul.f32 %v1257_v18, %v1472_v58 }
 0x3e7   :  { %v548_v19 = vpop.permute.xlu0 %547 }
 0x3e8   :  { %v550_v20 = vmul.f32 %v1257_v18, %v548_v19 }
 0x3ea   :  { %552 = vrot.lane.b32.xlu0 %v550_v20, %s1294_s2  ;;  %v816_v20 = vld [vmem:[%s1632_s5 + $0x8] sm:$0xff] }
 0x403   :  { %v536_v21 = vpop.permute.xlu1 %535 }
 0x404   :  { %v538_v22 = vadd.f32 %v536_v21, %v380_v12  ;;  %v815_v21 = vld [vmem:[%s1632_s5] sm:$0xff] }
 0x406   :  { %v1094_v23 = vmul.f32 -1.442695, %v538_v22 }
 0x407   :  { %v560_v27 = vpop.permute.xlu1 %559 }
 0x408   :  { %1258 = vpow2.f32 %v1094_v23 }
 0x415   :  { %v1259_v24 = vpop.eup %1258 }
 0x416   :  { %v542_v25 = vadd.f32 1.0, %v1259_v24 }
 0x418   :  { %1260 = vrcp.f32 %v542_v25 }
 0x425   :  { %v1261_v26 = vpop.eup %1260 }
 0x426   :  { %v562_v28 = vmul.f32 %v1261_v26, %v560_v27  ;;  %v577_v42 = vsub.f32 1.0, %v1261_v26  ;;  %v583_v44 = vmul.f32 %v1261_v26, %v1476_v63 }
 0x428   :  { %564 = vrot.lane.b32.xlu1 %v562_v28, %s1294_s2 }
 0x45c   :  { %v553_v29 = vpop.permute.xlu0 %552 }
 0x45d   :  { %v555_v30 = vadd.f32 %v553_v29, %v380_v12 }
 0x45f   :  { %1262 = vtanh.f32 %v555_v30 }
 0x46c   :  { %v1263_v32 = vpop.eup %1262 }
 0x46d   :  { %571 = vrot.lane.b32.xlu0 %v1263_v32, %s1298_s23 }
 0x49a   :  { %v565_v33 = vpop.permute.xlu1 %564 }
 0x49b   :  { %v567_v34 = vadd.f32 %v565_v33, %v380_v12  ;;  %v1099_v33 = vld [vmem:[%s1633_s6] ss:$0 sm:$0xff] }
 0x49d   :  { %1264 = vtanh.f32 %v567_v34 }
 0x4aa   :  { %v1265_v35 = vpop.eup %1264 }
 0x4ab   :  { %579 = vrot.lane.b32.xlu1 %v1265_v35, %s1298_s23 }
 0x4df   :  { %v572_v38 = vpop.permute.xlu0 %571 }
 0x4e0   :  { %v574_v40 = vmul.f32 %v572_v38, %v569_v37 }
 0x4e2   :  { %v1505_v41 = vadd.f32 %v575_v39, %v574_v40 }
 0x4e4   :  { %586 = vrot.lane.b32.xlu0 %v1505_v41, %s1298_s23 }
 0x51d   :  { %v580_v43 = vpop.permute.xlu1 %579 }
 0x51e   :  { %v582_v45 = vmul.f32 %v580_v43, %v577_v42 }
 0x520   :  { %v1510_v46 = vadd.f32 %v583_v44, %v582_v45  ;;  %v1103_v44 = vld [vmem:[%s1634_s7] ss:$0 sm:$0xff] }
 0x522   :  { %670 = vrot.lane.b32.xlu1 %v1510_v46, %s1299_s24 }
 0x556   :  { %v587_v47 = vpop.permute.xlu0 %586 }
 0x557   :  { %590 = vst.msk [vmem:[#allocation3 + $0x8] sm:$0xff] %vm159_vm3, %v587_v47  ;;  %1193 = vmatmul.mubr.msk.f32.vlgmr.msra.gmra.mxu1 %vm159_vm3, %v587_v47 }
 0x558   :  { %1196 = vmatpush3.msra.mxu1 %v1390_v6  ;;  %1199 = vmatprep.mubr.msk.f32.mxu1 %vm1293_vm0, %v1292_v0 }
 0x559   :  { %1197 = vmatprep.subr.mxu1 %v1292_v0 }
 0x55a   :  { %1198 = vmatpush3.msra.mxu1 %v1404_v8 }
 0x55b   :  { %1219 = vmatprep.subr.mxu1 %v1292_v0 }
 0x594   :  { %v671_v48 = vpop.permute.xlu1 %670 }
 0x595   :  { %1200 = vmatmul.mubr.msk.f32.vlgmr.msra.gmra.mxu1 %vm159_vm3, %v671_v48 }
 0x596   :  { %1227 = vmatprep.mubr.msk.f32.mxu1 %vm1293_vm0, %v1292_v0 }
 0x617   :  { %v666_v49 = vpop.f32.mrf.mxu1 }
 0x618   :  { %v762_v53 = vadd.f32 %v666_v49, %v1445_v13  ;;  %v744_v8 = vadd.f32 %v666_v49, %v1463_v36 }
 0x619   :  { %v1194_v50 = vpop.f32.mrf.mxu1 }
 0x61a   :  { %v1097_v54 = vmul.f32 -1.442695, %v744_v8 }
 0x61c   :  { %1266 = vpow2.f32 %v1097_v54 }
 0x629   :  { %v1267_v55 = vpop.eup %1266 }
 0x62a   :  { %v748_v56 = vadd.f32 1.0, %v1267_v55 }
 0x62c   :  { %1268 = vrcp.f32 %v748_v56 }
 0x639   :  { %v1269_v59 = vpop.eup %1268 }
 0x63a   :  { %v792_v4 = vmul.f32 %v1269_v59, %v1505_v41 }
 0x655   :  { %v740_v51 = vpop.f32.mrf.mxu1 }
 0x656   :  { %v774_v6 = vadd.f32 %v740_v51, %v1450_v17  ;;  %752 = vrot.lane.b32.xlu0 %v740_v51, %s1296_s0 }
 0x657   :  { %v1201_v52 = vpop.f32.mrf.mxu1 }
 0x658   :  { %776 = vrot.lane.b32.xlu1 %v774_v6, %s1295_s4 }
 0x65a   :  { %764 = vrot.lane.b32.xlu0 %v762_v53, %s1297_s3  ;;  %v1301_v53 = vmov 0  }
 0x65b   :  { %1241 = vset.pattern.permute.xlu0 %v1301_v53  ;;  %1240 = vset.pattern.permute.xlu1 %v1301_v53 }
 0x6c8   :  { %v753_v57 = vpop.permute.xlu0 %752 }
 0x6c9   :  { %v755_v58 = vadd.f32 %v753_v57, %v1460_v31 }
 0x6ca   :  { %v777_v3 = vpop.permute.xlu1 %776 }
 0x6cb   :  { %v1098_v17 = vmul.f32 -1.442695, %v755_v58 }
 0x6cc   :  { %v765_v60 = vpop.permute.xlu0 %764 }
 0x6cd   :  { %1270 = vpow2.f32 %v1098_v17  ;;  %v767_v61 = vmul.f32 %v1269_v59, %v765_v60 }
 0x6cf   :  { %769 = vrot.lane.b32.xlu0 %v767_v61, %s1294_s2 }
 0x6da   :  { %v1271_v13 = vpop.eup %1270 }
 0x6db   :  { %v759_v62 = vadd.f32 1.0, %v1271_v13 }
 0x6dd   :  { %1272 = vrcp.f32 %v759_v62  ;;  %v948_v62 = vld [vmem:[%s1635_s8] sm:$0xff] }
 0x6de   :  { %vm951_vm5 = vcmp.ne.f32.partialorder %v948_v62, 0.0 }
 0x6ea   :  { %v1273_v1 = vpop.eup %1272 }
 0x6eb   :  { %v779_v5 = vmul.f32 %v1273_v1, %v777_v3  ;;  %v794_v22 = vsub.f32 1.0, %v1273_v1  ;;  %v800_v24 = vmul.f32 %v1273_v1, %v1510_v46  ;;  %v949_v1 = vld [vmem:[%s1635_s8 + $0x8] sm:$0xff]  ;;  %v950_v3 = vld [vmem:[%s1635_s8 + $0x10] sm:$0xff] }
 0x6ec   :  { %vm952_vm6 = vcmp.ne.f32.partialorder %v949_v1, 0.0  ;;  %vm953_vm8 = vcmp.ne.f32.partialorder %v950_v3, 0.0 }
 0x6ed   :  { %781 = vrot.lane.b32.xlu1 %v779_v5, %s1294_s2 }
 0x741   :  { %v770_v7 = vpop.permute.xlu0 %769 }
 0x742   :  { %v772_v9 = vadd.f32 %v770_v7, %v1463_v36  ;;  %v786_v36 = vsub.f32 1.0, %v1269_v59 }
 0x744   :  { %1274 = vtanh.f32 %v772_v9 }
 0x751   :  { %v1275_v10 = vpop.eup %1274 }
 0x752   :  { %788 = vrot.lane.b32.xlu0 %v1275_v10, %s1298_s23 }
 0x756   :  { %592 = vrot.lane.b32.xlu0 %v1510_v46, %s1300_s25 }
 0x75f   :  { %v782_v11 = vpop.permute.xlu1 %781 }
 0x760   :  { %v784_v2 = vadd.f32 %v782_v11, %v1460_v31  ;;  %v817_v31 = vld [vmem:[%s1632_s5 + $0x10] sm:$0xff] }
 0x761   :  { %1205 = vmatpush3.msra.mxu0 %v817_v31 }
 0x762   :  { %1276 = vtanh.f32 %v784_v2  ;;  %1206 = vmatprep.subr.mxu0 %v1292_v0 }
 0x763   :  { %1207 = vmatpush3.msra.mxu0 %v816_v20 }
 0x764   :  { %1208 = vmatprep.subr.mxu0 %v1292_v0 }
 0x765   :  { %1209 = vmatpush3.msra.mxu0 %v815_v21 }
 0x76f   :  { %v1277_v12 = vpop.eup %1276 }
 0x770   :  { %796 = vrot.lane.b32.xlu1 %v1277_v12, %s1298_s23 }
 0x7c4   :  { %v789_v15 = vpop.permute.xlu0 %788 }
 0x7c5   :  { %v791_v16 = vmul.f32 %v789_v15, %v786_v36 }
 0x7c7   :  { %v793_v18 = vadd.f32 %v792_v4, %v791_v16 }
 0x7c8   :  { %v593_v19 = vpop.permute.xlu0 %592 }
 0x7c9   :  { %595 = vst.msk [vmem:[#allocation3 + $0x8] sm:$0xff] %vm377_vm4, %v593_v19  ;;  %803 = vrot.lane.b32.xlu0 %v793_v18, %s1298_s23 }
 0x7d0   :  { %v1571_v32 = vld [vmem:[#allocation3 + $0x8] sm:$0xff] }
 0x7e2   :  { %v797_v23 = vpop.permute.xlu1 %796 }
 0x7e3   :  { %v799_v25 = vmul.f32 %v797_v23, %v794_v22  ;;  %v997_v23 = vld [vmem:[%s1636_s9 + $0x18] sm:$0xff] }
 0x7e4   :  { %1220 = vmatpush3.msra.mxu1 %v997_v23 }
 0x7e5   :  { %v801_v26 = vadd.f32 %v800_v24, %v799_v25  ;;  %v996_v24 = vld [vmem:[%s1636_s9 + $0x10] sm:$0xff]  ;;  %1221 = vmatprep.subr.mxu1 %v1292_v0 }
 0x7e6   :  { %1222 = vmatpush3.msra.mxu1 %v996_v24 }
 0x7e7   :  { %808 = vrot.lane.b32.xlu1 %v801_v26, %s1300_s25  ;;  %v995_v26 = vld [vmem:[%s1636_s9 + $0x8] sm:$0xff]  ;;  %1223 = vmatprep.subr.mxu1 %v1292_v0 }
 0x7e8   :  { %1224 = vmatpush3.msra.mxu1 %v995_v26 }
 0x7e9   :  { %1225 = vmatprep.subr.mxu1 %v1292_v0 }
 0x7eb   :  { %373 = vrot.lane.b32.xlu1 %v1476_v63, %s1300_s25 }
 0x83b   :  { %v804_v29 = vpop.permute.xlu0 %803 }
 0x859   :  { %v809_v27 = vpop.permute.xlu1 %808 }
 0x85a   :  { %811 = vst.msk [vmem:[#allocation3] sm:$0xff] %vm377_vm4, %v809_v27  ;;  %v994_v27 = vld [vmem:[%s1636_s9] sm:$0xff] }
 0x85b   :  { %1226 = vmatpush3.msra.mxu1 %v994_v27 }
 0x85d   :  { %v374_v28 = vpop.permute.xlu1 %373 }
 0x85e   :  { %378 = vst.msk [vmem:[#allocation3 + $0x10] sm:$0xff] %vm377_vm4, %v374_v28 }
 0x85f   :  { %806 = vst.msk [vmem:[#allocation3 + $0x10] sm:$0xff] %vm159_vm3, %v804_v29 }
 0x861   :  { %v1565_v30 = vld [vmem:[#allocation3] sm:$0xff] }
 0x862   :  { %1211 = vmatmul.mubr.msk.f32.vlgmr.msra.gmra.mxu0 %vm52_vm1, %v1565_v30 }
 0x863   :  { %1213 = vmatprep.mubr.msk.f32.mxu0 %vm1293_vm0, %v1292_v0 }
 0x866   :  { %1214 = vmatmul.mubr.msk.f32.gmra.mxu0 %vm52_vm1, %v1571_v32  ;;  %v1577_v63 = vld [vmem:[#allocation3 + $0x10] sm:$0xff] }
 0x867   :  { %1216 = vmatprep.mubr.msk.f32.mxu0 %vm1293_vm0, %v1292_v0  ;;  %v1104_v0 = vld [vmem:[%s1637_s10] ss:$0 sm:$0xff] }
 0x86a   :  { %1217 = vmatmul.mubr.msk.f32.gmra.mxu0 %vm52_vm1, %v1577_v63 }
 0x922   :  { %v901_v34 = vpop.f32.mrf.mxu0 }
 0x923   :  { %v902_v35 = vadd.f32 %v1099_v33, %v901_v34 }
 0x924   :  { %v1212_v37 = vpop.f32.mrf.mxu0 }
 0x925   :  { %1278 = vtanh.f32 %v902_v35 }
 0x926   :  { %v906_v38 = vpop.f32.mrf.mxu0 }
 0x927   :  { %v907_v39 = vadd.f32 %v1099_v33, %v906_v38 }
 0x928   :  { %v1215_v40 = vpop.f32.mrf.mxu0 }
 0x929   :  { %1280 = vtanh.f32 %v907_v39 }
 0x92a   :  { %v911_v41 = vpop.f32.mrf.mxu0 }
 0x92b   :  { %v912_v42 = vadd.f32 %v1099_v33, %v911_v41 }
 0x92c   :  { %v1218_v43 = vpop.f32.mrf.mxu0 }
 0x92d   :  { %1282 = vtanh.f32 %v912_v42 }
 0x932   :  { %v1279_v45 = vpop.eup %1278 }
 0x933   :  { %v925_v46 = vmul.f32 %v1279_v45, %v1103_v44 }
 0x935   :  { %v928_v47 = vsel %vm52_vm1, %v925_v46, 0.0 }
 0x936   :  { %v1281_v48 = vpop.eup %1280  ;;  %929 = vadd.xlane.f32.xlu1 %v928_v47 }
 0x937   :  { %v926_v49 = vmul.f32 %v1281_v48, %v1103_v44 }
 0x939   :  { %v931_v50 = vsel %vm52_vm1, %v926_v49, 0.0 }
 0x93a   :  { %v1283_v51 = vpop.eup %1282  ;;  %932 = vadd.xlane.f32.xlu0 %v931_v50 }
 0x93b   :  { %v927_v6 = vmul.f32 %v1283_v51, %v1103_v44 }
 0x93d   :  { %v934_v52 = vsel %vm52_vm1, %v927_v6, 0.0 }
 0x93e   :  { %935 = vadd.xlane.f32.xlu0 %v934_v52 }
 0x9bf   :  { %v930_v54 = vpop.xlane.xlu1 %929 }
 0x9c3   :  { %v933_v8 = vpop.xlane.xlu0 %932 }
 0x9c4   :  { %v937_v55 = vmax.f32 %v930_v54, %v933_v8 }
 0x9c7   :  { %v936_v56 = vpop.xlane.xlu0 %935 }
 0x9c8   :  { %v938_v57 = vmax.f32 %v937_v55, %v936_v56 }
 0x9ca   :  { %v939_v58 = vsub.f32 %v930_v54, %v938_v57  ;;  %v940_v17 = vsub.f32 %v933_v8, %v938_v57  ;;  %v941_v59 = vsub.f32 %v936_v56, %v938_v57 }
 0x9cc   :  { %v942_v60 = vmul.f32 1.442695, %v939_v58  ;;  %v944_v61 = vmul.f32 1.442695, %v940_v17  ;;  %v946_v13 = vmul.f32 1.442695, %v941_v59 }
 0x9ce   :  { %1284 = vpow2.f32 %v942_v60 }
 0x9cf   :  { %1286 = vpow2.f32 %v944_v61 }
 0x9d0   :  { %1288 = vpow2.f32 %v946_v13 }
 0x9db   :  { %v1285_v5 = vpop.eup %1284 }
 0x9dc   :  { %v1287_v7 = vpop.eup %1286  ;;  %v954_v9 = vsel %vm951_vm5, %v1285_v5, 0.0 }
 0x9dd   :  { %v1289_v10 = vpop.eup %1288  ;;  %v955_v11 = vsel %vm952_vm6, %v1287_v7, 0.0  ;;  %v958_v2 = vsel %vm957_vm7, %v954_v9, 0.0  ;;  %v963_v12 = vadd.f32 %v1287_v7, %v1285_v5 }
 0x9de   :  { %v956_v14 = vsel %vm953_vm8, %v1289_v10, 0.0  ;;  %v959_v36 = vsel %vm957_vm7, %v955_v11, 0.0 }
 0x9df   :  { %v960_v15 = vadd.f32 %v959_v36, %v958_v2  ;;  %v964_v4 = vadd.f32 %v1289_v10, %v963_v12  ;;  %v961_v16 = vsel %vm957_vm7, %v956_v14, 0.0 }
 0x9e1   :  { %v962_v18 = vadd.f32 %v961_v16, %v960_v15  ;;  %v965_v19 = vmul.f32 0.0001, %v964_v4 }
 0x9e3   :  { %v966_v31 = vadd.f32 %v965_v19, %v962_v18 }
 0x9e5   :  { %1290 = vrcp.f32 %v966_v31 }
 0x9f2   :  { %v1291_v20 = vpop.eup %1290 }
 0x9f3   :  { %v969_v21 = vmul.f32 %v1291_v20, %v955_v11  ;;  %v968_v22 = vmul.f32 %v1291_v20, %v954_v9  ;;  %v970_v25 = vmul.f32 %v1291_v20, %v956_v14 }
 0x9f5   :  { %978 = vperm.xlu0 %1241, %v969_v21   ;;  %973 = vperm.xlu1 %1240, %v968_v22  }
 0x9f9   :  { %983 = vperm.xlu1 %1240, %v970_v25  }
 0xa70   :  { %v979_v28 = vpop.permute.xlu0 %978  ;;  %v974_v29 = vpop.permute.xlu1 %973 }
 0xa71   :  { %v987_v33 = vmul.f32 %v979_v28, %v1571_v32  ;;  %v986_v34 = vmul.f32 %v974_v29, %v1565_v30 }
 0xa73   :  { %v990_v35 = vsel %vm52_vm1, %v987_v33, 0.0  ;;  %v989_v37 = vsel %vm52_vm1, %v986_v34, 0.0 }
 0xa74   :  { %v984_v38 = vpop.permute.xlu1 %983  ;;  %v991_v40 = vadd.f32 %v990_v35, %v989_v37 }
 0xa75   :  { %v988_v39 = vmul.f32 %v984_v38, %v1577_v63 }
 0xa77   :  { %v992_v41 = vsel %vm52_vm1, %v988_v39, 0.0 }
 0xa78   :  { %v993_v42 = vadd.f32 %v992_v41, %v991_v40 }
 0xa7a   :  { %1228 = vmatmul.mubr.msk.f32.vlgmr.msra.gmra.mxu1 %vm52_vm1, %v993_v42 }
 0xb3a   :  { %v1074_v32 = vpop.f32.mrf.mxu1 }
 0xb3b   :  { %v1075_v30 = vadd.f32 %v1104_v0, %v1074_v32 }
 0xb3c   :  { %v1229_v43 = vpop.f32.mrf.mxu1 }
 0xb3d   :  { %1079 = vst.msk [vmem:[%s1638_s11] sm:$0xff] %vm1078_vm9, %v1075_v30 }

// kernel: han_forward.4
= control target key start
LH: loop header
LB: loop body
LE: loop exit
PB: predicated region body
PF: predicated region fallthrough
CT: control target
= control target key end

     0   :  { %v2281_v0 = vmov 0.0   ;;  %vm2282_vm0 = vmmov 0   ;;  %vm37_vm1 = vcmask 130048   ;;  %s2284_s17 = smov 16   ;;  %vm167_vm2 = vcmask 785408   ;;  %s2285_s23 = smov 48   ;;  %s2780_s1 = inlined_call_operand.vmem [shape: f32[16,96], index: 1, kind: input, shape index: {}]   ;;  %s2781_s2 = inlined_call_operand.vmem [shape: f32[32,48], index: 2, kind: input, shape index: {}]   ;;  %s2782_s0 = inlined_call_operand.vmem [shape: f32[8,8,16], index: 0, kind: input, shape index: {}]   ;;  %s2783_s4 = inlined_call_operand.vmem [shape: f32[1,32], index: 4, kind: input, shape index: {}]   ;;  %s2784_s3 = inlined_call_operand.vmem [shape: f32[1,96], index: 3, kind: input, shape index: {}]   ;;  %s2785_s5 = inlined_call_operand.vmem [shape: f32[8,8,32], index: 5, kind: output, shape index: {}]  }
   0x1   :  { %2064 = vmatprep.subr.mxu1 %v2281_v0  ;;  %v29_v1 = vld [vmem:[%s2780_s1 + $0x8] sm:$0xff]  ;;  %v28_v3 = vld [vmem:[%s2780_s1] sm:$0xff]  ;;  %2068 = vmatprep.mubr.msk.f32.mxu1 %vm2282_vm0, %v2281_v0  ;;  %v2351_v7 = vld [vmem:[%s2781_s2 + $0x18] sm:$0xff]  ;;  %s2287_s24 = smov 112   ;;  %s2288_s25 = smov 64   ;;  %vm406_vm3 = vcmask 261248  }
   0x2   :  { %v2327_v2 = vld [vmem:[%s2781_s2 + $0x8] sm:$0xff]  ;;  %2048 = vmatprep.subr.mxu0 %v29_v1  ;;  %v2338_v4 = vld [vmem:[%s2781_s2] sm:$0xff]  ;;  %v2359_v8 = vld [vmem:[%s2781_s2 + $0x10] sm:$0xff]  ;;  %s2289_s8 = smov 80  }
   0x3   :  { %2065 = vmatpush3.msra.mxu1 %v2327_v2  ;;  %v20_v5 = vld [vmem:[%s2782_s0] sm:$0xff]  ;;  %2049 = vmatpush3.msra.mxu0 %v29_v1  ;;  %v21_v6 = vld [vmem:[%s2782_s0 + $0x8] sm:$0xff]  ;;  %v22_v10 = vld [vmem:[%s2782_s0 + $0x10] sm:$0xff] }
   0x4   :  { %2066 = vmatprep.subr.mxu1 %v2281_v0  ;;  %2050 = vmatprep.subr.mxu0 %v28_v3  ;;  %v1945_v9 = vld [vmem:[%s2783_s4] ss:$0 sm:$0xff]  ;;  %v23_v11 = vld [vmem:[%s2782_s0 + $0x18] sm:$0xff]  ;;  %s2283_s4 = smov 32   ;;  %v25_v13 = vld [vmem:[%s2782_s0 + $0x28] sm:$0xff] }
   0x5   :  { %2067 = vmatpush3.msra.mxu1 %v2338_v4  ;;  %2051 = vmatpush3.msra.mxu0 %v28_v3  ;;  %v24_v12 = vld [vmem:[%s2782_s0 + $0x20] sm:$0xff]  ;;  %v26_v14 = vld [vmem:[%s2782_s0 + $0x30] sm:$0xff]  ;;  %v27_v15 = vld [vmem:[%s2782_s0 + $0x38] sm:$0xff] }
   0x6   :  { %2052 = vmatprep.mubr.msk.f32.mxu0 %vm37_vm1, %v20_v5  ;;  %2069 = vmatmul.mubr.f32.vlgmr.msra.gmra.mxu1 %v2281_v0  ;;  %v1936_v19 = vld [vmem:[%s2784_s3] ss:$0 sm:$0xff]  ;;  %s2286_s3 = smov 96  }
   0x7   :  { %2071 = vmatprep.subr.mxu1 %v2281_v0  ;;  %2053 = vmatmul.mubr.msk.f32.vlgmr.msra.gmra.mxu0 %vm37_vm1, %v21_v6 }
   0x8   :  { %2072 = vmatpush3.msra.mxu1 %v2351_v7  ;;  %2075 = vmatprep.mubr.msk.f32.mxu1 %vm2282_vm0, %v2281_v0 }
   0x9   :  { %2073 = vmatprep.subr.mxu1 %v2281_v0  ;;  %350 = vrot.lane.b32.xlu0 %v1945_v9, %s2283_s4 }
   0xa   :  { %2074 = vmatpush3.msra.mxu1 %v2359_v8  ;;  %2055 = vmatprep.mubr.msk.f32.mxu0 %vm37_vm1, %v22_v10 }
   0xb   :  { %2076 = vmatmul.mubr.f32.vlgmr.msra.gmra.mxu1 %v2281_v0  ;;  %2056 = vmatmul.mubr.msk.f32.gmra.mxu0 %vm37_vm1, %v23_v11 }
   0xc   :  { %2078 = vmatprep.subr.mxu1 %v2281_v0  ;;  %2058 = vmatprep.mubr.msk.f32.mxu0 %vm37_vm1, %v24_v12 }
   0xd   :  { %2079 = vmatpush3.msra.mxu1 %v2327_v2  ;;  %365 = vrot.lane.b32.xlu0 %v1945_v9, %s2284_s17 }
   0xe   :  { %2080 = vmatprep.subr.mxu1 %v2281_v0  ;;  %2082 = vmatprep.mubr.msk.f32.mxu1 %vm2282_vm0, %v2281_v0 }
   0xf   :  { %2081 = vmatpush3.msra.mxu1 %v2338_v4  ;;  %2059 = vmatmul.mubr.msk.f32.gmra.mxu0 %vm37_vm1, %v25_v13 }
  0x10   :  { %2085 = vmatprep.subr.mxu1 %v2281_v0  ;;  %2061 = vmatprep.mubr.msk.f32.mxu0 %vm37_vm1, %v26_v14 }
  0x11   :  { %2092 = vmatprep.subr.mxu0 %v2281_v0 }
  0x12   :  { %2093 = vmatpush3.msra.mxu0 %v2327_v2 }
  0x13   :  { %2094 = vmatprep.subr.mxu0 %v2281_v0  ;;  %2062 = vmatmul.mubr.msk.f32.gmra.mxu0 %vm37_vm1, %v27_v15 }
  0x14   :  { %2095 = vmatpush3.msra.mxu0 %v2338_v4  ;;  %2096 = vmatprep.mubr.msk.f32.mxu0 %vm2282_vm0, %v2281_v0 }
  0x15   :  { %2106 = vmatprep.subr.mxu0 %v2281_v0 }
  0x7b   :  { %v2411_v16 = vpop.permute.xlu0 %350 }
  0x7f   :  { %v2416_v22 = vpop.permute.xlu0 %365 }
  0xc6   :  { %v258_v17 = vpop.f32.mrf.mxu1 }
  0xc7   :  { %v2054_v18 = vpop.f32.mrf.mxu0  ;;  %v353_v30 = vadd.f32 %v2411_v16, %v258_v17 }
  0xc8   :  { %v134_v20 = vadd.f32 %v2054_v18, %v1936_v19  ;;  %v2070_v21 = vpop.f32.mrf.mxu1 }
  0xc9   :  { %v128_v23 = vpop.f32.mrf.mxu0 }
  0xca   :  { %169 = vst.msk [vmem:[#allocation2 + $0x8] sm:$0xff] %vm167_vm2, %v134_v20  ;;  %v129_v24 = vadd.f32 %v1936_v19, %v128_v23 }
  0xcb   :  { %v328_v25 = vpop.f32.mrf.mxu1  ;;  %v2057_v27 = vpop.f32.mrf.mxu0 }
  0xcc   :  { %340 = vrot.lane.b32.xlu1 %v328_v25, %s2285_s23  ;;  %v368_v26 = vadd.f32 %v2416_v22, %v328_v25  ;;  %168 = vst.msk [vmem:[#allocation2] sm:$0xff] %vm167_vm2, %v129_v24  ;;  %v144_v29 = vadd.f32 %v2057_v27, %v1936_v19 }
  0xcd   :  { %v2077_v28 = vpop.f32.mrf.mxu1  ;;  %v138_v31 = vpop.f32.mrf.mxu0 }
  0xce   :  { %370 = vrot.lane.b32.xlu0 %v368_v26, %s2284_s17  ;;  %171 = vst.msk [vmem:[#allocation2 + $0x18] sm:$0xff] %vm167_vm2, %v144_v29  ;;  %v139_v32 = vadd.f32 %v1936_v19, %v138_v31 }
  0xcf   :  { %v2060_v33 = vpop.f32.mrf.mxu0 }
  0xd0   :  { %355 = vrot.lane.b32.xlu1 %v353_v30, %s2286_s3  ;;  %170 = vst.msk [vmem:[#allocation2 + $0x10] sm:$0xff] %vm167_vm2, %v139_v32  ;;  %v154_v34 = vadd.f32 %v2060_v33, %v1936_v19 }
  0xd1   :  { %v148_v35 = vpop.f32.mrf.mxu0 }
  0xd2   :  { %173 = vst.msk [vmem:[#allocation2 + $0x28] sm:$0xff] %vm167_vm2, %v154_v34  ;;  %v149_v36 = vadd.f32 %v1936_v19, %v148_v35  ;;  %v2478_v34 = vld [vmem:[#allocation2 + $0x8] sm:$0xff] }
  0xd3   :  { %v2063_v37 = vpop.f32.mrf.mxu0  ;;  %v2431_v41 = vld [vmem:[#allocation2] sm:$0xff] }
  0xd4   :  { %172 = vst.msk [vmem:[#allocation2 + $0x20] sm:$0xff] %vm167_vm2, %v149_v36  ;;  %v164_v38 = vadd.f32 %v2063_v37, %v1936_v19  ;;  %v332_v42 = vadd.f32 %v258_v17, %v2431_v41 }
  0xd5   :  { %v158_v39 = vpop.f32.mrf.mxu0 }
  0xd6   :  { %175 = vst.msk [vmem:[#allocation2 + $0x38] sm:$0xff] %vm167_vm2, %v164_v38  ;;  %v159_v40 = vadd.f32 %v1936_v19, %v158_v39  ;;  %v1946_v43 = vmul.f32 -1.442695, %v332_v42 }
  0xd8   :  { %174 = vst.msk [vmem:[#allocation2 + $0x30] sm:$0xff] %vm167_vm2, %v159_v40  ;;  %2185 = vpow2.f32 %v1946_v43 }
  0xdd   :  { %v2434_v46 = vld [vmem:[#allocation2 + $0x38] sm:$0xff] }
  0xdf   :  { %v2472_v24 = vld [vmem:[#allocation2 + $0x30] sm:$0xff] }
  0xe5   :  { %v2186_v44 = vpop.eup %2185 }
  0xe6   :  { %v336_v45 = vadd.f32 1.0, %v2186_v44 }
  0xe8   :  { %2187 = vrcp.f32 %v336_v45 }
  0xf5   :  { %v2188_v50 = vpop.eup %2187 }
  0xf6   :  { %v380_v1 = vsub.f32 1.0, %v2188_v50  ;;  %v386_v5 = vmul.f32 0.0, %v2188_v50 }
 0x13e   :  { %v341_v47 = vpop.permute.xlu1 %340 }
 0x13f   :  { %v343_v48 = vadd.f32 %v341_v47, %v2434_v46 }
 0x140   :  { %v371_v56 = vpop.permute.xlu0 %370 }
 0x141   :  { %v1947_v49 = vmul.f32 -1.442695, %v343_v48 }
 0x142   :  { %v356_v51 = vpop.permute.xlu1 %355 }
 0x143   :  { %2189 = vpow2.f32 %v1947_v49  ;;  %v358_v52 = vmul.f32 %v2188_v50, %v356_v51 }
 0x145   :  { %360 = vrot.lane.b32.xlu1 %v358_v52, %s2283_s4 }
 0x150   :  { %v2190_v53 = vpop.eup %2189 }
 0x151   :  { %v347_v54 = vadd.f32 1.0, %v2190_v53 }
 0x153   :  { %2191 = vrcp.f32 %v347_v54 }
 0x160   :  { %v2192_v55 = vpop.eup %2191 }
 0x161   :  { %v373_v57 = vmul.f32 %v2192_v55, %v371_v56  ;;  %v388_v10 = vsub.f32 1.0, %v2192_v55  ;;  %v394_v12 = vmul.f32 0.0, %v2192_v55 }
 0x163   :  { %375 = vrot.lane.b32.xlu0 %v373_v57, %s2283_s4 }
 0x1b7   :  { %v361_v58 = vpop.permute.xlu1 %360 }
 0x1b8   :  { %v363_v59 = vadd.f32 %v361_v58, %v2431_v41 }
 0x1ba   :  { %2193 = vtanh.f32 %v363_v59 }
 0x1c7   :  { %v2194_v60 = vpop.eup %2193 }
 0x1c8   :  { %382 = vrot.lane.b32.xlu1 %v2194_v60, %s2287_s24 }
 0x1d5   :  { %v376_v61 = vpop.permute.xlu0 %375 }
 0x1d6   :  { %v378_v62 = vadd.f32 %v376_v61, %v2434_v46 }
 0x1d8   :  { %2195 = vtanh.f32 %v378_v62 }
 0x1e5   :  { %v2196_v63 = vpop.eup %2195 }
 0x1e6   :  { %390 = vrot.lane.b32.xlu0 %v2196_v63, %s2287_s24 }
 0x23a   :  { %v383_v3 = vpop.permute.xlu1 %382 }
 0x23b   :  { %v385_v6 = vmul.f32 %v383_v3, %v380_v1  ;;  %v2517_v3 = vld [vmem:[#allocation2 + $0x28] sm:$0xff] }
 0x23d   :  { %v2443_v9 = vadd.f32 %v386_v5, %v385_v6 }
 0x23f   :  { %397 = vrot.lane.b32.xlu1 %v2443_v9, %s2287_s24 }
 0x258   :  { %v391_v11 = vpop.permute.xlu0 %390 }
 0x259   :  { %v393_v13 = vmul.f32 %v391_v11, %v388_v10 }
 0x25b   :  { %v2447_v14 = vadd.f32 %v394_v12, %v393_v13 }
 0x25d   :  { %484 = vrot.lane.b32.xlu0 %v2447_v14, %s2288_s25 }
 0x2b1   :  { %v398_v15 = vpop.permute.xlu1 %397 }
 0x2b2   :  { %400 = vst.msk [vmem:[%s2785_s5] sm:$0xff] %vm37_vm1, %v398_v15  ;;  %2083 = vmatmul.mubr.msk.f32.vlgmr.msra.gmra.mxu1 %vm37_vm1, %v398_v15 }
 0x2b3   :  { %2086 = vmatpush3.msra.mxu1 %v2351_v7  ;;  %2089 = vmatprep.mubr.msk.f32.mxu1 %vm2282_vm0, %v2281_v0 }
 0x2b4   :  { %2087 = vmatprep.subr.mxu1 %v2281_v0 }
 0x2b5   :  { %2088 = vmatpush3.msra.mxu1 %v2359_v8 }
 0x2b6   :  { %2099 = vmatprep.subr.mxu1 %v2281_v0 }
 0x2cf   :  { %v485_v17 = vpop.permute.xlu0 %484 }
 0x2d0   :  { %2090 = vmatmul.mubr.msk.f32.vlgmr.msra.gmra.mxu1 %vm37_vm1, %v485_v17 }
 0x2d1   :  { %2100 = vmatpush3.msra.mxu1 %v2351_v7  ;;  %2103 = vmatprep.mubr.msk.f32.mxu1 %vm2282_vm0, %v2281_v0 }
 0x2d2   :  { %2101 = vmatprep.subr.mxu1 %v2281_v0 }
 0x2d3   :  { %2102 = vmatpush3.msra.mxu1 %v2359_v8 }
 0x2d4   :  { %2113 = vmatprep.subr.mxu1 %v2281_v0 }
 0x372   :  { %v480_v18 = vpop.f32.mrf.mxu1 }
 0x373   :  { %v576_v33 = vadd.f32 %v480_v18, %v2411_v16  ;;  %v558_v35 = vadd.f32 %v480_v18, %v2478_v34 }
 0x374   :  { %v2084_v19 = vpop.f32.mrf.mxu1 }
 0x375   :  { %v1951_v36 = vmul.f32 -1.442695, %v558_v35 }
 0x390   :  { %v554_v20 = vpop.f32.mrf.mxu1 }
 0x391   :  { %v588_v21 = vadd.f32 %v554_v20, %v2416_v22  ;;  %566 = vrot.lane.b32.xlu1 %v554_v20, %s2285_s23  ;;  %v2523_v20 = vld [vmem:[#allocation2 + $0x10] sm:$0xff] }
 0x392   :  { %v2091_v23 = vpop.f32.mrf.mxu1 }
 0x393   :  { %590 = vrot.lane.b32.xlu0 %v588_v21, %s2284_s17 }
 0x403   :  { %v567_v25 = vpop.permute.xlu1 %566 }
 0x404   :  { %v569_v26 = vadd.f32 %v567_v25, %v2472_v24 }
 0x405   :  { %v591_v31 = vpop.permute.xlu0 %590 }
 0x406   :  { %v1952_v27 = vmul.f32 -1.442695, %v569_v26 }
 0x408   :  { %2197 = vpow2.f32 %v1952_v27 }
 0x415   :  { %v2198_v28 = vpop.eup %2197 }
 0x416   :  { %v573_v29 = vadd.f32 1.0, %v2198_v28 }
 0x418   :  { %2199 = vrcp.f32 %v573_v29 }
 0x419   :  { %2201 = vpow2.f32 %v1951_v36 }
 0x425   :  { %v2200_v30 = vpop.eup %2199 }
 0x426   :  { %v593_v32 = vmul.f32 %v2200_v30, %v591_v31  ;;  %v2202_v37 = vpop.eup %2201  ;;  %v608_v49 = vsub.f32 1.0, %v2200_v30  ;;  %v614_v51 = vmul.f32 %v2200_v30, %v2447_v14 }
 0x427   :  { %v562_v38 = vadd.f32 1.0, %v2202_v37 }
 0x428   :  { %595 = vrot.lane.b32.xlu1 %v593_v32, %s2283_s4 }
 0x429   :  { %2203 = vrcp.f32 %v562_v38 }
 0x42c   :  { %578 = vrot.lane.b32.xlu1 %v576_v33, %s2286_s3 }
 0x436   :  { %v2204_v42 = vpop.eup %2203 }
 0x437   :  { %v600_v56 = vsub.f32 1.0, %v2204_v42  ;;  %v606_v58 = vmul.f32 %v2204_v42, %v2443_v9 }
 0x49a   :  { %v596_v39 = vpop.permute.xlu1 %595 }
 0x49b   :  { %v598_v40 = vadd.f32 %v596_v39, %v2472_v24 }
 0x49d   :  { %2205 = vtanh.f32 %v598_v40 }
 0x49e   :  { %v579_v43 = vpop.permute.xlu1 %578 }
 0x49f   :  { %v581_v44 = vmul.f32 %v2204_v42, %v579_v43 }
 0x4a1   :  { %583 = vrot.lane.b32.xlu1 %v581_v44, %s2283_s4 }
 0x4aa   :  { %v2206_v45 = vpop.eup %2205 }
 0x4ab   :  { %610 = vrot.lane.b32.xlu0 %v2206_v45, %s2287_s24 }
 0x513   :  { %v584_v47 = vpop.permute.xlu1 %583 }
 0x514   :  { %v586_v48 = vadd.f32 %v584_v47, %v2478_v34 }
 0x516   :  { %2207 = vtanh.f32 %v586_v48 }
 0x51d   :  { %v611_v50 = vpop.permute.xlu0 %610 }
 0x51e   :  { %v613_v52 = vmul.f32 %v611_v50, %v608_v49 }
 0x520   :  { %v2486_v53 = vadd.f32 %v614_v51, %v613_v52 }
 0x522   :  { %704 = vrot.lane.b32.xlu0 %v2486_v53, %s2288_s25 }
 0x523   :  { %v2208_v54 = vpop.eup %2207 }
 0x526   :  { %602 = vrot.lane.b32.xlu0 %v2208_v54, %s2287_s24 }
 0x594   :  { %v705_v55 = vpop.permute.xlu0 %704 }
 0x595   :  { %2104 = vmatmul.mubr.msk.f32.vlgmr.msra.gmra.mxu1 %vm37_vm1, %v705_v55  ;;  %v2559_v55 = vld [vmem:[#allocation2 + $0x20] sm:$0xff] }
 0x596   :  { %2114 = vmatpush3.msra.mxu1 %v2351_v7  ;;  %2117 = vmatprep.mubr.msk.f32.mxu1 %vm2282_vm0, %v2281_v0 }
 0x597   :  { %2115 = vmatprep.subr.mxu1 %v2281_v0 }
 0x598   :  { %v603_v57 = vpop.permute.xlu0 %602  ;;  %2116 = vmatpush3.msra.mxu1 %v2359_v8 }
 0x599   :  { %v605_v59 = vmul.f32 %v603_v57, %v600_v56  ;;  %2127 = vmatprep.subr.mxu1 %v2281_v0 }
 0x59b   :  { %v2499_v60 = vadd.f32 %v606_v58, %v605_v59 }
 0x59d   :  { %617 = vrot.lane.b32.xlu1 %v2499_v60, %s2287_s24 }
 0x60f   :  { %v618_v61 = vpop.permute.xlu1 %617 }
 0x610   :  { %1953 = vst.msk [vmem:[%s2785_s5 + $0x8] sm:$0xff] %vm37_vm1, %v618_v61  ;;  %2097 = vmatmul.mubr.msk.f32.vlgmr.msra.gmra.mxu0 %vm37_vm1, %v618_v61 }
 0x611   :  { %2107 = vmatpush3.msra.mxu0 %v2327_v2  ;;  %2110 = vmatprep.mubr.msk.f32.mxu0 %vm2282_vm0, %v2281_v0 }
 0x612   :  { %2108 = vmatprep.subr.mxu0 %v2281_v0 }
 0x613   :  { %2109 = vmatpush3.msra.mxu0 %v2338_v4 }
 0x614   :  { %2120 = vmatprep.subr.mxu0 %v2281_v0 }
 0x655   :  { %v774_v62 = vpop.f32.mrf.mxu1 }
 0x656   :  { %v808_v63 = vadd.f32 %v774_v62, %v2416_v22  ;;  %786 = vrot.lane.b32.xlu0 %v774_v62, %s2285_s23 }
 0x657   :  { %v2105_v1 = vpop.f32.mrf.mxu1 }
 0x658   :  { %810 = vrot.lane.b32.xlu1 %v808_v63, %s2284_s17 }
 0x6c8   :  { %v787_v5 = vpop.permute.xlu0 %786 }
 0x6c9   :  { %v789_v6 = vadd.f32 %v787_v5, %v2517_v3 }
 0x6ca   :  { %v811_v17 = vpop.permute.xlu1 %810 }
 0x6cb   :  { %v1958_v9 = vmul.f32 -1.442695, %v789_v6 }
 0x6cd   :  { %2209 = vpow2.f32 %v1958_v9  ;;  %v2565_v9 = vld [vmem:[#allocation2 + $0x18] sm:$0xff] }
 0x6d0   :  { %v700_v10 = vpop.f32.mrf.mxu0 }
 0x6d1   :  { %v796_v19 = vadd.f32 %v700_v10, %v2411_v16  ;;  %v778_v21 = vadd.f32 %v700_v10, %v2523_v20 }
 0x6d2   :  { %v2098_v11 = vpop.f32.mrf.mxu0 }
 0x6d3   :  { %v1957_v23 = vmul.f32 -1.442695, %v778_v21 }
 0x6da   :  { %v2210_v12 = vpop.eup %2209 }
 0x6db   :  { %v793_v13 = vadd.f32 1.0, %v2210_v12 }
 0x6dd   :  { %2211 = vrcp.f32 %v793_v13 }
 0x6de   :  { %2213 = vpow2.f32 %v1957_v23 }
 0x6ea   :  { %v2212_v15 = vpop.eup %2211 }
 0x6eb   :  { %v813_v18 = vmul.f32 %v2212_v15, %v811_v17  ;;  %v2214_v25 = vpop.eup %2213  ;;  %v828_v36 = vsub.f32 1.0, %v2212_v15  ;;  %v834_v38 = vmul.f32 %v2212_v15, %v2486_v53 }
 0x6ec   :  { %v782_v26 = vadd.f32 1.0, %v2214_v25 }
 0x6ed   :  { %815 = vrot.lane.b32.xlu0 %v813_v18, %s2283_s4 }
 0x6ee   :  { %2215 = vrcp.f32 %v782_v26 }
 0x6f1   :  { %798 = vrot.lane.b32.xlu0 %v796_v19, %s2286_s3 }
 0x6fb   :  { %v2216_v29 = vpop.eup %2215 }
 0x6fc   :  { %v820_v44 = vsub.f32 1.0, %v2216_v29  ;;  %v826_v47 = vmul.f32 %v2216_v29, %v2499_v60 }
 0x75f   :  { %v816_v27 = vpop.permute.xlu0 %815 }
 0x760   :  { %v818_v28 = vadd.f32 %v816_v27, %v2517_v3 }
 0x762   :  { %2217 = vtanh.f32 %v818_v28 }
 0x763   :  { %v799_v30 = vpop.permute.xlu0 %798 }
 0x764   :  { %v801_v31 = vmul.f32 %v2216_v29, %v799_v30 }
 0x766   :  { %803 = vrot.lane.b32.xlu0 %v801_v31, %s2283_s4 }
 0x76f   :  { %v2218_v32 = vpop.eup %2217 }
 0x770   :  { %830 = vrot.lane.b32.xlu1 %v2218_v32, %s2287_s24 }
 0x7d8   :  { %v804_v33 = vpop.permute.xlu0 %803 }
 0x7d9   :  { %v806_v35 = vadd.f32 %v804_v33, %v2523_v20 }
 0x7db   :  { %2219 = vtanh.f32 %v806_v35 }
 0x7e2   :  { %v831_v37 = vpop.permute.xlu1 %830 }
 0x7e3   :  { %v833_v39 = vmul.f32 %v831_v37, %v828_v36 }
 0x7e5   :  { %v2531_v40 = vadd.f32 %v834_v38, %v833_v39 }
 0x7e7   :  { %924 = vrot.lane.b32.xlu1 %v2531_v40, %s2288_s25 }
 0x7e8   :  { %v2220_v42 = vpop.eup %2219 }
 0x7eb   :  { %822 = vrot.lane.b32.xlu1 %v2220_v42, %s2287_s24 }
 0x859   :  { %v925_v43 = vpop.permute.xlu1 %924 }
 0x85a   :  { %2118 = vmatmul.mubr.msk.f32.vlgmr.msra.gmra.mxu1 %vm37_vm1, %v925_v43 }
 0x85b   :  { %2128 = vmatpush3.msra.mxu1 %v2351_v7  ;;  %2131 = vmatprep.mubr.msk.f32.mxu1 %vm2282_vm0, %v2281_v0 }
 0x85c   :  { %2129 = vmatprep.subr.mxu1 %v2281_v0 }
 0x85d   :  { %v823_v45 = vpop.permute.xlu1 %822  ;;  %2130 = vmatpush3.msra.mxu1 %v2359_v8 }
 0x85e   :  { %v825_v48 = vmul.f32 %v823_v45, %v820_v44  ;;  %2141 = vmatprep.subr.mxu1 %v2281_v0 }
 0x860   :  { %v827_v49 = vadd.f32 %v826_v47, %v825_v48 }
 0x862   :  { %837 = vrot.lane.b32.xlu0 %v827_v49, %s2287_s24 }
 0x8d4   :  { %v838_v50 = vpop.permute.xlu0 %837 }
 0x8d5   :  { %1959 = vst.msk [vmem:[%s2785_s5 + $0x10] sm:$0xff] %vm37_vm1, %v838_v50  ;;  %2111 = vmatmul.mubr.msk.f32.vlgmr.msra.gmra.mxu0 %vm37_vm1, %v838_v50 }
 0x8d6   :  { %2121 = vmatpush3.msra.mxu0 %v2327_v2  ;;  %2124 = vmatprep.mubr.msk.f32.mxu0 %vm2282_vm0, %v2281_v0 }
 0x8d7   :  { %2122 = vmatprep.subr.mxu0 %v2281_v0 }
 0x8d8   :  { %2123 = vmatpush3.msra.mxu0 %v2338_v4 }
 0x8d9   :  { %2134 = vmatprep.subr.mxu0 %v2281_v0 }
 0x91a   :  { %v994_v51 = vpop.f32.mrf.mxu1 }
 0x91b   :  { %v1028_v52 = vadd.f32 %v994_v51, %v2416_v22  ;;  %1006 = vrot.lane.b32.xlu1 %v994_v51, %s2285_s23 }
 0x91c   :  { %v2119_v54 = vpop.f32.mrf.mxu1 }
 0x91d   :  { %1030 = vrot.lane.b32.xlu0 %v1028_v52, %s2284_s17 }
 0x98d   :  { %v1007_v56 = vpop.permute.xlu1 %1006 }
 0x98e   :  { %v1009_v57 = vadd.f32 %v1007_v56, %v2559_v55 }
 0x98f   :  { %v1031_v5 = vpop.permute.xlu0 %1030 }
 0x990   :  { %v1964_v58 = vmul.f32 -1.442695, %v1009_v57 }
 0x992   :  { %2221 = vpow2.f32 %v1964_v58 }
 0x995   :  { %v920_v59 = vpop.f32.mrf.mxu0 }
 0x996   :  { %v1016_v60 = vadd.f32 %v920_v59, %v2411_v16  ;;  %v998_v10 = vadd.f32 %v920_v59, %v2565_v9 }
 0x997   :  { %v2112_v61 = vpop.f32.mrf.mxu0 }
 0x998   :  { %1018 = vrot.lane.b32.xlu0 %v1016_v60, %s2286_s3  ;;  %v1963_v11 = vmul.f32 -1.442695, %v998_v10 }
 0x99f   :  { %v2222_v62 = vpop.eup %2221 }
 0x9a0   :  { %v1013_v63 = vadd.f32 1.0, %v2222_v62 }
 0x9a2   :  { %2223 = vrcp.f32 %v1013_v63 }
 0x9a3   :  { %2225 = vpow2.f32 %v1963_v11 }
 0x9af   :  { %v2224_v1 = vpop.eup %2223 }
 0x9b0   :  { %v1033_v6 = vmul.f32 %v2224_v1, %v1031_v5  ;;  %v2226_v12 = vpop.eup %2225  ;;  %v1048_v28 = vsub.f32 1.0, %v2224_v1  ;;  %v1054_v30 = vmul.f32 %v2224_v1, %v2531_v40 }
 0x9b1   :  { %v1002_v13 = vadd.f32 1.0, %v2226_v12 }
 0x9b2   :  { %1035 = vrot.lane.b32.xlu1 %v1033_v6, %s2283_s4 }
 0x9b3   :  { %2227 = vrcp.f32 %v1002_v13 }
 0x9c0   :  { %v2228_v15 = vpop.eup %2227 }
 0x9c1   :  { %v1040_v33 = vsub.f32 1.0, %v2228_v15  ;;  %v1046_v36 = vmul.f32 %v2228_v15, %v827_v49 }
 0xa0a   :  { %v1019_v17 = vpop.permute.xlu0 %1018 }
 0xa0b   :  { %v1021_v18 = vmul.f32 %v2228_v15, %v1019_v17 }
 0xa0d   :  { %1023 = vrot.lane.b32.xlu0 %v1021_v18, %s2283_s4 }
 0xa24   :  { %v1036_v19 = vpop.permute.xlu1 %1035 }
 0xa25   :  { %v1038_v21 = vadd.f32 %v1036_v19, %v2559_v55 }
 0xa27   :  { %2229 = vtanh.f32 %v1038_v21 }
 0xa34   :  { %v2230_v23 = vpop.eup %2229 }
 0xa35   :  { %1050 = vrot.lane.b32.xlu1 %v2230_v23, %s2287_s24 }
 0xa7f   :  { %v1024_v25 = vpop.permute.xlu0 %1023 }
 0xa80   :  { %v1026_v26 = vadd.f32 %v1024_v25, %v2565_v9 }
 0xa82   :  { %2231 = vtanh.f32 %v1026_v26 }
 0xa8f   :  { %v2232_v27 = vpop.eup %2231 }
 0xa90   :  { %1042 = vrot.lane.b32.xlu0 %v2232_v27, %s2287_s24 }
 0xaa7   :  { %v1051_v29 = vpop.permute.xlu1 %1050 }
 0xaa8   :  { %v1053_v31 = vmul.f32 %v1051_v29, %v1048_v28 }
 0xaaa   :  { %v2574_v32 = vadd.f32 %v1054_v30, %v1053_v31 }
 0xaac   :  { %1142 = vrot.lane.b32.xlu1 %v2574_v32, %s2288_s25 }
 0xb02   :  { %v1043_v35 = vpop.permute.xlu0 %1042 }
 0xb03   :  { %v1045_v37 = vmul.f32 %v1043_v35, %v1040_v33 }
 0xb05   :  { %v2578_v38 = vadd.f32 %v1046_v36, %v1045_v37 }
 0xb07   :  { %1057 = vrot.lane.b32.xlu1 %v2578_v38, %s2287_s24 }
 0xb1e   :  { %v1143_v39 = vpop.permute.xlu1 %1142 }
 0xb1f   :  { %2132 = vmatmul.mubr.msk.f32.vlgmr.msra.gmra.mxu1 %vm37_vm1, %v1143_v39 }
 0xb20   :  { %2142 = vmatpush3.msra.mxu1 %v2351_v7  ;;  %2145 = vmatprep.mubr.msk.f32.mxu1 %vm2282_vm0, %v2281_v0 }
 0xb21   :  { %2143 = vmatprep.subr.mxu1 %v2281_v0 }
 0xb22   :  { %2144 = vmatpush3.msra.mxu1 %v2359_v8 }
 0xb23   :  { %2155 = vmatprep.subr.mxu1 %v2281_v0 }
 0xb79   :  { %v1058_v42 = vpop.permute.xlu1 %1057 }
 0xb7a   :  { %1965 = vst.msk [vmem:[%s2785_s5 + $0x18] sm:$0xff] %vm37_vm1, %v1058_v42  ;;  %2125 = vmatmul.mubr.msk.f32.vlgmr.msra.gmra.mxu0 %vm37_vm1, %v1058_v42 }
 0xb7b   :  { %2135 = vmatpush3.msra.mxu0 %v2327_v2  ;;  %2138 = vmatprep.mubr.msk.f32.mxu0 %vm2282_vm0, %v2281_v0 }
 0xb7c   :  { %2136 = vmatprep.subr.mxu0 %v2281_v0 }
 0xb7d   :  { %2137 = vmatpush3.msra.mxu0 %v2338_v4 }
 0xb7e   :  { %2148 = vmatprep.subr.mxu0 %v2281_v0 }
 0xbdf   :  { %v1212_v43 = vpop.f32.mrf.mxu1 }
 0xbe0   :  { %v1246_v44 = vadd.f32 %v1212_v43, %v2416_v22  ;;  %1224 = vrot.lane.b32.xlu0 %v1212_v43, %s2285_s23 }
 0xbe1   :  { %v2133_v45 = vpop.f32.mrf.mxu1 }
 0xbe2   :  { %1248 = vrot.lane.b32.xlu1 %v1246_v44, %s2284_s17 }
 0xc3a   :  { %v1138_v47 = vpop.f32.mrf.mxu0 }
 0xc3b   :  { %v1234_v48 = vadd.f32 %v1138_v47, %v2411_v16  ;;  %v1216_v60 = vadd.f32 %v1138_v47, %v2559_v55 }
 0xc3c   :  { %v2126_v49 = vpop.f32.mrf.mxu0 }
 0xc3d   :  { %1236 = vrot.lane.b32.xlu1 %v1234_v48, %s2286_s3  ;;  %v1969_v61 = vmul.f32 -1.442695, %v1216_v60 }
 0xc52   :  { %v1225_v50 = vpop.permute.xlu0 %1224 }
 0xc53   :  { %v1227_v51 = vadd.f32 %v1225_v50, %v2565_v9 }
 0xc54   :  { %v1249_v58 = vpop.permute.xlu1 %1248 }
 0xc55   :  { %v1970_v52 = vmul.f32 -1.442695, %v1227_v51 }
 0xc57   :  { %2233 = vpow2.f32 %v1970_v52 }
 0xc64   :  { %v2234_v54 = vpop.eup %2233 }
 0xc65   :  { %v1231_v56 = vadd.f32 1.0, %v2234_v54 }
 0xc67   :  { %2235 = vrcp.f32 %v1231_v56 }
 0xc68   :  { %2237 = vpow2.f32 %v1969_v61 }
 0xc74   :  { %v2236_v57 = vpop.eup %2235 }
 0xc75   :  { %v1251_v59 = vmul.f32 %v2236_v57, %v1249_v58  ;;  %v2238_v62 = vpop.eup %2237  ;;  %v1266_v18 = vsub.f32 1.0, %v2236_v57  ;;  %v1272_v21 = vmul.f32 %v2236_v57, %v2574_v32 }
 0xc76   :  { %v1220_v63 = vadd.f32 1.0, %v2238_v62 }
 0xc77   :  { %1253 = vrot.lane.b32.xlu0 %v1251_v59, %s2283_s4 }
 0xc78   :  { %2239 = vrcp.f32 %v1220_v63 }
 0xc85   :  { %v2240_v1 = vpop.eup %2239 }
 0xc86   :  { %v1264_v27 = vmul.f32 %v2240_v1, %v2578_v38 }
 0xcaf   :  { %v1237_v5 = vpop.permute.xlu1 %1236 }
 0xcb0   :  { %v1239_v6 = vmul.f32 %v2240_v1, %v1237_v5 }
 0xcb2   :  { %1241 = vrot.lane.b32.xlu1 %v1239_v6, %s2283_s4 }
 0xce9   :  { %v1254_v10 = vpop.permute.xlu0 %1253 }
 0xcea   :  { %v1256_v11 = vadd.f32 %v1254_v10, %v2565_v9  ;;  %v1258_v9 = vsub.f32 1.0, %v2240_v1 }
 0xcec   :  { %2241 = vtanh.f32 %v1256_v11 }
 0xcf9   :  { %v2242_v12 = vpop.eup %2241 }
 0xcfa   :  { %1268 = vrot.lane.b32.xlu0 %v2242_v12, %s2287_s24 }
 0xd24   :  { %v1242_v13 = vpop.permute.xlu1 %1241 }
 0xd25   :  { %v1244_v15 = vadd.f32 %v1242_v13, %v2559_v55 }
 0xd27   :  { %2243 = vtanh.f32 %v1244_v15 }
 0xd34   :  { %v2244_v17 = vpop.eup %2243 }
 0xd35   :  { %1260 = vrot.lane.b32.xlu1 %v2244_v17, %s2287_s24 }
 0xd6c   :  { %v1269_v19 = vpop.permute.xlu0 %1268 }
 0xd6d   :  { %v1271_v23 = vmul.f32 %v1269_v19, %v1266_v18 }
 0xd6f   :  { %v2614_v25 = vadd.f32 %v1272_v21, %v1271_v23 }
 0xd71   :  { %1358 = vrot.lane.b32.xlu0 %v2614_v25, %s2288_s25 }
 0xda7   :  { %v1261_v26 = vpop.permute.xlu1 %1260 }
 0xda8   :  { %v1263_v28 = vmul.f32 %v1261_v26, %v1258_v9 }
 0xdaa   :  { %v2619_v55 = vadd.f32 %v1264_v27, %v1263_v28 }
 0xdac   :  { %1275 = vrot.lane.b32.xlu0 %v2619_v55, %s2287_s24 }
 0xde3   :  { %v1359_v29 = vpop.permute.xlu0 %1358 }
 0xde4   :  { %2146 = vmatmul.mubr.msk.f32.vlgmr.msra.gmra.mxu1 %vm37_vm1, %v1359_v29 }
 0xde5   :  { %2156 = vmatpush3.msra.mxu1 %v2351_v7  ;;  %2159 = vmatprep.mubr.msk.f32.mxu1 %vm2282_vm0, %v2281_v0 }
 0xde6   :  { %2157 = vmatprep.subr.mxu1 %v2281_v0 }
 0xde7   :  { %2158 = vmatpush3.msra.mxu1 %v2359_v8 }
 0xde8   :  { %2169 = vmatprep.subr.mxu1 %v2281_v0 }
 0xe1e   :  { %v2630_v30 = vpop.permute.xlu0 %1275 }
 0xe1f   :  { %2139 = vmatmul.mubr.msk.f32.vlgmr.msra.gmra.mxu0 %vm37_vm1, %v2630_v30 }
 0xe20   :  { %2149 = vmatpush3.msra.mxu0 %v2327_v2  ;;  %2152 = vmatprep.mubr.msk.f32.mxu0 %vm2282_vm0, %v2281_v0 }
 0xe21   :  { %2150 = vmatprep.subr.mxu0 %v2281_v0 }
 0xe22   :  { %2151 = vmatpush3.msra.mxu0 %v2338_v4 }
 0xe23   :  { %2162 = vmatprep.subr.mxu0 %v2281_v0 }
 0xea4   :  { %v1428_v31 = vpop.f32.mrf.mxu1 }
 0xea5   :  { %v1462_v33 = vadd.f32 %v1428_v31, %v2416_v22  ;;  %1440 = vrot.lane.b32.xlu1 %v1428_v31, %s2285_s23 }
 0xea6   :  { %v2147_v35 = vpop.f32.mrf.mxu1 }
 0xea7   :  { %1464 = vrot.lane.b32.xlu0 %v1462_v33, %s2284_s17 }
 0xedf   :  { %v1354_v36 = vpop.f32.mrf.mxu0 }
 0xee0   :  { %v1450_v37 = vadd.f32 %v1354_v36, %v2411_v16  ;;  %v1432_v47 = vadd.f32 %v1354_v36, %v2517_v3 }
 0xee1   :  { %v2140_v38 = vpop.f32.mrf.mxu0 }
 0xee2   :  { %1452 = vrot.lane.b32.xlu0 %v1450_v37, %s2286_s3  ;;  %v1975_v48 = vmul.f32 -1.442695, %v1432_v47 }
 0xf17   :  { %v1441_v39 = vpop.permute.xlu1 %1440 }
 0xf18   :  { %v1443_v42 = vadd.f32 %v1441_v39, %v2523_v20 }
 0xf19   :  { %v1465_v50 = vpop.permute.xlu0 %1464 }
 0xf1a   :  { %v1976_v43 = vmul.f32 -1.442695, %v1443_v42 }
 0xf1c   :  { %2245 = vpow2.f32 %v1976_v43 }
 0xf29   :  { %v2246_v44 = vpop.eup %2245 }
 0xf2a   :  { %v1447_v45 = vadd.f32 1.0, %v2246_v44 }
 0xf2c   :  { %2247 = vrcp.f32 %v1447_v45 }
 0xf2d   :  { %2249 = vpow2.f32 %v1975_v48 }
 0xf39   :  { %v2248_v49 = vpop.eup %2247 }
 0xf3a   :  { %v1467_v51 = vmul.f32 %v2248_v49, %v1465_v50  ;;  %v2250_v52 = vpop.eup %2249  ;;  %v1482_v5 = vsub.f32 1.0, %v2248_v49  ;;  %v1488_v10 = vmul.f32 %v2248_v49, %v2614_v25 }
 0xf3b   :  { %v1436_v54 = vadd.f32 1.0, %v2250_v52 }
 0xf3c   :  { %1469 = vrot.lane.b32.xlu1 %v1467_v51, %s2283_s4 }
 0xf3d   :  { %2251 = vrcp.f32 %v1436_v54 }
 0xf4a   :  { %v2252_v56 = vpop.eup %2251 }
 0xf4b   :  { %v1480_v15 = vmul.f32 %v2252_v56, %v2619_v55 }
 0xf54   :  { %v1453_v57 = vpop.permute.xlu0 %1452 }
 0xf55   :  { %v1455_v58 = vmul.f32 %v2252_v56, %v1453_v57 }
 0xf57   :  { %1457 = vrot.lane.b32.xlu1 %v1455_v58, %s2283_s4 }
 0xfae   :  { %v1470_v59 = vpop.permute.xlu1 %1469 }
 0xfaf   :  { %v1472_v60 = vadd.f32 %v1470_v59, %v2523_v20  ;;  %v1474_v20 = vsub.f32 1.0, %v2252_v56 }
 0xfb1   :  { %2253 = vtanh.f32 %v1472_v60 }
 0xfbe   :  { %v2254_v61 = vpop.eup %2253 }
 0xfbf   :  { %1484 = vrot.lane.b32.xlu0 %v2254_v61, %s2287_s24 }
 0xfc9   :  { %v1458_v62 = vpop.permute.xlu1 %1457 }
 0xfca   :  { %v1460_v63 = vadd.f32 %v1458_v62, %v2517_v3 }
 0xfcc   :  { %2255 = vtanh.f32 %v1460_v63 }
 0xfd9   :  { %v2256_v1 = vpop.eup %2255 }
 0xfda   :  { %1476 = vrot.lane.b32.xlu0 %v2256_v1, %s2287_s24 }
0x1031   :  { %v1485_v6 = vpop.permute.xlu0 %1484 }
0x1032   :  { %v1487_v11 = vmul.f32 %v1485_v6, %v1482_v5 }
0x1034   :  { %v2654_v12 = vadd.f32 %v1488_v10, %v1487_v11 }
0x1036   :  { %1574 = vrot.lane.b32.xlu1 %v2654_v12, %s2288_s25 }
0x104c   :  { %v1477_v13 = vpop.permute.xlu0 %1476 }
0x104d   :  { %v1479_v17 = vmul.f32 %v1477_v13, %v1474_v20 }
0x104f   :  { %v1481_v3 = vadd.f32 %v1480_v15, %v1479_v17 }
0x1051   :  { %1491 = vrot.lane.b32.xlu1 %v1481_v3, %s2287_s24 }
0x10a8   :  { %v1575_v18 = vpop.permute.xlu1 %1574 }
0x10a9   :  { %2160 = vmatmul.mubr.msk.f32.vlgmr.msra.gmra.mxu1 %vm37_vm1, %v1575_v18 }
0x10aa   :  { %2170 = vmatpush3.msra.mxu1 %v2351_v7  ;;  %2173 = vmatprep.mubr.msk.f32.mxu1 %vm2282_vm0, %v2281_v0 }
0x10ab   :  { %2171 = vmatprep.subr.mxu1 %v2281_v0 }
0x10ac   :  { %2172 = vmatpush3.msra.mxu1 %v2359_v8 }
0x10c3   :  { %v2666_v19 = vpop.permute.xlu1 %1491 }
0x10c4   :  { %2153 = vmatmul.mubr.msk.f32.vlgmr.msra.gmra.mxu0 %vm37_vm1, %v2666_v19 }
0x10c5   :  { %2163 = vmatpush3.msra.mxu0 %v2327_v2  ;;  %2166 = vmatprep.mubr.msk.f32.mxu0 %vm2282_vm0, %v2281_v0 }
0x10c6   :  { %2164 = vmatprep.subr.mxu0 %v2281_v0 }
0x10c7   :  { %2165 = vmatpush3.msra.mxu0 %v2338_v4 }
0x1169   :  { %v1644_v7 = vpop.f32.mrf.mxu1 }
0x116a   :  { %v1678_v21 = vadd.f32 %v1644_v7, %v2416_v22  ;;  %1656 = vrot.lane.b32.xlu0 %v1644_v7, %s2285_s23 }
0x116b   :  { %v2161_v8 = vpop.f32.mrf.mxu1 }
0x116c   :  { %1680 = vrot.lane.b32.xlu1 %v1678_v21, %s2284_s17 }
0x1184   :  { %v1570_v23 = vpop.f32.mrf.mxu0 }
0x1185   :  { %v1666_v9 = vadd.f32 %v1570_v23, %v2411_v16  ;;  %v1648_v2 = vadd.f32 %v1570_v23, %v2472_v24 }
0x1186   :  { %v2154_v26 = vpop.f32.mrf.mxu0 }
0x1187   :  { %1668 = vrot.lane.b32.xlu0 %v1666_v9, %s2286_s3  ;;  %v1981_v27 = vmul.f32 -1.442695, %v1648_v2 }
0x1189   :  { %2257 = vpow2.f32 %v1981_v27 }
0x1196   :  { %v2258_v55 = vpop.eup %2257 }
0x1197   :  { %v1652_v29 = vadd.f32 1.0, %v2258_v55 }
0x11dc   :  { %v1657_v0 = vpop.permute.xlu0 %1656 }
0x11dd   :  { %v1659_v4 = vadd.f32 %v1657_v0, %v2478_v34 }
0x11de   :  { %v1681_v39 = vpop.permute.xlu1 %1680 }
0x11df   :  { %v1982_v28 = vmul.f32 -1.442695, %v1659_v4 }
0x11e1   :  { %2259 = vpow2.f32 %v1982_v28 }
0x11e2   :  { %2261 = vrcp.f32 %v1652_v29 }
0x11ee   :  { %v2260_v31 = vpop.eup %2259 }
0x11ef   :  { %v1663_v33 = vadd.f32 1.0, %v2260_v31  ;;  %v2262_v35 = vpop.eup %2261 }
0x11f0   :  { %v1690_v50 = vsub.f32 1.0, %v2262_v35  ;;  %v1696_v52 = vmul.f32 %v2262_v35, %v1481_v3 }
0x11f1   :  { %2263 = vrcp.f32 %v1663_v33 }
0x11f9   :  { %v1669_v36 = vpop.permute.xlu0 %1668 }
0x11fa   :  { %v1671_v37 = vmul.f32 %v2262_v35, %v1669_v36 }
0x11fc   :  { %1673 = vrot.lane.b32.xlu0 %v1671_v37, %s2283_s4 }
0x11fe   :  { %v2264_v38 = vpop.eup %2263 }
0x11ff   :  { %v1683_v42 = vmul.f32 %v2264_v38, %v1681_v39  ;;  %v1698_v57 = vsub.f32 1.0, %v2264_v38  ;;  %v1704_v58 = vmul.f32 %v2264_v38, %v2654_v12 }
0x1201   :  { %1685 = vrot.lane.b32.xlu1 %v1683_v42, %s2283_s4 }
0x126e   :  { %v1674_v43 = vpop.permute.xlu0 %1673 }
0x126f   :  { %v1676_v44 = vadd.f32 %v1674_v43, %v2472_v24 }
0x1271   :  { %2265 = vtanh.f32 %v1676_v44 }
0x1273   :  { %v1686_v45 = vpop.permute.xlu1 %1685 }
0x1274   :  { %v1688_v47 = vadd.f32 %v1686_v45, %v2478_v34 }
0x1276   :  { %2267 = vtanh.f32 %v1688_v47 }
0x127e   :  { %v2266_v48 = vpop.eup %2265 }
0x127f   :  { %1692 = vrot.lane.b32.xlu0 %v2266_v48, %s2287_s24 }
0x1283   :  { %v2268_v49 = vpop.eup %2267 }
0x1284   :  { %1700 = vrot.lane.b32.xlu1 %v2268_v49, %s2287_s24 }
0x12f1   :  { %v1693_v51 = vpop.permute.xlu0 %1692 }
0x12f2   :  { %v1695_v54 = vmul.f32 %v1693_v51, %v1690_v50 }
0x12f4   :  { %v1697_v56 = vadd.f32 %v1696_v52, %v1695_v54 }
0x12f6   :  { %1707 = vrot.lane.b32.xlu0 %v1697_v56, %s2287_s24  ;;  %v1701_v24 = vpop.permute.xlu1 %1700 }
0x12f7   :  { %v1703_v59 = vmul.f32 %v1701_v24, %v1698_v57 }
0x12f9   :  { %v2690_v34 = vadd.f32 %v1704_v58, %v1703_v59 }
0x12fb   :  { %1790 = vrot.lane.b32.xlu1 %v2690_v34, %s2288_s25 }
0x1368   :  { %v2694_v60 = vpop.permute.xlu0 %1707 }
0x1369   :  { %2167 = vmatmul.mubr.msk.f32.vlgmr.msra.gmra.mxu0 %vm37_vm1, %v2694_v60 }
0x136d   :  { %v1791_v61 = vpop.permute.xlu1 %1790 }
0x136e   :  { %2174 = vmatmul.mubr.msk.f32.vlgmr.msra.gmra.mxu1 %vm37_vm1, %v1791_v61 }
0x1429   :  { %v1786_v62 = vpop.f32.mrf.mxu0 }
0x142a   :  { %v1882_v63 = vadd.f32 %v1786_v62, %v2411_v16  ;;  %v1864_v11 = vadd.f32 %v1786_v62, %v2434_v46 }
0x142b   :  { %v2168_v1 = vpop.f32.mrf.mxu0 }
0x142c   :  { %1884 = vrot.lane.b32.xlu0 %v1882_v63, %s2286_s3  ;;  %v1987_v20 = vmul.f32 -1.442695, %v1864_v11 }
0x142e   :  { %v1860_v5 = vpop.f32.mrf.mxu1  ;;  %2269 = vpow2.f32 %v1987_v20 }
0x142f   :  { %1872 = vrot.lane.b32.xlu1 %v1860_v5, %s2285_s23  ;;  %v1894_v10 = vadd.f32 %v1860_v5, %v2416_v22 }
0x1430   :  { %v2175_v6 = vpop.f32.mrf.mxu1 }
0x1433   :  { %1896 = vrot.lane.b32.xlu1 %v1894_v10, %s2284_s17 }
0x143b   :  { %v2270_v13 = vpop.eup %2269 }
0x143c   :  { %v1868_v15 = vadd.f32 1.0, %v2270_v13 }
0x143e   :  { %2271 = vrcp.f32 %v1868_v15 }
0x144b   :  { %v2272_v17 = vpop.eup %2271 }
0x149e   :  { %v1885_v16 = vpop.permute.xlu0 %1884 }
0x149f   :  { %v1887_v3 = vmul.f32 %v2272_v17, %v1885_v16 }
0x14a1   :  { %1889 = vrot.lane.b32.xlu0 %v1887_v3, %s2283_s4  ;;  %v1873_v18 = vpop.permute.xlu1 %1872 }
0x14a2   :  { %v1875_v7 = vadd.f32 %v1873_v18, %v2431_v41 }
0x14a4   :  { %v1988_v21 = vmul.f32 -1.442695, %v1875_v7 }
0x14a5   :  { %v1897_v9 = vpop.permute.xlu1 %1896 }
0x14a6   :  { %2273 = vpow2.f32 %v1988_v21 }
0x14b3   :  { %v2274_v22 = vpop.eup %2273 }
0x14b4   :  { %v1879_v8 = vadd.f32 1.0, %v2274_v22 }
0x14b6   :  { %2275 = vrcp.f32 %v1879_v8 }
0x14c3   :  { %v2276_v23 = vpop.eup %2275 }
0x14c4   :  { %v1899_v26 = vmul.f32 %v2276_v23, %v1897_v9  ;;  %v1914_v31 = vsub.f32 1.0, %v2276_v23  ;;  %v1920_v35 = vmul.f32 %v2276_v23, %v2690_v34 }
0x14c6   :  { %1901 = vrot.lane.b32.xlu1 %v1899_v26, %s2283_s4 }
0x1513   :  { %v1890_v2 = vpop.permute.xlu0 %1889 }
0x1514   :  { %v1892_v27 = vadd.f32 %v1890_v2, %v2434_v46 }
0x1516   :  { %2277 = vtanh.f32 %v1892_v27 }
0x1523   :  { %v2278_v0 = vpop.eup %2277 }
0x1524   :  { %1908 = vrot.lane.b32.xlu0 %v2278_v0, %s2287_s24 }
0x1528   :  { %402 = vrot.lane.b32.xlu0 %v2447_v14, %s2289_s8  ;;  %v1906_v14 = vsub.f32 1.0, %v2272_v17 }
0x152c   :  { %843 = vrot.lane.b32.xlu0 %v2531_v40, %s2289_s8 }
0x1530   :  { %1280 = vrot.lane.b32.xlu0 %v2614_v25, %s2289_s8  ;;  %v1912_v25 = vmul.f32 %v2272_v17, %v1697_v56 }
0x1534   :  { %1712 = vrot.lane.b32.xlu0 %v2690_v34, %s2289_s8 }
0x1538   :  { %v1902_v4 = vpop.permute.xlu1 %1901 }
0x1539   :  { %v1904_v46 = vadd.f32 %v1902_v4, %v2431_v41 }
0x153b   :  { %2279 = vtanh.f32 %v1904_v46 }
0x1548   :  { %v2280_v28 = vpop.eup %2279 }
0x1549   :  { %1916 = vrot.lane.b32.xlu1 %v2280_v28, %s2287_s24 }
0x154d   :  { %623 = vrot.lane.b32.xlu1 %v2486_v53, %s2289_s8 }
0x1551   :  { %1063 = vrot.lane.b32.xlu1 %v2574_v32, %s2289_s8 }
0x1555   :  { %1496 = vrot.lane.b32.xlu1 %v2654_v12, %s2289_s8 }
0x1596   :  { %v1909_v40 = vpop.permute.xlu0 %1908 }
0x1597   :  { %v1911_v55 = vmul.f32 %v1909_v40, %v1906_v14 }
0x1599   :  { %v1913_v29 = vadd.f32 %v1912_v25, %v1911_v55 }
0x159a   :  { %v403_v41 = vpop.permute.xlu0 %402 }
0x159b   :  { %1948 = vst.msk [vmem:[%s2785_s5 + $0x38] sm:$0xff] %vm406_vm3, %v403_v41  ;;  %1923 = vrot.lane.b32.xlu1 %v1913_v29, %s2287_s24 }
0x159e   :  { %v844_v53 = vpop.permute.xlu0 %843 }
0x159f   :  { %1960 = vst.msk [vmem:[%s2785_s5 + $0x28] sm:$0xff] %vm406_vm3, %v844_v53 }
0x15a0   :  { %1977 = vst.msk [vmem:[%s2785_s5 + $0x28] sm:$0xff] %vm37_vm1, %v2666_v19 }
0x15a2   :  { %v1281_v32 = vpop.permute.xlu0 %1280 }
0x15a3   :  { %1972 = vst.msk [vmem:[%s2785_s5 + $0x18] sm:$0xff] %vm406_vm3, %v1281_v32 }
0x15a6   :  { %v1713_v12 = vpop.permute.xlu0 %1712 }
0x15a7   :  { %1984 = vst.msk [vmem:[%s2785_s5 + $0x8] sm:$0xff] %vm406_vm3, %v1713_v12 }
0x15bb   :  { %v1917_v33 = vpop.permute.xlu1 %1916 }
0x15bc   :  { %v1919_v36 = vmul.f32 %v1917_v33, %v1914_v31 }
0x15be   :  { %v1921_v37 = vadd.f32 %v1920_v35, %v1919_v36 }
0x15bf   :  { %v624_v38 = vpop.permute.xlu1 %623 }
0x15c0   :  { %1954 = vst.msk [vmem:[%s2785_s5 + $0x30] sm:$0xff] %vm406_vm3, %v624_v38  ;;  %1928 = vrot.lane.b32.xlu0 %v1921_v37, %s2289_s8 }
0x15c1   :  { %1983 = vst.msk [vmem:[%s2785_s5 + $0x30] sm:$0xff] %vm37_vm1, %v2694_v60 }
0x15c3   :  { %v1064_v19 = vpop.permute.xlu1 %1063 }
0x15c4   :  { %1966 = vst.msk [vmem:[%s2785_s5 + $0x20] sm:$0xff] %vm406_vm3, %v1064_v19 }
0x15c5   :  { %1971 = vst.msk [vmem:[%s2785_s5 + $0x20] sm:$0xff] %vm37_vm1, %v2630_v30 }
0x15c7   :  { %v1497_v39 = vpop.permute.xlu1 %1496 }
0x15c8   :  { %1978 = vst.msk [vmem:[%s2785_s5 + $0x10] sm:$0xff] %vm406_vm3, %v1497_v39 }
0x160d   :  { %v1924_v42 = vpop.permute.xlu1 %1923 }
0x160e   :  { %1989 = vst.msk [vmem:[%s2785_s5 + $0x38] sm:$0xff] %vm37_vm1, %v1924_v42 }
0x1632   :  { %v1929_v43 = vpop.permute.xlu0 %1928 }
0x1633   :  { %1931 = vst.msk [vmem:[%s2785_s5] sm:$0xff] %vm406_vm3, %v1929_v43 }

// kernel: han_forward.5
= control target key start
LH: loop header
LB: loop body
LE: loop exit
PB: predicated region body
PF: predicated region fallthrough
CT: control target
= control target key end

     0   :  { %vm51_vm0 = vcmask 261120   ;;  %v2715_v2 = vmov 0.0   ;;  %vm2716_vm1 = vmmov 0   ;;  %s2718_s11 = smov 16   ;;  %vm181_vm2 = vcmask 785408   ;;  %s2720_s22 = smov 96   ;;  %s3303_s1 = inlined_call_operand.vmem [shape: f32[32,96], index: 1, kind: input, shape index: {}]   ;;  %s3304_s0 = inlined_call_operand.vmem [shape: f32[8,8,32], index: 0, kind: input, shape index: {}]   ;;  %s3305_s2 = inlined_call_operand.vmem [shape: f32[32,48], index: 2, kind: input, shape index: {}]   ;;  %s3306_s4 = inlined_call_operand.vmem [shape: f32[1,32], index: 4, kind: input, shape index: {}]   ;;  %s3307_s3 = inlined_call_operand.vmem [shape: f32[1,96], index: 3, kind: input, shape index: {}]   ;;  %s3308_s5 = inlined_call_operand.vmem [shape: f32[32,32], index: 5, kind: input, shape index: {}]   ;;  %s3309_s6 = inlined_call_operand.vmem [shape: f32[1,32], index: 6, kind: input, shape index: {}]   ;;  %s3310_s7 = inlined_call_operand.vmem [shape: f32[1,32], index: 7, kind: input, shape index: {}]   ;;  %s3311_s8 = inlined_call_operand.vmem [shape: f32[8,8,1], index: 8, kind: input, shape index: {}]   ;;  %s3312_s9 = inlined_call_operand.vmem [shape: f32[8,32], index: 9, kind: output, shape index: {}]  }
   0x1   :  { %v43_v0 = vld [vmem:[%s3303_s1 + $0x18] sm:$0xff]  ;;  %v42_v1 = vld [vmem:[%s3303_s1 + $0x10] sm:$0xff]  ;;  %2455 = vmatprep.subr.mxu1 %v2715_v2  ;;  %2459 = vmatprep.mubr.msk.f32.mxu1 %vm2716_vm1, %v2715_v2  ;;  %v32_v3 = vld [vmem:[%s3304_s0] sm:$0xff]  ;;  %s2721_s23 = smov 112   ;;  %s2722_s24 = smov 64   ;;  %vm203_vm3 = vcmask 130048  }
   0x2   :  { %2421 = vmatprep.subr.mxu0 %v43_v0  ;;  %v41_v4 = vld [vmem:[%s3303_s1 + $0x8] sm:$0xff]  ;;  %2429 = vmatprep.mubr.msk.f32.mxu0 %vm51_vm0, %v32_v3  ;;  %v40_v6 = vld [vmem:[%s3303_s1] sm:$0xff]  ;;  %s2717_s1 = smov 32   ;;  %v34_v10 = vld [vmem:[%s3304_s0 + $0x10] sm:$0xff]  ;;  %s2723_s25 = smov 80   ;;  %vm421_vm4 = vcmask 261248  }
   0x3   :  { %2422 = vmatpush3.msra.mxu0 %v43_v0  ;;  %v2794_v5 = vld [vmem:[%s3305_s2 + $0x8] sm:$0xff]  ;;  %v2803_v7 = vld [vmem:[%s3305_s2] sm:$0xff]  ;;  %v35_v11 = vld [vmem:[%s3304_s0 + $0x18] sm:$0xff]  ;;  %vm2197_vm6 = vcmask 7168  }
   0x4   :  { %2423 = vmatprep.subr.mxu0 %v42_v1  ;;  %2456 = vmatpush3.msra.mxu1 %v2794_v5  ;;  %v2308_v8 = vld [vmem:[%s3306_s4] ss:$0 sm:$0xff]  ;;  %v33_v9 = vld [vmem:[%s3304_s0 + $0x8] sm:$0xff]  ;;  %v38_v14 = vld [vmem:[%s3304_s0 + $0x30] sm:$0xff] }
   0x5   :  { %2424 = vmatpush3.msra.mxu0 %v42_v1  ;;  %2457 = vmatprep.subr.mxu1 %v2715_v2  ;;  %v36_v12 = vld [vmem:[%s3304_s0 + $0x20] sm:$0xff]  ;;  %v37_v13 = vld [vmem:[%s3304_s0 + $0x28] sm:$0xff]  ;;  %v39_v15 = vld [vmem:[%s3304_s0 + $0x38] sm:$0xff] }
   0x6   :  { %2425 = vmatprep.subr.mxu0 %v41_v4  ;;  %2458 = vmatpush3.msra.mxu1 %v2803_v7  ;;  %v2851_v16 = vld [vmem:[%s3305_s2 + $0x18] sm:$0xff]  ;;  %v2857_v17 = vld [vmem:[%s3305_s2 + $0x10] sm:$0xff]  ;;  %v2299_v18 = vld [vmem:[%s3307_s3] ss:$0 sm:$0xff]  ;;  %s2719_s3 = smov 48  }
   0x7   :  { %2426 = vmatpush3.msra.mxu0 %v41_v4  ;;  %365 = vrot.lane.b32.xlu0 %v2308_v8, %s2717_s1 }
   0x8   :  { %2427 = vmatprep.subr.mxu0 %v40_v6  ;;  %2462 = vmatprep.subr.mxu1 %v2715_v2 }
   0x9   :  { %2428 = vmatpush3.msra.mxu0 %v40_v6 }
   0xa   :  { %2430 = vmatmul.mubr.msk.f32.vlgmr.msra.gmra.mxu0 %vm51_vm0, %v33_v9  ;;  %2441 = vmatprep.subr.mxu0 %v2715_v2 }
   0xb   :  { %2442 = vmatpush3.msra.mxu0 %v2794_v5  ;;  %2432 = vmatprep.mubr.msk.f32.mxu0 %vm51_vm0, %v34_v10 }
   0xc   :  { %2443 = vmatprep.subr.mxu0 %v2715_v2  ;;  %380 = vrot.lane.b32.xlu0 %v2308_v8, %s2718_s11 }
   0xd   :  { %2444 = vmatpush3.msra.mxu0 %v2803_v7 }
   0xe   :  { %2433 = vmatmul.mubr.msk.f32.gmra.mxu0 %vm51_vm0, %v35_v11  ;;  %2448 = vmatprep.subr.mxu0 %v2715_v2 }
   0xf   :  { %2435 = vmatprep.mubr.msk.f32.mxu0 %vm51_vm0, %v36_v12 }
  0x12   :  { %2436 = vmatmul.mubr.msk.f32.gmra.mxu0 %vm51_vm0, %v37_v13 }
  0x13   :  { %2438 = vmatprep.mubr.msk.f32.mxu0 %vm51_vm0, %v38_v14 }
  0x16   :  { %2439 = vmatmul.mubr.msk.f32.gmra.mxu0 %vm51_vm0, %v39_v15 }
  0x17   :  { %2445 = vmatprep.mubr.msk.f32.mxu0 %vm2716_vm1, %v2715_v2 }
  0x1a   :  { %2446 = vmatmul.mubr.f32.vlgmr.msra.gmra.mxu0 %v2715_v2 }
  0x1b   :  { %2449 = vmatpush3.msra.mxu0 %v2851_v16  ;;  %2452 = vmatprep.mubr.msk.f32.mxu0 %vm2716_vm1, %v2715_v2 }
  0x1c   :  { %2450 = vmatprep.subr.mxu0 %v2715_v2 }
  0x1d   :  { %2451 = vmatpush3.msra.mxu0 %v2857_v17 }
  0x1e   :  { %2453 = vmatmul.mubr.f32.vlgmr.msra.gmra.mxu0 %v2715_v2  ;;  %2476 = vmatprep.subr.mxu0 %v2715_v2 }
  0x1f   :  { %2477 = vmatpush3.msra.mxu0 %v2851_v16  ;;  %2480 = vmatprep.mubr.msk.f32.mxu0 %vm2716_vm1, %v2715_v2 }
  0x20   :  { %2478 = vmatprep.subr.mxu0 %v2715_v2 }
  0x21   :  { %2479 = vmatpush3.msra.mxu0 %v2857_v17 }
  0x22   :  { %2490 = vmatprep.subr.mxu0 %v2715_v2 }
  0x79   :  { %v2880_v32 = vpop.permute.xlu0 %365 }
  0x7e   :  { %v2885_v38 = vpop.permute.xlu0 %380 }
  0xca   :  { %v2431_v19 = vpop.f32.mrf.mxu0 }
  0xcb   :  { %v148_v20 = vadd.f32 %v2431_v19, %v2299_v18 }
  0xcc   :  { %v142_v21 = vpop.f32.mrf.mxu0 }
  0xcd   :  { %183 = vst.msk [vmem:[#allocation2 + $0x8] sm:$0xff] %vm181_vm2, %v148_v20  ;;  %v143_v22 = vadd.f32 %v2299_v18, %v142_v21 }
  0xce   :  { %v2434_v23 = vpop.f32.mrf.mxu0 }
  0xcf   :  { %182 = vst.msk [vmem:[#allocation2] sm:$0xff] %vm181_vm2, %v143_v22  ;;  %v158_v24 = vadd.f32 %v2434_v23, %v2299_v18 }
  0xd0   :  { %v152_v25 = vpop.f32.mrf.mxu0 }
  0xd1   :  { %185 = vst.msk [vmem:[#allocation2 + $0x18] sm:$0xff] %vm181_vm2, %v158_v24  ;;  %v153_v26 = vadd.f32 %v2299_v18, %v152_v25 }
  0xd2   :  { %v2437_v27 = vpop.f32.mrf.mxu0 }
  0xd3   :  { %184 = vst.msk [vmem:[#allocation2 + $0x10] sm:$0xff] %vm181_vm2, %v153_v26  ;;  %v168_v28 = vadd.f32 %v2437_v27, %v2299_v18 }
  0xd4   :  { %v162_v29 = vpop.f32.mrf.mxu0 }
  0xd5   :  { %187 = vst.msk [vmem:[#allocation2 + $0x28] sm:$0xff] %vm181_vm2, %v168_v28  ;;  %v163_v30 = vadd.f32 %v2299_v18, %v162_v29 }
  0xd6   :  { %v2440_v31 = vpop.f32.mrf.mxu0  ;;  %v2892_v43 = vld [vmem:[#allocation2] sm:$0xff] }
  0xd7   :  { %186 = vst.msk [vmem:[#allocation2 + $0x20] sm:$0xff] %vm181_vm2, %v163_v30  ;;  %v178_v33 = vadd.f32 %v2440_v31, %v2299_v18 }
  0xd8   :  { %v172_v34 = vpop.f32.mrf.mxu0 }
  0xd9   :  { %189 = vst.msk [vmem:[#allocation2 + $0x38] sm:$0xff] %vm181_vm2, %v178_v33  ;;  %v173_v35 = vadd.f32 %v2299_v18, %v172_v34 }
  0xda   :  { %v273_v36 = vpop.f32.mrf.mxu0 }
  0xdb   :  { %188 = vst.msk [vmem:[#allocation2 + $0x30] sm:$0xff] %vm181_vm2, %v173_v35  ;;  %v368_v42 = vadd.f32 %v2880_v32, %v273_v36  ;;  %v347_v44 = vadd.f32 %v273_v36, %v2892_v43 }
  0xdc   :  { %v2447_v37 = vpop.f32.mrf.mxu0 }
  0xdd   :  { %v2309_v45 = vmul.f32 -1.442695, %v347_v44 }
  0xde   :  { %v343_v39 = vpop.f32.mrf.mxu0 }
  0xdf   :  { %355 = vrot.lane.b32.xlu1 %v343_v39, %s2719_s3  ;;  %v383_v40 = vadd.f32 %v2885_v38, %v343_v39  ;;  %2585 = vpow2.f32 %v2309_v45  ;;  %v2938_v39 = vld [vmem:[#allocation2 + $0x8] sm:$0xff] }
  0xe0   :  { %v2454_v41 = vpop.f32.mrf.mxu0  ;;  %v2895_v48 = vld [vmem:[#allocation2 + $0x38] sm:$0xff] }
  0xe1   :  { %385 = vrot.lane.b32.xlu0 %v383_v40, %s2718_s11 }
  0xe2   :  { %v2930_v24 = vld [vmem:[#allocation2 + $0x30] sm:$0xff] }
  0xe3   :  { %370 = vrot.lane.b32.xlu1 %v368_v42, %s2720_s22 }
  0xec   :  { %v2586_v46 = vpop.eup %2585 }
  0xed   :  { %v351_v47 = vadd.f32 1.0, %v2586_v46 }
  0xef   :  { %2587 = vrcp.f32 %v351_v47 }
  0xfc   :  { %v2588_v52 = vpop.eup %2587 }
  0xfd   :  { %v395_v3 = vsub.f32 1.0, %v2588_v52  ;;  %v401_v6 = vmul.f32 0.0, %v2588_v52 }
 0x151   :  { %v356_v49 = vpop.permute.xlu1 %355 }
 0x152   :  { %v358_v50 = vadd.f32 %v356_v49, %v2895_v48 }
 0x153   :  { %v386_v58 = vpop.permute.xlu0 %385 }
 0x154   :  { %v2310_v51 = vmul.f32 -1.442695, %v358_v50 }
 0x155   :  { %v371_v53 = vpop.permute.xlu1 %370 }
 0x156   :  { %2589 = vpow2.f32 %v2310_v51  ;;  %v373_v54 = vmul.f32 %v2588_v52, %v371_v53 }
 0x158   :  { %375 = vrot.lane.b32.xlu1 %v373_v54, %s2717_s1 }
 0x163   :  { %v2590_v55 = vpop.eup %2589 }
 0x164   :  { %v362_v56 = vadd.f32 1.0, %v2590_v55 }
 0x166   :  { %2591 = vrcp.f32 %v362_v56 }
 0x173   :  { %v2592_v57 = vpop.eup %2591 }
 0x174   :  { %v388_v59 = vmul.f32 %v2592_v57, %v386_v58  ;;  %v403_v10 = vsub.f32 1.0, %v2592_v57  ;;  %v409_v12 = vmul.f32 0.0, %v2592_v57 }
 0x176   :  { %390 = vrot.lane.b32.xlu0 %v388_v59, %s2717_s1 }
 0x1ca   :  { %v376_v60 = vpop.permute.xlu1 %375 }
 0x1cb   :  { %v378_v61 = vadd.f32 %v376_v60, %v2892_v43 }
 0x1cd   :  { %2593 = vtanh.f32 %v378_v61 }
 0x1da   :  { %v2594_v62 = vpop.eup %2593 }
 0x1db   :  { %397 = vrot.lane.b32.xlu1 %v2594_v62, %s2721_s23 }
 0x1e8   :  { %v391_v63 = vpop.permute.xlu0 %390 }
 0x1e9   :  { %v393_v0 = vadd.f32 %v391_v63, %v2895_v48 }
 0x1eb   :  { %2595 = vtanh.f32 %v393_v0 }
 0x1f8   :  { %v2596_v1 = vpop.eup %2595 }
 0x1f9   :  { %405 = vrot.lane.b32.xlu0 %v2596_v1, %s2721_s23 }
 0x24d   :  { %v398_v4 = vpop.permute.xlu1 %397 }
 0x24e   :  { %v400_v8 = vmul.f32 %v398_v4, %v395_v3  ;;  %v2972_v4 = vld [vmem:[#allocation2 + $0x28] sm:$0xff] }
 0x250   :  { %v2904_v9 = vadd.f32 %v401_v6, %v400_v8 }
 0x252   :  { %412 = vrot.lane.b32.xlu1 %v2904_v9, %s2721_s23 }
 0x26b   :  { %v406_v11 = vpop.permute.xlu0 %405 }
 0x26c   :  { %v408_v13 = vmul.f32 %v406_v11, %v403_v10 }
 0x26e   :  { %v2908_v14 = vadd.f32 %v409_v12, %v408_v13 }
 0x270   :  { %499 = vrot.lane.b32.xlu0 %v2908_v14, %s2722_s24 }
 0x2c4   :  { %v413_v15 = vpop.permute.xlu1 %412 }
 0x2c5   :  { %415 = vst.msk [vmem:[#allocation3] sm:$0xff] %vm203_vm3, %v413_v15  ;;  %2460 = vmatmul.mubr.msk.f32.vlgmr.msra.gmra.mxu1 %vm203_vm3, %v413_v15 }
 0x2c6   :  { %2463 = vmatpush3.msra.mxu1 %v2851_v16  ;;  %2466 = vmatprep.mubr.msk.f32.mxu1 %vm2716_vm1, %v2715_v2 }
 0x2c7   :  { %2464 = vmatprep.subr.mxu1 %v2715_v2 }
 0x2c8   :  { %2465 = vmatpush3.msra.mxu1 %v2857_v17 }
 0x2c9   :  { %2469 = vmatprep.subr.mxu1 %v2715_v2 }
 0x2e2   :  { %v500_v18 = vpop.permute.xlu0 %499 }
 0x2e3   :  { %2467 = vmatmul.mubr.msk.f32.vlgmr.msra.gmra.mxu1 %vm203_vm3, %v500_v18 }
 0x2e4   :  { %2470 = vmatpush3.msra.mxu1 %v2794_v5  ;;  %2473 = vmatprep.mubr.msk.f32.mxu1 %vm2716_vm1, %v2715_v2 }
 0x2e5   :  { %2471 = vmatprep.subr.mxu1 %v2715_v2 }
 0x2e6   :  { %2472 = vmatpush3.msra.mxu1 %v2803_v7 }
 0x2e7   :  { %2483 = vmatprep.subr.mxu1 %v2715_v2 }
 0x385   :  { %v495_v19 = vpop.f32.mrf.mxu1 }
 0x386   :  { %v591_v37 = vadd.f32 %v495_v19, %v2880_v32  ;;  %v573_v40 = vadd.f32 %v495_v19, %v2938_v39 }
 0x387   :  { %v2461_v20 = vpop.f32.mrf.mxu1 }
 0x388   :  { %v2313_v41 = vmul.f32 -1.442695, %v573_v40 }
 0x3a3   :  { %v569_v21 = vpop.f32.mrf.mxu1 }
 0x3a4   :  { %v603_v22 = vadd.f32 %v569_v21, %v2885_v38  ;;  %581 = vrot.lane.b32.xlu1 %v569_v21, %s2719_s3 }
 0x3a5   :  { %v2468_v23 = vpop.f32.mrf.mxu1 }
 0x3a6   :  { %605 = vrot.lane.b32.xlu0 %v603_v22, %s2718_s11 }
 0x416   :  { %v582_v25 = vpop.permute.xlu1 %581 }
 0x417   :  { %v584_v26 = vadd.f32 %v582_v25, %v2930_v24  ;;  %v2980_v25 = vld [vmem:[#allocation2 + $0x10] sm:$0xff] }
 0x418   :  { %v606_v31 = vpop.permute.xlu0 %605 }
 0x419   :  { %v2314_v27 = vmul.f32 -1.442695, %v584_v26 }
 0x41b   :  { %2597 = vpow2.f32 %v2314_v27 }
 0x428   :  { %v2598_v28 = vpop.eup %2597 }
 0x429   :  { %v588_v29 = vadd.f32 1.0, %v2598_v28 }
 0x42b   :  { %2599 = vrcp.f32 %v588_v29 }
 0x438   :  { %v2600_v30 = vpop.eup %2599 }
 0x439   :  { %v608_v33 = vmul.f32 %v2600_v30, %v606_v31  ;;  %v623_v45 = vsub.f32 1.0, %v2600_v30  ;;  %v629_v47 = vmul.f32 %v2600_v30, %v2908_v14 }
 0x43b   :  { %610 = vrot.lane.b32.xlu1 %v608_v33, %s2717_s1 }
 0x4ad   :  { %v611_v34 = vpop.permute.xlu1 %610 }
 0x4ae   :  { %v613_v35 = vadd.f32 %v611_v34, %v2930_v24 }
 0x4b0   :  { %2601 = vtanh.f32 %v613_v35 }
 0x4b1   :  { %2603 = vpow2.f32 %v2313_v41 }
 0x4bd   :  { %v2602_v36 = vpop.eup %2601 }
 0x4be   :  { %625 = vrot.lane.b32.xlu0 %v2602_v36, %s2721_s23  ;;  %v2604_v42 = vpop.eup %2603 }
 0x4bf   :  { %v577_v44 = vadd.f32 1.0, %v2604_v42 }
 0x4c1   :  { %2605 = vrcp.f32 %v577_v44 }
 0x4c2   :  { %593 = vrot.lane.b32.xlu0 %v591_v37, %s2720_s22 }
 0x4ce   :  { %v2606_v52 = vpop.eup %2605 }
 0x4cf   :  { %v615_v58 = vsub.f32 1.0, %v2606_v52  ;;  %v621_v60 = vmul.f32 %v2606_v52, %v2904_v9 }
 0x530   :  { %v626_v46 = vpop.permute.xlu0 %625 }
 0x531   :  { %v628_v49 = vmul.f32 %v626_v46, %v623_v45 }
 0x533   :  { %v2942_v50 = vadd.f32 %v629_v47, %v628_v49 }
 0x534   :  { %v594_v51 = vpop.permute.xlu0 %593 }
 0x535   :  { %719 = vrot.lane.b32.xlu1 %v2942_v50, %s2722_s24  ;;  %v596_v53 = vmul.f32 %v2606_v52, %v594_v51 }
 0x539   :  { %598 = vrot.lane.b32.xlu1 %v596_v53, %s2717_s1 }
 0x5a7   :  { %v720_v54 = vpop.permute.xlu1 %719 }
 0x5a8   :  { %2481 = vmatmul.mubr.msk.f32.vlgmr.msra.gmra.mxu0 %vm203_vm3, %v720_v54 }
 0x5a9   :  { %2491 = vmatpush3.msra.mxu0 %v2851_v16  ;;  %2494 = vmatprep.mubr.msk.f32.mxu0 %vm2716_vm1, %v2715_v2 }
 0x5aa   :  { %2492 = vmatprep.subr.mxu0 %v2715_v2 }
 0x5ab   :  { %v599_v55 = vpop.permute.xlu1 %598  ;;  %2493 = vmatpush3.msra.mxu0 %v2857_v17 }
 0x5ac   :  { %v601_v56 = vadd.f32 %v599_v55, %v2938_v39  ;;  %2504 = vmatprep.subr.mxu0 %v2715_v2 }
 0x5ae   :  { %2607 = vtanh.f32 %v601_v56 }
 0x5bb   :  { %v2608_v57 = vpop.eup %2607 }
 0x5bc   :  { %617 = vrot.lane.b32.xlu0 %v2608_v57, %s2721_s23  ;;  %v3014_v57 = vld [vmem:[#allocation2 + $0x20] sm:$0xff] }
 0x62e   :  { %v618_v59 = vpop.permute.xlu0 %617 }
 0x62f   :  { %v620_v61 = vmul.f32 %v618_v59, %v615_v58 }
 0x631   :  { %v2957_v62 = vadd.f32 %v621_v60, %v620_v61 }
 0x633   :  { %632 = vrot.lane.b32.xlu1 %v2957_v62, %s2721_s23 }
 0x668   :  { %v789_v63 = vpop.f32.mrf.mxu0 }
 0x669   :  { %v823_v0 = vadd.f32 %v789_v63, %v2885_v38  ;;  %801 = vrot.lane.b32.xlu0 %v789_v63, %s2719_s3 }
 0x66a   :  { %v2482_v1 = vpop.f32.mrf.mxu0 }
 0x66b   :  { %825 = vrot.lane.b32.xlu1 %v823_v0, %s2718_s11 }
 0x6a5   :  { %v633_v3 = vpop.permute.xlu1 %632 }
 0x6a6   :  { %636 = vst.msk [vmem:[#allocation3 + $0x8] sm:$0xff] %vm203_vm3, %v633_v3  ;;  %2474 = vmatmul.mubr.msk.f32.vlgmr.msra.gmra.mxu1 %vm203_vm3, %v633_v3 }
 0x6a7   :  { %2484 = vmatpush3.msra.mxu1 %v2794_v5  ;;  %2487 = vmatprep.mubr.msk.f32.mxu1 %vm2716_vm1, %v2715_v2 }
 0x6a8   :  { %2485 = vmatprep.subr.mxu1 %v2715_v2 }
 0x6a9   :  { %2486 = vmatpush3.msra.mxu1 %v2803_v7 }
 0x6aa   :  { %2497 = vmatprep.subr.mxu1 %v2715_v2 }
 0x6db   :  { %v802_v6 = vpop.permute.xlu0 %801 }
 0x6dc   :  { %v804_v8 = vadd.f32 %v802_v6, %v2972_v4 }
 0x6dd   :  { %v826_v13 = vpop.permute.xlu1 %825 }
 0x6de   :  { %v2318_v9 = vmul.f32 -1.442695, %v804_v8 }
 0x6e0   :  { %2609 = vpow2.f32 %v2318_v9 }
 0x6ed   :  { %v2610_v10 = vpop.eup %2609 }
 0x6ee   :  { %v808_v11 = vadd.f32 1.0, %v2610_v10 }
 0x6f0   :  { %2611 = vrcp.f32 %v808_v11 }
 0x6fd   :  { %v2612_v12 = vpop.eup %2611 }
 0x6fe   :  { %v828_v15 = vmul.f32 %v2612_v12, %v826_v13  ;;  %v843_v34 = vsub.f32 1.0, %v2612_v12  ;;  %v849_v36 = vmul.f32 %v2612_v12, %v2942_v50  ;;  %v3022_v12 = vld [vmem:[#allocation2 + $0x18] sm:$0xff] }
 0x700   :  { %830 = vrot.lane.b32.xlu0 %v828_v15, %s2717_s1 }
 0x766   :  { %v715_v18 = vpop.f32.mrf.mxu1 }
 0x767   :  { %v811_v19 = vadd.f32 %v715_v18, %v2880_v32  ;;  %v793_v26 = vadd.f32 %v715_v18, %v2980_v25 }
 0x768   :  { %v2475_v20 = vpop.f32.mrf.mxu1 }
 0x769   :  { %813 = vrot.lane.b32.xlu0 %v811_v19, %s2720_s22  ;;  %v2317_v27 = vmul.f32 -1.442695, %v793_v26 }
 0x772   :  { %v831_v21 = vpop.permute.xlu0 %830 }
 0x773   :  { %v833_v22 = vadd.f32 %v831_v21, %v2972_v4 }
 0x775   :  { %2613 = vtanh.f32 %v833_v22 }
 0x776   :  { %2615 = vpow2.f32 %v2317_v27 }
 0x782   :  { %v2614_v23 = vpop.eup %2613 }
 0x783   :  { %845 = vrot.lane.b32.xlu1 %v2614_v23, %s2721_s23  ;;  %v2616_v28 = vpop.eup %2615 }
 0x784   :  { %v797_v29 = vadd.f32 1.0, %v2616_v28 }
 0x786   :  { %2617 = vrcp.f32 %v797_v29 }
 0x793   :  { %v2618_v30 = vpop.eup %2617 }
 0x794   :  { %v835_v46 = vsub.f32 1.0, %v2618_v30  ;;  %v841_v49 = vmul.f32 %v2618_v30, %v2957_v62 }
 0x7db   :  { %v814_v31 = vpop.permute.xlu0 %813 }
 0x7dc   :  { %v816_v33 = vmul.f32 %v2618_v30, %v814_v31 }
 0x7de   :  { %818 = vrot.lane.b32.xlu0 %v816_v33, %s2717_s1 }
 0x7f5   :  { %v846_v35 = vpop.permute.xlu1 %845 }
 0x7f6   :  { %v848_v37 = vmul.f32 %v846_v35, %v843_v34 }
 0x7f8   :  { %v2985_v40 = vadd.f32 %v849_v36, %v848_v37 }
 0x7fa   :  { %939 = vrot.lane.b32.xlu1 %v2985_v40, %s2722_s24 }
 0x850   :  { %v819_v41 = vpop.permute.xlu0 %818 }
 0x851   :  { %v821_v42 = vadd.f32 %v819_v41, %v2980_v25 }
 0x853   :  { %2619 = vtanh.f32 %v821_v42 }
 0x860   :  { %v2620_v44 = vpop.eup %2619 }
 0x861   :  { %837 = vrot.lane.b32.xlu1 %v2620_v44, %s2721_s23 }
 0x86c   :  { %v940_v45 = vpop.permute.xlu1 %939 }
 0x86d   :  { %2495 = vmatmul.mubr.msk.f32.vlgmr.msra.gmra.mxu0 %vm203_vm3, %v940_v45 }
 0x86e   :  { %2505 = vmatpush3.msra.mxu0 %v2851_v16  ;;  %2508 = vmatprep.mubr.msk.f32.mxu0 %vm2716_vm1, %v2715_v2 }
 0x86f   :  { %2506 = vmatprep.subr.mxu0 %v2715_v2 }
 0x870   :  { %2507 = vmatpush3.msra.mxu0 %v2857_v17 }
 0x871   :  { %2518 = vmatprep.subr.mxu0 %v2715_v2 }
 0x8d3   :  { %v838_v47 = vpop.permute.xlu1 %837 }
 0x8d4   :  { %v840_v51 = vmul.f32 %v838_v47, %v835_v46 }
 0x8d6   :  { %v2999_v52 = vadd.f32 %v841_v49, %v840_v51 }
 0x8d8   :  { %852 = vrot.lane.b32.xlu0 %v2999_v52, %s2721_s23 }
 0x92d   :  { %v1009_v53 = vpop.f32.mrf.mxu0 }
 0x92e   :  { %v1043_v54 = vadd.f32 %v1009_v53, %v2885_v38  ;;  %1021 = vrot.lane.b32.xlu1 %v1009_v53, %s2719_s3 }
 0x92f   :  { %v2496_v55 = vpop.f32.mrf.mxu0 }
 0x930   :  { %1045 = vrot.lane.b32.xlu0 %v1043_v54, %s2718_s11 }
 0x94a   :  { %v853_v56 = vpop.permute.xlu0 %852 }
 0x94b   :  { %856 = vst.msk [vmem:[#allocation3 + $0x10] sm:$0xff] %vm203_vm3, %v853_v56  ;;  %2488 = vmatmul.mubr.msk.f32.vlgmr.msra.gmra.mxu1 %vm203_vm3, %v853_v56 }
 0x94c   :  { %2498 = vmatpush3.msra.mxu1 %v2794_v5  ;;  %2501 = vmatprep.mubr.msk.f32.mxu1 %vm2716_vm1, %v2715_v2 }
 0x94d   :  { %2499 = vmatprep.subr.mxu1 %v2715_v2 }
 0x94e   :  { %2500 = vmatpush3.msra.mxu1 %v2803_v7 }
 0x94f   :  { %2511 = vmatprep.subr.mxu1 %v2715_v2 }
 0x9a0   :  { %v1022_v58 = vpop.permute.xlu1 %1021 }
 0x9a1   :  { %v1024_v59 = vadd.f32 %v1022_v58, %v3014_v57 }
 0x9a2   :  { %v1046_v0 = vpop.permute.xlu0 %1045 }
 0x9a3   :  { %v2322_v60 = vmul.f32 -1.442695, %v1024_v59 }
 0x9a5   :  { %2621 = vpow2.f32 %v2322_v60 }
 0x9b2   :  { %v2622_v61 = vpop.eup %2621 }
 0x9b3   :  { %v1028_v62 = vadd.f32 1.0, %v2622_v61 }
 0x9b5   :  { %2623 = vrcp.f32 %v1028_v62 }
 0x9c2   :  { %v2624_v63 = vpop.eup %2623 }
 0x9c3   :  { %v1048_v1 = vmul.f32 %v2624_v63, %v1046_v0  ;;  %v1063_v23 = vsub.f32 1.0, %v2624_v63  ;;  %v1069_v27 = vmul.f32 %v2624_v63, %v2985_v40 }
 0x9c5   :  { %1050 = vrot.lane.b32.xlu1 %v1048_v1, %s2717_s1 }
 0xa0b   :  { %v935_v3 = vpop.f32.mrf.mxu1 }
 0xa0c   :  { %v1031_v6 = vadd.f32 %v935_v3, %v2880_v32  ;;  %v1013_v13 = vadd.f32 %v935_v3, %v3022_v12 }
 0xa0d   :  { %v2489_v8 = vpop.f32.mrf.mxu1 }
 0xa0e   :  { %1033 = vrot.lane.b32.xlu1 %v1031_v6, %s2720_s22  ;;  %v2321_v15 = vmul.f32 -1.442695, %v1013_v13 }
 0xa37   :  { %v1051_v9 = vpop.permute.xlu1 %1050 }
 0xa38   :  { %v1053_v10 = vadd.f32 %v1051_v9, %v3014_v57 }
 0xa3a   :  { %2625 = vtanh.f32 %v1053_v10 }
 0xa3b   :  { %2627 = vpow2.f32 %v2321_v15 }
 0xa47   :  { %v2626_v11 = vpop.eup %2625 }
 0xa48   :  { %1065 = vrot.lane.b32.xlu0 %v2626_v11, %s2721_s23  ;;  %v2628_v18 = vpop.eup %2627 }
 0xa49   :  { %v1017_v19 = vadd.f32 1.0, %v2628_v18 }
 0xa4b   :  { %2629 = vrcp.f32 %v1017_v19 }
 0xa58   :  { %v2630_v20 = vpop.eup %2629 }
 0xa59   :  { %v1055_v35 = vsub.f32 1.0, %v2630_v20  ;;  %v1061_v37 = vmul.f32 %v2630_v20, %v2999_v52 }
 0xa80   :  { %v1034_v21 = vpop.permute.xlu1 %1033 }
 0xa81   :  { %v1036_v22 = vmul.f32 %v2630_v20, %v1034_v21 }
 0xa83   :  { %1038 = vrot.lane.b32.xlu1 %v1036_v22, %s2717_s1 }
 0xaba   :  { %v1066_v26 = vpop.permute.xlu0 %1065 }
 0xabb   :  { %v1068_v28 = vmul.f32 %v1066_v26, %v1063_v23 }
 0xabd   :  { %v3027_v29 = vadd.f32 %v1069_v27, %v1068_v28 }
 0xabf   :  { %1157 = vrot.lane.b32.xlu0 %v3027_v29, %s2722_s24 }
 0xaf5   :  { %v1039_v30 = vpop.permute.xlu1 %1038 }
 0xaf6   :  { %v1041_v31 = vadd.f32 %v1039_v30, %v3022_v12 }
 0xaf8   :  { %2631 = vtanh.f32 %v1041_v31 }
 0xb05   :  { %v2632_v33 = vpop.eup %2631 }
 0xb06   :  { %1057 = vrot.lane.b32.xlu0 %v2632_v33, %s2721_s23 }
 0xb31   :  { %v1158_v34 = vpop.permute.xlu0 %1157 }
 0xb32   :  { %2509 = vmatmul.mubr.msk.f32.vlgmr.msra.gmra.mxu0 %vm203_vm3, %v1158_v34 }
 0xb33   :  { %2519 = vmatpush3.msra.mxu0 %v2851_v16  ;;  %2522 = vmatprep.mubr.msk.f32.mxu0 %vm2716_vm1, %v2715_v2 }
 0xb34   :  { %2520 = vmatprep.subr.mxu0 %v2715_v2 }
 0xb35   :  { %2521 = vmatpush3.msra.mxu0 %v2857_v17 }
 0xb36   :  { %2532 = vmatprep.subr.mxu0 %v2715_v2 }
 0xb78   :  { %v1058_v36 = vpop.permute.xlu0 %1057 }
 0xb79   :  { %v1060_v41 = vmul.f32 %v1058_v36, %v1055_v35 }
 0xb7b   :  { %v3041_v42 = vadd.f32 %v1061_v37, %v1060_v41 }
 0xb7d   :  { %1072 = vrot.lane.b32.xlu1 %v3041_v42, %s2721_s23 }
 0xbef   :  { %v1073_v44 = vpop.permute.xlu1 %1072 }
 0xbf0   :  { %1076 = vst.msk [vmem:[#allocation3 + $0x18] sm:$0xff] %vm203_vm3, %v1073_v44  ;;  %2502 = vmatmul.mubr.msk.f32.vlgmr.msra.gmra.mxu1 %vm203_vm3, %v1073_v44 }
 0xbf1   :  { %2512 = vmatpush3.msra.mxu1 %v2794_v5  ;;  %2515 = vmatprep.mubr.msk.f32.mxu1 %vm2716_vm1, %v2715_v2 }
 0xbf2   :  { %v1227_v45 = vpop.f32.mrf.mxu0  ;;  %2513 = vmatprep.subr.mxu1 %v2715_v2 }
 0xbf3   :  { %v1261_v46 = vadd.f32 %v1227_v45, %v2885_v38  ;;  %1239 = vrot.lane.b32.xlu0 %v1227_v45, %s2719_s3  ;;  %2514 = vmatpush3.msra.mxu1 %v2803_v7 }
 0xbf4   :  { %v2510_v47 = vpop.f32.mrf.mxu0  ;;  %2525 = vmatprep.subr.mxu1 %v2715_v2 }
 0xbf5   :  { %1263 = vrot.lane.b32.xlu1 %v1261_v46, %s2718_s11 }
 0xc65   :  { %v1240_v49 = vpop.permute.xlu0 %1239 }
 0xc66   :  { %v1242_v51 = vadd.f32 %v1240_v49, %v3022_v12 }
 0xc67   :  { %v1264_v56 = vpop.permute.xlu1 %1263 }
 0xc68   :  { %v2326_v52 = vmul.f32 -1.442695, %v1242_v51 }
 0xc6a   :  { %2633 = vpow2.f32 %v2326_v52 }
 0xc77   :  { %v2634_v53 = vpop.eup %2633 }
 0xc78   :  { %v1246_v54 = vadd.f32 1.0, %v2634_v53 }
 0xc7a   :  { %2635 = vrcp.f32 %v1246_v54 }
 0xc87   :  { %v2636_v55 = vpop.eup %2635 }
 0xc88   :  { %v1266_v58 = vmul.f32 %v2636_v55, %v1264_v56  ;;  %v1281_v13 = vsub.f32 1.0, %v2636_v55  ;;  %v1287_v18 = vmul.f32 %v2636_v55, %v3027_v29 }
 0xc8a   :  { %1268 = vrot.lane.b32.xlu0 %v1266_v58, %s2717_s1 }
 0xcb0   :  { %v1153_v59 = vpop.f32.mrf.mxu1 }
 0xcb1   :  { %v1249_v60 = vadd.f32 %v1153_v59, %v2880_v32  ;;  %v1231_v62 = vadd.f32 %v1153_v59, %v3014_v57 }
 0xcb2   :  { %v2503_v61 = vpop.f32.mrf.mxu1 }
 0xcb3   :  { %1251 = vrot.lane.b32.xlu1 %v1249_v60, %s2720_s22  ;;  %v2325_v1 = vmul.f32 -1.442695, %v1231_v62 }
 0xcfc   :  { %v1269_v63 = vpop.permute.xlu0 %1268 }
 0xcfd   :  { %v1271_v0 = vadd.f32 %v1269_v63, %v3022_v12 }
 0xcff   :  { %2637 = vtanh.f32 %v1271_v0 }
 0xd00   :  { %2639 = vpow2.f32 %v2325_v1 }
 0xd0c   :  { %v2638_v3 = vpop.eup %2637 }
 0xd0d   :  { %1283 = vrot.lane.b32.xlu0 %v2638_v3, %s2721_s23  ;;  %v2640_v6 = vpop.eup %2639 }
 0xd0e   :  { %v1235_v8 = vadd.f32 1.0, %v2640_v6 }
 0xd10   :  { %2641 = vrcp.f32 %v1235_v8 }
 0xd1d   :  { %v2642_v9 = vpop.eup %2641 }
 0xd1e   :  { %v1273_v26 = vsub.f32 1.0, %v2642_v9  ;;  %v1279_v27 = vmul.f32 %v2642_v9, %v3041_v42 }
 0xd25   :  { %v1252_v10 = vpop.permute.xlu1 %1251 }
 0xd26   :  { %v1254_v11 = vmul.f32 %v2642_v9, %v1252_v10 }
 0xd28   :  { %1256 = vrot.lane.b32.xlu1 %v1254_v11, %s2717_s1 }
 0xd7f   :  { %v1284_v15 = vpop.permute.xlu0 %1283 }
 0xd80   :  { %v1286_v19 = vmul.f32 %v1284_v15, %v1281_v13 }
 0xd82   :  { %v3065_v12 = vadd.f32 %v1287_v18, %v1286_v19 }
 0xd84   :  { %1373 = vrot.lane.b32.xlu0 %v3065_v12, %s2722_s24 }
 0xd9a   :  { %v1257_v20 = vpop.permute.xlu1 %1256 }
 0xd9b   :  { %v1259_v21 = vadd.f32 %v1257_v20, %v3014_v57 }
 0xd9d   :  { %2643 = vtanh.f32 %v1259_v21 }
 0xdaa   :  { %v2644_v22 = vpop.eup %2643 }
 0xdab   :  { %1275 = vrot.lane.b32.xlu1 %v2644_v22, %s2721_s23 }
 0xdf6   :  { %v1374_v23 = vpop.permute.xlu0 %1373 }
 0xdf7   :  { %2523 = vmatmul.mubr.msk.f32.vlgmr.msra.gmra.mxu0 %vm203_vm3, %v1374_v23 }
 0xdf8   :  { %2533 = vmatpush3.msra.mxu0 %v2851_v16  ;;  %2536 = vmatprep.mubr.msk.f32.mxu0 %vm2716_vm1, %v2715_v2 }
 0xdf9   :  { %2534 = vmatprep.subr.mxu0 %v2715_v2 }
 0xdfa   :  { %2535 = vmatpush3.msra.mxu0 %v2857_v17 }
 0xdfb   :  { %2546 = vmatprep.subr.mxu0 %v2715_v2 }
 0xe1d   :  { %v1276_v57 = vpop.permute.xlu1 %1275 }
 0xe1e   :  { %v1278_v28 = vmul.f32 %v1276_v57, %v1273_v26 }
 0xe20   :  { %v3079_v30 = vadd.f32 %v1279_v27, %v1278_v28 }
 0xe22   :  { %1290 = vrot.lane.b32.xlu0 %v3079_v30, %s2721_s23 }
 0xe94   :  { %v3083_v31 = vpop.permute.xlu0 %1290 }
 0xe95   :  { %2516 = vmatmul.mubr.msk.f32.vlgmr.msra.gmra.mxu1 %vm203_vm3, %v3083_v31 }
 0xe96   :  { %2526 = vmatpush3.msra.mxu1 %v2794_v5  ;;  %2529 = vmatprep.mubr.msk.f32.mxu1 %vm2716_vm1, %v2715_v2 }
 0xe97   :  { %2527 = vmatprep.subr.mxu1 %v2715_v2 }
 0xe98   :  { %2528 = vmatpush3.msra.mxu1 %v2803_v7 }
 0xe99   :  { %2539 = vmatprep.subr.mxu1 %v2715_v2 }
 0xeb7   :  { %v1443_v33 = vpop.f32.mrf.mxu0 }
 0xeb8   :  { %v1477_v34 = vadd.f32 %v1443_v33, %v2885_v38  ;;  %1455 = vrot.lane.b32.xlu1 %v1443_v33, %s2719_s3 }
 0xeb9   :  { %v2524_v35 = vpop.f32.mrf.mxu0 }
 0xeba   :  { %1479 = vrot.lane.b32.xlu0 %v1477_v34, %s2718_s11 }
 0xf2a   :  { %v1456_v36 = vpop.permute.xlu1 %1455 }
 0xf2b   :  { %v1458_v37 = vadd.f32 %v1456_v36, %v2980_v25 }
 0xf2c   :  { %v1480_v46 = vpop.permute.xlu0 %1479 }
 0xf2d   :  { %v2330_v41 = vmul.f32 -1.442695, %v1458_v37 }
 0xf2f   :  { %2645 = vpow2.f32 %v2330_v41 }
 0xf3c   :  { %v2646_v42 = vpop.eup %2645 }
 0xf3d   :  { %v1462_v44 = vadd.f32 1.0, %v2646_v42 }
 0xf3f   :  { %2647 = vrcp.f32 %v1462_v44 }
 0xf4c   :  { %v2648_v45 = vpop.eup %2647 }
 0xf4d   :  { %v1482_v47 = vmul.f32 %v2648_v45, %v1480_v46  ;;  %v1497_v3 = vsub.f32 1.0, %v2648_v45  ;;  %v1503_v8 = vmul.f32 %v2648_v45, %v3065_v12 }
 0xf4f   :  { %1484 = vrot.lane.b32.xlu1 %v1482_v47, %s2717_s1 }
 0xf55   :  { %v1369_v49 = vpop.f32.mrf.mxu1 }
 0xf56   :  { %v1465_v51 = vadd.f32 %v1369_v49, %v2880_v32  ;;  %v1447_v53 = vadd.f32 %v1369_v49, %v2972_v4 }
 0xf57   :  { %v2517_v52 = vpop.f32.mrf.mxu1 }
 0xf58   :  { %1467 = vrot.lane.b32.xlu0 %v1465_v51, %s2720_s22  ;;  %v2329_v54 = vmul.f32 -1.442695, %v1447_v53 }
 0xf5a   :  { %2649 = vpow2.f32 %v2329_v54 }
 0xf67   :  { %v2650_v55 = vpop.eup %2649 }
 0xf68   :  { %v1451_v56 = vadd.f32 1.0, %v2650_v55 }
 0xf6a   :  { %2651 = vrcp.f32 %v1451_v56 }
 0xf77   :  { %v2652_v60 = vpop.eup %2651 }
 0xf78   :  { %v1495_v15 = vmul.f32 %v2652_v60, %v3079_v30 }
 0xfc1   :  { %v1485_v58 = vpop.permute.xlu1 %1484 }
 0xfc2   :  { %v1487_v59 = vadd.f32 %v1485_v58, %v2980_v25 }
 0xfc4   :  { %2653 = vtanh.f32 %v1487_v59 }
 0xfca   :  { %v1468_v61 = vpop.permute.xlu0 %1467 }
 0xfcb   :  { %v1470_v62 = vmul.f32 %v2652_v60, %v1468_v61 }
 0xfcd   :  { %1472 = vrot.lane.b32.xlu0 %v1470_v62, %s2717_s1 }
 0xfd1   :  { %v2654_v63 = vpop.eup %2653 }
 0xfd2   :  { %1499 = vrot.lane.b32.xlu1 %v2654_v63, %s2721_s23 }
0x103f   :  { %v1473_v0 = vpop.permute.xlu0 %1472 }
0x1040   :  { %v1475_v1 = vadd.f32 %v1473_v0, %v2972_v4  ;;  %v1489_v4 = vsub.f32 1.0, %v2652_v60 }
0x1042   :  { %2655 = vtanh.f32 %v1475_v1 }
0x1044   :  { %v1500_v6 = vpop.permute.xlu1 %1499 }
0x1045   :  { %v1502_v9 = vmul.f32 %v1500_v6, %v1497_v3 }
0x1047   :  { %v3106_v10 = vadd.f32 %v1503_v8, %v1502_v9 }
0x1049   :  { %1589 = vrot.lane.b32.xlu1 %v3106_v10, %s2722_s24 }
0x104f   :  { %v2656_v25 = vpop.eup %2655 }
0x1050   :  { %1491 = vrot.lane.b32.xlu0 %v2656_v25, %s2721_s23 }
0x10bb   :  { %v1590_v11 = vpop.permute.xlu1 %1589 }
0x10bc   :  { %2537 = vmatmul.mubr.msk.f32.vlgmr.msra.gmra.mxu0 %vm203_vm3, %v1590_v11 }
0x10bd   :  { %2547 = vmatpush3.msra.mxu0 %v2851_v16  ;;  %2550 = vmatprep.mubr.msk.f32.mxu0 %vm2716_vm1, %v2715_v2 }
0x10be   :  { %2548 = vmatprep.subr.mxu0 %v2715_v2 }
0x10bf   :  { %2549 = vmatpush3.msra.mxu0 %v2857_v17 }
0x10c2   :  { %v1492_v13 = vpop.permute.xlu0 %1491 }
0x10c3   :  { %v1494_v18 = vmul.f32 %v1492_v13, %v1489_v4 }
0x10c5   :  { %v1496_v19 = vadd.f32 %v1495_v15, %v1494_v18 }
0x10c7   :  { %1506 = vrot.lane.b32.xlu1 %v1496_v19, %s2721_s23 }
0x1139   :  { %v3119_v20 = vpop.permute.xlu1 %1506 }
0x113a   :  { %2530 = vmatmul.mubr.msk.f32.vlgmr.msra.gmra.mxu1 %vm203_vm3, %v3119_v20 }
0x113b   :  { %2540 = vmatpush3.msra.mxu1 %v2794_v5  ;;  %2543 = vmatprep.mubr.msk.f32.mxu1 %vm2716_vm1, %v2715_v2 }
0x113c   :  { %2541 = vmatprep.subr.mxu1 %v2715_v2 }
0x113d   :  { %2542 = vmatpush3.msra.mxu1 %v2803_v7 }
0x117c   :  { %v1659_v16 = vpop.f32.mrf.mxu0 }
0x117d   :  { %v1693_v17 = vadd.f32 %v1659_v16, %v2885_v38  ;;  %1671 = vrot.lane.b32.xlu0 %v1659_v16, %s2719_s3 }
0x117e   :  { %v2538_v21 = vpop.f32.mrf.mxu0 }
0x117f   :  { %1695 = vrot.lane.b32.xlu1 %v1693_v17, %s2718_s11 }
0x11ef   :  { %v1672_v22 = vpop.permute.xlu0 %1671 }
0x11f0   :  { %v1674_v23 = vadd.f32 %v1672_v22, %v2938_v39 }
0x11f1   :  { %v1696_v30 = vpop.permute.xlu1 %1695 }
0x11f2   :  { %v2334_v26 = vmul.f32 -1.442695, %v1674_v23 }
0x11f4   :  { %2657 = vpow2.f32 %v2334_v26 }
0x11fa   :  { %v1585_v5 = vpop.f32.mrf.mxu1 }
0x11fb   :  { %v1681_v57 = vadd.f32 %v1585_v5, %v2880_v32  ;;  %v1663_v34 = vadd.f32 %v1585_v5, %v2930_v24 }
0x11fc   :  { %v2531_v27 = vpop.f32.mrf.mxu1 }
0x11fd   :  { %1683 = vrot.lane.b32.xlu0 %v1681_v57, %s2720_s22  ;;  %v2333_v35 = vmul.f32 -1.442695, %v1663_v34 }
0x1201   :  { %v2658_v2 = vpop.eup %2657 }
0x1202   :  { %v1678_v7 = vadd.f32 1.0, %v2658_v2 }
0x1204   :  { %2659 = vrcp.f32 %v1678_v7 }
0x1205   :  { %2661 = vpow2.f32 %v2333_v35 }
0x1211   :  { %v2660_v28 = vpop.eup %2659 }
0x1212   :  { %v1698_v33 = vmul.f32 %v2660_v28, %v1696_v30  ;;  %v2662_v36 = vpop.eup %2661  ;;  %v1713_v53 = vsub.f32 1.0, %v2660_v28  ;;  %v1719_v55 = vmul.f32 %v2660_v28, %v3106_v10 }
0x1213   :  { %v1667_v37 = vadd.f32 1.0, %v2662_v36 }
0x1214   :  { %1700 = vrot.lane.b32.xlu1 %v1698_v33, %s2717_s1 }
0x1215   :  { %2663 = vrcp.f32 %v1667_v37 }
0x1222   :  { %v2664_v41 = vpop.eup %2663 }
0x1223   :  { %v1711_v60 = vmul.f32 %v2664_v41, %v1496_v19 }
0x126f   :  { %v1684_v42 = vpop.permute.xlu0 %1683 }
0x1270   :  { %v1686_v44 = vmul.f32 %v2664_v41, %v1684_v42 }
0x1272   :  { %1688 = vrot.lane.b32.xlu0 %v1686_v44, %s2717_s1 }
0x1286   :  { %v1701_v45 = vpop.permute.xlu1 %1700 }
0x1287   :  { %v1703_v46 = vadd.f32 %v1701_v45, %v2938_v39  ;;  %v1705_v39 = vsub.f32 1.0, %v2664_v41 }
0x1289   :  { %2665 = vtanh.f32 %v1703_v46 }
0x1296   :  { %v2666_v47 = vpop.eup %2665 }
0x1297   :  { %1715 = vrot.lane.b32.xlu1 %v2666_v47, %s2721_s23 }
0x12e4   :  { %v1689_v49 = vpop.permute.xlu0 %1688 }
0x12e5   :  { %v1691_v51 = vadd.f32 %v1689_v49, %v2930_v24 }
0x12e7   :  { %2667 = vtanh.f32 %v1691_v51 }
0x12f4   :  { %v2668_v52 = vpop.eup %2667 }
0x12f5   :  { %1707 = vrot.lane.b32.xlu0 %v2668_v52, %s2721_s23 }
0x1309   :  { %v1716_v54 = vpop.permute.xlu1 %1715 }
0x130a   :  { %v1718_v56 = vmul.f32 %v1716_v54, %v1713_v53 }
0x130c   :  { %v3142_v58 = vadd.f32 %v1719_v55, %v1718_v56 }
0x130e   :  { %1805 = vrot.lane.b32.xlu1 %v3142_v58, %s2722_s24 }
0x1367   :  { %v1708_v59 = vpop.permute.xlu0 %1707 }
0x1368   :  { %v1710_v61 = vmul.f32 %v1708_v59, %v1705_v39  ;;  %v2339_v59 = vld [vmem:[%s3309_s6] ss:$0 sm:$0xff] }
0x136a   :  { %v3146_v62 = vadd.f32 %v1711_v60, %v1710_v61 }
0x136c   :  { %1722 = vrot.lane.b32.xlu0 %v3146_v62, %s2721_s23 }
0x1380   :  { %v1806_v24 = vpop.permute.xlu1 %1805 }
0x1381   :  { %2551 = vmatmul.mubr.msk.f32.vlgmr.msra.gmra.mxu0 %vm203_vm3, %v1806_v24 }
0x13de   :  { %v3151_v63 = vpop.permute.xlu0 %1722 }
0x13df   :  { %2544 = vmatmul.mubr.msk.f32.vlgmr.msra.gmra.mxu1 %vm203_vm3, %v3151_v63 }
0x1441   :  { %v1875_v0 = vpop.f32.mrf.mxu0 }
0x1442   :  { %v1909_v1 = vadd.f32 %v1875_v0, %v2885_v38  ;;  %1887 = vrot.lane.b32.xlu1 %v1875_v0, %s2719_s3 }
0x1443   :  { %v2552_v3 = vpop.f32.mrf.mxu0 }
0x1444   :  { %1911 = vrot.lane.b32.xlu0 %v1909_v1, %s2718_s11 }
0x149f   :  { %v1801_v6 = vpop.f32.mrf.mxu1 }
0x14a0   :  { %v1897_v8 = vadd.f32 %v1801_v6, %v2880_v32  ;;  %v1879_v16 = vadd.f32 %v1801_v6, %v2895_v48 }
0x14a1   :  { %v2545_v9 = vpop.f32.mrf.mxu1 }
0x14a2   :  { %1899 = vrot.lane.b32.xlu1 %v1897_v8, %s2720_s22  ;;  %v2337_v17 = vmul.f32 -1.442695, %v1879_v16 }
0x14b4   :  { %v1888_v25 = vpop.permute.xlu1 %1887 }
0x14b5   :  { %v1890_v11 = vadd.f32 %v1888_v25, %v2892_v43 }
0x14b6   :  { %v1912_v18 = vpop.permute.xlu0 %1911 }
0x14b7   :  { %v2338_v4 = vmul.f32 -1.442695, %v1890_v11  ;;  %v2348_v11 = vld [vmem:[%s3310_s7] ss:$0 sm:$0xff] }
0x14b9   :  { %2669 = vpow2.f32 %v2338_v4 }
0x14c6   :  { %v2670_v13 = vpop.eup %2669 }
0x14c7   :  { %v1894_v15 = vadd.f32 1.0, %v2670_v13 }
0x14c9   :  { %2671 = vrcp.f32 %v1894_v15 }
0x14ca   :  { %2673 = vpow2.f32 %v2337_v17 }
0x14d6   :  { %v2672_v38 = vpop.eup %2671 }
0x14d7   :  { %v1914_v19 = vmul.f32 %v2672_v38, %v1912_v18  ;;  %v2674_v32 = vpop.eup %2673  ;;  %v1935_v33 = vmul.f32 %v2672_v38, %v3142_v58 }
0x14d8   :  { %v1883_v21 = vadd.f32 1.0, %v2674_v32 }
0x14d9   :  { %1916 = vrot.lane.b32.xlu0 %v1914_v19, %s2717_s1 }
0x14da   :  { %2675 = vrcp.f32 %v1883_v21 }
0x14e7   :  { %v2676_v22 = vpop.eup %2675 }
0x14e8   :  { %v1921_v36 = vsub.f32 1.0, %v2676_v22  ;;  %v1927_v41 = vmul.f32 %v2676_v22, %v3146_v62 }
0x1514   :  { %v1900_v23 = vpop.permute.xlu1 %1899 }
0x1515   :  { %v1902_v26 = vmul.f32 %v2676_v22, %v1900_v23 }
0x1517   :  { %1904 = vrot.lane.b32.xlu1 %v1902_v26, %s2717_s1 }
0x154b   :  { %v1917_v5 = vpop.permute.xlu0 %1916 }
0x154c   :  { %v1919_v57 = vadd.f32 %v1917_v5, %v2892_v43  ;;  %v1958_v43 = vld [vmem:[%s3308_s5 + $0x18] sm:$0xff] }
0x154d   :  { %2553 = vmatprep.subr.mxu1 %v1958_v43 }
0x154e   :  { %2677 = vtanh.f32 %v1919_v57  ;;  %2554 = vmatpush3.msra.mxu1 %v1958_v43 }
0x155b   :  { %v2678_v27 = vpop.eup %2677 }
0x155c   :  { %1931 = vrot.lane.b32.xlu0 %v2678_v27, %s2721_s23 }
0x1589   :  { %v1905_v2 = vpop.permute.xlu1 %1904 }
0x158a   :  { %v1907_v7 = vadd.f32 %v1905_v2, %v2895_v48  ;;  %v1957_v48 = vld [vmem:[%s3308_s5 + $0x10] sm:$0xff] }
0x158b   :  { %2555 = vmatprep.subr.mxu1 %v1957_v48 }
0x158c   :  { %2679 = vtanh.f32 %v1907_v7  ;;  %2556 = vmatpush3.msra.mxu1 %v1957_v48 }
0x1599   :  { %v2680_v28 = vpop.eup %2679 }
0x159a   :  { %1923 = vrot.lane.b32.xlu1 %v2680_v28, %s2721_s23 }
0x159e   :  { %1727 = vrot.lane.b32.xlu1 %v3142_v58, %s2723_s25 }
0x15a2   :  { %1295 = vrot.lane.b32.xlu1 %v3065_v12, %s2723_s25  ;;  %v1956_v12 = vld [vmem:[%s3308_s5 + $0x8] sm:$0xff] }
0x15a3   :  { %2557 = vmatprep.subr.mxu1 %v1956_v12 }
0x15a4   :  { %2558 = vmatpush3.msra.mxu1 %v1956_v12 }
0x15a6   :  { %858 = vrot.lane.b32.xlu1 %v2985_v40, %s2723_s25  ;;  %v1929_v40 = vsub.f32 1.0, %v2672_v38 }
0x15aa   :  { %417 = vrot.lane.b32.xlu1 %v2908_v14, %s2723_s25  ;;  %v1955_v14 = vld [vmem:[%s3308_s5] sm:$0xff] }
0x15ab   :  { %2559 = vmatprep.subr.mxu1 %v1955_v14 }
0x15ac   :  { %2560 = vmatpush3.msra.mxu1 %v1955_v14 }
0x15ce   :  { %v1932_v30 = vpop.permute.xlu0 %1931 }
0x15cf   :  { %v1934_v34 = vmul.f32 %v1932_v30, %v1929_v40 }
0x15d1   :  { %v1936_v35 = vadd.f32 %v1935_v33, %v1934_v34 }
0x15d3   :  { %1943 = vrot.lane.b32.xlu0 %v1936_v35, %s2723_s25 }
0x15d7   :  { %1511 = vrot.lane.b32.xlu0 %v3106_v10, %s2723_s25 }
0x15db   :  { %1078 = vrot.lane.b32.xlu0 %v3027_v29, %s2723_s25 }
0x15df   :  { %638 = vrot.lane.b32.xlu0 %v2942_v50, %s2723_s25 }
0x160c   :  { %v1924_v37 = vpop.permute.xlu1 %1923 }
0x160d   :  { %v1926_v42 = vmul.f32 %v1924_v37, %v1921_v36  ;;  %v2724_v36 = vmov 0  }
0x160e   :  { %2584 = vset.pattern.permute.xlu1 %v2724_v36  ;;  %2583 = vset.pattern.permute.xlu0 %v2724_v36  ;;  %v2180_v36 = vld [vmem:[%s3311_s8 + $0x38] sm:$0xff] }
0x160f   :  { %v1928_v44 = vadd.f32 %v1927_v41, %v1926_v42  ;;  %vm2188_vm13 = vcmp.ne.f32.partialorder %v2180_v36, 0.0 }
0x1610   :  { %v1728_v45 = vpop.permute.xlu1 %1727 }
0x1611   :  { %1730 = vst.msk [vmem:[#allocation3 + $0x8] sm:$0xff] %vm421_vm4, %v1728_v45  ;;  %1938 = vrot.lane.b32.xlu0 %v1928_v44, %s2721_s23 }
0x1614   :  { %v1296_v46 = vpop.permute.xlu1 %1295 }
0x1615   :  { %1298 = vst.msk [vmem:[#allocation3 + $0x18] sm:$0xff] %vm421_vm4, %v1296_v46 }
0x1618   :  { %v859_v10 = vpop.permute.xlu1 %858  ;;  %v3203_v52 = vld [vmem:[#allocation3 + $0x8] sm:$0xff] }
0x1619   :  { %862 = vst.msk [vmem:[#allocation3 + $0x28] sm:$0xff] %vm421_vm4, %v859_v10 }
0x161a   :  { %1509 = vst.msk [vmem:[#allocation3 + $0x28] sm:$0xff] %vm203_vm3, %v3119_v20 }
0x161c   :  { %v418_v50 = vpop.permute.xlu1 %417  ;;  %v3214_v54 = vld [vmem:[#allocation3 + $0x18] sm:$0xff] }
0x161d   :  { %422 = vst.msk [vmem:[#allocation3 + $0x38] sm:$0xff] %vm421_vm4, %v418_v50 }
0x1621   :  { %v3224_v55 = vld [vmem:[#allocation3 + $0x28] sm:$0xff] }
0x1645   :  { %v1944_v29 = vpop.permute.xlu0 %1943 }
0x1646   :  { %1946 = vst.msk [vmem:[#allocation3] sm:$0xff] %vm421_vm4, %v1944_v29 }
0x1649   :  { %v1512_v47 = vpop.permute.xlu0 %1511 }
0x164a   :  { %1514 = vst.msk [vmem:[#allocation3 + $0x10] sm:$0xff] %vm421_vm4, %v1512_v47 }
0x164d   :  { %v1079_v49 = vpop.permute.xlu0 %1078  ;;  %v3198_v51 = vld [vmem:[#allocation3] sm:$0xff] }
0x164e   :  { %1082 = vst.msk [vmem:[#allocation3 + $0x20] sm:$0xff] %vm421_vm4, %v1079_v49  ;;  %2561 = vmatprep.mubr.msk.f32.mxu1 %vm51_vm0, %v3198_v51 }
0x164f   :  { %1293 = vst.msk [vmem:[#allocation3 + $0x20] sm:$0xff] %vm203_vm3, %v3083_v31  ;;  %2562 = vmatmul.mubr.msk.f32.vlgmr.msra.gmra.mxu1 %vm51_vm0, %v3203_v52 }
0x1651   :  { %v639_v20 = vpop.permute.xlu0 %638  ;;  %v3209_v53 = vld [vmem:[#allocation3 + $0x10] sm:$0xff] }
0x1652   :  { %642 = vst.msk [vmem:[#allocation3 + $0x30] sm:$0xff] %vm421_vm4, %v639_v20  ;;  %2564 = vmatprep.mubr.msk.f32.mxu1 %vm51_vm0, %v3209_v53 }
0x1653   :  { %1725 = vst.msk [vmem:[#allocation3 + $0x30] sm:$0xff] %vm203_vm3, %v3151_v63  ;;  %2565 = vmatmul.mubr.msk.f32.gmra.mxu1 %vm51_vm0, %v3214_v54 }
0x1656   :  { %v3220_v31 = vld [vmem:[#allocation3 + $0x20] sm:$0xff] }
0x1657   :  { %2567 = vmatprep.mubr.msk.f32.mxu1 %vm51_vm0, %v3220_v31 }
0x1658   :  { %2568 = vmatmul.mubr.msk.f32.gmra.mxu1 %vm51_vm0, %v3224_v55 }
0x165a   :  { %v3228_v56 = vld [vmem:[#allocation3 + $0x30] sm:$0xff] }
0x165b   :  { %2570 = vmatprep.mubr.msk.f32.mxu1 %vm51_vm0, %v3228_v56 }
0x1683   :  { %v1939_v58 = vpop.permute.xlu0 %1938 }
0x1684   :  { %1941 = vst.msk [vmem:[#allocation3 + $0x38] sm:$0xff] %vm203_vm3, %v1939_v58 }
0x168b   :  { %v3233_v39 = vld [vmem:[#allocation3 + $0x38] sm:$0xff] }
0x168c   :  { %2571 = vmatmul.mubr.msk.f32.gmra.mxu1 %vm51_vm0, %v3233_v39 }
0x170f   :  { %v2563_v60 = vpop.f32.mrf.mxu1 }
0x1710   :  { %v2062_v61 = vadd.f32 %v2563_v60, %v2339_v59 }
0x1711   :  { %v2056_v62 = vpop.f32.mrf.mxu1 }
0x1712   :  { %2681 = vtanh.f32 %v2062_v61  ;;  %v2057_v24 = vadd.f32 %v2339_v59, %v2056_v62 }
0x1713   :  { %v2566_v63 = vpop.f32.mrf.mxu1 }
0x1714   :  { %2683 = vtanh.f32 %v2057_v24  ;;  %v2072_v0 = vadd.f32 %v2566_v63, %v2339_v59 }
0x1715   :  { %v2066_v1 = vpop.f32.mrf.mxu1 }
0x1716   :  { %2685 = vtanh.f32 %v2072_v0  ;;  %v2067_v3 = vadd.f32 %v2339_v59, %v2066_v1 }
0x1718   :  { %2687 = vtanh.f32 %v2067_v3  ;;  %v2569_v6 = vpop.f32.mrf.mxu1 }
0x1719   :  { %v2082_v8 = vadd.f32 %v2569_v6, %v2339_v59 }
0x171a   :  { %v2076_v9 = vpop.f32.mrf.mxu1 }
0x171b   :  { %2689 = vtanh.f32 %v2082_v8  ;;  %v2077_v25 = vadd.f32 %v2339_v59, %v2076_v9 }
0x171d   :  { %2691 = vtanh.f32 %v2077_v25 }
0x171f   :  { %v2682_v4 = vpop.eup %2681 }
0x1720   :  { %v2111_v13 = vmul.f32 %v2682_v4, %v2348_v11 }
0x1721   :  { %v2684_v15 = vpop.eup %2683 }
0x1722   :  { %v2121_v38 = vsel %vm51_vm0, %v2111_v13, 0.0  ;;  %v2110_v18 = vmul.f32 %v2684_v15, %v2348_v11 }
0x1723   :  { %v2686_v19 = vpop.eup %2685  ;;  %2122 = vadd.xlane.f32.xlu0 %v2121_v38 }
0x1724   :  { %v2118_v16 = vsel %vm51_vm0, %v2110_v18, 0.0  ;;  %v2113_v17 = vmul.f32 %v2686_v19, %v2348_v11  ;;  %v2173_v18 = vld [vmem:[%s3311_s8] sm:$0xff]  ;;  %v2174_v19 = vld [vmem:[%s3311_s8 + $0x8] sm:$0xff] }
0x1725   :  { %v2688_v32 = vpop.eup %2687  ;;  %2119 = vadd.xlane.f32.xlu1 %v2118_v16  ;;  %v2175_v16 = vld [vmem:[%s3311_s8 + $0x10] sm:$0xff]  ;;  %vm2181_vm5 = vcmp.ne.f32.partialorder %v2173_v18, 0.0  ;;  %vm2182_vm7 = vcmp.ne.f32.partialorder %v2174_v19, 0.0 }
0x1726   :  { %v2112_v21 = vmul.f32 %v2688_v32, %v2348_v11  ;;  %v2127_v26 = vsel %vm51_vm0, %v2113_v17, 0.0  ;;  %v2176_v17 = vld [vmem:[%s3311_s8 + $0x18] sm:$0xff]  ;;  %vm2183_vm8 = vcmp.ne.f32.partialorder %v2175_v16, 0.0 }
0x1727   :  { %vm2184_vm9 = vcmp.ne.f32.partialorder %v2176_v17, 0.0 }
0x1728   :  { %v2690_v22 = vpop.eup %2689  ;;  %v2124_v23 = vsel %vm51_vm0, %v2112_v21, 0.0  ;;  %v2177_v21 = vld [vmem:[%s3311_s8 + $0x20] sm:$0xff] }
0x1729   :  { %2125 = vadd.xlane.f32.xlu0 %v2124_v23  ;;  %2128 = vadd.xlane.f32.xlu1 %v2127_v26  ;;  %v2115_v5 = vmul.f32 %v2690_v22, %v2348_v11  ;;  %vm2185_vm10 = vcmp.ne.f32.partialorder %v2177_v21, 0.0 }
0x172a   :  { %v2692_v57 = vpop.eup %2691 }
0x172b   :  { %v2133_v27 = vsel %vm51_vm0, %v2115_v5, 0.0  ;;  %v2114_v2 = vmul.f32 %v2692_v57, %v2348_v11  ;;  %v2178_v57 = vld [vmem:[%s3311_s8 + $0x28] sm:$0xff] }
0x172c   :  { %vm2186_vm11 = vcmp.ne.f32.partialorder %v2178_v57, 0.0 }
0x172d   :  { %2134 = vadd.xlane.f32.xlu1 %v2133_v27  ;;  %v2130_v7 = vsel %vm51_vm0, %v2114_v2, 0.0 }
0x172e   :  { %2131 = vadd.xlane.f32.xlu0 %v2130_v7 }
0x174c   :  { %v2572_v28 = vpop.f32.mrf.mxu1 }
0x174d   :  { %v2092_v43 = vadd.f32 %v2572_v28, %v2339_v59 }
0x174e   :  { %v2086_v48 = vpop.f32.mrf.mxu1 }
0x174f   :  { %2693 = vtanh.f32 %v2092_v43  ;;  %v2087_v12 = vadd.f32 %v2339_v59, %v2086_v48 }
0x1751   :  { %2695 = vtanh.f32 %v2087_v12  ;;  %v2179_v12 = vld [vmem:[%s3311_s8 + $0x30] sm:$0xff] }
0x1752   :  { %vm2187_vm12 = vcmp.ne.f32.partialorder %v2179_v12, 0.0 }
0x175c   :  { %v2694_v14 = vpop.eup %2693 }
0x175d   :  { %v2117_v40 = vmul.f32 %v2694_v14, %v2348_v11 }
0x175e   :  { %v2696_v30 = vpop.eup %2695 }
0x175f   :  { %v2139_v33 = vsel %vm51_vm0, %v2117_v40, 0.0  ;;  %v2116_v34 = vmul.f32 %v2696_v30, %v2348_v11 }
0x1760   :  { %2140 = vadd.xlane.f32.xlu1 %v2139_v33 }
0x1761   :  { %v2136_v35 = vsel %vm51_vm0, %v2116_v34, 0.0 }
0x1762   :  { %2137 = vadd.xlane.f32.xlu0 %v2136_v35 }
0x17ac   :  { %v2123_v41 = vpop.xlane.xlu0 %2122 }
0x17ae   :  { %v2120_v37 = vpop.xlane.xlu1 %2119 }
0x17b2   :  { %v2129_v42 = vpop.xlane.xlu1 %2128  ;;  %v2126_v44 = vpop.xlane.xlu0 %2125 }
0x17b6   :  { %v2135_v45 = vpop.xlane.xlu1 %2134 }
0x17b7   :  { %v2132_v46 = vpop.xlane.xlu0 %2131  ;;  %v2143_v50 = vmax.f32 %v2123_v41, %v2135_v45 }
0x17b8   :  { %v2142_v29 = vmax.f32 %v2120_v37, %v2132_v46 }
0x17ba   :  { %v2146_v58 = vmax.f32 %v2142_v29, %v2143_v50 }
0x17e9   :  { %v2141_v10 = vpop.xlane.xlu1 %2140 }
0x17ea   :  { %v2145_v49 = vmax.f32 %v2129_v42, %v2141_v10 }
0x17eb   :  { %v2138_v47 = vpop.xlane.xlu0 %2137 }
0x17ec   :  { %v2144_v20 = vmax.f32 %v2126_v44, %v2138_v47 }
0x17ee   :  { %v2147_v59 = vmax.f32 %v2144_v20, %v2145_v49 }
0x17f0   :  { %v2148_v60 = vmax.f32 %v2146_v58, %v2147_v59 }
0x17f2   :  { %v2149_v61 = vsub.f32 %v2120_v37, %v2148_v60  ;;  %v2150_v62 = vsub.f32 %v2123_v41, %v2148_v60  ;;  %v2151_v24 = vsub.f32 %v2126_v44, %v2148_v60  ;;  %v2152_v63 = vsub.f32 %v2129_v42, %v2148_v60 }
0x17f3   :  { %v2153_v0 = vsub.f32 %v2132_v46, %v2148_v60  ;;  %v2154_v1 = vsub.f32 %v2135_v45, %v2148_v60  ;;  %v2155_v9 = vsub.f32 %v2138_v47, %v2148_v60  ;;  %v2156_v4 = vsub.f32 %v2141_v10, %v2148_v60 }
0x17f4   :  { %v2157_v3 = vmul.f32 1.442695, %v2149_v61  ;;  %v2159_v6 = vmul.f32 1.442695, %v2150_v62  ;;  %v2161_v8 = vmul.f32 1.442695, %v2151_v24 }
0x17f5   :  { %v2163_v25 = vmul.f32 1.442695, %v2152_v63  ;;  %v2165_v11 = vmul.f32 1.442695, %v2153_v0  ;;  %v2167_v13 = vmul.f32 1.442695, %v2154_v1 }
0x17f6   :  { %2697 = vpow2.f32 %v2157_v3  ;;  %v2169_v15 = vmul.f32 1.442695, %v2155_v9  ;;  %v2171_v38 = vmul.f32 1.442695, %v2156_v4 }
0x17f7   :  { %2699 = vpow2.f32 %v2159_v6 }
0x17f8   :  { %2701 = vpow2.f32 %v2161_v8 }
0x17f9   :  { %2703 = vpow2.f32 %v2163_v25 }
0x17fa   :  { %2705 = vpow2.f32 %v2165_v11 }
0x17fb   :  { %2707 = vpow2.f32 %v2167_v13 }
0x17fc   :  { %2709 = vpow2.f32 %v2169_v15 }
0x17fd   :  { %2711 = vpow2.f32 %v2171_v38 }
0x1803   :  { %v2698_v32 = vpop.eup %2697 }
0x1804   :  { %v2700_v22 = vpop.eup %2699  ;;  %v2189_v23 = vsel %vm2181_vm5, %v2698_v32, 0.0 }
0x1805   :  { %v2702_v26 = vpop.eup %2701  ;;  %v2213_v5 = vadd.f32 %v2700_v22, %v2698_v32  ;;  %v2190_v27 = vsel %vm2182_vm7, %v2700_v22, 0.0  ;;  %v2198_v2 = vsel %vm2197_vm6, %v2189_v23, 0.0 }
0x1806   :  { %v2704_v7 = vpop.eup %2703  ;;  %v2191_v28 = vsel %vm2183_vm8, %v2702_v26, 0.0  ;;  %v2199_v43 = vsel %vm2197_vm6, %v2190_v27, 0.0 }
0x1807   :  { %v2706_v48 = vpop.eup %2705  ;;  %v2214_v14 = vadd.f32 %v2702_v26, %v2213_v5  ;;  %v2192_v40 = vsel %vm2184_vm9, %v2704_v7, 0.0  ;;  %v2200_v30 = vadd.f32 %v2199_v43, %v2198_v2  ;;  %v2201_v34 = vsel %vm2197_vm6, %v2191_v28, 0.0 }
0x1808   :  { %v2708_v33 = vpop.eup %2707  ;;  %v2193_v37 = vsel %vm2185_vm10, %v2706_v48, 0.0  ;;  %v2203_v44 = vsel %vm2197_vm6, %v2192_v40, 0.0 }
0x1809   :  { %v2215_v35 = vadd.f32 %v2704_v7, %v2214_v14  ;;  %v2202_v41 = vadd.f32 %v2201_v34, %v2200_v30  ;;  %v2710_v42 = vpop.eup %2709  ;;  %v2194_v46 = vsel %vm2186_vm11, %v2708_v33, 0.0  ;;  %v2205_v29 = vsel %vm2197_vm6, %v2193_v37, 0.0 }
0x180a   :  { %v2712_v50 = vpop.eup %2711  ;;  %v2195_v47 = vsel %vm2187_vm12, %v2710_v42, 0.0  ;;  %v2207_v58 = vsel %vm2197_vm6, %v2194_v46, 0.0 }
0x180b   :  { %v2216_v45 = vadd.f32 %v2706_v48, %v2215_v35  ;;  %v2204_v10 = vadd.f32 %v2203_v44, %v2202_v41  ;;  %v2196_v60 = vsel %vm2188_vm13, %v2712_v50, 0.0  ;;  %v2209_v62 = vsel %vm2197_vm6, %v2195_v47, 0.0 }
0x180c   :  { %v2211_v0 = vsel %vm2197_vm6, %v2196_v60, 0.0 }
0x180d   :  { %v2217_v49 = vadd.f32 %v2708_v33, %v2216_v45  ;;  %v2206_v20 = vadd.f32 %v2205_v29, %v2204_v10 }
0x180f   :  { %v2218_v59 = vadd.f32 %v2710_v42, %v2217_v49  ;;  %v2208_v61 = vadd.f32 %v2207_v58, %v2206_v20 }
0x1811   :  { %v2219_v24 = vadd.f32 %v2712_v50, %v2218_v59  ;;  %v2210_v63 = vadd.f32 %v2209_v62, %v2208_v61 }
0x1813   :  { %v2220_v1 = vmul.f32 0.0001, %v2219_v24  ;;  %v2212_v3 = vadd.f32 %v2211_v0, %v2210_v63 }
0x1815   :  { %v2221_v6 = vadd.f32 %v2220_v1, %v2212_v3 }
0x1817   :  { %2713 = vrcp.f32 %v2221_v6 }
0x1824   :  { %v2714_v8 = vpop.eup %2713 }
0x1825   :  { %v2224_v9 = vmul.f32 %v2714_v8, %v2190_v27  ;;  %v2223_v25 = vmul.f32 %v2714_v8, %v2189_v23  ;;  %v2225_v11 = vmul.f32 %v2714_v8, %v2191_v28  ;;  %v2226_v4 = vmul.f32 %v2714_v8, %v2192_v40 }
0x1826   :  { %v2227_v13 = vmul.f32 %v2714_v8, %v2193_v37  ;;  %v2228_v15 = vmul.f32 %v2714_v8, %v2194_v46  ;;  %v2229_v38 = vmul.f32 %v2714_v8, %v2195_v47  ;;  %v2230_v18 = vmul.f32 %v2714_v8, %v2196_v60 }
0x1827   :  { %2238 = vperm.xlu1 %2584, %v2224_v9   ;;  %2233 = vperm.xlu0 %2583, %v2223_v25  }
0x182b   :  { %2243 = vperm.xlu1 %2584, %v2225_v11  }
0x182f   :  { %2248 = vperm.xlu1 %2584, %v2226_v4  }
0x1833   :  { %2253 = vperm.xlu1 %2584, %v2227_v13  }
0x1837   :  { %2258 = vperm.xlu1 %2584, %v2228_v15  }
0x183b   :  { %2263 = vperm.xlu1 %2584, %v2229_v38  }
0x183f   :  { %2268 = vperm.xlu1 %2584, %v2230_v18  }
0x18a2   :  { %v2239_v19 = vpop.permute.xlu1 %2238  ;;  %v2234_v17 = vpop.permute.xlu0 %2233 }
0x18a3   :  { %v2272_v21 = vmul.f32 %v2239_v19, %v3203_v52  ;;  %v2271_v22 = vmul.f32 %v2234_v17, %v3198_v51 }
0x18a5   :  { %v2280_v5 = vsel %vm51_vm0, %v2272_v21, 0.0  ;;  %v2279_v57 = vsel %vm51_vm0, %v2271_v22, 0.0 }
0x18a6   :  { %v2244_v16 = vpop.permute.xlu1 %2243  ;;  %v2281_v28 = vadd.f32 %v2280_v5, %v2279_v57 }
0x18a7   :  { %v2273_v23 = vmul.f32 %v2244_v16, %v3209_v53 }
0x18a9   :  { %v2282_v2 = vsel %vm51_vm0, %v2273_v23, 0.0 }
0x18aa   :  { %v2249_v32 = vpop.permute.xlu1 %2248  ;;  %v2283_v51 = vadd.f32 %v2282_v2, %v2281_v28 }
0x18ab   :  { %v2274_v27 = vmul.f32 %v2249_v32, %v3214_v54 }
0x18ad   :  { %v2284_v48 = vsel %vm51_vm0, %v2274_v27, 0.0 }
0x18ae   :  { %v2254_v26 = vpop.permute.xlu1 %2253  ;;  %v2285_v12 = vadd.f32 %v2284_v48, %v2283_v51 }
0x18af   :  { %v2275_v7 = vmul.f32 %v2254_v26, %v3220_v31 }
0x18b1   :  { %v2286_v53 = vsel %vm51_vm0, %v2275_v7, 0.0 }
0x18b2   :  { %v2259_v43 = vpop.permute.xlu1 %2258  ;;  %v2287_v54 = vadd.f32 %v2286_v53, %v2285_v12 }
0x18b3   :  { %v2276_v52 = vmul.f32 %v2259_v43, %v3224_v55 }
0x18b5   :  { %v2288_v40 = vsel %vm51_vm0, %v2276_v52, 0.0 }
0x18b6   :  { %v2264_v14 = vpop.permute.xlu1 %2263  ;;  %v2289_v34 = vadd.f32 %v2288_v40, %v2287_v54 }
0x18b7   :  { %v2277_v30 = vmul.f32 %v2264_v14, %v3228_v56 }
0x18b9   :  { %v2290_v33 = vsel %vm51_vm0, %v2277_v30, 0.0 }
0x18ba   :  { %v2269_v31 = vpop.permute.xlu1 %2268  ;;  %v2291_v36 = vadd.f32 %v2290_v33, %v2289_v34 }
0x18bb   :  { %v2278_v35 = vmul.f32 %v2269_v31, %v3233_v39 }
0x18bd   :  { %v2292_v37 = vsel %vm51_vm0, %v2278_v35, 0.0 }
0x18be   :  { %v2293_v55 = vadd.f32 %v2292_v37, %v2291_v36 }
0x18c0   :  { %2294 = vst.msk [vmem:[%s3312_s9] sm:$0xff] %vm51_vm0, %v2293_v55 }

</bundles_post_ra>
